<compile_context>
chip_gen: v6e
topology: v6e:2x2x1
jax: 0.10.0
libtpu: 0.0.40
codegen_flags: <defaults>
</compile_context>

<pallas_src>
import math
from functools import lru_cache, partial

import numpy as np
import jax
import jax.numpy as jnp
from jax.experimental import pallas as pl
from jax.experimental.pallas import tpu as pltpu


# ---------------------------------------------------------------------------
# Host-side constants, cached per static configuration.
# ---------------------------------------------------------------------------
@lru_cache(maxsize=None)
def _softcomp_constants(C, KH, KW, sh, sw, ph, pw, H, W):
    Hp, Wp = H + 2 * ph, W + 2 * pw
    Lh = (Hp - KH) // sh + 1
    Lw = (Wp - KW) // sw + 1
    Ws = sw * (Lw - 1) + 1
    # Permute embedding output units so feat columns are in (kw, kh, c) order.
    idx = np.arange(C * KH * KW).reshape(C, KH, KW)          # [c, kh, kw] -> torch unit id
    perm = np.transpose(idx, (2, 1, 0)).reshape(-1)          # new col j = (kw*KH + kh)*C + c
    # W-direction dilation matrix: lw -> sw*lw (used on the MXU, tiny).
    Dw = np.zeros((Ws, Lw), np.float32)
    Dw[sw * np.arange(Lw), np.arange(Lw)] = 1.0
    # Lane permutation (y*C + c) -> (c*Hp + y): channel-minor -> channel-planar.
    P = np.zeros((Hp * C, C * Hp), np.float32)
    yy = np.repeat(np.arange(Hp), C)
    cc = np.tile(np.arange(C), Hp)
    P[yy * C + cc, cc * Hp + yy] = 1.0
    return perm, Dw, P, Lh, Lw, Ws, Hp, Wp


# ---------------------------------------------------------------------------
# Fused per-bt kernel: embedding matmul -> fold (overlap-add) -> 3x3 conv.
# ---------------------------------------------------------------------------
def _softcomp_kernel(x_ref, we_ref, be_ref, dw_ref, pp_ref, wc_ref, bc_ref,
                     o_ref, acc_ref, cin_ref,
                     *, C, KH, KW, sh, sw, ph, pw, H, W, Lh, Lw, Ws, Hp):
    # 1) embedding Linear: (L, hidden) @ (hidden, c_out) + bias        [MXU]
    feat = jnp.dot(x_ref[0], we_ref[...], preferred_element_type=jnp.float32)
    feat = feat + be_ref[...]                                  # (L, KW*KH*C)

    # 2) F.fold as overlapping adds, fully in VMEM.
    #    Accumulator layout: acc[x_pad, y_pad*C + c]  (padded fold grid).
    acc_ref[...] = jnp.zeros_like(acc_ref)
    dw = dw_ref[...]                                           # (Ws, Lw)
    for lh in range(Lh):
        vals = feat[lh * Lw:(lh + 1) * Lw, :]                  # (Lw, KW*KH*C)
        spread = jnp.dot(dw, vals,
                         preferred_element_type=jnp.float32)   # (Ws, KW*KH*C)
        for kw in range(KW):
            blk = spread[:, kw * KH * C:(kw + 1) * KH * C]     # (Ws, KH*C)
            acc_ref[kw:kw + Ws, sh * lh * C: sh * lh * C + KH * C] += blk

    # 3) relayout lanes (y*C + c) -> (c*Hp + y) with a tiny permutation matmul,
    #    then crop the fold padding and zero-pad by 1 for the 3x3 conv.
    planes = jnp.dot(acc_ref[...], pp_ref[...],
                     preferred_element_type=jnp.float32)       # (Wp, C*Hp)
    cin_ref[...] = jnp.zeros_like(cin_ref)                     # (C, W+2, H+2)
    for c in range(C):
        cin_ref[c, 1:W + 1, 1:H + 1] = \
            planes[pw:pw + W, c * Hp + ph: c * Hp + ph + H]

    # 4) bias_conv: Conv2d(C, C, 3, padding=1), direct VPU accumulation.
    shifted = []
    for ci in range(C):
        plane = cin_ref[ci]                                    # (W+2, H+2)
        shifted.append([[plane[dx:dx + W, dy:dy + H] for dx in range(3)]
                        for dy in range(3)])
    for co in range(C):
        o_acc = jnp.full((W, H), bc_ref[0, co], dtype=jnp.float32)
        for ci in range(C):
            for dy in range(3):
                for dx in range(3):
                    o_acc = o_acc + wc_ref[co * C + ci, dy * 3 + dx] * shifted[ci][dy][dx]
        # o_acc is indexed [x, y]; output array is (bt, C, W, H), swapped on host.
        o_ref[0, co] = o_acc.astype(o_ref.dtype)


# ---------------------------------------------------------------------------
# SoftComp forward (Pallas-backed, single fused kernel)
# ---------------------------------------------------------------------------
@partial(jax.jit, static_argnums=(1, 2, 4, 5, 6))
def softcomp_forward(x, t, output_size, params, kernel_size, stride, padding):
    C = params["conv_w"].shape[0]
    KH, KW = kernel_size
    sh, sw = stride
    ph, pw = padding
    H, W = output_size
    hidden = x.shape[-1]
    B_ = x.shape[0]

    perm, Dw, P, Lh, Lw, Ws, Hp, Wp = _softcomp_constants(
        C, KH, KW, sh, sw, ph, pw, H, W)

    bt = B_ * t
    n_tok = int(np.prod(x.shape[1:-1]))
    L = (B_ * n_tok) // bt
    assert L == Lh * Lw, (L, Lh, Lw)
    c_out = C * KH * KW

    # ---- host-side (one-time / tiny) parameter prep ------------------------
    x3 = x.reshape(bt, L, hidden).astype(jnp.float32)
    perm_j = jnp.asarray(perm)
    we_t = params["emb_w"].astype(jnp.float32)[perm_j].T          # (hidden, c_out)
    be = params["emb_b"].astype(jnp.float32)[perm_j].reshape(1, c_out)
    wc = params["conv_w"].astype(jnp.float32).reshape(C * C, 9)
    bc = params["conv_b"].astype(jnp.float32).reshape(1, C)
    dw = jnp.asarray(Dw)
    pp = jnp.asarray(P)

    kernel = partial(_softcomp_kernel,
                     C=C, KH=KH, KW=KW, sh=sh, sw=sw, ph=ph, pw=pw,
                     H=H, W=W, Lh=Lh, Lw=Lw, Ws=Ws, Hp=Hp)

    out_t = pl.pallas_call(
        kernel,
        out_shape=jax.ShapeDtypeStruct((bt, C, W, H), jnp.float32),
        grid_spec=pltpu.PrefetchScalarGridSpec(
            num_scalar_prefetch=0,
            grid=(bt,),
            in_specs=[
                pl.BlockSpec((1, L, hidden), lambda b: (b, 0, 0)),     # x (per-bt tile)
                pl.BlockSpec((hidden, c_out), lambda b: (0, 0)),       # emb weight^T
                pl.BlockSpec((1, c_out), lambda b: (0, 0)),            # emb bias
                pl.BlockSpec((Ws, Lw), lambda b: (0, 0)),              # W dilation matrix
                pl.BlockSpec((Hp * C, C * Hp), lambda b: (0, 0)),      # lane permutation
                pl.BlockSpec((C * C, 9), lambda b: (0, 0)),            # conv weights
                pl.BlockSpec((1, C), lambda b: (0, 0)),                # conv bias
            ],
            out_specs=pl.BlockSpec((1, C, W, H), lambda b: (b, 0, 0, 0)),
            scratch_shapes=[
                pltpu.VMEM((Wp, Hp * C), jnp.float32),                 # fold accumulator
                pltpu.VMEM((C, W + 2, H + 2), jnp.float32),            # conv input (zero-padded)
            ],
        ),
        compiler_params=pltpu.CompilerParams(
            dimension_semantics=("parallel",)),
    )(x3, we_t, be, dw, pp, wc, bc)

    # kernel emits (bt, C, W, H); final NCHW via a cheap swap of the small output
    return jnp.swapaxes(out_t, 2, 3)


# ---------------------------------------------------------------------------
# Pure-JAX reference (mirrors the PyTorch semantics) for a correctness check.
# ---------------------------------------------------------------------------
def softcomp_reference(x, t, output_size, params, kernel_size, stride, padding):
    C = params["conv_w"].shape[0]
    KH, KW = kernel_size
    sh, sw = stride
    ph, pw = padding
    H, W = output_size
    hidden = x.shape[-1]
    c_out = C * KH * KW
    B_ = x.shape[0]

    x_flat = x.reshape(B_, -1, hidden)
    feat = jnp.einsum("bnh,oh->bno", x_flat, params["emb_w"]) + params["emb_b"]
    bt = B_ * t
    feat = feat.reshape(bt, -1, c_out).transpose(0, 2, 1)        # (bt, C*KH*KW, L)

    Lh = (H + 2 * ph - KH) // sh + 1
    Lw = (W + 2 * pw - KW) // sw + 1
    cols = feat.reshape(bt, C, KH, KW, Lh, Lw)
    acc = jnp.zeros((bt, C, H + 2 * ph, W + 2 * pw), feat.dtype)
    for kh in range(KH):
        for kw in range(KW):
            ys = kh + sh * jnp.arange(Lh)
            xs = kw + sw * jnp.arange(Lw)
            acc = acc.at[:, :, ys[:, None], xs[None, :]].add(cols[:, :, kh, kw])
    folded = acc[:, :, ph:ph + H, pw:pw + W]

    out = jax.lax.conv_general_dilated(
        folded, params["conv_w"], window_strides=(1, 1),
        padding=((1, 1), (1, 1)),
        dimension_numbers=("NCHW", "OIHW", "NCHW"))
    return out + params["conv_b"][None, :, None, None]


# ---------------------------------------------------------------------------
if __name__ == "__main__":
    # Module configuration (small, overlapping patches so fold is a real
    # scatter-add).
    channel = 4
    hidden = 32
    kernel_size = (4, 4)
    stride = (2, 2)
    padding = (1, 1)
    output_size = (16, 16)
    t = 2
    B_ = 1

    H, W = output_size
    Lh = (H + 2 * padding[0] - kernel_size[0]) // stride[0] + 1
    Lw = (W + 2 * padding[1] - kernel_size[1]) // stride[1] + 1
    c_out = channel * kernel_size[0] * kernel_size[1]

    key = jax.random.PRNGKey(0)
    k1, k2, k3, k4, k5 = jax.random.split(key, 5)
    be = 1.0 / math.sqrt(hidden)
    bc = 1.0 / math.sqrt(channel * 9)
    params = {
        "emb_w": jax.random.uniform(k1, (c_out, hidden), jnp.float32, -be, be),
        "emb_b": jax.random.uniform(k2, (c_out,), jnp.float32, -be, be),
        "conv_w": jax.random.uniform(k3, (channel, channel, 3, 3), jnp.float32, -bc, bc),
        "conv_b": jax.random.uniform(k4, (channel,), jnp.float32, -bc, bc),
    }

    # x: (B, T, Lh, Lw, hidden)
    x = jax.random.normal(k5, (B_, t, Lh, Lw, hidden), jnp.float32)

    out = softcomp_forward(x, t, output_size, params, kernel_size, stride, padding)
    out = jax.block_until_ready(out)

    ref = softcomp_reference(x, t, output_size, params, kernel_size, stride, padding)
    ref = jax.block_until_ready(ref)

    assert out.shape == (B_ * t, channel, H, W), out.shape
    np.testing.assert_allclose(np.asarray(out), np.asarray(ref), rtol=1e-3, atol=1e-3)

    print("KERNEL_OK")
</pallas_src>

<mosaic_0001>
module attributes {stable_mosaic.version = 11 : i64} {
  func.func @_softcomp_kernel(%arg0: i32, %arg1: memref<1x64x32xf32, #tpu.memory_space<vmem>>, %arg2: memref<32x64xf32, #tpu.memory_space<vmem>>, %arg3: memref<1x64xf32, #tpu.memory_space<vmem>>, %arg4: memref<15x8xf32, #tpu.memory_space<vmem>>, %arg5: memref<72x72xf32, #tpu.memory_space<vmem>>, %arg6: memref<16x9xf32, #tpu.memory_space<vmem>>, %arg7: memref<1x4xf32, #tpu.memory_space<vmem>>, %arg8: memref<1x4x16x16xf32, #tpu.memory_space<vmem>>, %arg9: memref<18x72xf32, #tpu.memory_space<vmem>>, %arg10: memref<4x18x18xf32, #tpu.memory_space<vmem>>) attributes {dimension_semantics = [#tpu.dimension_semantics<parallel>], iteration_bounds = array<i64: 2>, scalar_prefetch = 0 : i64, scratch_operands = 2 : i64, tpu.core_type = #tpu.core_type<tc>, window_params = [{transform_indices = @transform_0, window_bounds = array<i64: 1, 64, 32>}, {pipeline_mode = #tpu.pipeline_mode<synchronous>, transform_indices = @transform_1, window_bounds = array<i64: 32, 64>}, {pipeline_mode = #tpu.pipeline_mode<synchronous>, transform_indices = @transform_2, window_bounds = array<i64: 1, 64>}, {pipeline_mode = #tpu.pipeline_mode<synchronous>, transform_indices = @transform_3, window_bounds = array<i64: 15, 8>}, {pipeline_mode = #tpu.pipeline_mode<synchronous>, transform_indices = @transform_4, window_bounds = array<i64: 72, 72>}, {pipeline_mode = #tpu.pipeline_mode<synchronous>, transform_indices = @transform_5, window_bounds = array<i64: 16, 9>}, {pipeline_mode = #tpu.pipeline_mode<synchronous>, transform_indices = @transform_6, window_bounds = array<i64: 1, 4>}, {transform_indices = @transform_7, window_bounds = array<i64: 1, 4, 16, 16>}]} {
    %c0 = arith.constant 0 : index
    %c0_0 = arith.constant 0 : index
    %c0_1 = arith.constant 0 : index
    %0 = vector.load %arg1[%c0, %c0_0, %c0_1] : memref<1x64x32xf32, #tpu.memory_space<vmem>>, vector<1x64x32xf32>
    %1 = vector.shape_cast %0 : vector<1x64x32xf32> to vector<64x32xf32>
    %c0_2 = arith.constant 0 : index
    %c0_3 = arith.constant 0 : index
    %2 = vector.load %arg2[%c0_2, %c0_3] : memref<32x64xf32, #tpu.memory_space<vmem>>, vector<32x64xf32>
    %cst = arith.constant dense<0.000000e+00> : vector<64x64xf32>
    %3 = tpu.matmul %1, %2, %cst {dimension_numbers = #tpu.dot_dimension_numbers<[1], [0], [0], [1], [0, 0, 1, 1], [], []>} : vector<64x32xf32>, vector<32x64xf32>, vector<64x64xf32> -> vector<64x64xf32>
    %c0_4 = arith.constant 0 : index
    %c0_5 = arith.constant 0 : index
    %4 = vector.load %arg3[%c0_4, %c0_5] : memref<1x64xf32, #tpu.memory_space<vmem>>, vector<1x64xf32>
    %5 = vector.broadcast %4 : vector<1x64xf32> to vector<64x64xf32>
    %6 = arith.addf %3, %5 : vector<64x64xf32>
    %cst_6 = arith.constant 0.000000e+00 : f32
    %7 = vector.broadcast %cst_6 : f32 to vector<18x72xf32>
    %c0_7 = arith.constant 0 : index
    %c0_8 = arith.constant 0 : index
    %8 = vector.load %arg9[%c0_7, %c0_8] : memref<18x72xf32, #tpu.memory_space<vmem>>, vector<18x72xf32>
    tpu.vector_store %arg9[%c0_7, %c0_8], %7 {strides = array<i32>} : memref<18x72xf32, #tpu.memory_space<vmem>>, vector<18x72xf32>,
    %c0_9 = arith.constant 0 : index
    %c0_10 = arith.constant 0 : index
    %9 = vector.load %arg4[%c0_9, %c0_10] : memref<15x8xf32, #tpu.memory_space<vmem>>, vector<15x8xf32>
    %10 = vector.extract_strided_slice %6 {offsets = [0, 0], sizes = [8, 64], strides = [1, 1]} : vector<64x64xf32> to vector<8x64xf32>
    %cst_11 = arith.constant dense<0.000000e+00> : vector<15x64xf32>
    %11 = tpu.matmul %9, %10, %cst_11 {dimension_numbers = #tpu.dot_dimension_numbers<[1], [0], [0], [1], [0, 0, 1, 1], [], []>} : vector<15x8xf32>, vector<8x64xf32>, vector<15x64xf32> -> vector<15x64xf32>
    %12 = vector.extract_strided_slice %11 {offsets = [0, 0], sizes = [15, 16], strides = [1, 1]} : vector<15x64xf32> to vector<15x16xf32>
    %c0_12 = arith.constant 0 : index
    %c0_13 = arith.constant 0 : index
    %13 = vector.load %arg9[%c0_12, %c0_13] : memref<18x72xf32, #tpu.memory_space<vmem>>, vector<15x16xf32>
    %14 = arith.addf %13, %12 : vector<15x16xf32>
    %c0_14 = arith.constant 0 : index
    %c0_15 = arith.constant 0 : index
    %15 = vector.load %arg9[%c0_14, %c0_15] : memref<18x72xf32, #tpu.memory_space<vmem>>, vector<15x16xf32>
    tpu.vector_store %arg9[%c0_14, %c0_15], %14 {strides = array<i32>} : memref<18x72xf32, #tpu.memory_space<vmem>>, vector<15x16xf32>,
    %16 = vector.extract_strided_slice %11 {offsets = [0, 16], sizes = [15, 16], strides = [1, 1]} : vector<15x64xf32> to vector<15x16xf32>
    %c1 = arith.constant 1 : index
    %c0_16 = arith.constant 0 : index
    %17 = vector.load %arg9[%c1, %c0_16] : memref<18x72xf32, #tpu.memory_space<vmem>>, vector<15x16xf32>
    %18 = arith.addf %17, %16 : vector<15x16xf32>
    %c1_17 = arith.constant 1 : index
    %c0_18 = arith.constant 0 : index
    %19 = vector.load %arg9[%c1_17, %c0_18] : memref<18x72xf32, #tpu.memory_space<vmem>>, vector<15x16xf32>
    tpu.vector_store %arg9[%c1_17, %c0_18], %18 {strides = array<i32>} : memref<18x72xf32, #tpu.memory_space<vmem>>, vector<15x16xf32>,
    %20 = vector.extract_strided_slice %11 {offsets = [0, 32], sizes = [15, 16], strides = [1, 1]} : vector<15x64xf32> to vector<15x16xf32>
    %c2 = arith.constant 2 : index
    %c0_19 = arith.constant 0 : index
    %21 = vector.load %arg9[%c2, %c0_19] : memref<18x72xf32, #tpu.memory_space<vmem>>, vector<15x16xf32>
    %22 = arith.addf %21, %20 : vector<15x16xf32>
    %c2_20 = arith.constant 2 : index
    %c0_21 = arith.constant 0 : index
    %23 = vector.load %arg9[%c2_20, %c0_21] : memref<18x72xf32, #tpu.memory_space<vmem>>, vector<15x16xf32>
    tpu.vector_store %arg9[%c2_20, %c0_21], %22 {strides = array<i32>} : memref<18x72xf32, #tpu.memory_space<vmem>>, vector<15x16xf32>,
    %24 = vector.extract_strided_slice %11 {offsets = [0, 48], sizes = [15, 16], strides = [1, 1]} : vector<15x64xf32> to vector<15x16xf32>
    %c3 = arith.constant 3 : index
    %c0_22 = arith.constant 0 : index
    %25 = vector.load %arg9[%c3, %c0_22] : memref<18x72xf32, #tpu.memory_space<vmem>>, vector<15x16xf32>
    %26 = arith.addf %25, %24 : vector<15x16xf32>
    %c3_23 = arith.constant 3 : index
    %c0_24 = arith.constant 0 : index
    %27 = vector.load %arg9[%c3_23, %c0_24] : memref<18x72xf32, #tpu.memory_space<vmem>>, vector<15x16xf32>
    tpu.vector_store %arg9[%c3_23, %c0_24], %26 {strides = array<i32>} : memref<18x72xf32, #tpu.memory_space<vmem>>, vector<15x16xf32>,
    %28 = vector.extract_strided_slice %6 {offsets = [8, 0], sizes = [8, 64], strides = [1, 1]} : vector<64x64xf32> to vector<8x64xf32>
    %cst_25 = arith.constant dense<0.000000e+00> : vector<15x64xf32>
    %29 = tpu.matmul %9, %28, %cst_25 {dimension_numbers = #tpu.dot_dimension_numbers<[1], [0], [0], [1], [0, 0, 1, 1], [], []>} : vector<15x8xf32>, vector<8x64xf32>, vector<15x64xf32> -> vector<15x64xf32>
    %30 = vector.extract_strided_slice %29 {offsets = [0, 0], sizes = [15, 16], strides = [1, 1]} : vector<15x64xf32> to vector<15x16xf32>
    %c0_26 = arith.constant 0 : index
    %c8 = arith.constant 8 : index
    %31 = vector.load %arg9[%c0_26, %c8] : memref<18x72xf32, #tpu.memory_space<vmem>>, vector<15x16xf32>
    %32 = arith.addf %31, %30 : vector<15x16xf32>
    %c0_27 = arith.constant 0 : index
    %c8_28 = arith.constant 8 : index
    %33 = vector.load %arg9[%c0_27, %c8_28] : memref<18x72xf32, #tpu.memory_space<vmem>>, vector<15x16xf32>
    tpu.vector_store %arg9[%c0_27, %c8_28], %32 {strides = array<i32>} : memref<18x72xf32, #tpu.memory_space<vmem>>, vector<15x16xf32>,
    %34 = vector.extract_strided_slice %29 {offsets = [0, 16], sizes = [15, 16], strides = [1, 1]} : vector<15x64xf32> to vector<15x16xf32>
    %c1_29 = arith.constant 1 : index
    %c8_30 = arith.constant 8 : index
    %35 = vector.load %arg9[%c1_29, %c8_30] : memref<18x72xf32, #tpu.memory_space<vmem>>, vector<15x16xf32>
    %36 = arith.addf %35, %34 : vector<15x16xf32>
    %c1_31 = arith.constant 1 : index
    %c8_32 = arith.constant 8 : index
    %37 = vector.load %arg9[%c1_31, %c8_32] : memref<18x72xf32, #tpu.memory_space<vmem>>, vector<15x16xf32>
    tpu.vector_store %arg9[%c1_31, %c8_32], %36 {strides = array<i32>} : memref<18x72xf32, #tpu.memory_space<vmem>>, vector<15x16xf32>,
    %38 = vector.extract_strided_slice %29 {offsets = [0, 32], sizes = [15, 16], strides = [1, 1]} : vector<15x64xf32> to vector<15x16xf32>
    %c2_33 = arith.constant 2 : index
    %c8_34 = arith.constant 8 : index
    %39 = vector.load %arg9[%c2_33, %c8_34] : memref<18x72xf32, #tpu.memory_space<vmem>>, vector<15x16xf32>
    %40 = arith.addf %39, %38 : vector<15x16xf32>
    %c2_35 = arith.constant 2 : index
    %c8_36 = arith.constant 8 : index
    %41 = vector.load %arg9[%c2_35, %c8_36] : memref<18x72xf32, #tpu.memory_space<vmem>>, vector<15x16xf32>
    tpu.vector_store %arg9[%c2_35, %c8_36], %40 {strides = array<i32>} : memref<18x72xf32, #tpu.memory_space<vmem>>, vector<15x16xf32>,
    %42 = vector.extract_strided_slice %29 {offsets = [0, 48], sizes = [15, 16], strides = [1, 1]} : vector<15x64xf32> to vector<15x16xf32>
    %c3_37 = arith.constant 3 : index
    %c8_38 = arith.constant 8 : index
    %43 = vector.load %arg9[%c3_37, %c8_38] : memref<18x72xf32, #tpu.memory_space<vmem>>, vector<15x16xf32>
    %44 = arith.addf %43, %42 : vector<15x16xf32>
    %c3_39 = arith.constant 3 : index
    %c8_40 = arith.constant 8 : index
    %45 = vector.load %arg9[%c3_39, %c8_40] : memref<18x72xf32, #tpu.memory_space<vmem>>, vector<15x16xf32>
    tpu.vector_store %arg9[%c3_39, %c8_40], %44 {strides = array<i32>} : memref<18x72xf32, #tpu.memory_space<vmem>>, vector<15x16xf32>,
    %46 = vector.extract_strided_slice %6 {offsets = [16, 0], sizes = [8, 64], strides = [1, 1]} : vector<64x64xf32> to vector<8x64xf32>
    %cst_41 = arith.constant dense<0.000000e+00> : vector<15x64xf32>
    %47 = tpu.matmul %9, %46, %cst_41 {dimension_numbers = #tpu.dot_dimension_numbers<[1], [0], [0], [1], [0, 0, 1, 1], [], []>} : vector<15x8xf32>, vector<8x64xf32>, vector<15x64xf32> -> vector<15x64xf32>
    %48 = vector.extract_strided_slice %47 {offsets = [0, 0], sizes = [15, 16], strides = [1, 1]} : vector<15x64xf32> to vector<15x16xf32>
    %c0_42 = arith.constant 0 : index
    %c16 = arith.constant 16 : index
    %49 = vector.load %arg9[%c0_42, %c16] : memref<18x72xf32, #tpu.memory_space<vmem>>, vector<15x16xf32>
    %50 = arith.addf %49, %48 : vector<15x16xf32>
    %c0_43 = arith.constant 0 : index
    %c16_44 = arith.constant 16 : index
    %51 = vector.load %arg9[%c0_43, %c16_44] : memref<18x72xf32, #tpu.memory_space<vmem>>, vector<15x16xf32>
    tpu.vector_store %arg9[%c0_43, %c16_44], %50 {strides = array<i32>} : memref<18x72xf32, #tpu.memory_space<vmem>>, vector<15x16xf32>,
    %52 = vector.extract_strided_slice %47 {offsets = [0, 16], sizes = [15, 16], strides = [1, 1]} : vector<15x64xf32> to vector<15x16xf32>
    %c1_45 = arith.constant 1 : index
    %c16_46 = arith.constant 16 : index
    %53 = vector.load %arg9[%c1_45, %c16_46] : memref<18x72xf32, #tpu.memory_space<vmem>>, vector<15x16xf32>
    %54 = arith.addf %53, %52 : vector<15x16xf32>
    %c1_47 = arith.constant 1 : index
    %c16_48 = arith.constant 16 : index
    %55 = vector.load %arg9[%c1_47, %c16_48] : memref<18x72xf32, #tpu.memory_space<vmem>>, vector<15x16xf32>
    tpu.vector_store %arg9[%c1_47, %c16_48], %54 {strides = array<i32>} : memref<18x72xf32, #tpu.memory_space<vmem>>, vector<15x16xf32>,
    %56 = vector.extract_strided_slice %47 {offsets = [0, 32], sizes = [15, 16], strides = [1, 1]} : vector<15x64xf32> to vector<15x16xf32>
    %c2_49 = arith.constant 2 : index
    %c16_50 = arith.constant 16 : index
    %57 = vector.load %arg9[%c2_49, %c16_50] : memref<18x72xf32, #tpu.memory_space<vmem>>, vector<15x16xf32>
    %58 = arith.addf %57, %56 : vector<15x16xf32>
    %c2_51 = arith.constant 2 : index
    %c16_52 = arith.constant 16 : index
    %59 = vector.load %arg9[%c2_51, %c16_52] : memref<18x72xf32, #tpu.memory_space<vmem>>, vector<15x16xf32>
    tpu.vector_store %arg9[%c2_51, %c16_52], %58 {strides = array<i32>} : memref<18x72xf32, #tpu.memory_space<vmem>>, vector<15x16xf32>,
    %60 = vector.extract_strided_slice %47 {offsets = [0, 48], sizes = [15, 16], strides = [1, 1]} : vector<15x64xf32> to vector<15x16xf32>
    %c3_53 = arith.constant 3 : index
    %c16_54 = arith.constant 16 : index
    %61 = vector.load %arg9[%c3_53, %c16_54] : memref<18x72xf32, #tpu.memory_space<vmem>>, vector<15x16xf32>
    %62 = arith.addf %61, %60 : vector<15x16xf32>
    %c3_55 = arith.constant 3 : index
    %c16_56 = arith.constant 16 : index
    %63 = vector.load %arg9[%c3_55, %c16_56] : memref<18x72xf32, #tpu.memory_space<vmem>>, vector<15x16xf32>
    tpu.vector_store %arg9[%c3_55, %c16_56], %62 {strides = array<i32>} : memref<18x72xf32, #tpu.memory_space<vmem>>, vector<15x16xf32>,
    %64 = vector.extract_strided_slice %6 {offsets = [24, 0], sizes = [8, 64], strides = [1, 1]} : vector<64x64xf32> to vector<8x64xf32>
    %cst_57 = arith.constant dense<0.000000e+00> : vector<15x64xf32>
    %65 = tpu.matmul %9, %64, %cst_57 {dimension_numbers = #tpu.dot_dimension_numbers<[1], [0], [0], [1], [0, 0, 1, 1], [], []>} : vector<15x8xf32>, vector<8x64xf32>, vector<15x64xf32> -> vector<15x64xf32>
    %66 = vector.extract_strided_slice %65 {offsets = [0, 0], sizes = [15, 16], strides = [1, 1]} : vector<15x64xf32> to vector<15x16xf32>
    %c0_58 = arith.constant 0 : index
    %c24 = arith.constant 24 : index
    %67 = vector.load %arg9[%c0_58, %c24] : memref<18x72xf32, #tpu.memory_space<vmem>>, vector<15x16xf32>
    %68 = arith.addf %67, %66 : vector<15x16xf32>
    %c0_59 = arith.constant 0 : index
    %c24_60 = arith.constant 24 : index
    %69 = vector.load %arg9[%c0_59, %c24_60] : memref<18x72xf32, #tpu.memory_space<vmem>>, vector<15x16xf32>
    tpu.vector_store %arg9[%c0_59, %c24_60], %68 {strides = array<i32>} : memref<18x72xf32, #tpu.memory_space<vmem>>, vector<15x16xf32>,
    %70 = vector.extract_strided_slice %65 {offsets = [0, 16], sizes = [15, 16], strides = [1, 1]} : vector<15x64xf32> to vector<15x16xf32>
    %c1_61 = arith.constant 1 : index
    %c24_62 = arith.constant 24 : index
    %71 = vector.load %arg9[%c1_61, %c24_62] : memref<18x72xf32, #tpu.memory_space<vmem>>, vector<15x16xf32>
    %72 = arith.addf %71, %70 : vector<15x16xf32>
    %c1_63 = arith.constant 1 : index
    %c24_64 = arith.constant 24 : index
    %73 = vector.load %arg9[%c1_63, %c24_64] : memref<18x72xf32, #tpu.memory_space<vmem>>, vector<15x16xf32>
    tpu.vector_store %arg9[%c1_63, %c24_64], %72 {strides = array<i32>} : memref<18x72xf32, #tpu.memory_space<vmem>>, vector<15x16xf32>,
    %74 = vector.extract_strided_slice %65 {offsets = [0, 32], sizes = [15, 16], strides = [1, 1]} : vector<15x64xf32> to vector<15x16xf32>
    %c2_65 = arith.constant 2 : index
    %c24_66 = arith.constant 24 : index
    %75 = vector.load %arg9[%c2_65, %c24_66] : memref<18x72xf32, #tpu.memory_space<vmem>>, vector<15x16xf32>
    %76 = arith.addf %75, %74 : vector<15x16xf32>
    %c2_67 = arith.constant 2 : index
    %c24_68 = arith.constant 24 : index
    %77 = vector.load %arg9[%c2_67, %c24_68] : memref<18x72xf32, #tpu.memory_space<vmem>>, vector<15x16xf32>
    tpu.vector_store %arg9[%c2_67, %c24_68], %76 {strides = array<i32>} : memref<18x72xf32, #tpu.memory_space<vmem>>, vector<15x16xf32>,
    %78 = vector.extract_strided_slice %65 {offsets = [0, 48], sizes = [15, 16], strides = [1, 1]} : vector<15x64xf32> to vector<15x16xf32>
    %c3_69 = arith.constant 3 : index
    %c24_70 = arith.constant 24 : index
    %79 = vector.load %arg9[%c3_69, %c24_70] : memref<18x72xf32, #tpu.memory_space<vmem>>, vector<15x16xf32>
    %80 = arith.addf %79, %78 : vector<15x16xf32>
    %c3_71 = arith.constant 3 : index
    %c24_72 = arith.constant 24 : index
    %81 = vector.load %arg9[%c3_71, %c24_72] : memref<18x72xf32, #tpu.memory_space<vmem>>, vector<15x16xf32>
    tpu.vector_store %arg9[%c3_71, %c24_72], %80 {strides = array<i32>} : memref<18x72xf32, #tpu.memory_space<vmem>>, vector<15x16xf32>,
    %82 = vector.extract_strided_slice %6 {offsets = [32, 0], sizes = [8, 64], strides = [1, 1]} : vector<64x64xf32> to vector<8x64xf32>
    %cst_73 = arith.constant dense<0.000000e+00> : vector<15x64xf32>
    %83 = tpu.matmul %9, %82, %cst_73 {dimension_numbers = #tpu.dot_dimension_numbers<[1], [0], [0], [1], [0, 0, 1, 1], [], []>} : vector<15x8xf32>, vector<8x64xf32>, vector<15x64xf32> -> vector<15x64xf32>
    %84 = vector.extract_strided_slice %83 {offsets = [0, 0], sizes = [15, 16], strides = [1, 1]} : vector<15x64xf32> to vector<15x16xf32>
    %c0_74 = arith.constant 0 : index
    %c32 = arith.constant 32 : index
    %85 = vector.load %arg9[%c0_74, %c32] : memref<18x72xf32, #tpu.memory_space<vmem>>, vector<15x16xf32>
    %86 = arith.addf %85, %84 : vector<15x16xf32>
    %c0_75 = arith.constant 0 : index
    %c32_76 = arith.constant 32 : index
    %87 = vector.load %arg9[%c0_75, %c32_76] : memref<18x72xf32, #tpu.memory_space<vmem>>, vector<15x16xf32>
    tpu.vector_store %arg9[%c0_75, %c32_76], %86 {strides = array<i32>} : memref<18x72xf32, #tpu.memory_space<vmem>>, vector<15x16xf32>,
    %88 = vector.extract_strided_slice %83 {offsets = [0, 16], sizes = [15, 16], strides = [1, 1]} : vector<15x64xf32> to vector<15x16xf32>
    %c1_77 = arith.constant 1 : index
    %c32_78 = arith.constant 32 : index
    %89 = vector.load %arg9[%c1_77, %c32_78] : memref<18x72xf32, #tpu.memory_space<vmem>>, vector<15x16xf32>
    %90 = arith.addf %89, %88 : vector<15x16xf32>
    %c1_79 = arith.constant 1 : index
    %c32_80 = arith.constant 32 : index
    %91 = vector.load %arg9[%c1_79, %c32_80] : memref<18x72xf32, #tpu.memory_space<vmem>>, vector<15x16xf32>
    tpu.vector_store %arg9[%c1_79, %c32_80], %90 {strides = array<i32>} : memref<18x72xf32, #tpu.memory_space<vmem>>, vector<15x16xf32>,
    %92 = vector.extract_strided_slice %83 {offsets = [0, 32], sizes = [15, 16], strides = [1, 1]} : vector<15x64xf32> to vector<15x16xf32>
    %c2_81 = arith.constant 2 : index
    %c32_82 = arith.constant 32 : index
    %93 = vector.load %arg9[%c2_81, %c32_82] : memref<18x72xf32, #tpu.memory_space<vmem>>, vector<15x16xf32>
    %94 = arith.addf %93, %92 : vector<15x16xf32>
    %c2_83 = arith.constant 2 : index
    %c32_84 = arith.constant 32 : index
    %95 = vector.load %arg9[%c2_83, %c32_84] : memref<18x72xf32, #tpu.memory_space<vmem>>, vector<15x16xf32>
    tpu.vector_store %arg9[%c2_83, %c32_84], %94 {strides = array<i32>} : memref<18x72xf32, #tpu.memory_space<vmem>>, vector<15x16xf32>,
    %96 = vector.extract_strided_slice %83 {offsets = [0, 48], sizes = [15, 16], strides = [1, 1]} : vector<15x64xf32> to vector<15x16xf32>
    %c3_85 = arith.constant 3 : index
    %c32_86 = arith.constant 32 : index
    %97 = vector.load %arg9[%c3_85, %c32_86] : memref<18x72xf32, #tpu.memory_space<vmem>>, vector<15x16xf32>
    %98 = arith.addf %97, %96 : vector<15x16xf32>
    %c3_87 = arith.constant 3 : index
    %c32_88 = arith.constant 32 : index
    %99 = vector.load %arg9[%c3_87, %c32_88] : memref<18x72xf32, #tpu.memory_space<vmem>>, vector<15x16xf32>
    tpu.vector_store %arg9[%c3_87, %c32_88], %98 {strides = array<i32>} : memref<18x72xf32, #tpu.memory_space<vmem>>, vector<15x16xf32>,
    %100 = vector.extract_strided_slice %6 {offsets = [40, 0], sizes = [8, 64], strides = [1, 1]} : vector<64x64xf32> to vector<8x64xf32>
    %cst_89 = arith.constant dense<0.000000e+00> : vector<15x64xf32>
    %101 = tpu.matmul %9, %100, %cst_89 {dimension_numbers = #tpu.dot_dimension_numbers<[1], [0], [0], [1], [0, 0, 1, 1], [], []>} : vector<15x8xf32>, vector<8x64xf32>, vector<15x64xf32> -> vector<15x64xf32>
    %102 = vector.extract_strided_slice %101 {offsets = [0, 0], sizes = [15, 16], strides = [1, 1]} : vector<15x64xf32> to vector<15x16xf32>
    %c0_90 = arith.constant 0 : index
    %c40 = arith.constant 40 : index
    %103 = vector.load %arg9[%c0_90, %c40] : memref<18x72xf32, #tpu.memory_space<vmem>>, vector<15x16xf32>
    %104 = arith.addf %103, %102 : vector<15x16xf32>
    %c0_91 = arith.constant 0 : index
    %c40_92 = arith.constant 40 : index
    %105 = vector.load %arg9[%c0_91, %c40_92] : memref<18x72xf32, #tpu.memory_space<vmem>>, vector<15x16xf32>
    tpu.vector_store %arg9[%c0_91, %c40_92], %104 {strides = array<i32>} : memref<18x72xf32, #tpu.memory_space<vmem>>, vector<15x16xf32>,
    %106 = vector.extract_strided_slice %101 {offsets = [0, 16], sizes = [15, 16], strides = [1, 1]} : vector<15x64xf32> to vector<15x16xf32>
    %c1_93 = arith.constant 1 : index
    %c40_94 = arith.constant 40 : index
    %107 = vector.load %arg9[%c1_93, %c40_94] : memref<18x72xf32, #tpu.memory_space<vmem>>, vector<15x16xf32>
    %108 = arith.addf %107, %106 : vector<15x16xf32>
    %c1_95 = arith.constant 1 : index
    %c40_96 = arith.constant 40 : index
    %109 = vector.load %arg9[%c1_95, %c40_96] : memref<18x72xf32, #tpu.memory_space<vmem>>, vector<15x16xf32>
    tpu.vector_store %arg9[%c1_95, %c40_96], %108 {strides = array<i32>} : memref<18x72xf32, #tpu.memory_space<vmem>>, vector<15x16xf32>,
    %110 = vector.extract_strided_slice %101 {offsets = [0, 32], sizes = [15, 16], strides = [1, 1]} : vector<15x64xf32> to vector<15x16xf32>
    %c2_97 = arith.constant 2 : index
    %c40_98 = arith.constant 40 : index
    %111 = vector.load %arg9[%c2_97, %c40_98] : memref<18x72xf32, #tpu.memory_space<vmem>>, vector<15x16xf32>
    %112 = arith.addf %111, %110 : vector<15x16xf32>
    %c2_99 = arith.constant 2 : index
    %c40_100 = arith.constant 40 : index
    %113 = vector.load %arg9[%c2_99, %c40_100] : memref<18x72xf32, #tpu.memory_space<vmem>>, vector<15x16xf32>
    tpu.vector_store %arg9[%c2_99, %c40_100], %112 {strides = array<i32>} : memref<18x72xf32, #tpu.memory_space<vmem>>, vector<15x16xf32>,
    %114 = vector.extract_strided_slice %101 {offsets = [0, 48], sizes = [15, 16], strides = [1, 1]} : vector<15x64xf32> to vector<15x16xf32>
    %c3_101 = arith.constant 3 : index
    %c40_102 = arith.constant 40 : index
    %115 = vector.load %arg9[%c3_101, %c40_102] : memref<18x72xf32, #tpu.memory_space<vmem>>, vector<15x16xf32>
    %116 = arith.addf %115, %114 : vector<15x16xf32>
    %c3_103 = arith.constant 3 : index
    %c40_104 = arith.constant 40 : index
    %117 = vector.load %arg9[%c3_103, %c40_104] : memref<18x72xf32, #tpu.memory_space<vmem>>, vector<15x16xf32>
    tpu.vector_store %arg9[%c3_103, %c40_104], %116 {strides = array<i32>} : memref<18x72xf32, #tpu.memory_space<vmem>>, vector<15x16xf32>,
    %118 = vector.extract_strided_slice %6 {offsets = [48, 0], sizes = [8, 64], strides = [1, 1]} : vector<64x64xf32> to vector<8x64xf32>
    %cst_105 = arith.constant dense<0.000000e+00> : vector<15x64xf32>
    %119 = tpu.matmul %9, %118, %cst_105 {dimension_numbers = #tpu.dot_dimension_numbers<[1], [0], [0], [1], [0, 0, 1, 1], [], []>} : vector<15x8xf32>, vector<8x64xf32>, vector<15x64xf32> -> vector<15x64xf32>
    %120 = vector.extract_strided_slice %119 {offsets = [0, 0], sizes = [15, 16], strides = [1, 1]} : vector<15x64xf32> to vector<15x16xf32>
    %c0_106 = arith.constant 0 : index
    %c48 = arith.constant 48 : index
    %121 = vector.load %arg9[%c0_106, %c48] : memref<18x72xf32, #tpu.memory_space<vmem>>, vector<15x16xf32>
    %122 = arith.addf %121, %120 : vector<15x16xf32>
    %c0_107 = arith.constant 0 : index
    %c48_108 = arith.constant 48 : index
    %123 = vector.load %arg9[%c0_107, %c48_108] : memref<18x72xf32, #tpu.memory_space<vmem>>, vector<15x16xf32>
    tpu.vector_store %arg9[%c0_107, %c48_108], %122 {strides = array<i32>} : memref<18x72xf32, #tpu.memory_space<vmem>>, vector<15x16xf32>,
    %124 = vector.extract_strided_slice %119 {offsets = [0, 16], sizes = [15, 16], strides = [1, 1]} : vector<15x64xf32> to vector<15x16xf32>
    %c1_109 = arith.constant 1 : index
    %c48_110 = arith.constant 48 : index
    %125 = vector.load %arg9[%c1_109, %c48_110] : memref<18x72xf32, #tpu.memory_space<vmem>>, vector<15x16xf32>
    %126 = arith.addf %125, %124 : vector<15x16xf32>
    %c1_111 = arith.constant 1 : index
    %c48_112 = arith.constant 48 : index
    %127 = vector.load %arg9[%c1_111, %c48_112] : memref<18x72xf32, #tpu.memory_space<vmem>>, vector<15x16xf32>
    tpu.vector_store %arg9[%c1_111, %c48_112], %126 {strides = array<i32>} : memref<18x72xf32, #tpu.memory_space<vmem>>, vector<15x16xf32>,
    %128 = vector.extract_strided_slice %119 {offsets = [0, 32], sizes = [15, 16], strides = [1, 1]} : vector<15x64xf32> to vector<15x16xf32>
    %c2_113 = arith.constant 2 : index
    %c48_114 = arith.constant 48 : index
    %129 = vector.load %arg9[%c2_113, %c48_114] : memref<18x72xf32, #tpu.memory_space<vmem>>, vector<15x16xf32>
    %130 = arith.addf %129, %128 : vector<15x16xf32>
    %c2_115 = arith.constant 2 : index
    %c48_116 = arith.constant 48 : index
    %131 = vector.load %arg9[%c2_115, %c48_116] : memref<18x72xf32, #tpu.memory_space<vmem>>, vector<15x16xf32>
    tpu.vector_store %arg9[%c2_115, %c48_116], %130 {strides = array<i32>} : memref<18x72xf32, #tpu.memory_space<vmem>>, vector<15x16xf32>,
    %132 = vector.extract_strided_slice %119 {offsets = [0, 48], sizes = [15, 16], strides = [1, 1]} : vector<15x64xf32> to vector<15x16xf32>
    %c3_117 = arith.constant 3 : index
    %c48_118 = arith.constant 48 : index
    %133 = vector.load %arg9[%c3_117, %c48_118] : memref<18x72xf32, #tpu.memory_space<vmem>>, vector<15x16xf32>
    %134 = arith.addf %133, %132 : vector<15x16xf32>
    %c3_119 = arith.constant 3 : index
    %c48_120 = arith.constant 48 : index
    %135 = vector.load %arg9[%c3_119, %c48_120] : memref<18x72xf32, #tpu.memory_space<vmem>>, vector<15x16xf32>
    tpu.vector_store %arg9[%c3_119, %c48_120], %134 {strides = array<i32>} : memref<18x72xf32, #tpu.memory_space<vmem>>, vector<15x16xf32>,
    %136 = vector.extract_strided_slice %6 {offsets = [56, 0], sizes = [8, 64], strides = [1, 1]} : vector<64x64xf32> to vector<8x64xf32>
    %cst_121 = arith.constant dense<0.000000e+00> : vector<15x64xf32>
    %137 = tpu.matmul %9, %136, %cst_121 {dimension_numbers = #tpu.dot_dimension_numbers<[1], [0], [0], [1], [0, 0, 1, 1], [], []>} : vector<15x8xf32>, vector<8x64xf32>, vector<15x64xf32> -> vector<15x64xf32>
    %138 = vector.extract_strided_slice %137 {offsets = [0, 0], sizes = [15, 16], strides = [1, 1]} : vector<15x64xf32> to vector<15x16xf32>
    %c0_122 = arith.constant 0 : index
    %c56 = arith.constant 56 : index
    %139 = vector.load %arg9[%c0_122, %c56] : memref<18x72xf32, #tpu.memory_space<vmem>>, vector<15x16xf32>
    %140 = arith.addf %139, %138 : vector<15x16xf32>
    %c0_123 = arith.constant 0 : index
    %c56_124 = arith.constant 56 : index
    %141 = vector.load %arg9[%c0_123, %c56_124] : memref<18x72xf32, #tpu.memory_space<vmem>>, vector<15x16xf32>
    tpu.vector_store %arg9[%c0_123, %c56_124], %140 {strides = array<i32>} : memref<18x72xf32, #tpu.memory_space<vmem>>, vector<15x16xf32>,
    %142 = vector.extract_strided_slice %137 {offsets = [0, 16], sizes = [15, 16], strides = [1, 1]} : vector<15x64xf32> to vector<15x16xf32>
    %c1_125 = arith.constant 1 : index
    %c56_126 = arith.constant 56 : index
    %143 = vector.load %arg9[%c1_125, %c56_126] : memref<18x72xf32, #tpu.memory_space<vmem>>, vector<15x16xf32>
    %144 = arith.addf %143, %142 : vector<15x16xf32>
    %c1_127 = arith.constant 1 : index
    %c56_128 = arith.constant 56 : index
    %145 = vector.load %arg9[%c1_127, %c56_128] : memref<18x72xf32, #tpu.memory_space<vmem>>, vector<15x16xf32>
    tpu.vector_store %arg9[%c1_127, %c56_128], %144 {strides = array<i32>} : memref<18x72xf32, #tpu.memory_space<vmem>>, vector<15x16xf32>,
    %146 = vector.extract_strided_slice %137 {offsets = [0, 32], sizes = [15, 16], strides = [1, 1]} : vector<15x64xf32> to vector<15x16xf32>
    %c2_129 = arith.constant 2 : index
    %c56_130 = arith.constant 56 : index
    %147 = vector.load %arg9[%c2_129, %c56_130] : memref<18x72xf32, #tpu.memory_space<vmem>>, vector<15x16xf32>
    %148 = arith.addf %147, %146 : vector<15x16xf32>
    %c2_131 = arith.constant 2 : index
    %c56_132 = arith.constant 56 : index
    %149 = vector.load %arg9[%c2_131, %c56_132] : memref<18x72xf32, #tpu.memory_space<vmem>>, vector<15x16xf32>
    tpu.vector_store %arg9[%c2_131, %c56_132], %148 {strides = array<i32>} : memref<18x72xf32, #tpu.memory_space<vmem>>, vector<15x16xf32>,
    %150 = vector.extract_strided_slice %137 {offsets = [0, 48], sizes = [15, 16], strides = [1, 1]} : vector<15x64xf32> to vector<15x16xf32>
    %c3_133 = arith.constant 3 : index
    %c56_134 = arith.constant 56 : index
    %151 = vector.load %arg9[%c3_133, %c56_134] : memref<18x72xf32, #tpu.memory_space<vmem>>, vector<15x16xf32>
    %152 = arith.addf %151, %150 : vector<15x16xf32>
    %c3_135 = arith.constant 3 : index
    %c56_136 = arith.constant 56 : index
    %153 = vector.load %arg9[%c3_135, %c56_136] : memref<18x72xf32, #tpu.memory_space<vmem>>, vector<15x16xf32>
    tpu.vector_store %arg9[%c3_135, %c56_136], %152 {strides = array<i32>} : memref<18x72xf32, #tpu.memory_space<vmem>>, vector<15x16xf32>,
    %c0_137 = arith.constant 0 : index
    %c0_138 = arith.constant 0 : index
    %154 = vector.load %arg9[%c0_137, %c0_138] : memref<18x72xf32, #tpu.memory_space<vmem>>, vector<18x72xf32>
    %c0_139 = arith.constant 0 : index
    %c0_140 = arith.constant 0 : index
    %155 = vector.load %arg5[%c0_139, %c0_140] : memref<72x72xf32, #tpu.memory_space<vmem>>, vector<72x72xf32>
    %cst_141 = arith.constant dense<0.000000e+00> : vector<18x72xf32>
    %156 = tpu.matmul %154, %155, %cst_141 {dimension_numbers = #tpu.dot_dimension_numbers<[1], [0], [0], [1], [0, 0, 1, 1], [], []>} : vector<18x72xf32>, vector<72x72xf32>, vector<18x72xf32> -> vector<18x72xf32>
    %cst_142 = arith.constant 0.000000e+00 : f32
    %157 = vector.broadcast %cst_142 : f32 to vector<4x18x18xf32>
    %c0_143 = arith.constant 0 : index
    %c0_144 = arith.constant 0 : index
    %c0_145 = arith.constant 0 : index
    %158 = vector.load %arg10[%c0_143, %c0_144, %c0_145] : memref<4x18x18xf32, #tpu.memory_space<vmem>>, vector<4x18x18xf32>
    tpu.vector_store %arg10[%c0_143, %c0_144, %c0_145], %157 {strides = array<i32>} : memref<4x18x18xf32, #tpu.memory_space<vmem>>, vector<4x18x18xf32>,
    %159 = vector.extract_strided_slice %156 {offsets = [1, 1], sizes = [16, 16], strides = [1, 1]} : vector<18x72xf32> to vector<16x16xf32>
    %c0_146 = arith.constant 0 : index
    %c1_147 = arith.constant 1 : index
    %c1_148 = arith.constant 1 : index
    %160 = vector.load %arg10[%c0_146, %c1_147, %c1_148] : memref<4x18x18xf32, #tpu.memory_space<vmem>>, vector<1x16x16xf32>
    %161 = vector.shape_cast %160 : vector<1x16x16xf32> to vector<16x16xf32>
    %162 = vector.shape_cast %159 : vector<16x16xf32> to vector<1x16x16xf32>
    tpu.vector_store %arg10[%c0_146, %c1_147, %c1_148], %162 {strides = array<i32>} : memref<4x18x18xf32, #tpu.memory_space<vmem>>, vector<1x16x16xf32>,
    %163 = vector.extract_strided_slice %156 {offsets = [1, 19], sizes = [16, 16], strides = [1, 1]} : vector<18x72xf32> to vector<16x16xf32>
    %c1_149 = arith.constant 1 : index
    %c1_150 = arith.constant 1 : index
    %c1_151 = arith.constant 1 : index
    %164 = vector.load %arg10[%c1_149, %c1_150, %c1_151] : memref<4x18x18xf32, #tpu.memory_space<vmem>>, vector<1x16x16xf32>
    %165 = vector.shape_cast %164 : vector<1x16x16xf32> to vector<16x16xf32>
    %166 = vector.shape_cast %163 : vector<16x16xf32> to vector<1x16x16xf32>
    tpu.vector_store %arg10[%c1_149, %c1_150, %c1_151], %166 {strides = array<i32>} : memref<4x18x18xf32, #tpu.memory_space<vmem>>, vector<1x16x16xf32>,
    %167 = vector.extract_strided_slice %156 {offsets = [1, 37], sizes = [16, 16], strides = [1, 1]} : vector<18x72xf32> to vector<16x16xf32>
    %c2_152 = arith.constant 2 : index
    %c1_153 = arith.constant 1 : index
    %c1_154 = arith.constant 1 : index
    %168 = vector.load %arg10[%c2_152, %c1_153, %c1_154] : memref<4x18x18xf32, #tpu.memory_space<vmem>>, vector<1x16x16xf32>
    %169 = vector.shape_cast %168 : vector<1x16x16xf32> to vector<16x16xf32>
    %170 = vector.shape_cast %167 : vector<16x16xf32> to vector<1x16x16xf32>
    tpu.vector_store %arg10[%c2_152, %c1_153, %c1_154], %170 {strides = array<i32>} : memref<4x18x18xf32, #tpu.memory_space<vmem>>, vector<1x16x16xf32>,
    %171 = vector.extract_strided_slice %156 {offsets = [1, 55], sizes = [16, 16], strides = [1, 1]} : vector<18x72xf32> to vector<16x16xf32>
    %c3_155 = arith.constant 3 : index
    %c1_156 = arith.constant 1 : index
    %c1_157 = arith.constant 1 : index
    %172 = vector.load %arg10[%c3_155, %c1_156, %c1_157] : memref<4x18x18xf32, #tpu.memory_space<vmem>>, vector<1x16x16xf32>
    %173 = vector.shape_cast %172 : vector<1x16x16xf32> to vector<16x16xf32>
    %174 = vector.shape_cast %171 : vector<16x16xf32> to vector<1x16x16xf32>
    tpu.vector_store %arg10[%c3_155, %c1_156, %c1_157], %174 {strides = array<i32>} : memref<4x18x18xf32, #tpu.memory_space<vmem>>, vector<1x16x16xf32>,
    %c0_158 = arith.constant 0 : index
    %c0_159 = arith.constant 0 : index
    %c0_160 = arith.constant 0 : index
    %175 = vector.load %arg10[%c0_158, %c0_159, %c0_160] : memref<4x18x18xf32, #tpu.memory_space<vmem>>, vector<1x18x18xf32>
    %176 = vector.shape_cast %175 : vector<1x18x18xf32> to vector<18x18xf32>
    %177 = vector.extract_strided_slice %176 {offsets = [0, 0], sizes = [16, 16], strides = [1, 1]} : vector<18x18xf32> to vector<16x16xf32>
    %178 = vector.extract_strided_slice %176 {offsets = [1, 0], sizes = [16, 16], strides = [1, 1]} : vector<18x18xf32> to vector<16x16xf32>
    %179 = vector.extract_strided_slice %176 {offsets = [2, 0], sizes = [16, 16], strides = [1, 1]} : vector<18x18xf32> to vector<16x16xf32>
    %180 = vector.extract_strided_slice %176 {offsets = [0, 1], sizes = [16, 16], strides = [1, 1]} : vector<18x18xf32> to vector<16x16xf32>
    %181 = vector.extract_strided_slice %176 {offsets = [1, 1], sizes = [16, 16], strides = [1, 1]} : vector<18x18xf32> to vector<16x16xf32>
    %182 = vector.extract_strided_slice %176 {offsets = [2, 1], sizes = [16, 16], strides = [1, 1]} : vector<18x18xf32> to vector<16x16xf32>
    %183 = vector.extract_strided_slice %176 {offsets = [0, 2], sizes = [16, 16], strides = [1, 1]} : vector<18x18xf32> to vector<16x16xf32>
    %184 = vector.extract_strided_slice %176 {offsets = [1, 2], sizes = [16, 16], strides = [1, 1]} : vector<18x18xf32> to vector<16x16xf32>
    %185 = vector.extract_strided_slice %176 {offsets = [2, 2], sizes = [16, 16], strides = [1, 1]} : vector<18x18xf32> to vector<16x16xf32>
    %c1_161 = arith.constant 1 : index
    %c0_162 = arith.constant 0 : index
    %c0_163 = arith.constant 0 : index
    %186 = vector.load %arg10[%c1_161, %c0_162, %c0_163] : memref<4x18x18xf32, #tpu.memory_space<vmem>>, vector<1x18x18xf32>
    %187 = vector.shape_cast %186 : vector<1x18x18xf32> to vector<18x18xf32>
    %188 = vector.extract_strided_slice %187 {offsets = [0, 0], sizes = [16, 16], strides = [1, 1]} : vector<18x18xf32> to vector<16x16xf32>
    %189 = vector.extract_strided_slice %187 {offsets = [1, 0], sizes = [16, 16], strides = [1, 1]} : vector<18x18xf32> to vector<16x16xf32>
    %190 = vector.extract_strided_slice %187 {offsets = [2, 0], sizes = [16, 16], strides = [1, 1]} : vector<18x18xf32> to vector<16x16xf32>
    %191 = vector.extract_strided_slice %187 {offsets = [0, 1], sizes = [16, 16], strides = [1, 1]} : vector<18x18xf32> to vector<16x16xf32>
    %192 = vector.extract_strided_slice %187 {offsets = [1, 1], sizes = [16, 16], strides = [1, 1]} : vector<18x18xf32> to vector<16x16xf32>
    %193 = vector.extract_strided_slice %187 {offsets = [2, 1], sizes = [16, 16], strides = [1, 1]} : vector<18x18xf32> to vector<16x16xf32>
    %194 = vector.extract_strided_slice %187 {offsets = [0, 2], sizes = [16, 16], strides = [1, 1]} : vector<18x18xf32> to vector<16x16xf32>
    %195 = vector.extract_strided_slice %187 {offsets = [1, 2], sizes = [16, 16], strides = [1, 1]} : vector<18x18xf32> to vector<16x16xf32>
    %196 = vector.extract_strided_slice %187 {offsets = [2, 2], sizes = [16, 16], strides = [1, 1]} : vector<18x18xf32> to vector<16x16xf32>
    %c2_164 = arith.constant 2 : index
    %c0_165 = arith.constant 0 : index
    %c0_166 = arith.constant 0 : index
    %197 = vector.load %arg10[%c2_164, %c0_165, %c0_166] : memref<4x18x18xf32, #tpu.memory_space<vmem>>, vector<1x18x18xf32>
    %198 = vector.shape_cast %197 : vector<1x18x18xf32> to vector<18x18xf32>
    %199 = vector.extract_strided_slice %198 {offsets = [0, 0], sizes = [16, 16], strides = [1, 1]} : vector<18x18xf32> to vector<16x16xf32>
    %200 = vector.extract_strided_slice %198 {offsets = [1, 0], sizes = [16, 16], strides = [1, 1]} : vector<18x18xf32> to vector<16x16xf32>
    %201 = vector.extract_strided_slice %198 {offsets = [2, 0], sizes = [16, 16], strides = [1, 1]} : vector<18x18xf32> to vector<16x16xf32>
    %202 = vector.extract_strided_slice %198 {offsets = [0, 1], sizes = [16, 16], strides = [1, 1]} : vector<18x18xf32> to vector<16x16xf32>
    %203 = vector.extract_strided_slice %198 {offsets = [1, 1], sizes = [16, 16], strides = [1, 1]} : vector<18x18xf32> to vector<16x16xf32>
    %204 = vector.extract_strided_slice %198 {offsets = [2, 1], sizes = [16, 16], strides = [1, 1]} : vector<18x18xf32> to vector<16x16xf32>
    %205 = vector.extract_strided_slice %198 {offsets = [0, 2], sizes = [16, 16], strides = [1, 1]} : vector<18x18xf32> to vector<16x16xf32>
    %206 = vector.extract_strided_slice %198 {offsets = [1, 2], sizes = [16, 16], strides = [1, 1]} : vector<18x18xf32> to vector<16x16xf32>
    %207 = vector.extract_strided_slice %198 {offsets = [2, 2], sizes = [16, 16], strides = [1, 1]} : vector<18x18xf32> to vector<16x16xf32>
    %c3_167 = arith.constant 3 : index
    %c0_168 = arith.constant 0 : index
    %c0_169 = arith.constant 0 : index
    %208 = vector.load %arg10[%c3_167, %c0_168, %c0_169] : memref<4x18x18xf32, #tpu.memory_space<vmem>>, vector<1x18x18xf32>
    %209 = vector.shape_cast %208 : vector<1x18x18xf32> to vector<18x18xf32>
    %210 = vector.extract_strided_slice %209 {offsets = [0, 0], sizes = [16, 16], strides = [1, 1]} : vector<18x18xf32> to vector<16x16xf32>
    %211 = vector.extract_strided_slice %209 {offsets = [1, 0], sizes = [16, 16], strides = [1, 1]} : vector<18x18xf32> to vector<16x16xf32>
    %212 = vector.extract_strided_slice %209 {offsets = [2, 0], sizes = [16, 16], strides = [1, 1]} : vector<18x18xf32> to vector<16x16xf32>
    %213 = vector.extract_strided_slice %209 {offsets = [0, 1], sizes = [16, 16], strides = [1, 1]} : vector<18x18xf32> to vector<16x16xf32>
    %214 = vector.extract_strided_slice %209 {offsets = [1, 1], sizes = [16, 16], strides = [1, 1]} : vector<18x18xf32> to vector<16x16xf32>
    %215 = vector.extract_strided_slice %209 {offsets = [2, 1], sizes = [16, 16], strides = [1, 1]} : vector<18x18xf32> to vector<16x16xf32>
    %216 = vector.extract_strided_slice %209 {offsets = [0, 2], sizes = [16, 16], strides = [1, 1]} : vector<18x18xf32> to vector<16x16xf32>
    %217 = vector.extract_strided_slice %209 {offsets = [1, 2], sizes = [16, 16], strides = [1, 1]} : vector<18x18xf32> to vector<16x16xf32>
    %218 = vector.extract_strided_slice %209 {offsets = [2, 2], sizes = [16, 16], strides = [1, 1]} : vector<18x18xf32> to vector<16x16xf32>
    %c0_170 = arith.constant 0 : index
    %c0_171 = arith.constant 0 : index
    %219 = vector.load %arg7[%c0_170, %c0_171] : memref<1x4xf32, #tpu.memory_space<vmem>>, vector<1x1xf32>
    %220 = vector.extract %219[0, 0] : f32 from vector<1x1xf32>
    %221 = vector.broadcast %220 : f32 to vector<16x16xf32>
    %c0_172 = arith.constant 0 : index
    %c0_173 = arith.constant 0 : index
    %222 = vector.load %arg6[%c0_172, %c0_173] : memref<16x9xf32, #tpu.memory_space<vmem>>, vector<1x1xf32>
    %223 = vector.extract %222[0, 0] : f32 from vector<1x1xf32>
    %224 = vector.broadcast %223 : f32 to vector<16x16xf32>
    %225 = arith.mulf %224, %177 : vector<16x16xf32>
    %226 = arith.addf %221, %225 : vector<16x16xf32>
    %c0_174 = arith.constant 0 : index
    %c1_175 = arith.constant 1 : index
    %227 = vector.load %arg6[%c0_174, %c1_175] : memref<16x9xf32, #tpu.memory_space<vmem>>, vector<1x1xf32>
    %228 = vector.extract %227[0, 0] : f32 from vector<1x1xf32>
    %229 = vector.broadcast %228 : f32 to vector<16x16xf32>
    %230 = arith.mulf %229, %178 : vector<16x16xf32>
    %231 = arith.addf %226, %230 : vector<16x16xf32>
    %c0_176 = arith.constant 0 : index
    %c2_177 = arith.constant 2 : index
    %232 = vector.load %arg6[%c0_176, %c2_177] : memref<16x9xf32, #tpu.memory_space<vmem>>, vector<1x1xf32>
    %233 = vector.extract %232[0, 0] : f32 from vector<1x1xf32>
    %234 = vector.broadcast %233 : f32 to vector<16x16xf32>
    %235 = arith.mulf %234, %179 : vector<16x16xf32>
    %236 = arith.addf %231, %235 : vector<16x16xf32>
    %c0_178 = arith.constant 0 : index
    %c3_179 = arith.constant 3 : index
    %237 = vector.load %arg6[%c0_178, %c3_179] : memref<16x9xf32, #tpu.memory_space<vmem>>, vector<1x1xf32>
    %238 = vector.extract %237[0, 0] : f32 from vector<1x1xf32>
    %239 = vector.broadcast %238 : f32 to vector<16x16xf32>
    %240 = arith.mulf %239, %180 : vector<16x16xf32>
    %241 = arith.addf %236, %240 : vector<16x16xf32>
    %c0_180 = arith.constant 0 : index
    %c4 = arith.constant 4 : index
    %242 = vector.load %arg6[%c0_180, %c4] : memref<16x9xf32, #tpu.memory_space<vmem>>, vector<1x1xf32>
    %243 = vector.extract %242[0, 0] : f32 from vector<1x1xf32>
    %244 = vector.broadcast %243 : f32 to vector<16x16xf32>
    %245 = arith.mulf %244, %181 : vector<16x16xf32>
    %246 = arith.addf %241, %245 : vector<16x16xf32>
    %c0_181 = arith.constant 0 : index
    %c5 = arith.constant 5 : index
    %247 = vector.load %arg6[%c0_181, %c5] : memref<16x9xf32, #tpu.memory_space<vmem>>, vector<1x1xf32>
    %248 = vector.extract %247[0, 0] : f32 from vector<1x1xf32>
    %249 = vector.broadcast %248 : f32 to vector<16x16xf32>
    %250 = arith.mulf %249, %182 : vector<16x16xf32>
    %251 = arith.addf %246, %250 : vector<16x16xf32>
    %c0_182 = arith.constant 0 : index
    %c6 = arith.constant 6 : index
    %252 = vector.load %arg6[%c0_182, %c6] : memref<16x9xf32, #tpu.memory_space<vmem>>, vector<1x1xf32>
    %253 = vector.extract %252[0, 0] : f32 from vector<1x1xf32>
    %254 = vector.broadcast %253 : f32 to vector<16x16xf32>
    %255 = arith.mulf %254, %183 : vector<16x16xf32>
    %256 = arith.addf %251, %255 : vector<16x16xf32>
    %c0_183 = arith.constant 0 : index
    %c7 = arith.constant 7 : index
    %257 = vector.load %arg6[%c0_183, %c7] : memref<16x9xf32, #tpu.memory_space<vmem>>, vector<1x1xf32>
    %258 = vector.extract %257[0, 0] : f32 from vector<1x1xf32>
    %259 = vector.broadcast %258 : f32 to vector<16x16xf32>
    %260 = arith.mulf %259, %184 : vector<16x16xf32>
    %261 = arith.addf %256, %260 : vector<16x16xf32>
    %c0_184 = arith.constant 0 : index
    %c8_185 = arith.constant 8 : index
    %262 = vector.load %arg6[%c0_184, %c8_185] : memref<16x9xf32, #tpu.memory_space<vmem>>, vector<1x1xf32>
    %263 = vector.extract %262[0, 0] : f32 from vector<1x1xf32>
    %264 = vector.broadcast %263 : f32 to vector<16x16xf32>
    %265 = arith.mulf %264, %185 : vector<16x16xf32>
    %266 = arith.addf %261, %265 : vector<16x16xf32>
    %c1_186 = arith.constant 1 : index
    %c0_187 = arith.constant 0 : index
    %267 = vector.load %arg6[%c1_186, %c0_187] : memref<16x9xf32, #tpu.memory_space<vmem>>, vector<1x1xf32>
    %268 = vector.extract %267[0, 0] : f32 from vector<1x1xf32>
    %269 = vector.broadcast %268 : f32 to vector<16x16xf32>
    %270 = arith.mulf %269, %188 : vector<16x16xf32>
    %271 = arith.addf %266, %270 : vector<16x16xf32>
    %c1_188 = arith.constant 1 : index
    %c1_189 = arith.constant 1 : index
    %272 = vector.load %arg6[%c1_188, %c1_189] : memref<16x9xf32, #tpu.memory_space<vmem>>, vector<1x1xf32>
    %273 = vector.extract %272[0, 0] : f32 from vector<1x1xf32>
    %274 = vector.broadcast %273 : f32 to vector<16x16xf32>
    %275 = arith.mulf %274, %189 : vector<16x16xf32>
    %276 = arith.addf %271, %275 : vector<16x16xf32>
    %c1_190 = arith.constant 1 : index
    %c2_191 = arith.constant 2 : index
    %277 = vector.load %arg6[%c1_190, %c2_191] : memref<16x9xf32, #tpu.memory_space<vmem>>, vector<1x1xf32>
    %278 = vector.extract %277[0, 0] : f32 from vector<1x1xf32>
    %279 = vector.broadcast %278 : f32 to vector<16x16xf32>
    %280 = arith.mulf %279, %190 : vector<16x16xf32>
    %281 = arith.addf %276, %280 : vector<16x16xf32>
    %c1_192 = arith.constant 1 : index
    %c3_193 = arith.constant 3 : index
    %282 = vector.load %arg6[%c1_192, %c3_193] : memref<16x9xf32, #tpu.memory_space<vmem>>, vector<1x1xf32>
    %283 = vector.extract %282[0, 0] : f32 from vector<1x1xf32>
    %284 = vector.broadcast %283 : f32 to vector<16x16xf32>
    %285 = arith.mulf %284, %191 : vector<16x16xf32>
    %286 = arith.addf %281, %285 : vector<16x16xf32>
    %c1_194 = arith.constant 1 : index
    %c4_195 = arith.constant 4 : index
    %287 = vector.load %arg6[%c1_194, %c4_195] : memref<16x9xf32, #tpu.memory_space<vmem>>, vector<1x1xf32>
    %288 = vector.extract %287[0, 0] : f32 from vector<1x1xf32>
    %289 = vector.broadcast %288 : f32 to vector<16x16xf32>
    %290 = arith.mulf %289, %192 : vector<16x16xf32>
    %291 = arith.addf %286, %290 : vector<16x16xf32>
    %c1_196 = arith.constant 1 : index
    %c5_197 = arith.constant 5 : index
    %292 = vector.load %arg6[%c1_196, %c5_197] : memref<16x9xf32, #tpu.memory_space<vmem>>, vector<1x1xf32>
    %293 = vector.extract %292[0, 0] : f32 from vector<1x1xf32>
    %294 = vector.broadcast %293 : f32 to vector<16x16xf32>
    %295 = arith.mulf %294, %193 : vector<16x16xf32>
    %296 = arith.addf %291, %295 : vector<16x16xf32>
    %c1_198 = arith.constant 1 : index
    %c6_199 = arith.constant 6 : index
    %297 = vector.load %arg6[%c1_198, %c6_199] : memref<16x9xf32, #tpu.memory_space<vmem>>, vector<1x1xf32>
    %298 = vector.extract %297[0, 0] : f32 from vector<1x1xf32>
    %299 = vector.broadcast %298 : f32 to vector<16x16xf32>
    %300 = arith.mulf %299, %194 : vector<16x16xf32>
    %301 = arith.addf %296, %300 : vector<16x16xf32>
    %c1_200 = arith.constant 1 : index
    %c7_201 = arith.constant 7 : index
    %302 = vector.load %arg6[%c1_200, %c7_201] : memref<16x9xf32, #tpu.memory_space<vmem>>, vector<1x1xf32>
    %303 = vector.extract %302[0, 0] : f32 from vector<1x1xf32>
    %304 = vector.broadcast %303 : f32 to vector<16x16xf32>
    %305 = arith.mulf %304, %195 : vector<16x16xf32>
    %306 = arith.addf %301, %305 : vector<16x16xf32>
    %c1_202 = arith.constant 1 : index
    %c8_203 = arith.constant 8 : index
    %307 = vector.load %arg6[%c1_202, %c8_203] : memref<16x9xf32, #tpu.memory_space<vmem>>, vector<1x1xf32>
    %308 = vector.extract %307[0, 0] : f32 from vector<1x1xf32>
    %309 = vector.broadcast %308 : f32 to vector<16x16xf32>
    %310 = arith.mulf %309, %196 : vector<16x16xf32>
    %311 = arith.addf %306, %310 : vector<16x16xf32>
    %c2_204 = arith.constant 2 : index
    %c0_205 = arith.constant 0 : index
    %312 = vector.load %arg6[%c2_204, %c0_205] : memref<16x9xf32, #tpu.memory_space<vmem>>, vector<1x1xf32>
    %313 = vector.extract %312[0, 0] : f32 from vector<1x1xf32>
    %314 = vector.broadcast %313 : f32 to vector<16x16xf32>
    %315 = arith.mulf %314, %199 : vector<16x16xf32>
    %316 = arith.addf %311, %315 : vector<16x16xf32>
    %c2_206 = arith.constant 2 : index
    %c1_207 = arith.constant 1 : index
    %317 = vector.load %arg6[%c2_206, %c1_207] : memref<16x9xf32, #tpu.memory_space<vmem>>, vector<1x1xf32>
    %318 = vector.extract %317[0, 0] : f32 from vector<1x1xf32>
    %319 = vector.broadcast %318 : f32 to vector<16x16xf32>
    %320 = arith.mulf %319, %200 : vector<16x16xf32>
    %321 = arith.addf %316, %320 : vector<16x16xf32>
    %c2_208 = arith.constant 2 : index
    %c2_209 = arith.constant 2 : index
    %322 = vector.load %arg6[%c2_208, %c2_209] : memref<16x9xf32, #tpu.memory_space<vmem>>, vector<1x1xf32>
    %323 = vector.extract %322[0, 0] : f32 from vector<1x1xf32>
    %324 = vector.broadcast %323 : f32 to vector<16x16xf32>
    %325 = arith.mulf %324, %201 : vector<16x16xf32>
    %326 = arith.addf %321, %325 : vector<16x16xf32>
    %c2_210 = arith.constant 2 : index
    %c3_211 = arith.constant 3 : index
    %327 = vector.load %arg6[%c2_210, %c3_211] : memref<16x9xf32, #tpu.memory_space<vmem>>, vector<1x1xf32>
    %328 = vector.extract %327[0, 0] : f32 from vector<1x1xf32>
    %329 = vector.broadcast %328 : f32 to vector<16x16xf32>
    %330 = arith.mulf %329, %202 : vector<16x16xf32>
    %331 = arith.addf %326, %330 : vector<16x16xf32>
    %c2_212 = arith.constant 2 : index
    %c4_213 = arith.constant 4 : index
    %332 = vector.load %arg6[%c2_212, %c4_213] : memref<16x9xf32, #tpu.memory_space<vmem>>, vector<1x1xf32>
    %333 = vector.extract %332[0, 0] : f32 from vector<1x1xf32>
    %334 = vector.broadcast %333 : f32 to vector<16x16xf32>
    %335 = arith.mulf %334, %203 : vector<16x16xf32>
    %336 = arith.addf %331, %335 : vector<16x16xf32>
    %c2_214 = arith.constant 2 : index
    %c5_215 = arith.constant 5 : index
    %337 = vector.load %arg6[%c2_214, %c5_215] : memref<16x9xf32, #tpu.memory_space<vmem>>, vector<1x1xf32>
    %338 = vector.extract %337[0, 0] : f32 from vector<1x1xf32>
    %339 = vector.broadcast %338 : f32 to vector<16x16xf32>
    %340 = arith.mulf %339, %204 : vector<16x16xf32>
    %341 = arith.addf %336, %340 : vector<16x16xf32>
    %c2_216 = arith.constant 2 : index
    %c6_217 = arith.constant 6 : index
    %342 = vector.load %arg6[%c2_216, %c6_217] : memref<16x9xf32, #tpu.memory_space<vmem>>, vector<1x1xf32>
    %343 = vector.extract %342[0, 0] : f32 from vector<1x1xf32>
    %344 = vector.broadcast %343 : f32 to vector<16x16xf32>
    %345 = arith.mulf %344, %205 : vector<16x16xf32>
    %346 = arith.addf %341, %345 : vector<16x16xf32>
    %c2_218 = arith.constant 2 : index
    %c7_219 = arith.constant 7 : index
    %347 = vector.load %arg6[%c2_218, %c7_219] : memref<16x9xf32, #tpu.memory_space<vmem>>, vector<1x1xf32>
    %348 = vector.extract %347[0, 0] : f32 from vector<1x1xf32>
    %349 = vector.broadcast %348 : f32 to vector<16x16xf32>
    %350 = arith.mulf %349, %206 : vector<16x16xf32>
    %351 = arith.addf %346, %350 : vector<16x16xf32>
    %c2_220 = arith.constant 2 : index
    %c8_221 = arith.constant 8 : index
    %352 = vector.load %arg6[%c2_220, %c8_221] : memref<16x9xf32, #tpu.memory_space<vmem>>, vector<1x1xf32>
    %353 = vector.extract %352[0, 0] : f32 from vector<1x1xf32>
    %354 = vector.broadcast %353 : f32 to vector<16x16xf32>
    %355 = arith.mulf %354, %207 : vector<16x16xf32>
    %356 = arith.addf %351, %355 : vector<16x16xf32>
    %c3_222 = arith.constant 3 : index
    %c0_223 = arith.constant 0 : index
    %357 = vector.load %arg6[%c3_222, %c0_223] : memref<16x9xf32, #tpu.memory_space<vmem>>, vector<1x1xf32>
    %358 = vector.extract %357[0, 0] : f32 from vector<1x1xf32>
    %359 = vector.broadcast %358 : f32 to vector<16x16xf32>
    %360 = arith.mulf %359, %210 : vector<16x16xf32>
    %361 = arith.addf %356, %360 : vector<16x16xf32>
    %c3_224 = arith.constant 3 : index
    %c1_225 = arith.constant 1 : index
    %362 = vector.load %arg6[%c3_224, %c1_225] : memref<16x9xf32, #tpu.memory_space<vmem>>, vector<1x1xf32>
    %363 = vector.extract %362[0, 0] : f32 from vector<1x1xf32>
    %364 = vector.broadcast %363 : f32 to vector<16x16xf32>
    %365 = arith.mulf %364, %211 : vector<16x16xf32>
    %366 = arith.addf %361, %365 : vector<16x16xf32>
    %c3_226 = arith.constant 3 : index
    %c2_227 = arith.constant 2 : index
    %367 = vector.load %arg6[%c3_226, %c2_227] : memref<16x9xf32, #tpu.memory_space<vmem>>, vector<1x1xf32>
    %368 = vector.extract %367[0, 0] : f32 from vector<1x1xf32>
    %369 = vector.broadcast %368 : f32 to vector<16x16xf32>
    %370 = arith.mulf %369, %212 : vector<16x16xf32>
    %371 = arith.addf %366, %370 : vector<16x16xf32>
    %c3_228 = arith.constant 3 : index
    %c3_229 = arith.constant 3 : index
    %372 = vector.load %arg6[%c3_228, %c3_229] : memref<16x9xf32, #tpu.memory_space<vmem>>, vector<1x1xf32>
    %373 = vector.extract %372[0, 0] : f32 from vector<1x1xf32>
    %374 = vector.broadcast %373 : f32 to vector<16x16xf32>
    %375 = arith.mulf %374, %213 : vector<16x16xf32>
    %376 = arith.addf %371, %375 : vector<16x16xf32>
    %c3_230 = arith.constant 3 : index
    %c4_231 = arith.constant 4 : index
    %377 = vector.load %arg6[%c3_230, %c4_231] : memref<16x9xf32, #tpu.memory_space<vmem>>, vector<1x1xf32>
    %378 = vector.extract %377[0, 0] : f32 from vector<1x1xf32>
    %379 = vector.broadcast %378 : f32 to vector<16x16xf32>
    %380 = arith.mulf %379, %214 : vector<16x16xf32>
    %381 = arith.addf %376, %380 : vector<16x16xf32>
    %c3_232 = arith.constant 3 : index
    %c5_233 = arith.constant 5 : index
    %382 = vector.load %arg6[%c3_232, %c5_233] : memref<16x9xf32, #tpu.memory_space<vmem>>, vector<1x1xf32>
    %383 = vector.extract %382[0, 0] : f32 from vector<1x1xf32>
    %384 = vector.broadcast %383 : f32 to vector<16x16xf32>
    %385 = arith.mulf %384, %215 : vector<16x16xf32>
    %386 = arith.addf %381, %385 : vector<16x16xf32>
    %c3_234 = arith.constant 3 : index
    %c6_235 = arith.constant 6 : index
    %387 = vector.load %arg6[%c3_234, %c6_235] : memref<16x9xf32, #tpu.memory_space<vmem>>, vector<1x1xf32>
    %388 = vector.extract %387[0, 0] : f32 from vector<1x1xf32>
    %389 = vector.broadcast %388 : f32 to vector<16x16xf32>
    %390 = arith.mulf %389, %216 : vector<16x16xf32>
    %391 = arith.addf %386, %390 : vector<16x16xf32>
    %c3_236 = arith.constant 3 : index
    %c7_237 = arith.constant 7 : index
    %392 = vector.load %arg6[%c3_236, %c7_237] : memref<16x9xf32, #tpu.memory_space<vmem>>, vector<1x1xf32>
    %393 = vector.extract %392[0, 0] : f32 from vector<1x1xf32>
    %394 = vector.broadcast %393 : f32 to vector<16x16xf32>
    %395 = arith.mulf %394, %217 : vector<16x16xf32>
    %396 = arith.addf %391, %395 : vector<16x16xf32>
    %c3_238 = arith.constant 3 : index
    %c8_239 = arith.constant 8 : index
    %397 = vector.load %arg6[%c3_238, %c8_239] : memref<16x9xf32, #tpu.memory_space<vmem>>, vector<1x1xf32>
    %398 = vector.extract %397[0, 0] : f32 from vector<1x1xf32>
    %399 = vector.broadcast %398 : f32 to vector<16x16xf32>
    %400 = arith.mulf %399, %218 : vector<16x16xf32>
    %401 = arith.addf %396, %400 : vector<16x16xf32>
    %c0_240 = arith.constant 0 : index
    %c0_241 = arith.constant 0 : index
    %c0_242 = arith.constant 0 : index
    %c0_243 = arith.constant 0 : index
    %402 = vector.load %arg8[%c0_240, %c0_241, %c0_242, %c0_243] : memref<1x4x16x16xf32, #tpu.memory_space<vmem>>, vector<1x1x16x16xf32>
    %403 = vector.shape_cast %402 : vector<1x1x16x16xf32> to vector<16x16xf32>
    %404 = vector.shape_cast %401 : vector<16x16xf32> to vector<1x1x16x16xf32>
    tpu.vector_store %arg8[%c0_240, %c0_241, %c0_242, %c0_243], %404 {strides = array<i32>} : memref<1x4x16x16xf32, #tpu.memory_space<vmem>>, vector<1x1x16x16xf32>,
    %c0_244 = arith.constant 0 : index
    %c1_245 = arith.constant 1 : index
    %405 = vector.load %arg7[%c0_244, %c1_245] : memref<1x4xf32, #tpu.memory_space<vmem>>, vector<1x1xf32>
    %406 = vector.extract %405[0, 0] : f32 from vector<1x1xf32>
    %407 = vector.broadcast %406 : f32 to vector<16x16xf32>
    %c4_246 = arith.constant 4 : index
    %c0_247 = arith.constant 0 : index
    %408 = vector.load %arg6[%c4_246, %c0_247] : memref<16x9xf32, #tpu.memory_space<vmem>>, vector<1x1xf32>
    %409 = vector.extract %408[0, 0] : f32 from vector<1x1xf32>
    %410 = vector.broadcast %409 : f32 to vector<16x16xf32>
    %411 = arith.mulf %410, %177 : vector<16x16xf32>
    %412 = arith.addf %407, %411 : vector<16x16xf32>
    %c4_248 = arith.constant 4 : index
    %c1_249 = arith.constant 1 : index
    %413 = vector.load %arg6[%c4_248, %c1_249] : memref<16x9xf32, #tpu.memory_space<vmem>>, vector<1x1xf32>
    %414 = vector.extract %413[0, 0] : f32 from vector<1x1xf32>
    %415 = vector.broadcast %414 : f32 to vector<16x16xf32>
    %416 = arith.mulf %415, %178 : vector<16x16xf32>
    %417 = arith.addf %412, %416 : vector<16x16xf32>
    %c4_250 = arith.constant 4 : index
    %c2_251 = arith.constant 2 : index
    %418 = vector.load %arg6[%c4_250, %c2_251] : memref<16x9xf32, #tpu.memory_space<vmem>>, vector<1x1xf32>
    %419 = vector.extract %418[0, 0] : f32 from vector<1x1xf32>
    %420 = vector.broadcast %419 : f32 to vector<16x16xf32>
    %421 = arith.mulf %420, %179 : vector<16x16xf32>
    %422 = arith.addf %417, %421 : vector<16x16xf32>
    %c4_252 = arith.constant 4 : index
    %c3_253 = arith.constant 3 : index
    %423 = vector.load %arg6[%c4_252, %c3_253] : memref<16x9xf32, #tpu.memory_space<vmem>>, vector<1x1xf32>
    %424 = vector.extract %423[0, 0] : f32 from vector<1x1xf32>
    %425 = vector.broadcast %424 : f32 to vector<16x16xf32>
    %426 = arith.mulf %425, %180 : vector<16x16xf32>
    %427 = arith.addf %422, %426 : vector<16x16xf32>
    %c4_254 = arith.constant 4 : index
    %c4_255 = arith.constant 4 : index
    %428 = vector.load %arg6[%c4_254, %c4_255] : memref<16x9xf32, #tpu.memory_space<vmem>>, vector<1x1xf32>
    %429 = vector.extract %428[0, 0] : f32 from vector<1x1xf32>
    %430 = vector.broadcast %429 : f32 to vector<16x16xf32>
    %431 = arith.mulf %430, %181 : vector<16x16xf32>
    %432 = arith.addf %427, %431 : vector<16x16xf32>
    %c4_256 = arith.constant 4 : index
    %c5_257 = arith.constant 5 : index
    %433 = vector.load %arg6[%c4_256, %c5_257] : memref<16x9xf32, #tpu.memory_space<vmem>>, vector<1x1xf32>
    %434 = vector.extract %433[0, 0] : f32 from vector<1x1xf32>
    %435 = vector.broadcast %434 : f32 to vector<16x16xf32>
    %436 = arith.mulf %435, %182 : vector<16x16xf32>
    %437 = arith.addf %432, %436 : vector<16x16xf32>
    %c4_258 = arith.constant 4 : index
    %c6_259 = arith.constant 6 : index
    %438 = vector.load %arg6[%c4_258, %c6_259] : memref<16x9xf32, #tpu.memory_space<vmem>>, vector<1x1xf32>
    %439 = vector.extract %438[0, 0] : f32 from vector<1x1xf32>
    %440 = vector.broadcast %439 : f32 to vector<16x16xf32>
    %441 = arith.mulf %440, %183 : vector<16x16xf32>
    %442 = arith.addf %437, %441 : vector<16x16xf32>
    %c4_260 = arith.constant 4 : index
    %c7_261 = arith.constant 7 : index
    %443 = vector.load %arg6[%c4_260, %c7_261] : memref<16x9xf32, #tpu.memory_space<vmem>>, vector<1x1xf32>
    %444 = vector.extract %443[0, 0] : f32 from vector<1x1xf32>
    %445 = vector.broadcast %444 : f32 to vector<16x16xf32>
    %446 = arith.mulf %445, %184 : vector<16x16xf32>
    %447 = arith.addf %442, %446 : vector<16x16xf32>
    %c4_262 = arith.constant 4 : index
    %c8_263 = arith.constant 8 : index
    %448 = vector.load %arg6[%c4_262, %c8_263] : memref<16x9xf32, #tpu.memory_space<vmem>>, vector<1x1xf32>
    %449 = vector.extract %448[0, 0] : f32 from vector<1x1xf32>
    %450 = vector.broadcast %449 : f32 to vector<16x16xf32>
    %451 = arith.mulf %450, %185 : vector<16x16xf32>
    %452 = arith.addf %447, %451 : vector<16x16xf32>
    %c5_264 = arith.constant 5 : index
    %c0_265 = arith.constant 0 : index
    %453 = vector.load %arg6[%c5_264, %c0_265] : memref<16x9xf32, #tpu.memory_space<vmem>>, vector<1x1xf32>
    %454 = vector.extract %453[0, 0] : f32 from vector<1x1xf32>
    %455 = vector.broadcast %454 : f32 to vector<16x16xf32>
    %456 = arith.mulf %455, %188 : vector<16x16xf32>
    %457 = arith.addf %452, %456 : vector<16x16xf32>
    %c5_266 = arith.constant 5 : index
    %c1_267 = arith.constant 1 : index
    %458 = vector.load %arg6[%c5_266, %c1_267] : memref<16x9xf32, #tpu.memory_space<vmem>>, vector<1x1xf32>
    %459 = vector.extract %458[0, 0] : f32 from vector<1x1xf32>
    %460 = vector.broadcast %459 : f32 to vector<16x16xf32>
    %461 = arith.mulf %460, %189 : vector<16x16xf32>
    %462 = arith.addf %457, %461 : vector<16x16xf32>
    %c5_268 = arith.constant 5 : index
    %c2_269 = arith.constant 2 : index
    %463 = vector.load %arg6[%c5_268, %c2_269] : memref<16x9xf32, #tpu.memory_space<vmem>>, vector<1x1xf32>
    %464 = vector.extract %463[0, 0] : f32 from vector<1x1xf32>
    %465 = vector.broadcast %464 : f32 to vector<16x16xf32>
    %466 = arith.mulf %465, %190 : vector<16x16xf32>
    %467 = arith.addf %462, %466 : vector<16x16xf32>
    %c5_270 = arith.constant 5 : index
    %c3_271 = arith.constant 3 : index
    %468 = vector.load %arg6[%c5_270, %c3_271] : memref<16x9xf32, #tpu.memory_space<vmem>>, vector<1x1xf32>
    %469 = vector.extract %468[0, 0] : f32 from vector<1x1xf32>
    %470 = vector.broadcast %469 : f32 to vector<16x16xf32>
    %471 = arith.mulf %470, %191 : vector<16x16xf32>
    %472 = arith.addf %467, %471 : vector<16x16xf32>
    %c5_272 = arith.constant 5 : index
    %c4_273 = arith.constant 4 : index
    %473 = vector.load %arg6[%c5_272, %c4_273] : memref<16x9xf32, #tpu.memory_space<vmem>>, vector<1x1xf32>
    %474 = vector.extract %473[0, 0] : f32 from vector<1x1xf32>
    %475 = vector.broadcast %474 : f32 to vector<16x16xf32>
    %476 = arith.mulf %475, %192 : vector<16x16xf32>
    %477 = arith.addf %472, %476 : vector<16x16xf32>
    %c5_274 = arith.constant 5 : index
    %c5_275 = arith.constant 5 : index
    %478 = vector.load %arg6[%c5_274, %c5_275] : memref<16x9xf32, #tpu.memory_space<vmem>>, vector<1x1xf32>
    %479 = vector.extract %478[0, 0] : f32 from vector<1x1xf32>
    %480 = vector.broadcast %479 : f32 to vector<16x16xf32>
    %481 = arith.mulf %480, %193 : vector<16x16xf32>
    %482 = arith.addf %477, %481 : vector<16x16xf32>
    %c5_276 = arith.constant 5 : index
    %c6_277 = arith.constant 6 : index
    %483 = vector.load %arg6[%c5_276, %c6_277] : memref<16x9xf32, #tpu.memory_space<vmem>>, vector<1x1xf32>
    %484 = vector.extract %483[0, 0] : f32 from vector<1x1xf32>
    %485 = vector.broadcast %484 : f32 to vector<16x16xf32>
    %486 = arith.mulf %485, %194 : vector<16x16xf32>
    %487 = arith.addf %482, %486 : vector<16x16xf32>
    %c5_278 = arith.constant 5 : index
    %c7_279 = arith.constant 7 : index
    %488 = vector.load %arg6[%c5_278, %c7_279] : memref<16x9xf32, #tpu.memory_space<vmem>>, vector<1x1xf32>
    %489 = vector.extract %488[0, 0] : f32 from vector<1x1xf32>
    %490 = vector.broadcast %489 : f32 to vector<16x16xf32>
    %491 = arith.mulf %490, %195 : vector<16x16xf32>
    %492 = arith.addf %487, %491 : vector<16x16xf32>
    %c5_280 = arith.constant 5 : index
    %c8_281 = arith.constant 8 : index
    %493 = vector.load %arg6[%c5_280, %c8_281] : memref<16x9xf32, #tpu.memory_space<vmem>>, vector<1x1xf32>
    %494 = vector.extract %493[0, 0] : f32 from vector<1x1xf32>
    %495 = vector.broadcast %494 : f32 to vector<16x16xf32>
    %496 = arith.mulf %495, %196 : vector<16x16xf32>
    %497 = arith.addf %492, %496 : vector<16x16xf32>
    %c6_282 = arith.constant 6 : index
    %c0_283 = arith.constant 0 : index
    %498 = vector.load %arg6[%c6_282, %c0_283] : memref<16x9xf32, #tpu.memory_space<vmem>>, vector<1x1xf32>
    %499 = vector.extract %498[0, 0] : f32 from vector<1x1xf32>
    %500 = vector.broadcast %499 : f32 to vector<16x16xf32>
    %501 = arith.mulf %500, %199 : vector<16x16xf32>
    %502 = arith.addf %497, %501 : vector<16x16xf32>
    %c6_284 = arith.constant 6 : index
    %c1_285 = arith.constant 1 : index
    %503 = vector.load %arg6[%c6_284, %c1_285] : memref<16x9xf32, #tpu.memory_space<vmem>>, vector<1x1xf32>
    %504 = vector.extract %503[0, 0] : f32 from vector<1x1xf32>
    %505 = vector.broadcast %504 : f32 to vector<16x16xf32>
    %506 = arith.mulf %505, %200 : vector<16x16xf32>
    %507 = arith.addf %502, %506 : vector<16x16xf32>
    %c6_286 = arith.constant 6 : index
    %c2_287 = arith.constant 2 : index
    %508 = vector.load %arg6[%c6_286, %c2_287] : memref<16x9xf32, #tpu.memory_space<vmem>>, vector<1x1xf32>
    %509 = vector.extract %508[0, 0] : f32 from vector<1x1xf32>
    %510 = vector.broadcast %509 : f32 to vector<16x16xf32>
    %511 = arith.mulf %510, %201 : vector<16x16xf32>
    %512 = arith.addf %507, %511 : vector<16x16xf32>
    %c6_288 = arith.constant 6 : index
    %c3_289 = arith.constant 3 : index
    %513 = vector.load %arg6[%c6_288, %c3_289] : memref<16x9xf32, #tpu.memory_space<vmem>>, vector<1x1xf32>
    %514 = vector.extract %513[0, 0] : f32 from vector<1x1xf32>
    %515 = vector.broadcast %514 : f32 to vector<16x16xf32>
    %516 = arith.mulf %515, %202 : vector<16x16xf32>
    %517 = arith.addf %512, %516 : vector<16x16xf32>
    %c6_290 = arith.constant 6 : index
    %c4_291 = arith.constant 4 : index
    %518 = vector.load %arg6[%c6_290, %c4_291] : memref<16x9xf32, #tpu.memory_space<vmem>>, vector<1x1xf32>
    %519 = vector.extract %518[0, 0] : f32 from vector<1x1xf32>
    %520 = vector.broadcast %519 : f32 to vector<16x16xf32>
    %521 = arith.mulf %520, %203 : vector<16x16xf32>
    %522 = arith.addf %517, %521 : vector<16x16xf32>
    %c6_292 = arith.constant 6 : index
    %c5_293 = arith.constant 5 : index
    %523 = vector.load %arg6[%c6_292, %c5_293] : memref<16x9xf32, #tpu.memory_space<vmem>>, vector<1x1xf32>
    %524 = vector.extract %523[0, 0] : f32 from vector<1x1xf32>
    %525 = vector.broadcast %524 : f32 to vector<16x16xf32>
    %526 = arith.mulf %525, %204 : vector<16x16xf32>
    %527 = arith.addf %522, %526 : vector<16x16xf32>
    %c6_294 = arith.constant 6 : index
    %c6_295 = arith.constant 6 : index
    %528 = vector.load %arg6[%c6_294, %c6_295] : memref<16x9xf32, #tpu.memory_space<vmem>>, vector<1x1xf32>
    %529 = vector.extract %528[0, 0] : f32 from vector<1x1xf32>
    %530 = vector.broadcast %529 : f32 to vector<16x16xf32>
    %531 = arith.mulf %530, %205 : vector<16x16xf32>
    %532 = arith.addf %527, %531 : vector<16x16xf32>
    %c6_296 = arith.constant 6 : index
    %c7_297 = arith.constant 7 : index
    %533 = vector.load %arg6[%c6_296, %c7_297] : memref<16x9xf32, #tpu.memory_space<vmem>>, vector<1x1xf32>
    %534 = vector.extract %533[0, 0] : f32 from vector<1x1xf32>
    %535 = vector.broadcast %534 : f32 to vector<16x16xf32>
    %536 = arith.mulf %535, %206 : vector<16x16xf32>
    %537 = arith.addf %532, %536 : vector<16x16xf32>
    %c6_298 = arith.constant 6 : index
    %c8_299 = arith.constant 8 : index
    %538 = vector.load %arg6[%c6_298, %c8_299] : memref<16x9xf32, #tpu.memory_space<vmem>>, vector<1x1xf32>
    %539 = vector.extract %538[0, 0] : f32 from vector<1x1xf32>
    %540 = vector.broadcast %539 : f32 to vector<16x16xf32>
    %541 = arith.mulf %540, %207 : vector<16x16xf32>
    %542 = arith.addf %537, %541 : vector<16x16xf32>
    %c7_300 = arith.constant 7 : index
    %c0_301 = arith.constant 0 : index
    %543 = vector.load %arg6[%c7_300, %c0_301] : memref<16x9xf32, #tpu.memory_space<vmem>>, vector<1x1xf32>
    %544 = vector.extract %543[0, 0] : f32 from vector<1x1xf32>
    %545 = vector.broadcast %544 : f32 to vector<16x16xf32>
    %546 = arith.mulf %545, %210 : vector<16x16xf32>
    %547 = arith.addf %542, %546 : vector<16x16xf32>
    %c7_302 = arith.constant 7 : index
    %c1_303 = arith.constant 1 : index
    %548 = vector.load %arg6[%c7_302, %c1_303] : memref<16x9xf32, #tpu.memory_space<vmem>>, vector<1x1xf32>
    %549 = vector.extract %548[0, 0] : f32 from vector<1x1xf32>
    %550 = vector.broadcast %549 : f32 to vector<16x16xf32>
    %551 = arith.mulf %550, %211 : vector<16x16xf32>
    %552 = arith.addf %547, %551 : vector<16x16xf32>
    %c7_304 = arith.constant 7 : index
    %c2_305 = arith.constant 2 : index
    %553 = vector.load %arg6[%c7_304, %c2_305] : memref<16x9xf32, #tpu.memory_space<vmem>>, vector<1x1xf32>
    %554 = vector.extract %553[0, 0] : f32 from vector<1x1xf32>
    %555 = vector.broadcast %554 : f32 to vector<16x16xf32>
    %556 = arith.mulf %555, %212 : vector<16x16xf32>
    %557 = arith.addf %552, %556 : vector<16x16xf32>
    %c7_306 = arith.constant 7 : index
    %c3_307 = arith.constant 3 : index
    %558 = vector.load %arg6[%c7_306, %c3_307] : memref<16x9xf32, #tpu.memory_space<vmem>>, vector<1x1xf32>
    %559 = vector.extract %558[0, 0] : f32 from vector<1x1xf32>
    %560 = vector.broadcast %559 : f32 to vector<16x16xf32>
    %561 = arith.mulf %560, %213 : vector<16x16xf32>
    %562 = arith.addf %557, %561 : vector<16x16xf32>
    %c7_308 = arith.constant 7 : index
    %c4_309 = arith.constant 4 : index
    %563 = vector.load %arg6[%c7_308, %c4_309] : memref<16x9xf32, #tpu.memory_space<vmem>>, vector<1x1xf32>
    %564 = vector.extract %563[0, 0] : f32 from vector<1x1xf32>
    %565 = vector.broadcast %564 : f32 to vector<16x16xf32>
    %566 = arith.mulf %565, %214 : vector<16x16xf32>
    %567 = arith.addf %562, %566 : vector<16x16xf32>
    %c7_310 = arith.constant 7 : index
    %c5_311 = arith.constant 5 : index
    %568 = vector.load %arg6[%c7_310, %c5_311] : memref<16x9xf32, #tpu.memory_space<vmem>>, vector<1x1xf32>
    %569 = vector.extract %568[0, 0] : f32 from vector<1x1xf32>
    %570 = vector.broadcast %569 : f32 to vector<16x16xf32>
    %571 = arith.mulf %570, %215 : vector<16x16xf32>
    %572 = arith.addf %567, %571 : vector<16x16xf32>
    %c7_312 = arith.constant 7 : index
    %c6_313 = arith.constant 6 : index
    %573 = vector.load %arg6[%c7_312, %c6_313] : memref<16x9xf32, #tpu.memory_space<vmem>>, vector<1x1xf32>
    %574 = vector.extract %573[0, 0] : f32 from vector<1x1xf32>
    %575 = vector.broadcast %574 : f32 to vector<16x16xf32>
    %576 = arith.mulf %575, %216 : vector<16x16xf32>
    %577 = arith.addf %572, %576 : vector<16x16xf32>
    %c7_314 = arith.constant 7 : index
    %c7_315 = arith.constant 7 : index
    %578 = vector.load %arg6[%c7_314, %c7_315] : memref<16x9xf32, #tpu.memory_space<vmem>>, vector<1x1xf32>
    %579 = vector.extract %578[0, 0] : f32 from vector<1x1xf32>
    %580 = vector.broadcast %579 : f32 to vector<16x16xf32>
    %581 = arith.mulf %580, %217 : vector<16x16xf32>
    %582 = arith.addf %577, %581 : vector<16x16xf32>
    %c7_316 = arith.constant 7 : index
    %c8_317 = arith.constant 8 : index
    %583 = vector.load %arg6[%c7_316, %c8_317] : memref<16x9xf32, #tpu.memory_space<vmem>>, vector<1x1xf32>
    %584 = vector.extract %583[0, 0] : f32 from vector<1x1xf32>
    %585 = vector.broadcast %584 : f32 to vector<16x16xf32>
    %586 = arith.mulf %585, %218 : vector<16x16xf32>
    %587 = arith.addf %582, %586 : vector<16x16xf32>
    %c0_318 = arith.constant 0 : index
    %c1_319 = arith.constant 1 : index
    %c0_320 = arith.constant 0 : index
    %c0_321 = arith.constant 0 : index
    %588 = vector.load %arg8[%c0_318, %c1_319, %c0_320, %c0_321] : memref<1x4x16x16xf32, #tpu.memory_space<vmem>>, vector<1x1x16x16xf32>
    %589 = vector.shape_cast %588 : vector<1x1x16x16xf32> to vector<16x16xf32>
    %590 = vector.shape_cast %587 : vector<16x16xf32> to vector<1x1x16x16xf32>
    tpu.vector_store %arg8[%c0_318, %c1_319, %c0_320, %c0_321], %590 {strides = array<i32>} : memref<1x4x16x16xf32, #tpu.memory_space<vmem>>, vector<1x1x16x16xf32>,
    %c0_322 = arith.constant 0 : index
    %c2_323 = arith.constant 2 : index
    %591 = vector.load %arg7[%c0_322, %c2_323] : memref<1x4xf32, #tpu.memory_space<vmem>>, vector<1x1xf32>
    %592 = vector.extract %591[0, 0] : f32 from vector<1x1xf32>
    %593 = vector.broadcast %592 : f32 to vector<16x16xf32>
    %c8_324 = arith.constant 8 : index
    %c0_325 = arith.constant 0 : index
    %594 = vector.load %arg6[%c8_324, %c0_325] : memref<16x9xf32, #tpu.memory_space<vmem>>, vector<1x1xf32>
    %595 = vector.extract %594[0, 0] : f32 from vector<1x1xf32>
    %596 = vector.broadcast %595 : f32 to vector<16x16xf32>
    %597 = arith.mulf %596, %177 : vector<16x16xf32>
    %598 = arith.addf %593, %597 : vector<16x16xf32>
    %c8_326 = arith.constant 8 : index
    %c1_327 = arith.constant 1 : index
    %599 = vector.load %arg6[%c8_326, %c1_327] : memref<16x9xf32, #tpu.memory_space<vmem>>, vector<1x1xf32>
    %600 = vector.extract %599[0, 0] : f32 from vector<1x1xf32>
    %601 = vector.broadcast %600 : f32 to vector<16x16xf32>
    %602 = arith.mulf %601, %178 : vector<16x16xf32>
    %603 = arith.addf %598, %602 : vector<16x16xf32>
    %c8_328 = arith.constant 8 : index
    %c2_329 = arith.constant 2 : index
    %604 = vector.load %arg6[%c8_328, %c2_329] : memref<16x9xf32, #tpu.memory_space<vmem>>, vector<1x1xf32>
    %605 = vector.extract %604[0, 0] : f32 from vector<1x1xf32>
    %606 = vector.broadcast %605 : f32 to vector<16x16xf32>
    %607 = arith.mulf %606, %179 : vector<16x16xf32>
    %608 = arith.addf %603, %607 : vector<16x16xf32>
    %c8_330 = arith.constant 8 : index
    %c3_331 = arith.constant 3 : index
    %609 = vector.load %arg6[%c8_330, %c3_331] : memref<16x9xf32, #tpu.memory_space<vmem>>, vector<1x1xf32>
    %610 = vector.extract %609[0, 0] : f32 from vector<1x1xf32>
    %611 = vector.broadcast %610 : f32 to vector<16x16xf32>
    %612 = arith.mulf %611, %180 : vector<16x16xf32>
    %613 = arith.addf %608, %612 : vector<16x16xf32>
    %c8_332 = arith.constant 8 : index
    %c4_333 = arith.constant 4 : index
    %614 = vector.load %arg6[%c8_332, %c4_333] : memref<16x9xf32, #tpu.memory_space<vmem>>, vector<1x1xf32>
    %615 = vector.extract %614[0, 0] : f32 from vector<1x1xf32>
    %616 = vector.broadcast %615 : f32 to vector<16x16xf32>
    %617 = arith.mulf %616, %181 : vector<16x16xf32>
    %618 = arith.addf %613, %617 : vector<16x16xf32>
    %c8_334 = arith.constant 8 : index
    %c5_335 = arith.constant 5 : index
    %619 = vector.load %arg6[%c8_334, %c5_335] : memref<16x9xf32, #tpu.memory_space<vmem>>, vector<1x1xf32>
    %620 = vector.extract %619[0, 0] : f32 from vector<1x1xf32>
    %621 = vector.broadcast %620 : f32 to vector<16x16xf32>
    %622 = arith.mulf %621, %182 : vector<16x16xf32>
    %623 = arith.addf %618, %622 : vector<16x16xf32>
    %c8_336 = arith.constant 8 : index
    %c6_337 = arith.constant 6 : index
    %624 = vector.load %arg6[%c8_336, %c6_337] : memref<16x9xf32, #tpu.memory_space<vmem>>, vector<1x1xf32>
    %625 = vector.extract %624[0, 0] : f32 from vector<1x1xf32>
    %626 = vector.broadcast %625 : f32 to vector<16x16xf32>
    %627 = arith.mulf %626, %183 : vector<16x16xf32>
    %628 = arith.addf %623, %627 : vector<16x16xf32>
    %c8_338 = arith.constant 8 : index
    %c7_339 = arith.constant 7 : index
    %629 = vector.load %arg6[%c8_338, %c7_339] : memref<16x9xf32, #tpu.memory_space<vmem>>, vector<1x1xf32>
    %630 = vector.extract %629[0, 0] : f32 from vector<1x1xf32>
    %631 = vector.broadcast %630 : f32 to vector<16x16xf32>
    %632 = arith.mulf %631, %184 : vector<16x16xf32>
    %633 = arith.addf %628, %632 : vector<16x16xf32>
    %c8_340 = arith.constant 8 : index
    %c8_341 = arith.constant 8 : index
    %634 = vector.load %arg6[%c8_340, %c8_341] : memref<16x9xf32, #tpu.memory_space<vmem>>, vector<1x1xf32>
    %635 = vector.extract %634[0, 0] : f32 from vector<1x1xf32>
    %636 = vector.broadcast %635 : f32 to vector<16x16xf32>
    %637 = arith.mulf %636, %185 : vector<16x16xf32>
    %638 = arith.addf %633, %637 : vector<16x16xf32>
    %c9 = arith.constant 9 : index
    %c0_342 = arith.constant 0 : index
    %639 = vector.load %arg6[%c9, %c0_342] : memref<16x9xf32, #tpu.memory_space<vmem>>, vector<1x1xf32>
    %640 = vector.extract %639[0, 0] : f32 from vector<1x1xf32>
    %641 = vector.broadcast %640 : f32 to vector<16x16xf32>
    %642 = arith.mulf %641, %188 : vector<16x16xf32>
    %643 = arith.addf %638, %642 : vector<16x16xf32>
    %c9_343 = arith.constant 9 : index
    %c1_344 = arith.constant 1 : index
    %644 = vector.load %arg6[%c9_343, %c1_344] : memref<16x9xf32, #tpu.memory_space<vmem>>, vector<1x1xf32>
    %645 = vector.extract %644[0, 0] : f32 from vector<1x1xf32>
    %646 = vector.broadcast %645 : f32 to vector<16x16xf32>
    %647 = arith.mulf %646, %189 : vector<16x16xf32>
    %648 = arith.addf %643, %647 : vector<16x16xf32>
    %c9_345 = arith.constant 9 : index
    %c2_346 = arith.constant 2 : index
    %649 = vector.load %arg6[%c9_345, %c2_346] : memref<16x9xf32, #tpu.memory_space<vmem>>, vector<1x1xf32>
    %650 = vector.extract %649[0, 0] : f32 from vector<1x1xf32>
    %651 = vector.broadcast %650 : f32 to vector<16x16xf32>
    %652 = arith.mulf %651, %190 : vector<16x16xf32>
    %653 = arith.addf %648, %652 : vector<16x16xf32>
    %c9_347 = arith.constant 9 : index
    %c3_348 = arith.constant 3 : index
    %654 = vector.load %arg6[%c9_347, %c3_348] : memref<16x9xf32, #tpu.memory_space<vmem>>, vector<1x1xf32>
    %655 = vector.extract %654[0, 0] : f32 from vector<1x1xf32>
    %656 = vector.broadcast %655 : f32 to vector<16x16xf32>
    %657 = arith.mulf %656, %191 : vector<16x16xf32>
    %658 = arith.addf %653, %657 : vector<16x16xf32>
    %c9_349 = arith.constant 9 : index
    %c4_350 = arith.constant 4 : index
    %659 = vector.load %arg6[%c9_349, %c4_350] : memref<16x9xf32, #tpu.memory_space<vmem>>, vector<1x1xf32>
    %660 = vector.extract %659[0, 0] : f32 from vector<1x1xf32>
    %661 = vector.broadcast %660 : f32 to vector<16x16xf32>
    %662 = arith.mulf %661, %192 : vector<16x16xf32>
    %663 = arith.addf %658, %662 : vector<16x16xf32>
    %c9_351 = arith.constant 9 : index
    %c5_352 = arith.constant 5 : index
    %664 = vector.load %arg6[%c9_351, %c5_352] : memref<16x9xf32, #tpu.memory_space<vmem>>, vector<1x1xf32>
    %665 = vector.extract %664[0, 0] : f32 from vector<1x1xf32>
    %666 = vector.broadcast %665 : f32 to vector<16x16xf32>
    %667 = arith.mulf %666, %193 : vector<16x16xf32>
    %668 = arith.addf %663, %667 : vector<16x16xf32>
    %c9_353 = arith.constant 9 : index
    %c6_354 = arith.constant 6 : index
    %669 = vector.load %arg6[%c9_353, %c6_354] : memref<16x9xf32, #tpu.memory_space<vmem>>, vector<1x1xf32>
    %670 = vector.extract %669[0, 0] : f32 from vector<1x1xf32>
    %671 = vector.broadcast %670 : f32 to vector<16x16xf32>
    %672 = arith.mulf %671, %194 : vector<16x16xf32>
    %673 = arith.addf %668, %672 : vector<16x16xf32>
    %c9_355 = arith.constant 9 : index
    %c7_356 = arith.constant 7 : index
    %674 = vector.load %arg6[%c9_355, %c7_356] : memref<16x9xf32, #tpu.memory_space<vmem>>, vector<1x1xf32>
    %675 = vector.extract %674[0, 0] : f32 from vector<1x1xf32>
    %676 = vector.broadcast %675 : f32 to vector<16x16xf32>
    %677 = arith.mulf %676, %195 : vector<16x16xf32>
    %678 = arith.addf %673, %677 : vector<16x16xf32>
    %c9_357 = arith.constant 9 : index
    %c8_358 = arith.constant 8 : index
    %679 = vector.load %arg6[%c9_357, %c8_358] : memref<16x9xf32, #tpu.memory_space<vmem>>, vector<1x1xf32>
    %680 = vector.extract %679[0, 0] : f32 from vector<1x1xf32>
    %681 = vector.broadcast %680 : f32 to vector<16x16xf32>
    %682 = arith.mulf %681, %196 : vector<16x16xf32>
    %683 = arith.addf %678, %682 : vector<16x16xf32>
    %c10 = arith.constant 10 : index
    %c0_359 = arith.constant 0 : index
    %684 = vector.load %arg6[%c10, %c0_359] : memref<16x9xf32, #tpu.memory_space<vmem>>, vector<1x1xf32>
    %685 = vector.extract %684[0, 0] : f32 from vector<1x1xf32>
    %686 = vector.broadcast %685 : f32 to vector<16x16xf32>
    %687 = arith.mulf %686, %199 : vector<16x16xf32>
    %688 = arith.addf %683, %687 : vector<16x16xf32>
    %c10_360 = arith.constant 10 : index
    %c1_361 = arith.constant 1 : index
    %689 = vector.load %arg6[%c10_360, %c1_361] : memref<16x9xf32, #tpu.memory_space<vmem>>, vector<1x1xf32>
    %690 = vector.extract %689[0, 0] : f32 from vector<1x1xf32>
    %691 = vector.broadcast %690 : f32 to vector<16x16xf32>
    %692 = arith.mulf %691, %200 : vector<16x16xf32>
    %693 = arith.addf %688, %692 : vector<16x16xf32>
    %c10_362 = arith.constant 10 : index
    %c2_363 = arith.constant 2 : index
    %694 = vector.load %arg6[%c10_362, %c2_363] : memref<16x9xf32, #tpu.memory_space<vmem>>, vector<1x1xf32>
    %695 = vector.extract %694[0, 0] : f32 from vector<1x1xf32>
    %696 = vector.broadcast %695 : f32 to vector<16x16xf32>
    %697 = arith.mulf %696, %201 : vector<16x16xf32>
    %698 = arith.addf %693, %697 : vector<16x16xf32>
    %c10_364 = arith.constant 10 : index
    %c3_365 = arith.constant 3 : index
    %699 = vector.load %arg6[%c10_364, %c3_365] : memref<16x9xf32, #tpu.memory_space<vmem>>, vector<1x1xf32>
    %700 = vector.extract %699[0, 0] : f32 from vector<1x1xf32>
    %701 = vector.broadcast %700 : f32 to vector<16x16xf32>
    %702 = arith.mulf %701, %202 : vector<16x16xf32>
    %703 = arith.addf %698, %702 : vector<16x16xf32>
    %c10_366 = arith.constant 10 : index
    %c4_367 = arith.constant 4 : index
    %704 = vector.load %arg6[%c10_366, %c4_367] : memref<16x9xf32, #tpu.memory_space<vmem>>, vector<1x1xf32>
    %705 = vector.extract %704[0, 0] : f32 from vector<1x1xf32>
    %706 = vector.broadcast %705 : f32 to vector<16x16xf32>
    %707 = arith.mulf %706, %203 : vector<16x16xf32>
    %708 = arith.addf %703, %707 : vector<16x16xf32>
    %c10_368 = arith.constant 10 : index
    %c5_369 = arith.constant 5 : index
    %709 = vector.load %arg6[%c10_368, %c5_369] : memref<16x9xf32, #tpu.memory_space<vmem>>, vector<1x1xf32>
    %710 = vector.extract %709[0, 0] : f32 from vector<1x1xf32>
    %711 = vector.broadcast %710 : f32 to vector<16x16xf32>
    %712 = arith.mulf %711, %204 : vector<16x16xf32>
    %713 = arith.addf %708, %712 : vector<16x16xf32>
    %c10_370 = arith.constant 10 : index
    %c6_371 = arith.constant 6 : index
    %714 = vector.load %arg6[%c10_370, %c6_371] : memref<16x9xf32, #tpu.memory_space<vmem>>, vector<1x1xf32>
    %715 = vector.extract %714[0, 0] : f32 from vector<1x1xf32>
    %716 = vector.broadcast %715 : f32 to vector<16x16xf32>
    %717 = arith.mulf %716, %205 : vector<16x16xf32>
    %718 = arith.addf %713, %717 : vector<16x16xf32>
    %c10_372 = arith.constant 10 : index
    %c7_373 = arith.constant 7 : index
    %719 = vector.load %arg6[%c10_372, %c7_373] : memref<16x9xf32, #tpu.memory_space<vmem>>, vector<1x1xf32>
    %720 = vector.extract %719[0, 0] : f32 from vector<1x1xf32>
    %721 = vector.broadcast %720 : f32 to vector<16x16xf32>
    %722 = arith.mulf %721, %206 : vector<16x16xf32>
    %723 = arith.addf %718, %722 : vector<16x16xf32>
    %c10_374 = arith.constant 10 : index
    %c8_375 = arith.constant 8 : index
    %724 = vector.load %arg6[%c10_374, %c8_375] : memref<16x9xf32, #tpu.memory_space<vmem>>, vector<1x1xf32>
    %725 = vector.extract %724[0, 0] : f32 from vector<1x1xf32>
    %726 = vector.broadcast %725 : f32 to vector<16x16xf32>
    %727 = arith.mulf %726, %207 : vector<16x16xf32>
    %728 = arith.addf %723, %727 : vector<16x16xf32>
    %c11 = arith.constant 11 : index
    %c0_376 = arith.constant 0 : index
    %729 = vector.load %arg6[%c11, %c0_376] : memref<16x9xf32, #tpu.memory_space<vmem>>, vector<1x1xf32>
    %730 = vector.extract %729[0, 0] : f32 from vector<1x1xf32>
    %731 = vector.broadcast %730 : f32 to vector<16x16xf32>
    %732 = arith.mulf %731, %210 : vector<16x16xf32>
    %733 = arith.addf %728, %732 : vector<16x16xf32>
    %c11_377 = arith.constant 11 : index
    %c1_378 = arith.constant 1 : index
    %734 = vector.load %arg6[%c11_377, %c1_378] : memref<16x9xf32, #tpu.memory_space<vmem>>, vector<1x1xf32>
    %735 = vector.extract %734[0, 0] : f32 from vector<1x1xf32>
    %736 = vector.broadcast %735 : f32 to vector<16x16xf32>
    %737 = arith.mulf %736, %211 : vector<16x16xf32>
    %738 = arith.addf %733, %737 : vector<16x16xf32>
    %c11_379 = arith.constant 11 : index
    %c2_380 = arith.constant 2 : index
    %739 = vector.load %arg6[%c11_379, %c2_380] : memref<16x9xf32, #tpu.memory_space<vmem>>, vector<1x1xf32>
    %740 = vector.extract %739[0, 0] : f32 from vector<1x1xf32>
    %741 = vector.broadcast %740 : f32 to vector<16x16xf32>
    %742 = arith.mulf %741, %212 : vector<16x16xf32>
    %743 = arith.addf %738, %742 : vector<16x16xf32>
    %c11_381 = arith.constant 11 : index
    %c3_382 = arith.constant 3 : index
    %744 = vector.load %arg6[%c11_381, %c3_382] : memref<16x9xf32, #tpu.memory_space<vmem>>, vector<1x1xf32>
    %745 = vector.extract %744[0, 0] : f32 from vector<1x1xf32>
    %746 = vector.broadcast %745 : f32 to vector<16x16xf32>
    %747 = arith.mulf %746, %213 : vector<16x16xf32>
    %748 = arith.addf %743, %747 : vector<16x16xf32>
    %c11_383 = arith.constant 11 : index
    %c4_384 = arith.constant 4 : index
    %749 = vector.load %arg6[%c11_383, %c4_384] : memref<16x9xf32, #tpu.memory_space<vmem>>, vector<1x1xf32>
    %750 = vector.extract %749[0, 0] : f32 from vector<1x1xf32>
    %751 = vector.broadcast %750 : f32 to vector<16x16xf32>
    %752 = arith.mulf %751, %214 : vector<16x16xf32>
    %753 = arith.addf %748, %752 : vector<16x16xf32>
    %c11_385 = arith.constant 11 : index
    %c5_386 = arith.constant 5 : index
    %754 = vector.load %arg6[%c11_385, %c5_386] : memref<16x9xf32, #tpu.memory_space<vmem>>, vector<1x1xf32>
    %755 = vector.extract %754[0, 0] : f32 from vector<1x1xf32>
    %756 = vector.broadcast %755 : f32 to vector<16x16xf32>
    %757 = arith.mulf %756, %215 : vector<16x16xf32>
    %758 = arith.addf %753, %757 : vector<16x16xf32>
    %c11_387 = arith.constant 11 : index
    %c6_388 = arith.constant 6 : index
    %759 = vector.load %arg6[%c11_387, %c6_388] : memref<16x9xf32, #tpu.memory_space<vmem>>, vector<1x1xf32>
    %760 = vector.extract %759[0, 0] : f32 from vector<1x1xf32>
    %761 = vector.broadcast %760 : f32 to vector<16x16xf32>
    %762 = arith.mulf %761, %216 : vector<16x16xf32>
    %763 = arith.addf %758, %762 : vector<16x16xf32>
    %c11_389 = arith.constant 11 : index
    %c7_390 = arith.constant 7 : index
    %764 = vector.load %arg6[%c11_389, %c7_390] : memref<16x9xf32, #tpu.memory_space<vmem>>, vector<1x1xf32>
    %765 = vector.extract %764[0, 0] : f32 from vector<1x1xf32>
    %766 = vector.broadcast %765 : f32 to vector<16x16xf32>
    %767 = arith.mulf %766, %217 : vector<16x16xf32>
    %768 = arith.addf %763, %767 : vector<16x16xf32>
    %c11_391 = arith.constant 11 : index
    %c8_392 = arith.constant 8 : index
    %769 = vector.load %arg6[%c11_391, %c8_392] : memref<16x9xf32, #tpu.memory_space<vmem>>, vector<1x1xf32>
    %770 = vector.extract %769[0, 0] : f32 from vector<1x1xf32>
    %771 = vector.broadcast %770 : f32 to vector<16x16xf32>
    %772 = arith.mulf %771, %218 : vector<16x16xf32>
    %773 = arith.addf %768, %772 : vector<16x16xf32>
    %c0_393 = arith.constant 0 : index
    %c2_394 = arith.constant 2 : index
    %c0_395 = arith.constant 0 : index
    %c0_396 = arith.constant 0 : index
    %774 = vector.load %arg8[%c0_393, %c2_394, %c0_395, %c0_396] : memref<1x4x16x16xf32, #tpu.memory_space<vmem>>, vector<1x1x16x16xf32>
    %775 = vector.shape_cast %774 : vector<1x1x16x16xf32> to vector<16x16xf32>
    %776 = vector.shape_cast %773 : vector<16x16xf32> to vector<1x1x16x16xf32>
    tpu.vector_store %arg8[%c0_393, %c2_394, %c0_395, %c0_396], %776 {strides = array<i32>} : memref<1x4x16x16xf32, #tpu.memory_space<vmem>>, vector<1x1x16x16xf32>,
    %c0_397 = arith.constant 0 : index
    %c3_398 = arith.constant 3 : index
    %777 = vector.load %arg7[%c0_397, %c3_398] : memref<1x4xf32, #tpu.memory_space<vmem>>, vector<1x1xf32>
    %778 = vector.extract %777[0, 0] : f32 from vector<1x1xf32>
    %779 = vector.broadcast %778 : f32 to vector<16x16xf32>
    %c12 = arith.constant 12 : index
    %c0_399 = arith.constant 0 : index
    %780 = vector.load %arg6[%c12, %c0_399] : memref<16x9xf32, #tpu.memory_space<vmem>>, vector<1x1xf32>
    %781 = vector.extract %780[0, 0] : f32 from vector<1x1xf32>
    %782 = vector.broadcast %781 : f32 to vector<16x16xf32>
    %783 = arith.mulf %782, %177 : vector<16x16xf32>
    %784 = arith.addf %779, %783 : vector<16x16xf32>
    %c12_400 = arith.constant 12 : index
    %c1_401 = arith.constant 1 : index
    %785 = vector.load %arg6[%c12_400, %c1_401] : memref<16x9xf32, #tpu.memory_space<vmem>>, vector<1x1xf32>
    %786 = vector.extract %785[0, 0] : f32 from vector<1x1xf32>
    %787 = vector.broadcast %786 : f32 to vector<16x16xf32>
    %788 = arith.mulf %787, %178 : vector<16x16xf32>
    %789 = arith.addf %784, %788 : vector<16x16xf32>
    %c12_402 = arith.constant 12 : index
    %c2_403 = arith.constant 2 : index
    %790 = vector.load %arg6[%c12_402, %c2_403] : memref<16x9xf32, #tpu.memory_space<vmem>>, vector<1x1xf32>
    %791 = vector.extract %790[0, 0] : f32 from vector<1x1xf32>
    %792 = vector.broadcast %791 : f32 to vector<16x16xf32>
    %793 = arith.mulf %792, %179 : vector<16x16xf32>
    %794 = arith.addf %789, %793 : vector<16x16xf32>
    %c12_404 = arith.constant 12 : index
    %c3_405 = arith.constant 3 : index
    %795 = vector.load %arg6[%c12_404, %c3_405] : memref<16x9xf32, #tpu.memory_space<vmem>>, vector<1x1xf32>
    %796 = vector.extract %795[0, 0] : f32 from vector<1x1xf32>
    %797 = vector.broadcast %796 : f32 to vector<16x16xf32>
    %798 = arith.mulf %797, %180 : vector<16x16xf32>
    %799 = arith.addf %794, %798 : vector<16x16xf32>
    %c12_406 = arith.constant 12 : index
    %c4_407 = arith.constant 4 : index
    %800 = vector.load %arg6[%c12_406, %c4_407] : memref<16x9xf32, #tpu.memory_space<vmem>>, vector<1x1xf32>
    %801 = vector.extract %800[0, 0] : f32 from vector<1x1xf32>
    %802 = vector.broadcast %801 : f32 to vector<16x16xf32>
    %803 = arith.mulf %802, %181 : vector<16x16xf32>
    %804 = arith.addf %799, %803 : vector<16x16xf32>
    %c12_408 = arith.constant 12 : index
    %c5_409 = arith.constant 5 : index
    %805 = vector.load %arg6[%c12_408, %c5_409] : memref<16x9xf32, #tpu.memory_space<vmem>>, vector<1x1xf32>
    %806 = vector.extract %805[0, 0] : f32 from vector<1x1xf32>
    %807 = vector.broadcast %806 : f32 to vector<16x16xf32>
    %808 = arith.mulf %807, %182 : vector<16x16xf32>
    %809 = arith.addf %804, %808 : vector<16x16xf32>
    %c12_410 = arith.constant 12 : index
    %c6_411 = arith.constant 6 : index
    %810 = vector.load %arg6[%c12_410, %c6_411] : memref<16x9xf32, #tpu.memory_space<vmem>>, vector<1x1xf32>
    %811 = vector.extract %810[0, 0] : f32 from vector<1x1xf32>
    %812 = vector.broadcast %811 : f32 to vector<16x16xf32>
    %813 = arith.mulf %812, %183 : vector<16x16xf32>
    %814 = arith.addf %809, %813 : vector<16x16xf32>
    %c12_412 = arith.constant 12 : index
    %c7_413 = arith.constant 7 : index
    %815 = vector.load %arg6[%c12_412, %c7_413] : memref<16x9xf32, #tpu.memory_space<vmem>>, vector<1x1xf32>
    %816 = vector.extract %815[0, 0] : f32 from vector<1x1xf32>
    %817 = vector.broadcast %816 : f32 to vector<16x16xf32>
    %818 = arith.mulf %817, %184 : vector<16x16xf32>
    %819 = arith.addf %814, %818 : vector<16x16xf32>
    %c12_414 = arith.constant 12 : index
    %c8_415 = arith.constant 8 : index
    %820 = vector.load %arg6[%c12_414, %c8_415] : memref<16x9xf32, #tpu.memory_space<vmem>>, vector<1x1xf32>
    %821 = vector.extract %820[0, 0] : f32 from vector<1x1xf32>
    %822 = vector.broadcast %821 : f32 to vector<16x16xf32>
    %823 = arith.mulf %822, %185 : vector<16x16xf32>
    %824 = arith.addf %819, %823 : vector<16x16xf32>
    %c13 = arith.constant 13 : index
    %c0_416 = arith.constant 0 : index
    %825 = vector.load %arg6[%c13, %c0_416] : memref<16x9xf32, #tpu.memory_space<vmem>>, vector<1x1xf32>
    %826 = vector.extract %825[0, 0] : f32 from vector<1x1xf32>
    %827 = vector.broadcast %826 : f32 to vector<16x16xf32>
    %828 = arith.mulf %827, %188 : vector<16x16xf32>
    %829 = arith.addf %824, %828 : vector<16x16xf32>
    %c13_417 = arith.constant 13 : index
    %c1_418 = arith.constant 1 : index
    %830 = vector.load %arg6[%c13_417, %c1_418] : memref<16x9xf32, #tpu.memory_space<vmem>>, vector<1x1xf32>
    %831 = vector.extract %830[0, 0] : f32 from vector<1x1xf32>
    %832 = vector.broadcast %831 : f32 to vector<16x16xf32>
    %833 = arith.mulf %832, %189 : vector<16x16xf32>
    %834 = arith.addf %829, %833 : vector<16x16xf32>
    %c13_419 = arith.constant 13 : index
    %c2_420 = arith.constant 2 : index
    %835 = vector.load %arg6[%c13_419, %c2_420] : memref<16x9xf32, #tpu.memory_space<vmem>>, vector<1x1xf32>
    %836 = vector.extract %835[0, 0] : f32 from vector<1x1xf32>
    %837 = vector.broadcast %836 : f32 to vector<16x16xf32>
    %838 = arith.mulf %837, %190 : vector<16x16xf32>
    %839 = arith.addf %834, %838 : vector<16x16xf32>
    %c13_421 = arith.constant 13 : index
    %c3_422 = arith.constant 3 : index
    %840 = vector.load %arg6[%c13_421, %c3_422] : memref<16x9xf32, #tpu.memory_space<vmem>>, vector<1x1xf32>
    %841 = vector.extract %840[0, 0] : f32 from vector<1x1xf32>
    %842 = vector.broadcast %841 : f32 to vector<16x16xf32>
    %843 = arith.mulf %842, %191 : vector<16x16xf32>
    %844 = arith.addf %839, %843 : vector<16x16xf32>
    %c13_423 = arith.constant 13 : index
    %c4_424 = arith.constant 4 : index
    %845 = vector.load %arg6[%c13_423, %c4_424] : memref<16x9xf32, #tpu.memory_space<vmem>>, vector<1x1xf32>
    %846 = vector.extract %845[0, 0] : f32 from vector<1x1xf32>
    %847 = vector.broadcast %846 : f32 to vector<16x16xf32>
    %848 = arith.mulf %847, %192 : vector<16x16xf32>
    %849 = arith.addf %844, %848 : vector<16x16xf32>
    %c13_425 = arith.constant 13 : index
    %c5_426 = arith.constant 5 : index
    %850 = vector.load %arg6[%c13_425, %c5_426] : memref<16x9xf32, #tpu.memory_space<vmem>>, vector<1x1xf32>
    %851 = vector.extract %850[0, 0] : f32 from vector<1x1xf32>
    %852 = vector.broadcast %851 : f32 to vector<16x16xf32>
    %853 = arith.mulf %852, %193 : vector<16x16xf32>
    %854 = arith.addf %849, %853 : vector<16x16xf32>
    %c13_427 = arith.constant 13 : index
    %c6_428 = arith.constant 6 : index
    %855 = vector.load %arg6[%c13_427, %c6_428] : memref<16x9xf32, #tpu.memory_space<vmem>>, vector<1x1xf32>
    %856 = vector.extract %855[0, 0] : f32 from vector<1x1xf32>
    %857 = vector.broadcast %856 : f32 to vector<16x16xf32>
    %858 = arith.mulf %857, %194 : vector<16x16xf32>
    %859 = arith.addf %854, %858 : vector<16x16xf32>
    %c13_429 = arith.constant 13 : index
    %c7_430 = arith.constant 7 : index
    %860 = vector.load %arg6[%c13_429, %c7_430] : memref<16x9xf32, #tpu.memory_space<vmem>>, vector<1x1xf32>
    %861 = vector.extract %860[0, 0] : f32 from vector<1x1xf32>
    %862 = vector.broadcast %861 : f32 to vector<16x16xf32>
    %863 = arith.mulf %862, %195 : vector<16x16xf32>
    %864 = arith.addf %859, %863 : vector<16x16xf32>
    %c13_431 = arith.constant 13 : index
    %c8_432 = arith.constant 8 : index
    %865 = vector.load %arg6[%c13_431, %c8_432] : memref<16x9xf32, #tpu.memory_space<vmem>>, vector<1x1xf32>
    %866 = vector.extract %865[0, 0] : f32 from vector<1x1xf32>
    %867 = vector.broadcast %866 : f32 to vector<16x16xf32>
    %868 = arith.mulf %867, %196 : vector<16x16xf32>
    %869 = arith.addf %864, %868 : vector<16x16xf32>
    %c14 = arith.constant 14 : index
    %c0_433 = arith.constant 0 : index
    %870 = vector.load %arg6[%c14, %c0_433] : memref<16x9xf32, #tpu.memory_space<vmem>>, vector<1x1xf32>
    %871 = vector.extract %870[0, 0] : f32 from vector<1x1xf32>
    %872 = vector.broadcast %871 : f32 to vector<16x16xf32>
    %873 = arith.mulf %872, %199 : vector<16x16xf32>
    %874 = arith.addf %869, %873 : vector<16x16xf32>
    %c14_434 = arith.constant 14 : index
    %c1_435 = arith.constant 1 : index
    %875 = vector.load %arg6[%c14_434, %c1_435] : memref<16x9xf32, #tpu.memory_space<vmem>>, vector<1x1xf32>
    %876 = vector.extract %875[0, 0] : f32 from vector<1x1xf32>
    %877 = vector.broadcast %876 : f32 to vector<16x16xf32>
    %878 = arith.mulf %877, %200 : vector<16x16xf32>
    %879 = arith.addf %874, %878 : vector<16x16xf32>
    %c14_436 = arith.constant 14 : index
    %c2_437 = arith.constant 2 : index
    %880 = vector.load %arg6[%c14_436, %c2_437] : memref<16x9xf32, #tpu.memory_space<vmem>>, vector<1x1xf32>
    %881 = vector.extract %880[0, 0] : f32 from vector<1x1xf32>
    %882 = vector.broadcast %881 : f32 to vector<16x16xf32>
    %883 = arith.mulf %882, %201 : vector<16x16xf32>
    %884 = arith.addf %879, %883 : vector<16x16xf32>
    %c14_438 = arith.constant 14 : index
    %c3_439 = arith.constant 3 : index
    %885 = vector.load %arg6[%c14_438, %c3_439] : memref<16x9xf32, #tpu.memory_space<vmem>>, vector<1x1xf32>
    %886 = vector.extract %885[0, 0] : f32 from vector<1x1xf32>
    %887 = vector.broadcast %886 : f32 to vector<16x16xf32>
    %888 = arith.mulf %887, %202 : vector<16x16xf32>
    %889 = arith.addf %884, %888 : vector<16x16xf32>
    %c14_440 = arith.constant 14 : index
    %c4_441 = arith.constant 4 : index
    %890 = vector.load %arg6[%c14_440, %c4_441] : memref<16x9xf32, #tpu.memory_space<vmem>>, vector<1x1xf32>
    %891 = vector.extract %890[0, 0] : f32 from vector<1x1xf32>
    %892 = vector.broadcast %891 : f32 to vector<16x16xf32>
    %893 = arith.mulf %892, %203 : vector<16x16xf32>
    %894 = arith.addf %889, %893 : vector<16x16xf32>
    %c14_442 = arith.constant 14 : index
    %c5_443 = arith.constant 5 : index
    %895 = vector.load %arg6[%c14_442, %c5_443] : memref<16x9xf32, #tpu.memory_space<vmem>>, vector<1x1xf32>
    %896 = vector.extract %895[0, 0] : f32 from vector<1x1xf32>
    %897 = vector.broadcast %896 : f32 to vector<16x16xf32>
    %898 = arith.mulf %897, %204 : vector<16x16xf32>
    %899 = arith.addf %894, %898 : vector<16x16xf32>
    %c14_444 = arith.constant 14 : index
    %c6_445 = arith.constant 6 : index
    %900 = vector.load %arg6[%c14_444, %c6_445] : memref<16x9xf32, #tpu.memory_space<vmem>>, vector<1x1xf32>
    %901 = vector.extract %900[0, 0] : f32 from vector<1x1xf32>
    %902 = vector.broadcast %901 : f32 to vector<16x16xf32>
    %903 = arith.mulf %902, %205 : vector<16x16xf32>
    %904 = arith.addf %899, %903 : vector<16x16xf32>
    %c14_446 = arith.constant 14 : index
    %c7_447 = arith.constant 7 : index
    %905 = vector.load %arg6[%c14_446, %c7_447] : memref<16x9xf32, #tpu.memory_space<vmem>>, vector<1x1xf32>
    %906 = vector.extract %905[0, 0] : f32 from vector<1x1xf32>
    %907 = vector.broadcast %906 : f32 to vector<16x16xf32>
    %908 = arith.mulf %907, %206 : vector<16x16xf32>
    %909 = arith.addf %904, %908 : vector<16x16xf32>
    %c14_448 = arith.constant 14 : index
    %c8_449 = arith.constant 8 : index
    %910 = vector.load %arg6[%c14_448, %c8_449] : memref<16x9xf32, #tpu.memory_space<vmem>>, vector<1x1xf32>
    %911 = vector.extract %910[0, 0] : f32 from vector<1x1xf32>
    %912 = vector.broadcast %911 : f32 to vector<16x16xf32>
    %913 = arith.mulf %912, %207 : vector<16x16xf32>
    %914 = arith.addf %909, %913 : vector<16x16xf32>
    %c15 = arith.constant 15 : index
    %c0_450 = arith.constant 0 : index
    %915 = vector.load %arg6[%c15, %c0_450] : memref<16x9xf32, #tpu.memory_space<vmem>>, vector<1x1xf32>
    %916 = vector.extract %915[0, 0] : f32 from vector<1x1xf32>
    %917 = vector.broadcast %916 : f32 to vector<16x16xf32>
    %918 = arith.mulf %917, %210 : vector<16x16xf32>
    %919 = arith.addf %914, %918 : vector<16x16xf32>
    %c15_451 = arith.constant 15 : index
    %c1_452 = arith.constant 1 : index
    %920 = vector.load %arg6[%c15_451, %c1_452] : memref<16x9xf32, #tpu.memory_space<vmem>>, vector<1x1xf32>
    %921 = vector.extract %920[0, 0] : f32 from vector<1x1xf32>
    %922 = vector.broadcast %921 : f32 to vector<16x16xf32>
    %923 = arith.mulf %922, %211 : vector<16x16xf32>
    %924 = arith.addf %919, %923 : vector<16x16xf32>
    %c15_453 = arith.constant 15 : index
    %c2_454 = arith.constant 2 : index
    %925 = vector.load %arg6[%c15_453, %c2_454] : memref<16x9xf32, #tpu.memory_space<vmem>>, vector<1x1xf32>
    %926 = vector.extract %925[0, 0] : f32 from vector<1x1xf32>
    %927 = vector.broadcast %926 : f32 to vector<16x16xf32>
    %928 = arith.mulf %927, %212 : vector<16x16xf32>
    %929 = arith.addf %924, %928 : vector<16x16xf32>
    %c15_455 = arith.constant 15 : index
    %c3_456 = arith.constant 3 : index
    %930 = vector.load %arg6[%c15_455, %c3_456] : memref<16x9xf32, #tpu.memory_space<vmem>>, vector<1x1xf32>
    %931 = vector.extract %930[0, 0] : f32 from vector<1x1xf32>
    %932 = vector.broadcast %931 : f32 to vector<16x16xf32>
    %933 = arith.mulf %932, %213 : vector<16x16xf32>
    %934 = arith.addf %929, %933 : vector<16x16xf32>
    %c15_457 = arith.constant 15 : index
    %c4_458 = arith.constant 4 : index
    %935 = vector.load %arg6[%c15_457, %c4_458] : memref<16x9xf32, #tpu.memory_space<vmem>>, vector<1x1xf32>
    %936 = vector.extract %935[0, 0] : f32 from vector<1x1xf32>
    %937 = vector.broadcast %936 : f32 to vector<16x16xf32>
    %938 = arith.mulf %937, %214 : vector<16x16xf32>
    %939 = arith.addf %934, %938 : vector<16x16xf32>
    %c15_459 = arith.constant 15 : index
    %c5_460 = arith.constant 5 : index
    %940 = vector.load %arg6[%c15_459, %c5_460] : memref<16x9xf32, #tpu.memory_space<vmem>>, vector<1x1xf32>
    %941 = vector.extract %940[0, 0] : f32 from vector<1x1xf32>
    %942 = vector.broadcast %941 : f32 to vector<16x16xf32>
    %943 = arith.mulf %942, %215 : vector<16x16xf32>
    %944 = arith.addf %939, %943 : vector<16x16xf32>
    %c15_461 = arith.constant 15 : index
    %c6_462 = arith.constant 6 : index
    %945 = vector.load %arg6[%c15_461, %c6_462] : memref<16x9xf32, #tpu.memory_space<vmem>>, vector<1x1xf32>
    %946 = vector.extract %945[0, 0] : f32 from vector<1x1xf32>
    %947 = vector.broadcast %946 : f32 to vector<16x16xf32>
    %948 = arith.mulf %947, %216 : vector<16x16xf32>
    %949 = arith.addf %944, %948 : vector<16x16xf32>
    %c15_463 = arith.constant 15 : index
    %c7_464 = arith.constant 7 : index
    %950 = vector.load %arg6[%c15_463, %c7_464] : memref<16x9xf32, #tpu.memory_space<vmem>>, vector<1x1xf32>
    %951 = vector.extract %950[0, 0] : f32 from vector<1x1xf32>
    %952 = vector.broadcast %951 : f32 to vector<16x16xf32>
    %953 = arith.mulf %952, %217 : vector<16x16xf32>
    %954 = arith.addf %949, %953 : vector<16x16xf32>
    %c15_465 = arith.constant 15 : index
    %c8_466 = arith.constant 8 : index
    %955 = vector.load %arg6[%c15_465, %c8_466] : memref<16x9xf32, #tpu.memory_space<vmem>>, vector<1x1xf32>
    %956 = vector.extract %955[0, 0] : f32 from vector<1x1xf32>
    %957 = vector.broadcast %956 : f32 to vector<16x16xf32>
    %958 = arith.mulf %957, %218 : vector<16x16xf32>
    %959 = arith.addf %954, %958 : vector<16x16xf32>
    %c0_467 = arith.constant 0 : index
    %c3_468 = arith.constant 3 : index
    %c0_469 = arith.constant 0 : index
    %c0_470 = arith.constant 0 : index
    %960 = vector.load %arg8[%c0_467, %c3_468, %c0_469, %c0_470] : memref<1x4x16x16xf32, #tpu.memory_space<vmem>>, vector<1x1x16x16xf32>
    %961 = vector.shape_cast %960 : vector<1x1x16x16xf32> to vector<16x16xf32>
    %962 = vector.shape_cast %959 : vector<16x16xf32> to vector<1x1x16x16xf32>
    tpu.vector_store %arg8[%c0_467, %c3_468, %c0_469, %c0_470], %962 {strides = array<i32>} : memref<1x4x16x16xf32, #tpu.memory_space<vmem>>, vector<1x1x16x16xf32>,
    return
  }
  func.func @transform_0(%arg0: i32) -> (i32, i32, i32) {
    %c0_i32 = arith.constant 0 : i32
    %c0_i32_0 = arith.constant 0 : i32
    %c0_i32_1 = arith.constant 0 : i32
    return %arg0, %c0_i32, %c0_i32_0 : i32, i32, i32
  }
  func.func @transform_1(%arg0: i32) -> (i32, i32) {
    %c0_i32 = arith.constant 0 : i32
    %c0_i32_0 = arith.constant 0 : i32
    %c0_i32_1 = arith.constant 0 : i32
    return %c0_i32, %c0_i32_0 : i32, i32
  }
  func.func @transform_2(%arg0: i32) -> (i32, i32) {
    %c0_i32 = arith.constant 0 : i32
    %c0_i32_0 = arith.constant 0 : i32
    %c0_i32_1 = arith.constant 0 : i32
    return %c0_i32, %c0_i32_0 : i32, i32
  }
  func.func @transform_3(%arg0: i32) -> (i32, i32) {
    %c0_i32 = arith.constant 0 : i32
    %c0_i32_0 = arith.constant 0 : i32
    %c0_i32_1 = arith.constant 0 : i32
    return %c0_i32, %c0_i32_0 : i32, i32
  }
  func.func @transform_4(%arg0: i32) -> (i32, i32) {
    %c0_i32 = arith.constant 0 : i32
    %c0_i32_0 = arith.constant 0 : i32
    %c0_i32_1 = arith.constant 0 : i32
    return %c0_i32, %c0_i32_0 : i32, i32
  }
  func.func @transform_5(%arg0: i32) -> (i32, i32) {
    %c0_i32 = arith.constant 0 : i32
    %c0_i32_0 = arith.constant 0 : i32
    %c0_i32_1 = arith.constant 0 : i32
    return %c0_i32, %c0_i32_0 : i32, i32
  }
  func.func @transform_6(%arg0: i32) -> (i32, i32) {
    %c0_i32 = arith.constant 0 : i32
    %c0_i32_0 = arith.constant 0 : i32
    %c0_i32_1 = arith.constant 0 : i32
    return %c0_i32, %c0_i32_0 : i32, i32
  }
  func.func @transform_7(%arg0: i32) -> (i32, i32, i32, i32) {
    %c0_i32 = arith.constant 0 : i32
    %c0_i32_0 = arith.constant 0 : i32
    %c0_i32_1 = arith.constant 0 : i32
    %c0_i32_2 = arith.constant 0 : i32
    return %arg0, %c0_i32, %c0_i32_0, %c0_i32_1 : i32, i32, i32, i32
  }
}

</mosaic_0001>

<bundles_post_ra>
// kernel: softcomp_forward.1
= control target key start
LH: loop header
LB: loop body
LE: loop exit
PB: predicated region body
PF: predicated region fallthrough
CT: control target
= control target key end

     0   :  { %s5144_s24 = smov 0   ;;  %s8720_s0 = inlined_call_operand.vmem [shape: f32[2,64,32], index: 0, kind: input, shape index: {}]   ;;  %s8721_s1 = inlined_call_operand.vmem [shape: f32[32,64], index: 1, kind: input, shape index: {}]   ;;  %s8722_s2 = inlined_call_operand.vmem [shape: f32[1,64], index: 2, kind: input, shape index: {}]   ;;  %s8723_s3 = inlined_call_operand.vmem [shape: f32[15,8], index: 3, kind: input, shape index: {}]   ;;  %s8724_s4 = inlined_call_operand.vmem [shape: f32[72,72], index: 4, kind: input, shape index: {}]   ;;  %s8725_s5 = inlined_call_operand.vmem [shape: f32[16,9], index: 5, kind: input, shape index: {}]   ;;  %s8726_s6 = inlined_call_operand.vmem [shape: f32[1,4], index: 6, kind: input, shape index: {}]   ;;  %s8727_s7 = inlined_call_operand.vmem [shape: f32[2,4,16,16], index: 7, kind: output, shape index: {}]  }
   0x1   :  { %8913 = sst [smem:[#allocation183_spill]] %s8720_s0 }
   0x2   :  { %8914 = sst [smem:[#allocation184_spill]] %s8721_s1 }
   0x3   :  { %8915 = sst [smem:[#allocation185_spill]] %s8722_s2 }
   0x4   :  { %8916 = sst [smem:[#allocation186_spill]] %s8723_s3 }
   0x5   :  { %8917 = sst [smem:[#allocation187_spill]] %s8724_s4 }
   0x6   :  { %8918 = sst [smem:[#allocation188_spill]] %s8725_s5 }
   0x7   :  { %8919 = sst [smem:[#allocation189_spill]] %s8726_s6 }
   0x8   :  { %8920 = sst [smem:[#allocation190_spill]] %s8727_s7 }
   0x9 LB: > { %8921 = sst [smem:[#allocation4_spill]] %s5077_s24  ;;  %s4549_s25 = sadd.s32 4294967295, %s5077_s24   ;;  %s5077_s24 = sphi %s5144_s24, %s17_s24  }
   0xa   : > { %p4553_p0 = scmp.ge.s32.totalorder %s5077_s24, 1  ;;  %p237_p1 = scmp.lt.s32.totalorder %s5077_s24, 3 }
   0xc   : > { %p238_p2 = pnand %p4553_p0, %p237_p1 }
   0xe   : > { %241 = sbr.rel (%p238_p2) target bundleno = 1592 (0x638), region = 48 }
  0x13   : > { %s8922_s1 = sld [smem:[#allocation184_spill]]  ;;  %p269_p3 = scmp.lt.s32.totalorder %s4549_s25, 1  ;;  %vm298_vm0 = vcmask 261120   ;;  %vm435_vm1 = vcmask 64512   ;;  %vm428_vm2 = vcmask 588800   ;;  %v5085_v14 = vmov 0.0  }
  0x14   : > { %s8924_s0 = sld [smem:[#allocation183_spill]]  ;;  %s8729_s19 = smov 127   ;;  %430 = vst.msk [vmem:[#allocation2 + $0x8] sm:$0xff] %vm428_vm2, %v5085_v14  ;;  %429 = vst.msk [vmem:[#allocation2] sm:$0xff] %vm428_vm2, %v5085_v14  ;;  %vm431_vm3 = vcmask 582656   ;;  %vm523_vm4 = vcmask 129024  }
  0x15   : > { %s9581_s25 = smov (!%p269_p3, %s4549_s25), 1  ;;  %s8925_s3 = sld [smem:[#allocation186_spill]]  ;;  %432 = vst.msk [vmem:[#allocation2 + $0x10] sm:$0x3] %vm431_vm3, %v5085_v14  ;;  %vm521_vm5 = vcmask 130048   ;;  %vm652_vm6 = vcmask 194624  }
  0x16   : > { %8923 = sst [smem:[#allocation5_spill]] %s9581_s25  ;;  %s8728_s11 = sshll.u32 %s9581_s25, 6  ;;  %vm650_vm7 = vcmask 195648   ;;  %vm779_vm8 = vcmask 260224   ;;  %vm777_vm9 = vcmask 261248   ;;  %vm900_vm10 = vcmask 325824  }
  0x17   : > { %s8926_s5 = sld [smem:[#allocation188_spill]]  ;;  %s8731_s20 = smov 126   ;;  %vm898_vm11 = vcmask 326848   ;;  %vm1025_vm12 = vcmask 392448   ;;  %vm1027_vm13 = vcmask 391424   ;;  %vm5100_vm14 = vmmov 0  }
  0x18   : > { %s5081_s21 = smov 125   ;;  %s5082_s22 = smov 124   ;;  %vm1146_vm15 = vcmask 458048   ;;  %vm1275_vm3 = vcmask 522624  }
  0x19   : > { %v290_v0 = vld [vmem:[%s8922_s1 + $0x18] sm:$0xff]  ;;  %v289_v1 = vld [vmem:[%s8922_s1 + $0x10] sm:$0xff]  ;;  %v288_v2 = vld [vmem:[%s8922_s1 + $0x8] sm:$0xff]  ;;  %s5083_s23 = smov 123   ;;  %s5084_s26 = smov 122  }
  0x1a   : > { %4644 = vmatprep.subr.mxu0 %v290_v0  ;;  %v287_v3 = vld [vmem:[%s8922_s1] sm:$0xff]  ;;  %s273_s14 = scalar_lea.vmem %s8924_s0, %s8728_s11  ;;  %s5086_s27 = smov 121  }
  0x1b   : > { %4645 = vmatpush3.msra.mxu0 %v290_v0  ;;  %v279_v4 = vld [vmem:[%s273_s14] sm:$0xff]  ;;  %v280_v5 = vld [vmem:[%s273_s14 + $0x8] sm:$0xff]  ;;  %v281_v6 = vld [vmem:[%s273_s14 + $0x10] sm:$0xff]  ;;  %s5087_s30 = smov 120   ;;  %s8927_s6 = sld [smem:[#allocation189_spill]] }
  0x1c   : > { %4646 = vmatprep.subr.mxu0 %v289_v1  ;;  %4652 = vmatprep.mubr.msk.f32.mxu0 %vm298_vm0, %v279_v4  ;;  %v282_v7 = vld [vmem:[%s273_s14 + $0x18] sm:$0xff]  ;;  %v283_v8 = vld [vmem:[%s273_s14 + $0x20] sm:$0xff]  ;;  %v284_v9 = vld [vmem:[%s273_s14 + $0x28] sm:$0xff]  ;;  %s8928_s2 = sld [smem:[#allocation185_spill]]  ;;  %s5088_s13 = smov 96  }
  0x1d   : > { %4647 = vmatpush3.msra.mxu0 %v289_v1  ;;  %v5181_v10 = vld [vmem:[%s8925_s3] sm:$0xff]  ;;  %v285_v11 = vld [vmem:[%s273_s14 + $0x30] sm:$0xff]  ;;  %v286_v12 = vld [vmem:[%s273_s14 + $0x38] sm:$0xff]  ;;  %s5089_s14 = smov 112   ;;  %s5090_s15 = smov 80  }
  0x1e   : > { %4648 = vmatprep.subr.mxu0 %v288_v2  ;;  %4666 = vmatprep.mubr.msk.f32.mxu1 %vm435_vm1, %v5181_v10  ;;  %v5190_v13 = vld [vmem:[%s8926_s5] sm:$0x1]  ;;  %v5214_v15 = vld [vmem:[%s8926_s5 + $0x1] sm:$0x1]  ;;  %v5235_v16 = vld [vmem:[%s8926_s5 + $0x2] sm:$0x1] }
  0x1f   : > { %4649 = vmatpush3.msra.mxu0 %v288_v2  ;;  %1620 = vrot.lane.b32.xlu1 %v5190_v13, %s8729_s19  ;;  %v5256_v17 = vld [vmem:[%s8926_s5 + $0x3] sm:$0x1]  ;;  %v5283_v19 = vld [vmem:[%s8926_s5 + $0x4] sm:$0x1]  ;;  %v5304_v20 = vld [vmem:[%s8926_s5 + $0x5] sm:$0x1] }
  0x20   : > { %4650 = vmatprep.subr.mxu0 %v287_v3  ;;  %1641 = vrot.lane.b32.xlu0 %v5190_v13, %s8731_s20  ;;  %v434_v25 = vld [vmem:[%s8925_s3 + $0x8] sm:$0x7f]  ;;  %s5091_s18 = smov 8   ;;  %s5092_s28 = smov 104  }
  0x21   : > { %4651 = vmatpush3.msra.mxu0 %v287_v3  ;;  %v2328_v18 = vld [vmem:[%s8927_s6] sm:$0x1]  ;;  %s5093_s29 = smov 88   ;;  %s5094_s10 = smov 16  }
  0x22   : > { %4653 = vmatmul.mubr.msk.f32.vlgmr.msra.gmra.mxu0 %vm298_vm0, %v280_v5  ;;  %4704 = vmatprep.subr.mxu0 %v5085_v14  ;;  %v4558_v22 = vld [vmem:[%s8928_s2] ss:$0 sm:$0xff]  ;;  %s5095_s9 = smov 24   ;;  %s5097_s12 = smov 40  }
  0x23   : > { %4655 = vmatprep.mubr.msk.f32.mxu0 %vm298_vm0, %v281_v6  ;;  %1662 = vrot.lane.b32.xlu1 %v5190_v13, %s5081_s21  ;;  %v1609_v42 = vld [vmem:[%s8927_s6] sm:$0x1]  ;;  %s8929_s4 = sld [smem:[#allocation187_spill]] }
  0x24   : > { %1679 = vrot.lane.b32.xlu0 %v5190_v13, %s5082_s22  ;;  %4731 = vpush %v1609_v42 }
  0x25   : > { %4733 = vpush %v5190_v13 }
  0x26   : > { %4656 = vmatmul.mubr.msk.f32.gmra.mxu0 %vm298_vm0, %v282_v7 }
  0x27   : > { %4658 = vmatprep.mubr.msk.f32.mxu0 %vm298_vm0, %v283_v8  ;;  %1703 = vrot.lane.b32.xlu1 %v5190_v13, %s5083_s23 }
  0x28   : > { %1727 = vrot.lane.b32.xlu0 %v5190_v13, %s5084_s26 }
  0x2a   : > { %4659 = vmatmul.mubr.msk.f32.gmra.mxu0 %vm298_vm0, %v284_v9 }
  0x2b   : > { %4661 = vmatprep.mubr.msk.f32.mxu0 %vm298_vm0, %v285_v11  ;;  %1744 = vrot.lane.b32.xlu1 %v5190_v13, %s5086_s27 }
  0x2c   : > { %1768 = vrot.lane.b32.xlu0 %v5190_v13, %s5087_s30 }
  0x2e   : > { %4662 = vmatmul.mubr.msk.f32.gmra.mxu0 %vm298_vm0, %v286_v12  ;;  %vm1148_vm0 = vcmask 457024  }
  0x2f   : > { %1800 = vrot.lane.b32.xlu1 %v5214_v15, %s8729_s19  ;;  %4722 = vmatprep.mubr.msk.f32.mxu0 %vm5100_vm14, %v5085_v14 }
  0x30   : > { %1820 = vrot.lane.b32.xlu0 %v5214_v15, %s8731_s20 }
  0x33   : > { %1840 = vrot.lane.b32.xlu1 %v5214_v15, %s5081_s21 }
  0x34   : > { %1857 = vrot.lane.b32.xlu0 %v5214_v15, %s5082_s22 }
  0x37   : > { %1881 = vrot.lane.b32.xlu1 %v5214_v15, %s5083_s23 }
  0x38   : > { %1905 = vrot.lane.b32.xlu0 %v5214_v15, %s5084_s26 }
  0x3b   : > { %1922 = vrot.lane.b32.xlu1 %v5214_v15, %s5086_s27 }
  0x3c   : > { %1946 = vrot.lane.b32.xlu0 %v5214_v15, %s5087_s30 }
  0x3f   : > { %1978 = vrot.lane.b32.xlu1 %v5235_v16, %s8729_s19 }
  0x40   : > { %1998 = vrot.lane.b32.xlu0 %v5235_v16, %s8731_s20 }
  0x43   : > { %2018 = vrot.lane.b32.xlu1 %v5235_v16, %s5081_s21 }
  0x44   : > { %2035 = vrot.lane.b32.xlu0 %v5235_v16, %s5082_s22 }
  0x47   : > { %2059 = vrot.lane.b32.xlu1 %v5235_v16, %s5083_s23 }
  0x48   : > { %2083 = vrot.lane.b32.xlu0 %v5235_v16, %s5084_s26 }
  0x4b   : > { %2100 = vrot.lane.b32.xlu1 %v5235_v16, %s5086_s27 }
  0x4c   : > { %2124 = vrot.lane.b32.xlu0 %v5235_v16, %s5087_s30 }
  0x4f   : > { %2156 = vrot.lane.b32.xlu1 %v5256_v17, %s8729_s19 }
  0x50   : > { %2176 = vrot.lane.b32.xlu0 %v5256_v17, %s8731_s20 }
  0x53   : > { %2196 = vrot.lane.b32.xlu1 %v5256_v17, %s5081_s21 }
  0x54   : > { %2213 = vrot.lane.b32.xlu0 %v5256_v17, %s5082_s22 }
  0x57   : > { %2237 = vrot.lane.b32.xlu1 %v5256_v17, %s5083_s23 }
  0x58   : > { %2261 = vrot.lane.b32.xlu0 %v5256_v17, %s5084_s26 }
  0x5b   : > { %2278 = vrot.lane.b32.xlu1 %v5256_v17, %s5086_s27 }
  0x5c   : > { %2302 = vrot.lane.b32.xlu0 %v5256_v17, %s5087_s30 }
  0x5f   : > { %2330 = vrot.lane.b32.xlu1 %v2328_v18, %s8729_s19 }
  0x60   : > { %2343 = vrot.lane.b32.xlu0 %v5283_v19, %s8729_s19 }
  0x63   : > { %2363 = vrot.lane.b32.xlu1 %v5283_v19, %s8731_s20 }
  0x64   : > { %2383 = vrot.lane.b32.xlu0 %v5283_v19, %s5081_s21 }
  0x67   : > { %2400 = vrot.lane.b32.xlu1 %v5283_v19, %s5082_s22 }
  0x68   : > { %2424 = vrot.lane.b32.xlu0 %v5283_v19, %s5083_s23 }
  0x6b   : > { %2448 = vrot.lane.b32.xlu1 %v5283_v19, %s5084_s26 }
  0x6c   : > { %2465 = vrot.lane.b32.xlu0 %v5283_v19, %s5086_s27 }
  0x6f   : > { %2489 = vrot.lane.b32.xlu1 %v5283_v19, %s5087_s30 }
  0x70   : > { %2521 = vrot.lane.b32.xlu0 %v5304_v20, %s8729_s19 }
  0x73   : > { %2541 = vrot.lane.b32.xlu1 %v5304_v20, %s8731_s20 }
  0x91   : > { %v1621_v39 = vpop.permute.xlu1 %1620 }
  0x92   : > { %v1642_v40 = vpop.permute.xlu0 %1641  ;;  %4735 = vpush %v1621_v39 }
  0x93   : > { %4737 = vpush %v1642_v40 }
  0x95   : > { %v1663_v41 = vpop.permute.xlu1 %1662 }
  0x96   : > { %v1680_v43 = vpop.permute.xlu0 %1679  ;;  %4739 = vpush %v1663_v41 }
  0x97   : > { %4741 = vpush %v1680_v43 }
  0x99   : > { %v1704_v44 = vpop.permute.xlu1 %1703 }
  0x9a   : > { %4743 = vpush %v1704_v44  ;;  %v1728_v45 = vpop.permute.xlu0 %1727 }
  0x9b   : > { %4745 = vpush %v1728_v45 }
  0x9d   : > { %v1745_v46 = vpop.permute.xlu1 %1744 }
  0x9e   : > { %4747 = vpush %v1745_v46  ;;  %v1769_v48 = vpop.permute.xlu0 %1768 }
  0x9f   : > { %4749 = vpush %v1769_v48 }
  0xa0   : > { %4751 = vpush %v5214_v15 }
  0xa1   : > { %v1801_v47 = vpop.permute.xlu1 %1800 }
  0xa2   : > { %4753 = vpush %v1801_v47  ;;  %v1821_v50 = vpop.permute.xlu0 %1820 }
  0xa3   : > { %4755 = vpush %v1821_v50 }
  0xa5   : > { %v1841_v49 = vpop.permute.xlu1 %1840 }
  0xa6   : > { %4757 = vpush %v1841_v49  ;;  %v1858_v52 = vpop.permute.xlu0 %1857  ;;  %v5485_v49 = vld [vmem:[%s8926_s5 + $0xa] sm:$0x1] }
  0xa7   : > { %4759 = vpush %v1858_v52 }
  0xa9   : > { %v1882_v51 = vpop.permute.xlu1 %1881 }
  0xaa   : > { %4761 = vpush %v1882_v51  ;;  %v1906_v54 = vpop.permute.xlu0 %1905 }
  0xab   : > { %4763 = vpush %v1906_v54 }
  0xad   : > { %v1923_v53 = vpop.permute.xlu1 %1922 }
  0xae   : > { %4765 = vpush %v1923_v53  ;;  %v1947_v56 = vpop.permute.xlu0 %1946 }
  0xaf   : > { %4767 = vpush %v1947_v56 }
  0xb0   : > { %4769 = vpush %v5235_v16 }
  0xb1   : > { %v1979_v55 = vpop.permute.xlu1 %1978 }
  0xb2   : > { %4771 = vpush %v1979_v55  ;;  %v1999_v58 = vpop.permute.xlu0 %1998 }
  0xb3   : > { %4773 = vpush %v1999_v58 }
  0xb5   : > { %v2019_v57 = vpop.permute.xlu1 %2018 }
  0xb6   : > { %4775 = vpush %v2019_v57  ;;  %v2036_v60 = vpop.permute.xlu0 %2035 }
  0xb7   : > { %4777 = vpush %v2036_v60 }
  0xb9   : > { %v2060_v59 = vpop.permute.xlu1 %2059 }
  0xba   : > { %4779 = vpush %v2060_v59  ;;  %v2084_v62 = vpop.permute.xlu0 %2083 }
  0xbb   : > { %4781 = vpush %v2084_v62 }
  0xbd   : > { %v2101_v61 = vpop.permute.xlu1 %2100 }
  0xbe   : > { %4783 = vpush %v2101_v61  ;;  %v2125_v0 = vpop.permute.xlu0 %2124 }
  0xbf   : > { %4785 = vpush %v2125_v0 }
  0xc0   : > { %4787 = vpush %v5256_v17 }
  0xc1   : > { %v2157_v63 = vpop.permute.xlu1 %2156 }
  0xc2   : > { %4789 = vpush %v2157_v63  ;;  %v2177_v2 = vpop.permute.xlu0 %2176 }
  0xc3   : > { %4791 = vpush %v2177_v2 }
  0xc5   : > { %v2197_v1 = vpop.permute.xlu1 %2196 }
  0xc6   : > { %4793 = vpush %v2197_v1  ;;  %v2214_v4 = vpop.permute.xlu0 %2213 }
  0xc7   : > { %4795 = vpush %v2214_v4 }
  0xc9   : > { %v2238_v3 = vpop.permute.xlu1 %2237 }
  0xca   : > { %4797 = vpush %v2238_v3  ;;  %v2262_v6 = vpop.permute.xlu0 %2261 }
  0xcb   : > { %4799 = vpush %v2262_v6 }
  0xcd   : > { %v2279_v5 = vpop.permute.xlu1 %2278 }
  0xce   : > { %4801 = vpush %v2279_v5  ;;  %v2303_v8 = vpop.permute.xlu0 %2302 }
  0xcf   : > { %4803 = vpush %v2303_v8 }
  0xd1   : > { %v2331_v7 = vpop.permute.xlu1 %2330 }
  0xd2   : > { %4805 = vpush %v2331_v7 }
  0xd3   : > { %4807 = vpush %v5283_v19 }
  0xd5   : > { %v2364_v9 = vpop.permute.xlu1 %2363 }
  0xd9   : > { %v2401_v11 = vpop.permute.xlu1 %2400 }
  0xdd   : > { %v2449_v13 = vpop.permute.xlu1 %2448 }
  0xe1   : > { %v2490_v16 = vpop.permute.xlu1 %2489 }
  0xe2   : > { %v4654_v21 = vpop.f32.mrf.mxu0 }
  0xe3   : > { %v395_v27 = vadd.f32 %v4654_v21, %v4558_v22  ;;  %v518_v21 = vld [vmem:[#allocation2 + $0x8] sm:$0x7f] }
  0xe4   : > { %v389_v23 = vpop.f32.mrf.mxu0 }
  0xe5   : > { %v390_v24 = vadd.f32 %v4558_v22, %v389_v23  ;;  %v2542_v19 = vpop.permute.xlu1 %2541  ;;  %v517_v23 = vld [vmem:[#allocation2] sm:$0xff] }
  0xe6   : > { %v4657_v26 = vpop.f32.mrf.mxu0 }
  0xe7   : > { %4664 = vmatprep.subr.mxu1 %v390_v24  ;;  %v405_v31 = vadd.f32 %v4657_v26, %v4558_v22 }
  0xe8   : > { %4665 = vmatpush3.msra.mxu1 %v390_v24  ;;  %v399_v28 = vpop.f32.mrf.mxu0 }
  0xe9   : > { %4667 = vmatmul.mubr.msk.f32.vlgmr.msra.gmra.mxu1 %vm435_vm1, %v434_v25  ;;  %4669 = vmatprep.subr.mxu1 %v395_v27  ;;  %v400_v29 = vadd.f32 %v4558_v22, %v399_v28 }
  0xea   : > { %4670 = vmatpush3.msra.mxu1 %v395_v27  ;;  %4671 = vmatprep.mubr.msk.f32.mxu1 %vm435_vm1, %v5181_v10  ;;  %v4660_v30 = vpop.f32.mrf.mxu0  ;;  %v5367_v27 = vld [vmem:[%s8926_s5 + $0x6] sm:$0x1] }
  0xeb   : > { %4674 = vmatprep.subr.mxu1 %v400_v29  ;;  %v415_v34 = vadd.f32 %v4660_v30, %v4558_v22 }
  0xec   : > { %v409_v32 = vpop.f32.mrf.mxu0 }
  0xed   : > { %4672 = vmatmul.mubr.msk.f32.vlgmr.msra.gmra.mxu1 %vm435_vm1, %v434_v25  ;;  %v410_v33 = vadd.f32 %v4558_v22, %v409_v32  ;;  %v3050_v32 = vld [vmem:[%s8927_s6] sm:$0x1] }
  0xee   : > { %4675 = vmatpush3.msra.mxu1 %v400_v29  ;;  %4676 = vmatprep.mubr.msk.f32.mxu1 %vm435_vm1, %v5181_v10  ;;  %v4663_v35 = vpop.f32.mrf.mxu0 }
  0xef   : > { %4679 = vmatprep.subr.mxu1 %v405_v31  ;;  %v425_v37 = vadd.f32 %v4663_v35, %v4558_v22 }
  0xf0   : > { %v419_v36 = vpop.f32.mrf.mxu0 }
  0xf1   : > { %4677 = vmatmul.mubr.msk.f32.vlgmr.msra.gmra.mxu1 %vm435_vm1, %v434_v25  ;;  %v420_v38 = vadd.f32 %v4558_v22, %v419_v36 }
  0xf2   : > { %4680 = vmatpush3.msra.mxu1 %v405_v31  ;;  %4681 = vmatprep.mubr.msk.f32.mxu1 %vm435_vm1, %v5181_v10 }
  0xf3   : > { %4684 = vmatprep.subr.mxu1 %v410_v33 }
  0xf5   : > { %4682 = vmatmul.mubr.msk.f32.vlgmr.msra.gmra.mxu1 %vm435_vm1, %v434_v25 }
  0xf6   : > { %4685 = vmatpush3.msra.mxu1 %v410_v33  ;;  %4686 = vmatprep.mubr.msk.f32.mxu1 %vm435_vm1, %v5181_v10  ;;  %v5431_v33 = vld [vmem:[%s8926_s5 + $0x8] sm:$0x1] }
  0xf7   : > { %4689 = vmatprep.subr.mxu1 %v415_v34 }
  0xf9   : > { %4687 = vmatmul.mubr.msk.f32.vlgmr.msra.gmra.mxu1 %vm435_vm1, %v434_v25 }
  0xfa   : > { %4690 = vmatpush3.msra.mxu1 %v415_v34  ;;  %4691 = vmatprep.mubr.msk.f32.mxu1 %vm435_vm1, %v5181_v10  ;;  %v5456_v34 = vld [vmem:[%s8926_s5 + $0x9] sm:$0x1] }
  0xfb   : > { %4694 = vmatprep.subr.mxu1 %v420_v38 }
  0xfd   : > { %4692 = vmatmul.mubr.msk.f32.vlgmr.msra.gmra.mxu1 %vm435_vm1, %v434_v25 }
  0xfe   : > { %4696 = vmatprep.mubr.msk.f32.mxu1 %vm435_vm1, %v5181_v10  ;;  %4695 = vmatpush3.msra.mxu1 %v420_v38 }
  0xff   : > { %4699 = vmatprep.subr.mxu1 %v425_v37 }
 0x101   : > { %4697 = vmatmul.mubr.msk.f32.vlgmr.msra.gmra.mxu1 %vm435_vm1, %v434_v25 }
 0x102   : > { %4700 = vmatpush3.msra.mxu1 %v425_v37  ;;  %4701 = vmatprep.mubr.msk.f32.mxu1 %vm435_vm1, %v5181_v10  ;;  %v2344_v10 = vpop.permute.xlu0 %2343 }
 0x103   : > { %4809 = vpush %v2344_v10 }
 0x104   : > { %4811 = vpush %v2364_v9  ;;  %v5519_v9 = vld [vmem:[%s8926_s5 + $0xb] sm:$0x1] }
 0x105   : > { %4702 = vmatmul.mubr.msk.f32.vlgmr.msra.gmra.mxu1 %vm435_vm1, %v434_v25  ;;  %vm1273_vm1 = vcmask 523648  }
 0x106   : > { %v2384_v12 = vpop.permute.xlu0 %2383 }
 0x107   : > { %4813 = vpush %v2384_v12 }
 0x108   : > { %4815 = vpush %v2401_v11 }
 0x10a   : > { %v2425_v15 = vpop.permute.xlu0 %2424 }
 0x10b   : > { %4817 = vpush %v2425_v15 }
 0x10c   : > { %4819 = vpush %v2449_v13 }
 0x10e   : > { %v2466_v17 = vpop.permute.xlu0 %2465 }
 0x10f   : > { %4821 = vpush %v2466_v17 }
 0x110   : > { %4823 = vpush %v2490_v16 }
 0x111   : > { %4825 = vpush %v5304_v20 }
 0x112   : > { %v2522_v18 = vpop.permute.xlu0 %2521 }
 0x113   : > { %4827 = vpush %v2522_v18 }
 0x114   : > { %4829 = vpush %v2542_v19 }
 0x1a9   : > { %v4668_v22 = vpop.f32.mrf.mxu1 }
 0x1aa   : > { %v520_v24 = vadd.f32 %v4668_v22, %v518_v21  ;;  %543 = vrot.lane.b32.xlu1 %v4668_v22, %s5088_s13  ;;  %531 = vrot.lane.b32.xlu0 %v4668_v22, %s5089_s14 }
 0x1ab   : > { %v508_v25 = vpop.f32.mrf.mxu1 }
 0x1ac   : > { %v519_v26 = vadd.f32 %v517_v23, %v508_v25  ;;  %524 = vst.msk [vmem:[#allocation2 + $0x8] sm:$0x7f] %vm523_vm4, %v520_v24 }
 0x1ad   : > { %v4673_v28 = vpop.f32.mrf.mxu1 }
 0x1ae   : > { %522 = vst.msk [vmem:[#allocation2] sm:$0xff] %vm521_vm5, %v519_v26  ;;  %555 = vrot.lane.b32.xlu1 %v4668_v22, %s5090_s15  ;;  %529 = vrot.lane.b32.xlu0 %v508_v25, %s5089_s14 }
 0x1af   : > { %v629_v29 = vpop.f32.mrf.mxu1 }
 0x1b1   : > { %v5410_v30 = vpop.f32.mrf.mxu1 }
 0x1b2   : > { %541 = vrot.lane.b32.xlu1 %v508_v25, %s5088_s13  ;;  %2561 = vrot.lane.b32.xlu0 %v5304_v20, %s5081_s21 }
 0x1b3   : > { %v5416_v31 = vpop.f32.mrf.mxu1  ;;  %v526_v39 = vld [vmem:[#allocation2 + $0x9] sm:$0x7f] }
 0x1b5   : > { %v4683_v35 = vpop.f32.mrf.mxu1  ;;  %v525_v43 = vld [vmem:[#allocation2 + $0x1] sm:$0xff] }
 0x1b6   : > { %2578 = vrot.lane.b32.xlu1 %v5304_v20, %s5082_s22  ;;  %2602 = vrot.lane.b32.xlu0 %v5304_v20, %s5083_s23 }
 0x1b7   : > { %v877_v36 = vpop.f32.mrf.mxu1 }
 0x1b9   : > { %v5510_v2 = vpop.f32.mrf.mxu1 }
 0x1ba   : > { %2626 = vrot.lane.b32.xlu1 %v5304_v20, %s5084_s26  ;;  %2643 = vrot.lane.b32.xlu0 %v5304_v20, %s5086_s27 }
 0x1bb   : > { %v5523_v12 = vpop.f32.mrf.mxu1 }
 0x1be   : > { %2667 = vrot.lane.b32.xlu1 %v5304_v20, %s5087_s30  ;;  %2699 = vrot.lane.b32.xlu0 %v5367_v27, %s8729_s19  ;;  %v5391_v20 = vld [vmem:[%s8926_s5 + $0x7] sm:$0x1] }
 0x1c2   : > { %2719 = vrot.lane.b32.xlu1 %v5367_v27, %s8731_s20  ;;  %553 = vrot.lane.b32.xlu0 %v508_v25, %s5090_s15  ;;  %s5096_s15 = smov 32  }
 0x1c6   : > { %2739 = vrot.lane.b32.xlu0 %v5367_v27, %s5081_s21  ;;  %644 = vrot.lane.b32.xlu1 %v4673_v28, %s5091_s18 }
 0x1ca   : > { %2756 = vrot.lane.b32.xlu1 %v5367_v27, %s5082_s22  ;;  %642 = vrot.lane.b32.xlu0 %v629_v29, %s5091_s18 }
 0x1ce   : > { %658 = vrot.lane.b32.xlu1 %v4673_v28, %s5087_s30  ;;  %2780 = vrot.lane.b32.xlu0 %v5367_v27, %s5083_s23 }
 0x1d2   : > { %670 = vrot.lane.b32.xlu1 %v4673_v28, %s5092_s28  ;;  %2821 = vrot.lane.b32.xlu0 %v5367_v27, %s5086_s27 }
 0x1d6   : > { %682 = vrot.lane.b32.xlu1 %v4673_v28, %s5093_s29  ;;  %656 = vrot.lane.b32.xlu0 %v629_v29, %s5087_s30 }
 0x1da   : > { %2804 = vrot.lane.b32.xlu1 %v5367_v27, %s5084_s26  ;;  %2877 = vrot.lane.b32.xlu0 %v5391_v20, %s8729_s19 }
 0x1de   : > { %2845 = vrot.lane.b32.xlu1 %v5367_v27, %s5087_s30  ;;  %668 = vrot.lane.b32.xlu0 %v629_v29, %s5092_s28 }
 0x1e2   : > { %2897 = vrot.lane.b32.xlu1 %v5391_v20, %s8731_s20  ;;  %2917 = vrot.lane.b32.xlu0 %v5391_v20, %s5081_s21 }
 0x1e6   : > { %2934 = vrot.lane.b32.xlu1 %v5391_v20, %s5082_s22  ;;  %2958 = vrot.lane.b32.xlu0 %v5391_v20, %s5083_s23 }
 0x1ea   : > { %2982 = vrot.lane.b32.xlu1 %v5391_v20, %s5084_s26  ;;  %680 = vrot.lane.b32.xlu0 %v629_v29, %s5093_s29  ;;  %s5098_s29 = smov 48  }
 0x1ee   : > { %2999 = vrot.lane.b32.xlu0 %v5391_v20, %s5086_s27  ;;  %771 = vrot.lane.b32.xlu1 %v5410_v30, %s5094_s10 }
 0x1f2   : > { %3023 = vrot.lane.b32.xlu1 %v5391_v20, %s5087_s30  ;;  %769 = vrot.lane.b32.xlu0 %v5416_v31, %s5094_s10 }
 0x1f6   : > { %791 = vrot.lane.b32.xlu1 %v5410_v30, %s5089_s14  ;;  %3052 = vrot.lane.b32.xlu0 %v3050_v32, %s8731_s20 }
 0x1fa   : > { %803 = vrot.lane.b32.xlu1 %v5410_v30, %s5088_s13  ;;  %3085 = vrot.lane.b32.xlu0 %v5431_v33, %s8731_s20 }
 0x1fe   : > { %3065 = vrot.lane.b32.xlu1 %v5431_v33, %s8729_s19  ;;  %3122 = vrot.lane.b32.xlu0 %v5431_v33, %s5082_s22 }
 0x202   : > { %3105 = vrot.lane.b32.xlu1 %v5431_v33, %s5081_s21  ;;  %3170 = vrot.lane.b32.xlu0 %v5431_v33, %s5084_s26 }
 0x206   : > { %3146 = vrot.lane.b32.xlu1 %v5431_v33, %s5083_s23  ;;  %789 = vrot.lane.b32.xlu0 %v5416_v31, %s5089_s14 }
 0x20a   : > { %3187 = vrot.lane.b32.xlu1 %v5431_v33, %s5086_s27  ;;  %3211 = vrot.lane.b32.xlu0 %v5431_v33, %s5087_s30 }
 0x20e   : > { %3243 = vrot.lane.b32.xlu1 %v5456_v34, %s8729_s19  ;;  %3263 = vrot.lane.b32.xlu0 %v5456_v34, %s8731_s20 }
 0x212   : > { %3283 = vrot.lane.b32.xlu1 %v5456_v34, %s5081_s21  ;;  %801 = vrot.lane.b32.xlu0 %v5416_v31, %s5088_s13 }
 0x216   : > { %3300 = vrot.lane.b32.xlu0 %v5456_v34, %s5082_s22  ;;  %892 = vrot.lane.b32.xlu1 %v4683_v35, %s5095_s9 }
 0x21a   : > { %3324 = vrot.lane.b32.xlu1 %v5456_v34, %s5083_s23  ;;  %890 = vrot.lane.b32.xlu0 %v877_v36, %s5095_s9 }
 0x21c   : > { %v544_v37 = vpop.permute.xlu1 %543  ;;  %v532_v38 = vpop.permute.xlu0 %531 }
 0x21d   : > { %v536_v40 = vadd.f32 %v532_v38, %v526_v39 }
 0x21e   : > { %906 = vrot.lane.b32.xlu1 %v4683_v35, %s5091_s18  ;;  %3348 = vrot.lane.b32.xlu0 %v5456_v34, %s5084_s26 }
 0x21f   : > { %538 = vst.msk [vmem:[#allocation2 + $0x9] sm:$0x7f] %vm523_vm4, %v536_v40 }
 0x220   : > { %v556_v41 = vpop.permute.xlu1 %555  ;;  %v530_v42 = vpop.permute.xlu0 %529 }
 0x221   : > { %v535_v44 = vadd.f32 %v530_v42, %v525_v43 }
 0x222   : > { %918 = vrot.lane.b32.xlu1 %v4683_v35, %s5087_s30  ;;  %3389 = vrot.lane.b32.xlu0 %v5456_v34, %s5087_s30 }
 0x223   : > { %537 = vst.msk [vmem:[#allocation2 + $0x1] sm:$0xff] %vm521_vm5, %v535_v44 }
 0x224   : > { %v542_v45 = vpop.permute.xlu1 %541  ;;  %v2562_v46 = vpop.permute.xlu0 %2561 }
 0x225   : > { %4831 = vpush %v2562_v46 }
 0x226   : > { %v540_v47 = vld [vmem:[#allocation2 + $0xa] sm:$0x7f]  ;;  %930 = vrot.lane.b32.xlu1 %v4683_v35, %s5092_s28  ;;  %904 = vrot.lane.b32.xlu0 %v877_v36, %s5091_s18 }
 0x227   : > { %v548_v48 = vadd.f32 %v544_v37, %v540_v47  ;;  %v5560_v37 = vld [vmem:[%s8926_s5 + $0xc] sm:$0x1] }
 0x228   : > { %v2579_v50 = vpop.permute.xlu1 %2578  ;;  %v2603_v51 = vpop.permute.xlu0 %2602 }
 0x229   : > { %550 = vst.msk [vmem:[#allocation2 + $0xa] sm:$0x7f] %vm523_vm4, %v548_v48  ;;  %v4693_v48 = vpop.f32.mrf.mxu1 }
 0x22a   : > { %4833 = vpush %v2579_v50  ;;  %v539_v52 = vld [vmem:[#allocation2 + $0x2] sm:$0xff]  ;;  %3365 = vrot.lane.b32.xlu1 %v5456_v34, %s5086_s27  ;;  %3441 = vrot.lane.b32.xlu0 %v5485_v49, %s8731_s20 }
 0x22b   : > { %4835 = vpush %v2603_v51  ;;  %v547_v53 = vadd.f32 %v542_v45, %v539_v52 }
 0x22c   : > { %v2627_v54 = vpop.permute.xlu1 %2626  ;;  %v2644_v55 = vpop.permute.xlu0 %2643 }
 0x22d   : > { %549 = vst.msk [vmem:[#allocation2 + $0x2] sm:$0xff] %vm521_vm5, %v547_v53 }
 0x22e   : > { %4837 = vpush %v2627_v54  ;;  %3421 = vrot.lane.b32.xlu1 %v5485_v49, %s8729_s19  ;;  %916 = vrot.lane.b32.xlu0 %v877_v36, %s5087_s30 }
 0x22f   : > { %4839 = vpush %v2644_v55 }
 0x230   : > { %v552_v56 = vld [vmem:[#allocation2 + $0xb] sm:$0x7f]  ;;  %v2668_v57 = vpop.permute.xlu1 %2667  ;;  %v2700_v58 = vpop.permute.xlu0 %2699 }
 0x231   : > { %v560_v59 = vadd.f32 %v556_v41, %v552_v56  ;;  %4841 = vpush %v2668_v57 }
 0x232   : > { %4843 = vpush %v5367_v27  ;;  %3461 = vrot.lane.b32.xlu1 %v5485_v49, %s5081_s21  ;;  %3478 = vrot.lane.b32.xlu0 %v5485_v49, %s5082_s22 }
 0x233   : > { %562 = vst.msk [vmem:[#allocation2 + $0xb] sm:$0x7f] %vm523_vm4, %v560_v59  ;;  %vm1394_vm4 = vcmask 589248  }
 0x234   : > { %4845 = vpush %v2700_v58  ;;  %v2720_v60 = vpop.permute.xlu1 %2719  ;;  %v554_v61 = vpop.permute.xlu0 %553  ;;  %v551_v62 = vld [vmem:[#allocation2 + $0x3] sm:$0xff] }
 0x235   : > { %v559_v63 = vadd.f32 %v554_v61, %v551_v62  ;;  %4847 = vpush %v2720_v60  ;;  %v5580_v58 = vpop.f32.mrf.mxu1  ;;  %v5593_v61 = vld [vmem:[%s8926_s5 + $0xd] sm:$0x1] }
 0x236   : > { %3502 = vrot.lane.b32.xlu1 %v5485_v49, %s5083_s23  ;;  %3526 = vrot.lane.b32.xlu0 %v5485_v49, %s5084_s26 }
 0x237   : > { %561 = vst.msk [vmem:[#allocation2 + $0x3] sm:$0xff] %vm521_vm5, %v559_v63 }
 0x238   : > { %v2740_v0 = vpop.permute.xlu0 %2739  ;;  %v645_v1 = vpop.permute.xlu1 %644 }
 0x239   : > { %4849 = vpush %v2740_v0 }
 0x23a   : > { %3543 = vrot.lane.b32.xlu1 %v5485_v49, %s5086_s27  ;;  %928 = vrot.lane.b32.xlu0 %v877_v36, %s5092_s28 }
 0x23c   : > { %v2757_v3 = vpop.permute.xlu1 %2756  ;;  %v643_v4 = vpop.permute.xlu0 %642 }
 0x23d   : > { %4851 = vpush %v2757_v3 }
 0x23e   : > { %v639_v5 = vld [vmem:[#allocation2 + $0x8] sm:$0x7f]  ;;  %v638_v6 = vld [vmem:[#allocation2] sm:$0xff]  ;;  %3567 = vrot.lane.b32.xlu0 %v5485_v49, %s5087_s30  ;;  %1019 = vrot.lane.b32.xlu1 %v5510_v2, %s5096_s15 }
 0x23f   : > { %v649_v7 = vadd.f32 %v645_v1, %v639_v5  ;;  %v648_v8 = vadd.f32 %v643_v4, %v638_v6 }
 0x240   : > { %v659_v10 = vpop.permute.xlu1 %658  ;;  %v2781_v11 = vpop.permute.xlu0 %2780 }
 0x241   : > { %653 = vst.msk [vmem:[#allocation2 + $0x8] sm:$0x7f] %vm652_vm6, %v649_v7 }
 0x242   : > { %651 = vst.msk [vmem:[#allocation2] sm:$0xff] %vm650_vm7, %v648_v8  ;;  %3599 = vrot.lane.b32.xlu1 %v5519_v9, %s8729_s19  ;;  %1017 = vrot.lane.b32.xlu0 %v5523_v12, %s5096_s15 }
 0x243   : > { %4853 = vpush %v2781_v11 }
 0x244   : > { %v671_v13 = vpop.permute.xlu1 %670  ;;  %v2822_v15 = vpop.permute.xlu0 %2821 }
 0x246   : > { %1033 = vrot.lane.b32.xlu1 %v5510_v2, %s5094_s10  ;;  %3619 = vrot.lane.b32.xlu0 %v5519_v9, %s8731_s20 }
 0x248   : > { %v655_v16 = vld [vmem:[#allocation2 + $0x9] sm:$0x7f]  ;;  %v683_v17 = vpop.permute.xlu1 %682  ;;  %v657_v18 = vpop.permute.xlu0 %656 }
 0x249   : > { %v654_v19 = vld [vmem:[#allocation2 + $0x1] sm:$0xff]  ;;  %v663_v21 = vadd.f32 %v659_v10, %v655_v16 }
 0x24a   : > { %v662_v22 = vadd.f32 %v657_v18, %v654_v19  ;;  %1051 = vrot.lane.b32.xlu1 %v5510_v2, %s5089_s14  ;;  %3656 = vrot.lane.b32.xlu0 %v5519_v9, %s5082_s22 }
 0x24b   : > { %665 = vst.msk [vmem:[#allocation2 + $0x9] sm:$0x7f] %vm652_vm6, %v663_v21 }
 0x24c   : > { %664 = vst.msk [vmem:[#allocation2 + $0x1] sm:$0xff] %vm650_vm7, %v662_v22  ;;  %v2805_v23 = vpop.permute.xlu1 %2804  ;;  %v2878_v24 = vpop.permute.xlu0 %2877 }
 0x24d   : > { %4855 = vpush %v2805_v23 }
 0x24e   : > { %4857 = vpush %v2822_v15  ;;  %3639 = vrot.lane.b32.xlu1 %v5519_v9, %s5081_s21  ;;  %1031 = vrot.lane.b32.xlu0 %v5523_v12, %s5094_s10 }
 0x250   : > { %v2846_v25 = vpop.permute.xlu1 %2845  ;;  %v669_v26 = vpop.permute.xlu0 %668 }
 0x251   : > { %4859 = vpush %v2846_v25  ;;  %v5630_v25 = vpop.f32.mrf.mxu1 }
 0x252   : > { %v667_v27 = vld [vmem:[#allocation2 + $0xa] sm:$0x7f]  ;;  %4861 = vpush %v5391_v20  ;;  %3680 = vrot.lane.b32.xlu1 %v5519_v9, %s5083_s23  ;;  %3704 = vrot.lane.b32.xlu0 %v5519_v9, %s5084_s26  ;;  %v3772_v20 = vld [vmem:[%s8927_s6] sm:$0x1] }
 0x253   : > { %v666_v28 = vld [vmem:[#allocation2 + $0x2] sm:$0xff]  ;;  %v675_v29 = vadd.f32 %v671_v13, %v667_v27  ;;  %4863 = vpush %v2878_v24 }
 0x254   : > { %v674_v32 = vadd.f32 %v669_v26, %v666_v28  ;;  %v2898_v35 = vpop.permute.xlu1 %2897  ;;  %v2918_v36 = vpop.permute.xlu0 %2917  ;;  %v5635_v26 = vld [vmem:[%s8926_s5 + $0xe] sm:$0x1] }
 0x255   : > { %677 = vst.msk [vmem:[#allocation2 + $0xa] sm:$0x7f] %vm652_vm6, %v675_v29 }
 0x256   : > { %676 = vst.msk [vmem:[#allocation2 + $0x2] sm:$0xff] %vm650_vm7, %v674_v32  ;;  %3721 = vrot.lane.b32.xlu1 %v5519_v9, %s5086_s27  ;;  %3745 = vrot.lane.b32.xlu0 %v5519_v9, %s5087_s30 }
 0x257   : > { %4865 = vpush %v2898_v35 }
 0x258   : > { %4867 = vpush %v2918_v36  ;;  %v2935_v38 = vpop.permute.xlu1 %2934  ;;  %v2959_v39 = vpop.permute.xlu0 %2958 }
 0x259   : > { %4869 = vpush %v2935_v38 }
 0x25a   : > { %4871 = vpush %v2959_v39  ;;  %3774 = vrot.lane.b32.xlu1 %v3772_v20, %s5081_s21  ;;  %3787 = vrot.lane.b32.xlu0 %v5560_v37, %s8729_s19  ;;  %v5642_v39 = vpop.f32.mrf.mxu1 }
 0x25c   : > { %v679_v40 = vld [vmem:[#allocation2 + $0xb] sm:$0x7f]  ;;  %v2983_v41 = vpop.permute.xlu1 %2982  ;;  %v681_v42 = vpop.permute.xlu0 %680 }
 0x25d   : > { %v678_v43 = vld [vmem:[#allocation2 + $0x3] sm:$0xff]  ;;  %v687_v44 = vadd.f32 %v683_v17, %v679_v40  ;;  %4873 = vpush %v2983_v41 }
 0x25e   : > { %v686_v45 = vadd.f32 %v681_v42, %v678_v43  ;;  %3807 = vrot.lane.b32.xlu1 %v5560_v37, %s8731_s20  ;;  %3827 = vrot.lane.b32.xlu0 %v5560_v37, %s5081_s21 }
 0x25f   : > { %689 = vst.msk [vmem:[#allocation2 + $0xb] sm:$0x7f] %vm652_vm6, %v687_v44  ;;  %vm1396_vm6 = vcmask 588224  }
 0x260   : > { %688 = vst.msk [vmem:[#allocation2 + $0x3] sm:$0xff] %vm650_vm7, %v686_v45  ;;  %v3000_v46 = vpop.permute.xlu0 %2999  ;;  %v772_v47 = vpop.permute.xlu1 %771  ;;  %vm1535_vm7 = vcmask 146432  }
 0x261   : > { %4875 = vpush %v3000_v46 }
 0x262   : > { %3844 = vrot.lane.b32.xlu1 %v5560_v37, %s5082_s22  ;;  %1049 = vrot.lane.b32.xlu0 %v5523_v12, %s5089_s14  ;;  %1536 = vst.msk [vmem:[#allocation3] sm:$0xff] %vm1535_vm7, %v5085_v14  ;;  %1537 = vst.msk [vmem:[#allocation3 + $0x8] sm:$0xff] %vm1535_vm7, %v5085_v14 }
 0x263   : > { %1540 = vst.msk [vmem:[#allocation3 + $0x18] sm:$0xff] %vm1535_vm7, %v5085_v14  ;;  %1541 = vst.msk [vmem:[#allocation3 + $0x20] sm:$0xff] %vm1535_vm7, %v5085_v14 }
 0x264   : > { %v3024_v50 = vpop.permute.xlu1 %3023  ;;  %v770_v51 = vpop.permute.xlu0 %769  ;;  %1543 = vst.msk [vmem:[#allocation3 + $0x30] sm:$0xff] %vm1535_vm7, %v5085_v14  ;;  %1544 = vst.msk [vmem:[#allocation3 + $0x38] sm:$0xff] %vm1535_vm7, %v5085_v14 }
 0x265   : > { %4877 = vpush %v3024_v50 }
 0x266   : > { %3868 = vrot.lane.b32.xlu0 %v5560_v37, %s5083_s23  ;;  %1140 = vrot.lane.b32.xlu1 %v4693_v48, %s5097_s12  ;;  %1546 = vst.msk [vmem:[#allocation3 + $0x48] sm:$0xff] %vm1535_vm7, %v5085_v14  ;;  %1547 = vst.msk [vmem:[#allocation3 + $0x50] sm:$0xff] %vm1535_vm7, %v5085_v14 }
 0x267   : > { %v766_v52 = vld [vmem:[#allocation2 + $0x8] sm:$0x7f]  ;;  %v765_v53 = vld [vmem:[#allocation2] sm:$0xff] }
 0x268   : > { %v776_v54 = vadd.f32 %v772_v47, %v766_v52  ;;  %v775_v55 = vadd.f32 %v770_v51, %v765_v53  ;;  %v792_v56 = vpop.permute.xlu1 %791  ;;  %v3053_v57 = vpop.permute.xlu0 %3052 }
 0x269   : > { %4879 = vpush %v3053_v57 }
 0x26a   : > { %780 = vst.msk [vmem:[#allocation2 + $0x8] sm:$0x7f] %vm779_vm8, %v776_v54  ;;  %3892 = vrot.lane.b32.xlu1 %v5560_v37, %s5084_s26  ;;  %1138 = vrot.lane.b32.xlu0 %v5580_v58, %s5097_s12 }
 0x26b   : > { %778 = vst.msk [vmem:[#allocation2] sm:$0xff] %vm777_vm9, %v775_v55 }
 0x26c   : > { %4881 = vpush %v5431_v33  ;;  %v804_v59 = vpop.permute.xlu1 %803  ;;  %v3086_v60 = vpop.permute.xlu0 %3085 }
 0x26e   : > { %1154 = vrot.lane.b32.xlu1 %v4693_v48, %s5095_s9  ;;  %3909 = vrot.lane.b32.xlu0 %v5560_v37, %s5086_s27 }
 0x270   : > { %v3066_v0 = vpop.permute.xlu1 %3065  ;;  %v3123_v1 = vpop.permute.xlu0 %3122 }
 0x271   : > { %v782_v62 = vld [vmem:[#allocation2 + $0x9] sm:$0x7f]  ;;  %4883 = vpush %v3066_v0 }
 0x272   : > { %v781_v63 = vld [vmem:[#allocation2 + $0x1] sm:$0xff]  ;;  %v784_v3 = vadd.f32 %v5410_v30, %v782_v62  ;;  %4885 = vpush %v3086_v60  ;;  %1166 = vrot.lane.b32.xlu1 %v4693_v48, %s5091_s18  ;;  %3965 = vrot.lane.b32.xlu0 %v5593_v61, %s8729_s19 }
 0x273   : > { %v783_v33 = vadd.f32 %v781_v63, %v5416_v31 }
 0x274   : > { %786 = vst.msk [vmem:[#allocation2 + $0x9] sm:$0x7f] %vm779_vm8, %v784_v3  ;;  %v3106_v4 = vpop.permute.xlu1 %3105  ;;  %v3171_v5 = vpop.permute.xlu0 %3170 }
 0x275   : > { %785 = vst.msk [vmem:[#allocation2 + $0x1] sm:$0xff] %vm777_vm9, %v783_v33 }
 0x276   : > { %4887 = vpush %v3106_v4  ;;  %1178 = vrot.lane.b32.xlu1 %v4693_v48, %s5087_s30  ;;  %1152 = vrot.lane.b32.xlu0 %v5580_v58, %s5095_s9 }
 0x277   : > { %4889 = vpush %v3123_v1 }
 0x278   : > { %v3147_v30 = vpop.permute.xlu1 %3146  ;;  %v790_v31 = vpop.permute.xlu0 %789 }
 0x279   : > { %4891 = vpush %v3147_v30  ;;  %v4703_v30 = vpop.f32.mrf.mxu1 }
 0x27a   : > { %4893 = vpush %v3171_v5  ;;  %3933 = vrot.lane.b32.xlu1 %v5560_v37, %s5087_s30  ;;  %4005 = vrot.lane.b32.xlu0 %v5593_v61, %s5081_s21 }
 0x27b   : > { %v788_v6 = vld [vmem:[#allocation2 + $0xa] sm:$0x7f] }
 0x27c   : > { %v787_v7 = vld [vmem:[#allocation2 + $0x2] sm:$0xff]  ;;  %v796_v8 = vadd.f32 %v792_v56, %v788_v6  ;;  %v3188_v11 = vpop.permute.xlu1 %3187  ;;  %v3212_v13 = vpop.permute.xlu0 %3211 }
 0x27d   : > { %v795_v10 = vadd.f32 %v790_v31, %v787_v7  ;;  %4895 = vpush %v3188_v11 }
 0x27e   : > { %798 = vst.msk [vmem:[#allocation2 + $0xa] sm:$0x7f] %vm779_vm8, %v796_v8  ;;  %3985 = vrot.lane.b32.xlu1 %v5593_v61, %s8731_s20  ;;  %1164 = vrot.lane.b32.xlu0 %v5580_v58, %s5091_s18 }
 0x27f   : > { %797 = vst.msk [vmem:[#allocation2 + $0x2] sm:$0xff] %vm777_vm9, %v795_v10 }
 0x280   : > { %4897 = vpush %v3212_v13  ;;  %v3244_v15 = vpop.permute.xlu1 %3243  ;;  %v3264_v16 = vpop.permute.xlu0 %3263 }
 0x281   : > { %4899 = vpush %v5456_v34  ;;  %v1373_v13 = vpop.f32.mrf.mxu1 }
 0x282   : > { %4901 = vpush %v3244_v15  ;;  %4022 = vrot.lane.b32.xlu1 %v5593_v61, %s5082_s22  ;;  %4046 = vrot.lane.b32.xlu0 %v5593_v61, %s5083_s23 }
 0x283   : > { %4903 = vpush %v3264_v16 }
 0x284   : > { %v3284_v18 = vpop.permute.xlu1 %3283  ;;  %v802_v19 = vpop.permute.xlu0 %801 }
 0x285   : > { %v800_v17 = vld [vmem:[#allocation2 + $0xb] sm:$0x7f]  ;;  %4905 = vpush %v3284_v18 }
 0x286   : > { %v799_v21 = vld [vmem:[#allocation2 + $0x3] sm:$0xff]  ;;  %v808_v22 = vadd.f32 %v804_v59, %v800_v17  ;;  %4070 = vrot.lane.b32.xlu1 %v5593_v61, %s5084_s26  ;;  %4087 = vrot.lane.b32.xlu0 %v5593_v61, %s5086_s27 }
 0x287   : > { %v807_v23 = vadd.f32 %v802_v19, %v799_v21 }
 0x288   : > { %810 = vst.msk [vmem:[#allocation2 + $0xb] sm:$0x7f] %vm779_vm8, %v808_v22  ;;  %v3301_v34 = vpop.permute.xlu0 %3300  ;;  %v893_v24 = vpop.permute.xlu1 %892  ;;  %vm1549_vm8 = vcmask 138249  }
 0x289   : > { %809 = vst.msk [vmem:[#allocation2 + $0x3] sm:$0xff] %vm777_vm9, %v807_v23  ;;  %vm1551_vm9 = vcmask 138248  }
 0x28a   : > { %4907 = vpush %v3301_v34  ;;  %4111 = vrot.lane.b32.xlu1 %v5593_v61, %s5087_s30  ;;  %1176 = vrot.lane.b32.xlu0 %v5580_v58, %s5087_s30 }
 0x28c   : > { %v3325_v27 = vpop.permute.xlu1 %3324  ;;  %v891_v28 = vpop.permute.xlu0 %890 }
 0x28d   : > { %4909 = vpush %v3325_v27 }
 0x28e   : > { %4143 = vrot.lane.b32.xlu0 %v5635_v26, %s8729_s19  ;;  %1267 = vrot.lane.b32.xlu1 %v5630_v25, %s5098_s29 }
 0x290   : > { %v887_v29 = vld [vmem:[#allocation2 + $0x8] sm:$0x7f]  ;;  %v886_v32 = vld [vmem:[#allocation2] sm:$0xff]  ;;  %v907_v20 = vpop.permute.xlu1 %906  ;;  %v3349_v38 = vpop.permute.xlu0 %3348 }
 0x291   : > { %v897_v35 = vadd.f32 %v893_v24, %v887_v29  ;;  %v896_v36 = vadd.f32 %v891_v28, %v886_v32  ;;  %4911 = vpush %v3349_v38  ;;  %v1445_v28 = vld [vmem:[%s8929_s4 + $0x40] sm:$0xff] }
 0x292   : > { %4163 = vrot.lane.b32.xlu1 %v5635_v26, %s8731_s20  ;;  %1265 = vrot.lane.b32.xlu0 %v5642_v39, %s5098_s29 }
 0x293   : > { %901 = vst.msk [vmem:[#allocation2 + $0x8] sm:$0x7f] %vm900_vm10, %v897_v35  ;;  %4705 = vmatpush3.msra.mxu0 %v1445_v28  ;;  %v1444_v35 = vld [vmem:[%s8929_s4 + $0x38] sm:$0xff] }
 0x294   : > { %899 = vst.msk [vmem:[#allocation2] sm:$0xff] %vm898_vm11, %v896_v36  ;;  %v919_v40 = vpop.permute.xlu1 %918  ;;  %v3390_v41 = vpop.permute.xlu0 %3389  ;;  %4706 = vmatprep.subr.mxu0 %v5085_v14 }
 0x295   : > { %4707 = vmatpush3.msra.mxu0 %v1444_v35 }
 0x296   : > { %1281 = vrot.lane.b32.xlu1 %v5630_v25, %s5096_s15  ;;  %4183 = vrot.lane.b32.xlu0 %v5635_v26, %s5081_s21 }
 0x297   : > { %4708 = vmatprep.subr.mxu0 %v5085_v14 }
 0x298   : > { %v931_v43 = vpop.permute.xlu1 %930  ;;  %v905_v44 = vpop.permute.xlu0 %904 }
 0x29a   : > { %v903_v42 = vld [vmem:[#allocation2 + $0x9] sm:$0x7f]  ;;  %1293 = vrot.lane.b32.xlu1 %v5630_v25, %s5094_s10  ;;  %4224 = vrot.lane.b32.xlu0 %v5635_v26, %s5083_s23 }
 0x29b   : > { %v902_v45 = vld [vmem:[#allocation2 + $0x1] sm:$0xff]  ;;  %v911_v46 = vadd.f32 %v907_v20, %v903_v42 }
 0x29c   : > { %v910_v47 = vadd.f32 %v905_v44, %v902_v45  ;;  %v3366_v48 = vpop.permute.xlu1 %3365  ;;  %v3442_v50 = vpop.permute.xlu0 %3441  ;;  %v1440_v44 = vld [vmem:[%s8929_s4 + $0x18] sm:$0xff] }
 0x29d   : > { %913 = vst.msk [vmem:[#allocation2 + $0x9] sm:$0x7f] %vm900_vm10, %v911_v46 }
 0x29e   : > { %912 = vst.msk [vmem:[#allocation2 + $0x1] sm:$0xff] %vm898_vm11, %v910_v47  ;;  %4200 = vrot.lane.b32.xlu1 %v5635_v26, %s5082_s22  ;;  %1279 = vrot.lane.b32.xlu0 %v5642_v39, %s5096_s15  ;;  %v1438_v47 = vld [vmem:[%s8929_s4 + $0x8] sm:$0xff] }
 0x29f   : > { %4913 = vpush %v3366_v48 }
 0x2a0   : > { %4915 = vpush %v3390_v41  ;;  %v3422_v51 = vpop.permute.xlu1 %3421  ;;  %v917_v52 = vpop.permute.xlu0 %916  ;;  %v1443_v41 = vld [vmem:[%s8929_s4 + $0x30] sm:$0xff] }
 0x2a1   : > { %4917 = vpush %v5485_v49  ;;  %v5675_v49 = vld [vmem:[%s8926_s5 + $0xf] sm:$0x1]  ;;  %4709 = vmatpush3.msra.mxu0 %v1443_v41 }
 0x2a2   : > { %4919 = vpush %v3422_v51  ;;  %4248 = vrot.lane.b32.xlu1 %v5635_v26, %s5084_s26  ;;  %4265 = vrot.lane.b32.xlu0 %v5635_v26, %s5086_s27 }
 0x2a3   : > { %4921 = vpush %v3442_v50  ;;  %4710 = vmatprep.subr.mxu0 %v5085_v14 }
 0x2a4   : > { %v915_v53 = vld [vmem:[#allocation2 + $0xa] sm:$0x7f]  ;;  %v3462_v57 = vpop.permute.xlu1 %3461  ;;  %v3479_v58 = vpop.permute.xlu0 %3478 }
 0x2a5   : > { %v914_v54 = vld [vmem:[#allocation2 + $0x2] sm:$0xff]  ;;  %v923_v55 = vadd.f32 %v919_v40, %v915_v53  ;;  %4923 = vpush %v3462_v57 }
 0x2a6   : > { %v922_v56 = vadd.f32 %v917_v52, %v914_v54  ;;  %4925 = vpush %v3479_v58  ;;  %4289 = vrot.lane.b32.xlu1 %v5635_v26, %s5087_s30  ;;  %1291 = vrot.lane.b32.xlu0 %v5642_v39, %s5094_s10 }
 0x2a7   : > { %925 = vst.msk [vmem:[#allocation2 + $0xa] sm:$0x7f] %vm900_vm10, %v923_v55  ;;  %v1437_v55 = vld [vmem:[%s8929_s4] sm:$0xff] }
 0x2a8   : > { %924 = vst.msk [vmem:[#allocation2 + $0x2] sm:$0xff] %vm898_vm11, %v922_v56  ;;  %v3503_v59 = vpop.permute.xlu1 %3502  ;;  %v3527_v60 = vpop.permute.xlu0 %3526 }
 0x2a9   : > { %4927 = vpush %v3503_v59 }
 0x2aa   : > { %4929 = vpush %v3527_v60  ;;  %4341 = vrot.lane.b32.xlu1 %v5675_v49, %s8731_s20  ;;  %4321 = vrot.lane.b32.xlu0 %v5675_v49, %s8729_s19 }
 0x2ac   : > { %v3544_v63 = vpop.permute.xlu1 %3543  ;;  %v929_v0 = vpop.permute.xlu0 %928 }
 0x2ad   : > { %4931 = vpush %v3544_v63 }
 0x2ae   : > { %v927_v62 = vld [vmem:[#allocation2 + $0xb] sm:$0x7f]  ;;  %4378 = vrot.lane.b32.xlu1 %v5675_v49, %s5082_s22  ;;  %4361 = vrot.lane.b32.xlu0 %v5675_v49, %s5081_s21  ;;  %s5099_s21 = smov 56   ;;  %s5760_s22 = spop %4731 }
 0x2af   : > { %v926_v1 = vld [vmem:[#allocation2 + $0x3] sm:$0xff]  ;;  %v935_v3 = vadd.f32 %v931_v43, %v927_v62 }
 0x2b0   : > { %v934_v33 = vadd.f32 %v929_v0, %v926_v1  ;;  %v3568_v4 = vpop.permute.xlu0 %3567  ;;  %v1020_v5 = vpop.permute.xlu1 %1019 }
 0x2b1   : > { %937 = vst.msk [vmem:[#allocation2 + $0xb] sm:$0x7f] %vm900_vm10, %v935_v3  ;;  %vm1553_vm10 = vcmask 131080  }
 0x2b2   : > { %936 = vst.msk [vmem:[#allocation2 + $0x3] sm:$0xff] %vm898_vm11, %v934_v33  ;;  %4426 = vrot.lane.b32.xlu1 %v5675_v49, %s5084_s26  ;;  %4402 = vrot.lane.b32.xlu0 %v5675_v49, %s5083_s23  ;;  %s5762_s23 = spop %4733  ;;  %vm1631_vm11 = vcmask 1046528  }
 0x2b3   : > { %4933 = vpush %v3568_v4  ;;  %s5764_s26 = spop %4735 }
 0x2b4   : > { %4935 = vpush %v5519_v9  ;;  %v3600_v31 = vpop.permute.xlu1 %3599  ;;  %v1018_v6 = vpop.permute.xlu0 %1017 }
 0x2b5   : > { %4937 = vpush %v3600_v31 }
 0x2b6   : > { %4443 = vrot.lane.b32.xlu0 %v5675_v49, %s5086_s27  ;;  %1388 = vrot.lane.b32.xlu1 %v4703_v30, %s5099_s21  ;;  %s5769_s27 = spop %4737 }
 0x2b8   : > { %v1034_v15 = vpop.permute.xlu1 %1033  ;;  %v3620_v16 = vpop.permute.xlu0 %3619 }
 0x2b9   : > { %v1014_v7 = vld [vmem:[#allocation2 + $0x8] sm:$0x7f]  ;;  %v1013_v8 = vld [vmem:[#allocation2] sm:$0xff]  ;;  %4939 = vpush %v3620_v16 }
 0x2ba   : > { %v1024_v10 = vadd.f32 %v1020_v5, %v1014_v7  ;;  %v1023_v11 = vadd.f32 %v1018_v6, %v1013_v8  ;;  %4467 = vrot.lane.b32.xlu1 %v5675_v49, %s5087_s30  ;;  %1386 = vrot.lane.b32.xlu0 %v1373_v13, %s5099_s21  ;;  %s5771_s30 = spop %4739 }
 0x2bc   : > { %1026 = vst.msk [vmem:[#allocation2] sm:$0xff] %vm1025_vm12, %v1023_v11  ;;  %v5698_v9 = vpop.permute.xlu1 %1051  ;;  %v3657_v17 = vpop.permute.xlu0 %3656 }
 0x2bd   : > { %1028 = vst.msk [vmem:[#allocation2 + $0x8] sm:$0x7f] %vm1027_vm13, %v1024_v10 }
 0x2be   : > { %1402 = vrot.lane.b32.xlu1 %v4703_v30, %s5097_s12  ;;  %1400 = vrot.lane.b32.xlu0 %v1373_v13, %s5097_s12 }
 0x2c0   : > { %v3640_v19 = vpop.permute.xlu1 %3639  ;;  %v1032_v21 = vpop.permute.xlu0 %1031 }
 0x2c1   : > { %4941 = vpush %v3640_v19 }
 0x2c2   : > { %4943 = vpush %v3657_v17  ;;  %1414 = vrot.lane.b32.xlu1 %v4703_v30, %s5095_s9  ;;  %1412 = vrot.lane.b32.xlu0 %v1373_v13, %s5095_s9 }
 0x2c4   : > { %v1030_v18 = vld [vmem:[#allocation2 + $0x9] sm:$0x7f]  ;;  %v1029_v22 = vld [vmem:[#allocation2 + $0x1] sm:$0xff]  ;;  %v3681_v24 = vpop.permute.xlu1 %3680  ;;  %v3705_v27 = vpop.permute.xlu0 %3704 }
 0x2c5   : > { %v1038_v23 = vadd.f32 %v1034_v15, %v1030_v18  ;;  %v1037_v34 = vadd.f32 %v1032_v21, %v1029_v22  ;;  %4945 = vpush %v3681_v24 }
 0x2c6   : > { %4947 = vpush %v3705_v27  ;;  %1426 = vrot.lane.b32.xlu1 %v4703_v30, %s5091_s18  ;;  %1424 = vrot.lane.b32.xlu0 %v1373_v13, %s5091_s18  ;;  %s5773_s18 = spop %4741 }
 0x2c7   : > { %1040 = vst.msk [vmem:[#allocation2 + $0x9] sm:$0x7f] %vm1027_vm13, %v1038_v23  ;;  %s5777_s10 = spop %4743 }
 0x2c8   : > { %1039 = vst.msk [vmem:[#allocation2 + $0x1] sm:$0xff] %vm1025_vm12, %v1037_v34  ;;  %v3722_v29 = vpop.permute.xlu1 %3721  ;;  %v3746_v32 = vpop.permute.xlu0 %3745  ;;  %s5779_s9 = spop %4745 }
 0x2c9   : > { %4949 = vpush %v3722_v29  ;;  %s5783_s13 = spop %4747 }
 0x2ca   : > { %4951 = vpush %v3746_v32  ;;  %s5785_s12 = spop %4749 }
 0x2cb   : > { %s5787_s14 = spop %4751 }
 0x2cc   : > { %v3775_v42 = vpop.permute.xlu1 %3774  ;;  %v3788_v43 = vpop.permute.xlu0 %3787  ;;  %8930 = sst [smem:[#allocation6_spill]] %s5787_s14  ;;  %s5789_s16 = spop %4753 }
 0x2cd   : > { %4953 = vpush %v3775_v42  ;;  %8931 = sst [smem:[#allocation7_spill]] %s5789_s16  ;;  %s5792_s28 = spop %4755 }
 0x2ce   : > { %v1042_v36 = vld [vmem:[#allocation2 + $0xa] sm:$0x7f]  ;;  %4955 = vpush %v5560_v37  ;;  %8932 = sst [smem:[#allocation8_spill]] %s5792_s28  ;;  %s5796_s17 = spop %4757 }
 0x2cf   : > { %v1041_v20 = vld [vmem:[#allocation2 + $0x2] sm:$0xff]  ;;  %v1044_v38 = vadd.f32 %v5510_v2, %v1042_v36  ;;  %4957 = vpush %v3788_v43  ;;  %v1439_v37 = vld [vmem:[%s8929_s4 + $0x10] sm:$0xff]  ;;  %8933 = sst [smem:[#allocation9_spill]] %s5796_s17  ;;  %s5798_s29 = spop %4759 }
 0x2d0   : > { %v1043_v40 = vadd.f32 %v1041_v20, %v5523_v12  ;;  %v1442_v2 = vld [vmem:[%s8929_s4 + $0x28] sm:$0xff]  ;;  %v1441_v12 = vld [vmem:[%s8929_s4 + $0x20] sm:$0xff]  ;;  %v3808_v45 = vpop.permute.xlu1 %3807  ;;  %v3828_v46 = vpop.permute.xlu0 %3827  ;;  %8934 = sst [smem:[#allocation10_spill]] %s5798_s29  ;;  %s5800_s15 = spop %4761 }
 0x2d1   : > { %1046 = vst.msk [vmem:[#allocation2 + $0xa] sm:$0x7f] %vm1027_vm13, %v1044_v38  ;;  %4711 = vmatpush3.msra.mxu0 %v1442_v2  ;;  %8935 = sst [smem:[#allocation11_spill]] %s5800_s15  ;;  %s5802_s8 = spop %4763 }
 0x2d2   : > { %1045 = vst.msk [vmem:[#allocation2 + $0x2] sm:$0xff] %vm1025_vm12, %v1043_v40  ;;  %4712 = vmatprep.subr.mxu0 %v5085_v14  ;;  %8936 = sst [smem:[#allocation12_spill]] %s5802_s8  ;;  %s5806_s21 = spop %4765 }
 0x2d3   : > { %4713 = vmatpush3.msra.mxu0 %v1441_v12  ;;  %4959 = vpush %v3808_v45  ;;  %8937 = sst [smem:[#allocation13_spill]] %s5806_s21  ;;  %s5810_s11 = spop %4767 }
 0x2d4   : > { %4714 = vmatprep.subr.mxu0 %v5085_v14  ;;  %4961 = vpush %v3828_v46  ;;  %v3845_v50 = vpop.permute.xlu1 %3844  ;;  %v1050_v51 = vpop.permute.xlu0 %1049  ;;  %8938 = sst [smem:[#allocation14_spill]] %s5810_s11  ;;  %s5812_s19 = spop %4769 }
 0x2d5   : > { %4715 = vmatpush3.msra.mxu0 %v1440_v44  ;;  %4963 = vpush %v3845_v50  ;;  %8939 = sst [smem:[#allocation15_spill]] %s5812_s19  ;;  %s5837_s20 = spop %4771 }
 0x2d6   : > { %4716 = vmatprep.subr.mxu0 %v5085_v14  ;;  %8940 = sst [smem:[#allocation16_spill]] %s5837_s20  ;;  %s5839_s0 = spop %4773 }
 0x2d7   : > { %4717 = vmatpush3.msra.mxu0 %v1439_v37  ;;  %8941 = sst [smem:[#allocation17_spill]] %s5839_s0  ;;  %s5841_s1 = spop %4775 }
 0x2d8   : > { %v1048_v48 = vld [vmem:[#allocation2 + $0xb] sm:$0x7f]  ;;  %4718 = vmatprep.subr.mxu0 %v5085_v14  ;;  %v3869_v56 = vpop.permute.xlu0 %3868  ;;  %v1141_v57 = vpop.permute.xlu1 %1140  ;;  %8942 = sst [smem:[#allocation18_spill]] %s5841_s1  ;;  %s5843_s2 = spop %4777 }
 0x2d9   : > { %v1047_v52 = vld [vmem:[#allocation2 + $0x3] sm:$0xff]  ;;  %v1056_v53 = vadd.f32 %v5698_v9, %v1048_v48  ;;  %4719 = vmatpush3.msra.mxu0 %v1438_v47  ;;  %4965 = vpush %v3869_v56  ;;  %8943 = sst [smem:[#allocation19_spill]] %s5843_s2  ;;  %s5845_s3 = spop %4779 }
 0x2da   : > { %v1055_v54 = vadd.f32 %v1050_v51, %v1047_v52  ;;  %4720 = vmatprep.subr.mxu0 %v5085_v14  ;;  %8944 = sst [smem:[#allocation20_spill]] %s5845_s3  ;;  %s5847_s4 = spop %4781 }
 0x2db   : > { %1058 = vst.msk [vmem:[#allocation2 + $0xb] sm:$0x7f] %vm1027_vm13, %v1056_v53  ;;  %4721 = vmatpush3.msra.mxu0 %v1437_v55  ;;  %8945 = sst [smem:[#allocation21_spill]] %s5847_s4  ;;  %s5853_s5 = spop %4783 }
 0x2dc   : > { %1057 = vst.msk [vmem:[#allocation2 + $0x3] sm:$0xff] %vm1025_vm12, %v1055_v54  ;;  %v3893_v58 = vpop.permute.xlu1 %3892  ;;  %v1139_v59 = vpop.permute.xlu0 %1138  ;;  %8946 = sst [smem:[#allocation22_spill]] %s5853_s5  ;;  %s5855_s6 = spop %4785  ;;  %vm1652_vm12 = vcmask 1045504  }
 0x2dd   : > { %4967 = vpush %v3893_v58  ;;  %8947 = sst [smem:[#allocation23_spill]] %s5855_s6  ;;  %s5857_s24 = spop %4787 }
 0x2de   : > { %8948 = sst [smem:[#allocation24_spill]] %s5857_s24  ;;  %s5859_s7 = spop %4789 }
 0x2df   : > { %8949 = sst [smem:[#allocation25_spill]] %s5859_s7  ;;  %s5861_s25 = spop %4791 }
 0x2e0   : > { %v1155_v1 = vpop.permute.xlu1 %1154  ;;  %v3910_v3 = vpop.permute.xlu0 %3909  ;;  %8950 = sst [smem:[#allocation26_spill]] %s5861_s25  ;;  %s5863_s19 = spop %4793 }
 0x2e1   : > { %4969 = vpush %v3910_v3  ;;  %8951 = sst [smem:[#allocation27_spill]] %s5863_s19  ;;  %s5865_s0 = spop %4795 }
 0x2e2   : > { %8952 = sst [smem:[#allocation28_spill]] %s5865_s0  ;;  %s5867_s20 = spop %4797 }
 0x2e3   : > { %v1135_v60 = vld [vmem:[#allocation2 + $0x8] sm:$0x7f]  ;;  %v1134_v62 = vld [vmem:[#allocation2] sm:$0xff]  ;;  %8953 = sst [smem:[#allocation29_spill]] %s5867_s20  ;;  %s5869_s3 = spop %4799 }
 0x2e4   : > { %v1145_v63 = vadd.f32 %v1141_v57, %v1135_v60  ;;  %v1144_v0 = vadd.f32 %v1139_v59, %v1134_v62  ;;  %v1167_v33 = vpop.permute.xlu1 %1166  ;;  %v3966_v4 = vpop.permute.xlu0 %3965  ;;  %8954 = sst [smem:[#allocation30_spill]] %s5869_s3  ;;  %s5871_s2 = spop %4801 }
 0x2e5   : > { %8955 = sst [smem:[#allocation31_spill]] %s5871_s2  ;;  %s5873_s11 = spop %4803 }
 0x2e6   : > { %1147 = vst.msk [vmem:[#allocation2] sm:$0xff] %vm1146_vm15, %v1144_v0  ;;  %8956 = sst [smem:[#allocation32_spill]] %s5873_s11  ;;  %s5875_s5 = spop %4805 }
 0x2e7   : > { %1149 = vst.msk [vmem:[#allocation2 + $0x8] sm:$0x7f] %vm1148_vm0, %v1145_v63  ;;  %s5877_s6 = spop %4807 }
 0x2e8   : > { %v1179_v30 = vpop.permute.xlu1 %1178  ;;  %v1153_v31 = vpop.permute.xlu0 %1152  ;;  %s5879_s24 = spop %4809 }
 0x2e9   : > { %s5881_s7 = spop %4811 }
 0x2ea   : > { %s5883_s25 = spop %4813 }
 0x2eb   : > { %s5885_s21 = spop %4815 }
 0x2ec   : > { %v3934_v10 = vpop.permute.xlu1 %3933  ;;  %v4006_v11 = vpop.permute.xlu0 %4005  ;;  %s5887_s0 = spop %4817 }
 0x2ed   : > { %4971 = vpush %v3934_v10  ;;  %s5889_s20 = spop %4819 }
 0x2ee   : > { %v1151_v5 = vld [vmem:[#allocation2 + $0x9] sm:$0x7f]  ;;  %v1150_v6 = vld [vmem:[#allocation2 + $0x1] sm:$0xff]  ;;  %4973 = vpush %v5593_v61  ;;  %s5891_s15 = spop %4821 }
 0x2ef   : > { %v1159_v7 = vadd.f32 %v1155_v1, %v1151_v5  ;;  %v1158_v8 = vadd.f32 %v1153_v31, %v1150_v6  ;;  %4975 = vpush %v3966_v4  ;;  %s5893_s2 = spop %4823 }
 0x2f0   : > { %v3986_v13 = vpop.permute.xlu1 %3985  ;;  %v1165_v15 = vpop.permute.xlu0 %1164  ;;  %s5895_s11 = spop %4825 }
 0x2f1   : > { %1161 = vst.msk [vmem:[#allocation2 + $0x9] sm:$0x7f] %vm1148_vm0, %v1159_v7  ;;  %8957 = sst [smem:[#allocation33_spill]] %s5895_s11  ;;  %s5897_s29 = spop %4827 }
 0x2f2   : > { %1160 = vst.msk [vmem:[#allocation2 + $0x1] sm:$0xff] %vm1146_vm15, %v1158_v8  ;;  %8958 = sst [smem:[#allocation34_spill]] %s5897_s29  ;;  %s5899_s28 = spop %4829 }
 0x2f3   : > { %4977 = vpush %v3986_v13  ;;  %8959 = sst [smem:[#allocation35_spill]] %s5899_s28  ;;  %s5901_s16 = spop %4831 }
 0x2f4   : > { %4979 = vpush %v4006_v11  ;;  %v4023_v19 = vpop.permute.xlu1 %4022  ;;  %v4047_v21 = vpop.permute.xlu0 %4046  ;;  %8960 = sst [smem:[#allocation36_spill]] %s5901_s16  ;;  %s5903_s14 = spop %4833 }
 0x2f5   : > { %4981 = vpush %v4023_v19  ;;  %8961 = sst [smem:[#allocation37_spill]] %s5903_s14  ;;  %s5905_s3 = spop %4835 }
 0x2f6   : > { %4983 = vpush %v4047_v21  ;;  %8962 = sst [smem:[#allocation38_spill]] %s5905_s3  ;;  %s5907_s19 = spop %4837 }
 0x2f7   : > { %8963 = sst [smem:[#allocation39_spill]] %s5907_s19  ;;  %s5909_s4 = spop %4839 }
 0x2f8   : > { %v1163_v16 = vld [vmem:[#allocation2 + $0xa] sm:$0x7f]  ;;  %v4071_v22 = vpop.permute.xlu1 %4070  ;;  %v4088_v23 = vpop.permute.xlu0 %4087  ;;  %8964 = sst [smem:[#allocation40_spill]] %s5909_s4  ;;  %s5911_s1 = spop %4841 }
 0x2f9   : > { %v1162_v9 = vld [vmem:[#allocation2 + $0x2] sm:$0xff]  ;;  %v1171_v17 = vadd.f32 %v1167_v33, %v1163_v16  ;;  %4985 = vpush %v4071_v22  ;;  %8965 = sst [smem:[#allocation41_spill]] %s5911_s1  ;;  %s5913_s8 = spop %4843 }
 0x2fa   : > { %v1170_v18 = vadd.f32 %v1165_v15, %v1162_v9  ;;  %4987 = vpush %v4088_v23  ;;  %8966 = sst [smem:[#allocation42_spill]] %s5913_s8  ;;  %s5915_s17 = spop %4845 }
 0x2fb   : > { %1173 = vst.msk [vmem:[#allocation2 + $0xa] sm:$0x7f] %vm1148_vm0, %v1171_v17  ;;  %8967 = sst [smem:[#allocation43_spill]] %s5915_s17  ;;  %s5917_s11 = spop %4847 }
 0x2fc   : > { %1172 = vst.msk [vmem:[#allocation2 + $0x2] sm:$0xff] %vm1146_vm15, %v1170_v18  ;;  %v4112_v34 = vpop.permute.xlu1 %4111  ;;  %v1177_v24 = vpop.permute.xlu0 %1176  ;;  %8968 = sst [smem:[#allocation44_spill]] %s5917_s11  ;;  %s5919_s29 = spop %4849 }
 0x2fd   : > { %4989 = vpush %v4112_v34  ;;  %8969 = sst [smem:[#allocation45_spill]] %s5919_s29  ;;  %s5921_s28 = spop %4851 }
 0x2fe   : > { %4991 = vpush %v5635_v26  ;;  %8970 = sst [smem:[#allocation46_spill]] %s5921_s28  ;;  %s5923_s16 = spop %4853 }
 0x2ff   : > { %8971 = sst [smem:[#allocation47_spill]] %s5923_s16  ;;  %s5925_s14 = spop %4855 }
 0x300   : > { %v4144_v32 = vpop.permute.xlu0 %4143  ;;  %v1268_v35 = vpop.permute.xlu1 %1267  ;;  %8972 = sst [smem:[#allocation48_spill]] %s5925_s14  ;;  %s5927_s3 = spop %4857 }
 0x301   : > { %4993 = vpush %v4144_v32  ;;  %8973 = sst [smem:[#allocation49_spill]] %s5927_s3  ;;  %s5929_s19 = spop %4859 }
 0x302   : > { %v1175_v61 = vld [vmem:[#allocation2 + $0xb] sm:$0x7f]  ;;  %8974 = sst [smem:[#allocation50_spill]] %s5929_s19  ;;  %s5931_s4 = spop %4861 }
 0x303   : > { %v1174_v27 = vld [vmem:[#allocation2 + $0x3] sm:$0xff]  ;;  %v1183_v28 = vadd.f32 %v1179_v30, %v1175_v61  ;;  %8975 = sst [smem:[#allocation51_spill]] %s5931_s4  ;;  %s5933_s1 = spop %4863 }
 0x304   : > { %v1182_v29 = vadd.f32 %v1177_v24, %v1174_v27  ;;  %v4164_v36 = vpop.permute.xlu1 %4163  ;;  %v1266_v20 = vpop.permute.xlu0 %1265  ;;  %8976 = sst [smem:[#allocation52_spill]] %s5933_s1  ;;  %s5935_s8 = spop %4865 }
 0x305   : > { %1185 = vst.msk [vmem:[#allocation2 + $0xb] sm:$0x7f] %vm1148_vm0, %v1183_v28  ;;  %8977 = sst [smem:[#allocation53_spill]] %s5935_s8  ;;  %s5937_s17 = spop %4867 }
 0x306   : > { %1184 = vst.msk [vmem:[#allocation2 + $0x3] sm:$0xff] %vm1146_vm15, %v1182_v29  ;;  %8978 = sst [smem:[#allocation54_spill]] %s5937_s17  ;;  %s5939_s11 = spop %4869 }
 0x307   : > { %4995 = vpush %v4164_v36  ;;  %8979 = sst [smem:[#allocation55_spill]] %s5939_s11  ;;  %s5941_s29 = spop %4871 }
 0x308   : > { %v1282_v42 = vpop.permute.xlu1 %1281  ;;  %v4184_v43 = vpop.permute.xlu0 %4183  ;;  %8980 = sst [smem:[#allocation56_spill]] %s5941_s29  ;;  %s5943_s28 = spop %4873 }
 0x309   : > { %4997 = vpush %v4184_v43  ;;  %8981 = sst [smem:[#allocation57_spill]] %s5943_s28  ;;  %s5945_s16 = spop %4875 }
 0x30a   : > { %8982 = sst [smem:[#allocation58_spill]] %s5945_s16  ;;  %s5947_s14 = spop %4877 }
 0x30b   : > { %8983 = sst [smem:[#allocation59_spill]] %s5947_s14  ;;  %s5949_s3 = spop %4879 }
 0x30c   : > { %v1294_v2 = vpop.permute.xlu1 %1293  ;;  %v4225_v12 = vpop.permute.xlu0 %4224  ;;  %8984 = sst [smem:[#allocation60_spill]] %s5949_s3  ;;  %s5951_s19 = spop %4881 }
 0x30d   : > { %v1262_v38 = vld [vmem:[#allocation2 + $0x8] sm:$0x7f]  ;;  %v1261_v40 = vld [vmem:[#allocation2] sm:$0xff]  ;;  %8985 = sst [smem:[#allocation61_spill]] %s5951_s19  ;;  %s5953_s4 = spop %4883 }
 0x30e   : > { %v1272_v41 = vadd.f32 %v1268_v35, %v1262_v38  ;;  %v1271_v26 = vadd.f32 %v1266_v20, %v1261_v40  ;;  %8986 = sst [smem:[#allocation62_spill]] %s5953_s4  ;;  %s5955_s1 = spop %4885 }
 0x30f   : > { %8987 = sst [smem:[#allocation63_spill]] %s5955_s1  ;;  %s5957_s8 = spop %4887 }
 0x310   : > { %1274 = vst.msk [vmem:[#allocation2] sm:$0xff] %vm1273_vm1, %v1271_v26  ;;  %v4201_v45 = vpop.permute.xlu1 %4200  ;;  %v1280_v46 = vpop.permute.xlu0 %1279  ;;  %8988 = sst [smem:[#allocation64_spill]] %s5957_s8  ;;  %s5959_s17 = spop %4889 }
 0x311   : > { %1276 = vst.msk [vmem:[#allocation2 + $0x8] sm:$0x7f] %vm1275_vm3, %v1272_v41  ;;  %8989 = sst [smem:[#allocation65_spill]] %s5959_s17  ;;  %s5961_s11 = spop %4891 }
 0x312   : > { %4999 = vpush %v4201_v45  ;;  %8990 = sst [smem:[#allocation66_spill]] %s5961_s11  ;;  %s5963_s29 = spop %4893  ;;  %v6040_v45 = vstv %s5769_s27 }
 0x313   : > { %5001 = vpush %v4225_v12  ;;  %8991 = sst [smem:[#allocation67_spill]] %s5963_s29  ;;  %s5965_s28 = spop %4895 }
 0x314   : > { %v4249_v50 = vpop.permute.xlu1 %4248  ;;  %v4266_v51 = vpop.permute.xlu0 %4265  ;;  %8992 = sst [smem:[#allocation68_spill]] %s5965_s28  ;;  %s5967_s16 = spop %4897 }
 0x315   : > { %5003 = vpush %v4249_v50  ;;  %8993 = sst [smem:[#allocation69_spill]] %s5967_s16  ;;  %s5969_s14 = spop %4899  ;;  %v2387_v50 = vstv %s5883_s25 }
 0x316   : > { %5005 = vpush %v4266_v51  ;;  %8994 = sst [smem:[#allocation70_spill]] %s5969_s14  ;;  %s5971_s3 = spop %4901  ;;  %v6057_v51 = vstv %s5785_s12 }
 0x317   : > { %8995 = sst [smem:[#allocation71_spill]] %s5971_s3  ;;  %s5973_s19 = spop %4903 }
 0x318   : > { %v1278_v44 = vld [vmem:[#allocation2 + $0x9] sm:$0x7f]  ;;  %v1277_v37 = vld [vmem:[#allocation2 + $0x1] sm:$0xff]  ;;  %v4290_v52 = vpop.permute.xlu1 %4289  ;;  %v1292_v53 = vpop.permute.xlu0 %1291  ;;  %8996 = sst [smem:[#allocation72_spill]] %s5973_s19  ;;  %s5975_s4 = spop %4905 }
 0x319   : > { %v1286_v47 = vadd.f32 %v1282_v42, %v1278_v44  ;;  %v1285_v48 = vadd.f32 %v1280_v46, %v1277_v37  ;;  %5007 = vpush %v4290_v52  ;;  %8997 = sst [smem:[#allocation73_spill]] %s5975_s4  ;;  %s5977_s1 = spop %4907  ;;  %v1731_v42 = vstv %s5779_s9  ;;  %v6037_v44 = vstv %s5764_s26 }
 0x31a   : > { %5009 = vpush %v5675_v49  ;;  %8998 = sst [smem:[#allocation74_spill]] %s5977_s1  ;;  %s5979_s8 = spop %4909  ;;  %v1666_v46 = vstv %s5771_s30  ;;  %v6047_v37 = vstv %s5773_s18  ;;  %v8770_v52 = vstv %s5875_s5 }
 0x31b   : > { %1288 = vst.msk [vmem:[#allocation2 + $0x9] sm:$0x7f] %vm1275_vm3, %v1286_v47  ;;  %8999 = sst [smem:[#allocation75_spill]] %s5979_s8  ;;  %s5981_s17 = spop %4911  ;;  %v6050_v47 = vstv %s5777_s10 }
 0x31c   : > { %1287 = vst.msk [vmem:[#allocation2 + $0x1] sm:$0xff] %vm1273_vm1, %v1285_v48  ;;  %v4342_v58 = vpop.permute.xlu1 %4341  ;;  %v4322_v59 = vpop.permute.xlu0 %4321  ;;  %9000 = sst [smem:[#allocation76_spill]] %s5981_s17  ;;  %s5983_s11 = spop %4913  ;;  %v6053_v48 = vstv %s5783_s13 }
 0x31d   : > { %5011 = vpush %v4322_v59  ;;  %9001 = sst [smem:[#allocation77_spill]] %s5983_s11  ;;  %s5985_s29 = spop %4915  ;;  %v8771_v59 = vstv %s5877_s6 }
 0x31e   : > { %5013 = vpush %v4342_v58  ;;  %9002 = sst [smem:[#allocation78_spill]] %s5985_s29  ;;  %s5987_s28 = spop %4917  ;;  %v6076_v58 = vstv %s5887_s0 }
 0x31f   : > { %9003 = sst [smem:[#allocation79_spill]] %s5987_s28  ;;  %s5989_s16 = spop %4919 }
 0x320   : > { %v4379_v60 = vpop.permute.xlu1 %4378  ;;  %v4362_v62 = vpop.permute.xlu0 %4361  ;;  %9004 = sst [smem:[#allocation80_spill]] %s5989_s16  ;;  %s5991_s14 = spop %4921 }
 0x321   : > { %5015 = vpush %v4362_v62  ;;  %9005 = sst [smem:[#allocation81_spill]] %s5991_s14  ;;  %s5993_s3 = spop %4923  ;;  %v2452_v62 = vstv %s5889_s20 }
 0x322   : > { %v1290_v54 = vld [vmem:[#allocation2 + $0xa] sm:$0x7f]  ;;  %5017 = vpush %v4379_v60  ;;  %s5995_s19 = spop %4925  ;;  %s5101_s28 = smov 92   ;;  %v6080_v60 = vstv %s5891_s15 }
 0x323   : > { %v1289_v55 = vld [vmem:[#allocation2 + $0x2] sm:$0xff]  ;;  %v1298_v56 = vadd.f32 %v1294_v2, %v1290_v54  ;;  %9006 = sst [smem:[#allocation82_spill]] %s5995_s19  ;;  %s5997_s4 = spop %4927 }
 0x324   : > { %v1297_v57 = vadd.f32 %v1292_v53, %v1289_v55  ;;  %v4427_v63 = vpop.permute.xlu1 %4426  ;;  %v4403_v0 = vpop.permute.xlu0 %4402  ;;  %9007 = sst [smem:[#allocation83_spill]] %s5997_s4  ;;  %s5999_s1 = spop %4929  ;;  %v6067_v55 = vstv %s5879_s24 }
 0x325   : > { %1300 = vst.msk [vmem:[#allocation2 + $0xa] sm:$0x7f] %vm1275_vm3, %v1298_v56  ;;  %9008 = sst [smem:[#allocation84_spill]] %s5999_s1  ;;  %s6001_s8 = spop %4931  ;;  %v6070_v56 = vstv %s5881_s7 }
 0x326   : > { %1299 = vst.msk [vmem:[#allocation2 + $0x2] sm:$0xff] %vm1273_vm1, %v1297_v57  ;;  %9009 = sst [smem:[#allocation85_spill]] %s6001_s8  ;;  %s6003_s11 = spop %4933  ;;  %v6073_v57 = vstv %s5885_s21 }
 0x327   : > { %5019 = vpush %v4403_v0  ;;  %9010 = sst [smem:[#allocation86_spill]] %s6003_s11  ;;  %s6005_s29 = spop %4935 }
 0x328   : > { %5021 = vpush %v4427_v63  ;;  %v4444_v4 = vpop.permute.xlu0 %4443  ;;  %v1389_v5 = vpop.permute.xlu1 %1388  ;;  %9011 = sst [smem:[#allocation87_spill]] %s6005_s29  ;;  %s5102_s14 = smov 110  }
 0x329   : > { %5023 = vpush %v4444_v4  ;;  %s6008_s16 = spop %4937  ;;  %s5103_s8 = smov 74  }
 0x32a   : > { %9012 = sst [smem:[#allocation88_spill]] %s6008_s16  ;;  %s6010_s4 = spop %4939 }
 0x32b   : > { %9013 = sst [smem:[#allocation89_spill]] %s6010_s4  ;;  %s6013_s29 = spop %4941 }
 0x32c   : > { %v1302_v1 = vld [vmem:[#allocation2 + $0xb] sm:$0x7f]  ;;  %v4468_v30 = vpop.permute.xlu1 %4467  ;;  %v1387_v31 = vpop.permute.xlu0 %1386  ;;  %s6015_s11 = spop %4943  ;;  %s9020_s26 = sld [smem:[#allocation60_spill]] }
 0x32d   : > { %v1301_v49 = vld [vmem:[#allocation2 + $0x3] sm:$0xff]  ;;  %v1304_v33 = vadd.f32 %v5630_v25, %v1302_v1  ;;  %5025 = vpush %v4468_v30  ;;  %9014 = sst [smem:[#allocation90_spill]] %s6015_s11  ;;  %s6017_s16 = spop %4945 }
 0x32e   : > { %v1303_v3 = vadd.f32 %v1301_v49, %v5642_v39  ;;  %9015 = sst [smem:[#allocation91_spill]] %s6017_s16  ;;  %s6020_s4 = spop %4947  ;;  %v6086_v49 = vstv %s5893_s2 }
 0x32f   : > { %1306 = vst.msk [vmem:[#allocation2 + $0xb] sm:$0x7f] %vm1275_vm3, %v1304_v33  ;;  %9016 = sst [smem:[#allocation92_spill]] %s6020_s4  ;;  %s6022_s19 = spop %4949 }
 0x330   : > { %1305 = vst.msk [vmem:[#allocation2 + $0x3] sm:$0xff] %vm1273_vm1, %v1303_v3  ;;  %v1403_v8 = vpop.permute.xlu1 %1402  ;;  %v1401_v11 = vpop.permute.xlu0 %1400  ;;  %9017 = sst [smem:[#allocation93_spill]] %s6022_s19  ;;  %s6027_s16 = spop %4951 }
 0x331   : > { %9018 = sst [smem:[#allocation94_spill]] %s6027_s16  ;;  %s6029_s11 = spop %4953 }
 0x332   : > { %s9021_s27 = sld [smem:[#allocation67_spill]]  ;;  %s9027_s19 = smov 127  }
 0x333   : > { %s9022_s18 = sld [smem:[#allocation61_spill]] }
 0x334   : > { %v1415_v9 = vpop.permute.xlu1 %1414  ;;  %v1413_v18 = vpop.permute.xlu0 %1412  ;;  %s9023_s10 = sld [smem:[#allocation62_spill]] }
 0x335   : > { %s9024_s13 = sld [smem:[#allocation63_spill]] }
 0x336   : > { %s9026_s16 = sld [smem:[#allocation65_spill]] }
 0x337   : > { %v1383_v39 = vld [vmem:[#allocation2 + $0x8] sm:$0x7f]  ;;  %v1382_v25 = vld [vmem:[#allocation2] sm:$0xff]  ;;  %s9028_s4 = sld [smem:[#allocation66_spill]] }
 0x338   : > { %v1393_v6 = vadd.f32 %v1389_v5, %v1383_v39  ;;  %v1392_v7 = vadd.f32 %v1387_v31, %v1382_v25  ;;  %v1427_v23 = vpop.permute.xlu1 %1426  ;;  %v1425_v34 = vpop.permute.xlu0 %1424  ;;  %s9029_s24 = sld [smem:[#allocation68_spill]]  ;;  %v3174_v0 = vstv %s9021_s27 }
 0x339   : > { %s9030_s7 = sld [smem:[#allocation69_spill]] }
 0x33a   : > { %1395 = vst.msk [vmem:[#allocation2] sm:$0xff] %vm1394_vm4, %v1392_v7  ;;  %v6094_v3 = vstv %s9023_s10  ;;  %s9067_s25 = sld [smem:[#allocation9_spill]] }
 0x33b   : > { %1397 = vst.msk [vmem:[#allocation2 + $0x8] sm:$0x7f] %vm1396_vm6, %v1393_v6  ;;  %v6099_v5 = vstv %s9024_s13  ;;  %s9073_s20 = sld [smem:[#allocation18_spill]] }
 0x33c   : > { %v6103_v39 = vstv %s9026_s16  ;;  %s9076_s9 = sld [smem:[#allocation30_spill]] }
 0x33d   : > { %v6106_v31 = vstv %s9028_s4  ;;  %s9077_s16 = sld [smem:[#allocation36_spill]] }
 0x33e   : > { %v6111_v6 = vstv %s9029_s24  ;;  %s9078_s21 = sld [smem:[#allocation39_spill]] }
 0x33f   : > { %v6114_v7 = vstv %s9030_s7  ;;  %s9082_s27 = sld [smem:[#allocation54_spill]] }
 0x340   : > { %9031 = vst [vmem:[#allocation95_spill] sm:$0xff] %v6114_v7 }
 0x342   : > { %v1399_v10 = vld [vmem:[#allocation2 + $0x9] sm:$0x7f]  ;;  %v1398_v13 = vld [vmem:[#allocation2 + $0x1] sm:$0xff] }
 0x343   : > { %v1407_v15 = vadd.f32 %v1403_v8, %v1399_v10  ;;  %v1406_v16 = vadd.f32 %v1401_v11, %v1398_v13 }
 0x345   : > { %1409 = vst.msk [vmem:[#allocation2 + $0x9] sm:$0x7f] %vm1396_vm6, %v1407_v15 }
 0x346   : > { %1408 = vst.msk [vmem:[#allocation2 + $0x1] sm:$0xff] %vm1394_vm4, %v1406_v16 }
 0x34c   : > { %v1411_v17 = vld [vmem:[#allocation2 + $0xa] sm:$0x7f] }
 0x34d   : > { %v1410_v19 = vld [vmem:[#allocation2 + $0x2] sm:$0xff]  ;;  %v1419_v21 = vadd.f32 %v1415_v9, %v1411_v17 }
 0x34e   : > { %v1418_v22 = vadd.f32 %v1413_v18, %v1410_v19 }
 0x34f   : > { %1421 = vst.msk [vmem:[#allocation2 + $0xa] sm:$0x7f] %vm1396_vm6, %v1419_v21 }
 0x350   : > { %1420 = vst.msk [vmem:[#allocation2 + $0x2] sm:$0xff] %vm1394_vm4, %v1418_v22 }
 0x356   : > { %v1423_v61 = vld [vmem:[#allocation2 + $0xb] sm:$0x7f] }
 0x357   : > { %v1422_v24 = vld [vmem:[#allocation2 + $0x3] sm:$0xff]  ;;  %v1431_v27 = vadd.f32 %v1427_v23, %v1423_v61 }
 0x358   : > { %v1430_v28 = vadd.f32 %v1425_v34, %v1422_v24 }
 0x359   : > { %1433 = vst.msk [vmem:[#allocation2 + $0xb] sm:$0x7f] %vm1396_vm6, %v1431_v27 }
 0x35a   : > { %1432 = vst.msk [vmem:[#allocation2 + $0x3] sm:$0xff] %vm1394_vm4, %v1430_v28 }
 0x360   : > { %v1436_v35 = vld [vmem:[#allocation2 + $0x10] sm:$0x3] }
 0x361   : > { %v1434_v29 = vld [vmem:[#allocation2] sm:$0xff]  ;;  %v1435_v32 = vld [vmem:[#allocation2 + $0x8] sm:$0xff] }
 0x362   : > { %4723 = vmatmul.mubr.msk.f32.vlgmr.msra.gmra.mxu0 %vm428_vm2, %v1434_v29 }
 0x363   : > { %4725 = vmatprep.mubr.msk.f32.mxu0 %vm5100_vm14, %v5085_v14 }
 0x366   : > { %4726 = vmatmul.mubr.msk.f32.gmra.mxu0 %vm428_vm2, %v1435_v32 }
 0x367   : > { %4728 = vmatprep.mubr.msk.f32.mxu0 %vm5100_vm14, %v5085_v14 }
 0x36a   : > { %4729 = vmatmul.mubr.msk.f32.gmra.mxu0 %vm428_vm2, %v1436_v35  ;;  %vm1538_vm2 = vcmask 140288  }
 0x36b   : > { %1539 = vst.msk [vmem:[#allocation3 + $0x10] sm:$0x3] %vm1538_vm2, %v5085_v14  ;;  %1542 = vst.msk [vmem:[#allocation3 + $0x28] sm:$0x3] %vm1538_vm2, %v5085_v14 }
 0x36c   : > { %1545 = vst.msk [vmem:[#allocation3 + $0x40] sm:$0x3] %vm1538_vm2, %v5085_v14  ;;  %1548 = vst.msk [vmem:[#allocation3 + $0x58] sm:$0x3] %vm1538_vm2, %v5085_v14 }
 0x422   : > { %v1521_v14 = vpop.f32.mrf.mxu0 }
 0x423   : > { %1550 = vst.msk [vmem:[#allocation3] sm:$0xfe] %vm1549_vm8, %v1521_v14  ;;  %1571 = vrot.lane.b32.xlu1 %v1521_v14, %s5101_s28  ;;  %1558 = vrot.lane.b32.xlu0 %v1521_v14, %s5102_s14 }
 0x424   : > { %v4724_v36 = vpop.f32.mrf.mxu0 }
 0x426   : > { %v1526_v20 = vpop.f32.mrf.mxu0 }
 0x427   : > { %1552 = vst.msk [vmem:[#allocation3 + $0x8] sm:$0xff] %vm1551_vm9, %v1526_v20  ;;  %1584 = vrot.lane.b32.xlu0 %v1521_v14, %s5103_s8  ;;  %1560 = vrot.lane.b32.xlu1 %v1526_v20, %s5102_s14 }
 0x428   : > { %v4727_v38 = vpop.f32.mrf.mxu0 }
 0x42a   : > { %v1531_v40 = vpop.f32.mrf.mxu0  ;;  %v6024_v26 = vld [vmem:[#allocation3] sm:$0xff] }
 0x42b   : > { %1554 = vst.msk [vmem:[#allocation3 + $0x10] sm:$0x1] %vm1553_vm10, %v1531_v40  ;;  %1573 = vrot.lane.b32.xlu0 %v1526_v20, %s5101_s28  ;;  %1586 = vrot.lane.b32.xlu1 %v1526_v20, %s5103_s8  ;;  %v1732_v43 = vmul.f32 %v1731_v42, %v6024_v26  ;;  %v2388_v53 = vmul.f32 %v2387_v50, %v6024_v26 }
 0x42c   : > { %v4730_v41 = vpop.f32.mrf.mxu0  ;;  %v1667_v54 = vmul.f32 %v1666_v46, %v6024_v26  ;;  %v3175_v33 = vmul.f32 %v3174_v0, %v6024_v26  ;;  %v2453_v4 = vmul.f32 %v2452_v62, %v6024_v26  ;;  %v1684_v22 = vmul.f32 %v6047_v37, %v6024_v26 }
 0x42d   : > { %v1773_v23 = vmul.f32 %v6057_v51, %v6024_v26  ;;  %v1708_v61 = vmul.f32 %v6050_v47, %v6024_v26  ;;  %v2429_v34 = vmul.f32 %v6076_v58, %v6024_v26  ;;  %v1749_v24 = vmul.f32 %v6053_v48, %v6024_v26 }
 0x42e   : > { %v6108_v25 = vld [vmem:[#allocation3 + $0x8] sm:$0xff]  ;;  %v2470_v27 = vmul.f32 %v6080_v60, %v6024_v26  ;;  %v2405_v28 = vmul.f32 %v6073_v57, %v6024_v26  ;;  %v2494_v8 = vmul.f32 %v6086_v49, %v6024_v26 }
 0x42f   : > { %1575 = vrot.lane.b32.xlu1 %v1531_v40, %s5101_s28  ;;  %1562 = vrot.lane.b32.xlu0 %v1531_v40, %s5102_s14  ;;  %s6043_s14 = spop %4955  ;;  %s9019_s28 = smov 126   ;;  %v1668_v9 = vmul.f32 %v1666_v46, %v6108_v25  ;;  %v2454_v29 = vmul.f32 %v2452_v62, %v6108_v25  ;;  %v6154_v35 = vmul.f32 %v6047_v37, %v6108_v25  ;;  %v1690_v46 = vrot.slane %v1684_v22, 1 }
 0x430   : > { %s6060_s30 = spop %4957  ;;  %v6158_v14 = vmul.f32 %v6057_v51, %v6108_v25  ;;  %v1733_v20 = vmul.f32 %v1731_v42, %v6108_v25  ;;  %v6166_v38 = vmul.f32 %v6050_v47, %v6108_v25  ;;  %v6180_v42 = vmul.f32 %v6053_v48, %v6108_v25 }
 0x431   : > { %s4960_s12 = spop %4959  ;;  %v6123_v11 = vstv %s6060_s30  ;;  %v6187_v62 = vmul.f32 %v6080_v60, %v6108_v25  ;;  %v2476_v10 = vrot.slane %v2470_v27, 1  ;;  %v2411_v12 = vrot.slane %v2405_v28, 1  ;;  %s9083_s30 = sld [smem:[#allocation57_spill]] }
 0x432   : > { %s6090_s0 = spop %4961  ;;  %v6125_v13 = vstv %s4960_s12  ;;  %v8767_v22 = vrot.slane %v6180_v42, 1  ;;  %v6248_v28 = vld [vmem:[#allocation3 + $0x10] sm:$0x3] }
 0x433   : > { %1736 = vrot.lane.b32.xlu1 %v1732_v43, %s9019_s28  ;;  %1588 = vrot.lane.b32.xlu0 %v1531_v40, %s5103_s8  ;;  %s9025_s8 = sld [smem:[#allocation64_spill]]  ;;  %s4964_s15 = spop %4963  ;;  %v3831_v15 = vstv %s6090_s0  ;;  %v6170_v40 = vmul.f32 %v6076_v58, %v6108_v25  ;;  %v2389_v43 = vmul.f32 %v2387_v50, %v6108_v25  ;;  %9032 = vst [vmem:[#allocation96_spill] sm:$0xff] %v6187_v62  ;;  %v8761_v50 = vrot.slane %v6158_v14, 2 }
 0x434   : > { %s6116_s2 = spop %4965  ;;  %v6130_v18 = vstv %s4964_s15  ;;  %v3832_v19 = vmul.f32 %v3831_v15, %v6024_v26  ;;  %v3833_v36 = vmul.f32 %v3831_v15, %v6108_v25  ;;  %v6197_v15 = vmul.f32 %v6103_v39, %v6108_v25 }
 0x435   : > { %s4968_s4 = spop %4967 }
 0x436   : > { %v3896_v16 = vstv %s4968_s4  ;;  %9033 = vst [vmem:[#allocation97_spill] sm:$0xff] %v6197_v15  ;;  %v8762_v63 = vrot.slane %v6197_v15, 1  ;;  %v9037_v15 = vstv %s5762_s23 }
 0x437   : > { %2392 = vrot.lane.b32.xlu1 %v2388_v53, %s9027_s19  ;;  %1671 = vrot.lane.b32.xlu0 %v1667_v54, %s9027_s19  ;;  %v3897_v21 = vmul.f32 %v3896_v16, %v6024_v26  ;;  %v3898_v41 = vmul.f32 %v3896_v16, %v6108_v25  ;;  %v6183_v53 = vmul.f32 %v3174_v0, %v6108_v25  ;;  %v1779_v54 = vrot.slane %v1773_v23, 2 }
 0x438   : > { %v8769_v0 = vrot.slane %v6166_v38, 2  ;;  %v2435_v16 = vrot.slane %v2429_v34, 2  ;;  %v3127_v23 = vmul.f32 %v6103_v39, %v6024_v26  ;;  %v8763_v34 = vrot.slane %v6187_v62, 1 }
 0x439   : > { %v3109_v30 = vstv %s9025_s8 }
 0x43a   : > { %v3110_v17 = vmul.f32 %v3109_v30, %v6024_v26  ;;  %v3111_v32 = vmul.f32 %v3109_v30, %v6108_v25  ;;  %v1714_v30 = vrot.slane %v1708_v61, 2  ;;  %v6212_v61 = vmul.f32 %v6114_v7, %v6108_v25 }
 0x43b   : > { %3179 = vrot.lane.b32.xlu1 %v3175_v33, %s9019_s28  ;;  %2457 = vrot.lane.b32.xlu0 %v2453_v4, %s9019_s28  ;;  %v6191_v33 = vmul.f32 %v6073_v57, %v6108_v25  ;;  %v8764_v4 = vrot.slane %v6154_v35, 1 }
 0x43c   : > { %9034 = vst [vmem:[#allocation98_spill] sm:$0xff] %v6212_v61  ;;  %v1716_v1 = vsel %vm1652_vm12, %v1714_v30, %v8769_v0  ;;  %v8768_v30 = vrot.slane %v6212_v61, 2 }
 0x43f   : > { %1673 = vrot.lane.b32.xlu1 %v1668_v9, %s9027_s19  ;;  %3114 = vrot.lane.b32.xlu0 %v3110_v17, %s9027_s19  ;;  %v8760_v9 = vrot.slane %v6170_v40, 2  ;;  %v6203_v17 = vmul.f32 %v6086_v49, %v6108_v25 }
 0x441   : > { %v6233_v2 = vsel %vm1652_vm12, %v2435_v16, %v8760_v9  ;;  %v6246_v16 = vmul.f32 %v6106_v31, %v6024_v26 }
 0x443   : > { %2459 = vrot.lane.b32.xlu1 %v2454_v29, %s9019_s28  ;;  %3836 = vrot.lane.b32.xlu0 %v3832_v19, %s9027_s19  ;;  %v1755_v19 = vrot.slane %v1749_v24, 1  ;;  %v8766_v29 = vrot.slane %v6191_v33, 1  ;;  %v1692_v24 = vsel %vm1631_vm11, %v1690_v46, %v8764_v4  ;;  %v8765_v46 = vrot.slane %v6203_v17, 2 }
 0x444   : > { %v6301_v4 = vmul.f32 %v6050_v47, %v6248_v28  ;;  %v9035_v47 = vstv %s5762_s23  ;;  %s9075_s23 = sld [smem:[#allocation27_spill]] }
 0x445   : > { %v6241_v27 = vsel %vm1631_vm11, %v1755_v19, %v8767_v22  ;;  %v2500_v19 = vrot.slane %v2494_v8, 2  ;;  %v1615_v0 = vmul.f32 %v9035_v47, %v6024_v26 }
 0x447   : > { %3116 = vrot.lane.b32.xlu1 %v3111_v32, %s9027_s19  ;;  %3901 = vrot.lane.b32.xlu0 %v3897_v21, %s9019_s28  ;;  %v3216_v21 = vmul.f32 %v6114_v7, %v6024_v26  ;;  %v1781_v32 = vsel %vm1652_vm12, %v1779_v54, %v8761_v50  ;;  %v3133_v54 = vrot.slane %v3127_v23, 1  ;;  %v6267_v50 = vmul.f32 %v6106_v31, %v6108_v25 }
 0x448   : > { %v6279_v8 = vsel %vm1652_vm12, %v2500_v19, %v8765_v46  ;;  %v1616_v7 = vmul.f32 %v9037_v15, %v6108_v25 }
 0x449   : > { %v3222_v23 = vrot.slane %v3216_v21, 2  ;;  %v6263_v9 = vsel %vm1631_vm11, %v3133_v54, %v8762_v63  ;;  %v6283_v21 = vmul.f32 %v6111_v6, %v6024_v26  ;;  %v2348_v54 = vmul.f32 %v6067_v55, %v6024_v26 }
 0x44a   : > { %v6289_v63 = vmul.f32 %v6067_v55, %v6108_v25 }
 0x44b   : > { %3838 = vrot.lane.b32.xlu1 %v3833_v36, %s9027_s19  ;;  %1738 = vrot.lane.b32.xlu0 %v1733_v20, %s9019_s28  ;;  %v6253_v36 = vsel %vm1631_vm11, %v2476_v10, %v8763_v34  ;;  %v6258_v20 = vsel %vm1631_vm11, %v2411_v12, %v8766_v29  ;;  %v6271_v10 = vmul.f32 %v6111_v6, %v6108_v25  ;;  %v2354_v29 = vrot.slane %v2348_v54, 1 }
 0x44c   : > { %v2338_v12 = vmul.f32 %v8771_v59, %v6024_v26  ;;  %v6296_v19 = vsel %vm1652_vm12, %v3222_v23, %v8768_v30  ;;  %v8773_v22 = vrot.slane %v6289_v63, 1  ;;  %v1626_v59 = vmul.f32 %v6037_v44, %v6108_v25 }
 0x44d   : > { %v9036_v30 = vstv %s5760_s22 }
 0x44e   : > { %v2340_v46 = vadd.f32 %v2338_v12, %v8770_v52  ;;  %v1625_v12 = vmul.f32 %v6037_v44, %v6024_v26  ;;  %v2356_v54 = vsel %vm1631_vm11, %v2354_v29, %v8773_v22  ;;  %v1617_v23 = vadd.f32 %v1615_v0, %v9036_v30 }
 0x44f   : > { %3903 = vrot.lane.b32.xlu1 %v3898_v41, %s9019_s28  ;;  %2394 = vrot.lane.b32.xlu0 %v2389_v43, %s9027_s19  ;;  %v2368_v41 = vmul.f32 %v6070_v56, %v6024_v26  ;;  %v6310_v43 = vmul.f32 %v6070_v56, %v6108_v25  ;;  %v1646_v29 = vmul.f32 %v6040_v45, %v6024_v26  ;;  %v1633_v22 = vrot.slane %v1626_v59, 1 }
 0x450   : > { %v2361_v47 = vadd.f32 %v2356_v54, %v2340_v46  ;;  %v1632_v61 = vrot.slane %v1625_v12, 1  ;;  %v1627_v0 = vmul.f32 %v6037_v44, %v6248_v28  ;;  %v1648_v30 = vmul.f32 %v6040_v45, %v6248_v28 }
 0x451   : > { %v2374_v34 = vrot.slane %v2368_v41, 2  ;;  %v8776_v52 = vrot.slane %v6310_v43, 2  ;;  %v1653_v46 = vrot.slane %v1646_v29, 2  ;;  %v9038_v59 = vstv %s5760_s22  ;;  %s9074_s22 = sld [smem:[#allocation21_spill]] }
 0x452   : > { %v1634_v12 = vsel %vm1631_vm11, %v1632_v61, %v1633_v22  ;;  %v1618_v54 = vadd.f32 %v1616_v7, %v9038_v59  ;;  %v1656_v29 = vrot.slane %v1648_v30, 2  ;;  %v3070_v44 = vmul.f32 %v6094_v3, %v6024_v26 }
 0x453   : > { %1695 = vrot.lane.b32.xlu1 %v1692_v24, %s9027_s19  ;;  %3181 = vrot.lane.b32.xlu0 %v6183_v53, %s9019_s28  ;;  %v2376_v41 = vsel %vm1652_vm12, %v2374_v34, %v8776_v52  ;;  %v1647_v24 = vmul.f32 %v6040_v45, %v6108_v25  ;;  %v9039_v52 = vstv %s9022_s18  ;;  %v1639_v15 = vadd.f32 %v1634_v12, %v1617_v23 }
 0x454   : > { %v6340_v53 = vadd.f32 %v2376_v41, %v2361_v47  ;;  %v3060_v62 = vmul.f32 %v9039_v52, %v6024_v26  ;;  %v1635_v47 = vrot.slane %v1627_v0, 1  ;;  %v9040_v61 = vstv %s9020_s26 }
 0x455   : > { %v1654_v34 = vrot.slane %v1647_v24, 2  ;;  %v3071_v7 = vmul.f32 %v6094_v3, %v6108_v25  ;;  %v3090_v52 = vmul.f32 %v6099_v5, %v6024_v26  ;;  %v3076_v30 = vrot.slane %v3070_v44, 1 }
 0x456   : > { %v3062_v41 = vadd.f32 %v3060_v62, %v9040_v61  ;;  %v1636_v23 = vsel %vm1631_vm11, %v1633_v22, %v1635_v47  ;;  %v3091_v62 = vmul.f32 %v6099_v5, %v6108_v25  ;;  %v9042_v59 = vstv %s6043_s14 }
 0x457   : > { %1784 = vrot.lane.b32.xlu1 %v1781_v32, %s9019_s28  ;;  %1719 = vrot.lane.b32.xlu0 %v1716_v1, %s9027_s19  ;;  %v1655_v45 = vsel %vm1652_vm12, %v1653_v46, %v1654_v34  ;;  %v1717_v32 = vrot.slane %v6301_v4, 2  ;;  %v1657_v24 = vsel %vm1652_vm12, %v1654_v34, %v1656_v29  ;;  %v1640_v0 = vadd.f32 %v1636_v23, %v1618_v54 }
 0x458   : > { %v6364_v1 = vadd.f32 %v1655_v45, %v1639_v15  ;;  %v3077_v46 = vrot.slane %v3071_v7, 1  ;;  %v3096_v12 = vrot.slane %v3090_v52, 2  ;;  %v3782_v22 = vmul.f32 %v9042_v59, %v6024_v26 }
 0x459   : > { %v3792_v34 = vmul.f32 %v6123_v11, %v6024_v26  ;;  %v3793_v54 = vmul.f32 %v6123_v11, %v6108_v25  ;;  %v6381_v15 = vadd.f32 %v1657_v24, %v1640_v0  ;;  %v3097_v29 = vrot.slane %v3091_v62, 2 }
 0x45a   : > { %9041 = vst [vmem:[#allocation99_spill] sm:$0xff] %v6364_v1  ;;  %v3078_v47 = vsel %vm1631_vm11, %v3076_v30, %v3077_v46  ;;  %v9043_v44 = vstv %s6029_s11  ;;  %v6390_v52 = vmul.f32 %v6130_v18, %v6108_v25  ;;  %v3813_v24 = vmul.f32 %v6125_v13, %v6108_v25 }
 0x45b   : > { %2440 = vrot.lane.b32.xlu1 %v6233_v2, %s9027_s19  ;;  %1760 = vrot.lane.b32.xlu0 %v6241_v27, %s9019_s28  ;;  %v3812_v2 = vmul.f32 %v6125_v13, %v6024_v26  ;;  %v3083_v27 = vadd.f32 %v3078_v47, %v3062_v41  ;;  %v3784_v45 = vadd.f32 %v3782_v22, %v9043_v44  ;;  %v3798_v61 = vrot.slane %v3792_v34, 1 }
 0x45c   : > { %v3799_v7 = vrot.slane %v3793_v54, 1  ;;  %v3098_v23 = vsel %vm1652_vm12, %v3096_v12, %v3097_v29  ;;  %v9044_v0 = vstv %s9022_s18  ;;  %v3072_v12 = vmul.f32 %v6094_v3, %v6248_v28  ;;  %s9085_s18 = sld [smem:[#allocation73_spill]] }
 0x45d   : > { %v3061_v30 = vmul.f32 %v9044_v0, %v6108_v25  ;;  %v6402_v41 = vadd.f32 %v3098_v23, %v3083_v27  ;;  %v3818_v59 = vrot.slane %v3812_v2, 2  ;;  %v3819_v34 = vrot.slane %v3813_v24, 2 }
 0x45e   : > { %v3800_v62 = vsel %vm1631_vm11, %v3798_v61, %v3799_v7  ;;  %v9045_v54 = vstv %s9020_s26  ;;  %v3079_v44 = vrot.slane %v3072_v12, 1  ;;  %v9046_v0 = vstv %s6043_s14  ;;  %s9079_s14 = sld [smem:[#allocation45_spill]] }
 0x45f   : > { %2481 = vrot.lane.b32.xlu1 %v6253_v36, %s9019_s28  ;;  %2416 = vrot.lane.b32.xlu0 %v6258_v20, %s9027_s19  ;;  %v3805_v22 = vadd.f32 %v3800_v62, %v3784_v45  ;;  %v3063_v47 = vadd.f32 %v3061_v30, %v9045_v54  ;;  %v3092_v36 = vmul.f32 %v6099_v5, %v6248_v28  ;;  %v9047_v61 = vstv %s5877_s6  ;;  %s9081_s26 = sld [smem:[#allocation48_spill]] }
 0x460   : > { %v3783_v20 = vmul.f32 %v9046_v0, %v6108_v25  ;;  %v3794_v27 = vmul.f32 %v6123_v11, %v6248_v28  ;;  %v3814_v2 = vmul.f32 %v6125_v13, %v6248_v28  ;;  %v3820_v3 = vsel %vm1652_vm12, %v3818_v59, %v3819_v34 }
 0x461   : > { %v3099_v45 = vrot.slane %v3092_v36, 2  ;;  %v2339_v23 = vmul.f32 %v9047_v61, %v6108_v25  ;;  %v2350_v5 = vmul.f32 %v6067_v55, %v6248_v28  ;;  %v6428_v24 = vadd.f32 %v3820_v3, %v3805_v22 }
 0x462   : > { %v3080_v11 = vsel %vm1631_vm11, %v3077_v46, %v3079_v44  ;;  %v9048_v13 = vstv %s6029_s11  ;;  %v3801_v62 = vrot.slane %v3794_v27, 1  ;;  %v3821_v54 = vrot.slane %v3814_v2, 2  ;;  %s9070_s11 = sld [smem:[#allocation12_spill]] }
 0x463   : > { %3138 = vrot.lane.b32.xlu1 %v6263_v9, %s9027_s19  ;;  %2505 = vrot.lane.b32.xlu0 %v6279_v8, %s9019_s28  ;;  %v3785_v30 = vadd.f32 %v3783_v20, %v9048_v13  ;;  %v3084_v59 = vadd.f32 %v3080_v11, %v3063_v47  ;;  %v3100_v12 = vsel %vm1652_vm12, %v3097_v29, %v3099_v45  ;;  %v9049_v36 = vstv %s5875_s5  ;;  %s4970_s5 = spop %4969 }
 0x464   : > { %v2341_v55 = vadd.f32 %v2339_v23, %v9049_v36  ;;  %v1751_v9 = vmul.f32 %v6053_v48, %v6248_v28  ;;  %v3802_v0 = vsel %vm1631_vm11, %v3799_v7, %v3801_v62  ;;  %v2357_v8 = vrot.slane %v2350_v5, 1  ;;  %s4972_s6 = spop %4971 }
 0x465   : > { %v2370_v22 = vmul.f32 %v6070_v56, %v6248_v28  ;;  %v9050_v46 = vrot.slane %v6267_v50, 2  ;;  %v9051_v44 = vrot.slane %v6246_v16, 2  ;;  %v6446_v29 = vadd.f32 %v3100_v12, %v3084_v59  ;;  %s6651_s10 = spop %4973 }
 0x466   : > { %v3806_v20 = vadd.f32 %v3802_v0, %v3785_v30  ;;  %v3822_v27 = vsel %vm1652_vm12, %v3819_v34, %v3821_v54  ;;  %v3198_v48 = vrot.slane %v6283_v21, 1  ;;  %v9052_v56 = vrot.slane %v6289_v63, 1  ;;  %s6663_s13 = spop %4975 }
 0x467   : > { %v3159_v47 = vsel %vm1652_vm12, %v9051_v44, %v9050_v46  ;;  %3227 = vrot.lane.b32.xlu1 %v6296_v19, %s9019_s28  ;;  %v2377_v2 = vrot.slane %v2370_v22, 2  ;;  %v3872_v16 = vstv %s6116_s2  ;;  %v3849_v3 = vmul.f32 %v6130_v18, %v6024_v26  ;;  %s6665_s12 = spop %4977 }
 0x468   : > { %3162 = vrot.lane.b32.xlu0 %v3159_v47, %s9027_s19  ;;  %v2358_v7 = vsel %vm1631_vm11, %v9052_v56, %v2357_v8  ;;  %v6459_v45 = vadd.f32 %v3822_v27, %v3806_v20  ;;  %v9053_v34 = vrot.slane %v6271_v10, 1  ;;  %v9054_v21 = vrot.slane %v6166_v38, 2  ;;  %s6675_s8 = spop %4979 }
 0x469   : > { %v2362_v61 = vadd.f32 %v2358_v7, %v2341_v55  ;;  %v6470_v23 = vmul.f32 %v3872_v16, %v6108_v25  ;;  %v9055_v5 = vrot.slane %v6310_v43, 2  ;;  %v3856_v13 = vrot.slane %v6390_v52, 1  ;;  %s6683_s24 = spop %4981 }
 0x46a   : > { %v3200_v19 = vsel %vm1631_vm11, %v3198_v48, %v9053_v34  ;;  %v1718_v63 = vsel %vm1652_vm12, %v9054_v21, %v1717_v32  ;;  %v1758_v30 = vrot.slane %v1751_v9, 1  ;;  %v2407_v62 = vmul.f32 %v6073_v57, %v6248_v28  ;;  %s6690_s7 = spop %4983 }
 0x46b   : > { %v2378_v11 = vsel %vm1652_vm12, %v9055_v5, %v2377_v2  ;;  %1721 = vrot.lane.b32.xlu1 %v1718_v63, %s9027_s19  ;;  %v3873_v38 = vmul.f32 %v3872_v16, %v6024_v26  ;;  %v3913_v4 = vstv %s4970_s5  ;;  %v3855_v32 = vrot.slane %v3849_v3, 1  ;;  %s6696_s0 = spop %4985  ;;  %s9117_s5 = sld [smem:[#allocation32_spill]] }
 0x46c   : > { %v6478_v59 = vadd.f32 %v2378_v11, %v2362_v61  ;;  %3203 = vrot.lane.b32.xlu0 %v3200_v19, %s9019_s28  ;;  %v3880_v43 = vrot.slane %v6470_v23, 2  ;;  %v6485_v12 = vmul.f32 %v3913_v4, %v6108_v25  ;;  %v9056_v54 = vrot.slane %v6180_v42, 1  ;;  %9086 = sst [smem:[#allocation60_spill]] %s6696_s0  ;;  %s6706_s15 = spop %4987 }
 0x46d   : > { %v3857_v52 = vsel %vm1631_vm11, %v3855_v32, %v3856_v13  ;;  %v2414_v36 = vrot.slane %v2407_v62, 1  ;;  %v2496_v55 = vmul.f32 %v6086_v49, %v6248_v28  ;;  %v3879_v9 = vrot.slane %v3873_v38, 2  ;;  %s6711_s2 = spop %4989 }
 0x46e   : > { %v1759_v57 = vsel %vm1631_vm11, %v9056_v54, %v1758_v30  ;;  %v3914_v0 = vmul.f32 %v3913_v4, %v6024_v26  ;;  %v3937_v8 = vstv %s4972_s6  ;;  %v3921_v46 = vrot.slane %v6485_v12, 1  ;;  %9088 = sst [smem:[#allocation67_spill]] %s6711_s2  ;;  %s6723_s4 = spop %4991 }
 0x46f   : > { %1762 = vrot.lane.b32.xlu1 %v1759_v57, %s9019_s28  ;;  %v3881_v22 = vsel %vm1652_vm12, %v3879_v9, %v3880_v43  ;;  %v9057_v42 = vrot.slane %v6191_v33, 1  ;;  %v2503_v47 = vrot.slane %v2496_v55, 2  ;;  %v3939_v49 = vmul.f32 %v3937_v8, %v6108_v25  ;;  %v9064_v55 = vld [vmem:[#allocation96_spill] sm:$0xff]  ;;  %9089 = sst [smem:[#allocation61_spill]] %s6723_s4 }
 0x470   : > { %3860 = vrot.lane.b32.xlu0 %v3857_v52, %s9027_s19  ;;  %v3153_v20 = vmul.f32 %v6106_v31, %v6248_v28  ;;  %v3920_v27 = vrot.slane %v3914_v0, 1  ;;  %v3938_v48 = vmul.f32 %v3937_v8, %v6024_v26  ;;  %v3194_v56 = vmul.f32 %v6111_v6, %v6248_v28  ;;  %s9091_s6 = sld [smem:[#allocation7_spill]] }
 0x471   : > { %v2415_v44 = vsel %vm1631_vm11, %v9057_v42, %v2414_v36  ;;  %v1686_v33 = vmul.f32 %v6047_v37, %v6248_v28  ;;  %v9058_v25 = vrot.slane %v6203_v17, 2  ;;  %v3945_v31 = vrot.slane %v3939_v49, 2 }
 0x472   : > { %v3922_v7 = vsel %vm1631_vm11, %v3920_v27, %v3921_v46  ;;  %v3160_v3 = vrot.slane %v3153_v20, 2  ;;  %v3944_v61 = vrot.slane %v3938_v48, 2  ;;  %v3201_v26 = vrot.slane %v3194_v56, 1 }
 0x473   : > { %2418 = vrot.lane.b32.xlu1 %v2415_v44, %s9027_s19  ;;  %v2504_v2 = vsel %vm1652_vm12, %v9058_v25, %v2503_v47  ;;  %v1693_v34 = vrot.slane %v1686_v33, 1  ;;  %v9059_v19 = vrot.slane %v6267_v50, 2  ;;  %v3851_v17 = vmul.f32 %v6130_v18, %v6248_v28  ;;  %v9071_v47 = vld [vmem:[#allocation98_spill] sm:$0xff] }
 0x474   : > { %3884 = vrot.lane.b32.xlu0 %v3881_v22, %s9027_s19  ;;  %v3946_v6 = vsel %vm1652_vm12, %v3944_v61, %v3945_v31  ;;  %v1775_v21 = vmul.f32 %v6057_v51, %v6248_v28  ;;  %v3875_v63 = vmul.f32 %v3872_v16, %v6248_v28  ;;  %v2431_v23 = vmul.f32 %v6076_v58, %v6248_v28  ;;  %v9068_v22 = vld [vmem:[#allocation97_spill] sm:$0xff] }
 0x475   : > { %v3161_v37 = vsel %vm1652_vm12, %v9059_v19, %v3160_v3  ;;  %v9060_v5 = vrot.slane %v6271_v10, 1  ;;  %v9061_v11 = vrot.slane %v6154_v35, 1  ;;  %v3858_v30 = vrot.slane %v3851_v17, 1 }
 0x476   : > { %v1782_v62 = vrot.slane %v1775_v21, 2  ;;  %v3882_v51 = vrot.slane %v3875_v63, 2  ;;  %v2438_v38 = vrot.slane %v2431_v23, 2  ;;  %v9062_v58 = vrot.slane %v6158_v14, 2 }
 0x477   : > { %2507 = vrot.lane.b32.xlu1 %v2504_v2, %s9019_s28  ;;  %v3202_v50 = vsel %vm1631_vm11, %v9060_v5, %v3201_v26  ;;  %v1694_v18 = vsel %vm1631_vm11, %v9061_v11, %v1693_v34  ;;  %v3859_v16 = vsel %vm1631_vm11, %v3856_v13, %v3858_v30  ;;  %v3916_v32 = vmul.f32 %v3913_v4, %v6248_v28 }
 0x478   : > { %3925 = vrot.lane.b32.xlu0 %v3922_v7, %s9019_s28  ;;  %v1783_v10 = vsel %vm1652_vm12, %v9062_v58, %v1782_v62  ;;  %v2472_v35 = vmul.f32 %v6080_v60, %v6248_v28  ;;  %v3883_v12 = vsel %vm1652_vm12, %v3880_v43, %v3882_v51  ;;  %v3940_v52 = vmul.f32 %v3937_v8, %v6248_v28 }
 0x479   : > { %v9063_v54 = vrot.slane %v6170_v40, 2  ;;  %v3923_v14 = vrot.slane %v3916_v32, 1  ;;  %v3129_v4 = vmul.f32 %v6103_v39, %v6248_v28  ;;  %v9065_v43 = vrot.slane %v9064_v55, 1  ;;  %v9066_v40 = vld [vmem:[#allocation95_spill] sm:$0xff] }
 0x47a   : > { %v2479_v57 = vrot.slane %v2472_v35, 1  ;;  %v3947_v60 = vrot.slane %v3940_v52, 2  ;;  %v3218_v8 = vmul.f32 %v9066_v40, %v6248_v28  ;;  %v9069_v42 = vrot.slane %v9068_v22, 1 }
 0x47b   : > { %3164 = vrot.lane.b32.xlu1 %v3161_v37, %s9027_s19  ;;  %v2439_v13 = vsel %vm1652_vm12, %v9063_v54, %v2438_v38  ;;  %v3924_v36 = vsel %vm1631_vm11, %v3921_v46, %v3923_v14  ;;  %v3136_v0 = vrot.slane %v3129_v4, 1  ;;  %v9072_v49 = vrot.slane %v9071_v47, 2 }
 0x47c   : > { %3949 = vrot.lane.b32.xlu0 %v3946_v6, %s9019_s28  ;;  %v2480_v9 = vsel %vm1631_vm11, %v9065_v43, %v2479_v57  ;;  %v3948_v39 = vsel %vm1652_vm12, %v3945_v31, %v3947_v60  ;;  %v3225_v44 = vrot.slane %v3218_v8, 2  ;;  %v1844_v33 = vstv %s9067_s25  ;;  %s6730_s25 = spop %4993 }
 0x47d   : > { %v3137_v46 = vsel %vm1631_vm11, %v9069_v42, %v3136_v0  ;;  %v8797_v7 = vstv %s9070_s11  ;;  %v2022_v34 = vstv %s9073_s20  ;;  %v8794_v6 = vstv %s9074_s22  ;;  %9092 = sst [smem:[#allocation62_spill]] %s6730_s25  ;;  %s6736_s4 = spop %4995 }
 0x47e   : > { %v3226_v28 = vsel %vm1652_vm12, %v9072_v49, %v3225_v44  ;;  %v2200_v23 = vstv %s9075_s23  ;;  %v8792_v5 = vstv %s9076_s9  ;;  %v8790_v62 = vstv %s9077_s16  ;;  %s9093_s20 = sld [smem:[#allocation8_spill]]  ;;  %s6744_s16 = spop %4997 }
 0x47f   : > { %3205 = vrot.lane.b32.xlu1 %v3202_v50, %s9019_s28  ;;  %v2630_v51 = vstv %s9078_s21  ;;  %v8789_v32 = vstv %s9079_s14  ;;  %v2808_v35 = vstv %s9081_s26  ;;  %9095 = sst [smem:[#allocation63_spill]] %s6736_s4  ;;  %s6749_s2 = spop %4999 }
 0x480   : > { %1697 = vrot.lane.b32.xlu0 %v1694_v18, %s9027_s19  ;;  %v8788_v14 = vstv %s9082_s27  ;;  %v2986_v57 = vstv %s9083_s30  ;;  %v8799_v43 = vstv %s9085_s18  ;;  %s9096_s27 = sld [smem:[#allocation11_spill]] }
 0x481   : > { %v8798_v42 = vstv %s5993_s3  ;;  %s9097_s14 = sld [smem:[#allocation13_spill]] }
 0x482   : > { %s9098_s25 = sld [smem:[#allocation14_spill]] }
 0x483   : > { %3862 = vrot.lane.b32.xlu1 %v3859_v16, %s9027_s19  ;;  %s9099_s9 = sld [smem:[#allocation19_spill]] }
 0x484   : > { %1786 = vrot.lane.b32.xlu0 %v1783_v10, %s9019_s28  ;;  %9100 = sst [smem:[#allocation64_spill]] %s6749_s2 }
 0x485   : > { %s9102_s23 = sld [smem:[#allocation20_spill]] }
 0x486   : > { %s9104_s4 = sld [smem:[#allocation22_spill]] }
 0x487   : > { %3886 = vrot.lane.b32.xlu1 %v3883_v12, %s9027_s19  ;;  %s9105_s22 = sld [smem:[#allocation23_spill]] }
 0x488   : > { %2442 = vrot.lane.b32.xlu0 %v2439_v13, %s9027_s19  ;;  %s9108_s2 = sld [smem:[#allocation28_spill]] }
 0x489   : > { %s9115_s21 = sld [smem:[#allocation31_spill]] }
 0x48a   : > { %s9138_s26 = sld [smem:[#allocation50_spill]] }
 0x48b   : > { %3927 = vrot.lane.b32.xlu1 %v3924_v36, %s9019_s28  ;;  %s9160_s30 = sld [smem:[#allocation75_spill]] }
 0x48c   : > { %2483 = vrot.lane.b32.xlu0 %v2480_v9, %s9019_s28  ;;  %v8787_v9 = vstv %s5981_s17  ;;  %s9094_s17 = sld [smem:[#allocation10_spill]] }
 0x48f   : > { %3951 = vrot.lane.b32.xlu1 %v3948_v39, %s9019_s28 }
 0x490   : > { %3140 = vrot.lane.b32.xlu0 %v3137_v46, %s9027_s19 }
 0x494   : > { %3229 = vrot.lane.b32.xlu0 %v3226_v28, %s9019_s28 }
 0x495   : > { %v1572_v20 = vpop.permute.xlu1 %1571  ;;  %v1559_v27 = vpop.permute.xlu0 %1558 }
 0x496   : > { %1581 = vst.msk [vmem:[#allocation3 + $0x30] sm:$0xfe] %vm1549_vm8, %v1572_v20  ;;  %1568 = vst.msk [vmem:[#allocation3 + $0x18] sm:$0xfe] %vm1549_vm8, %v1559_v27  ;;  %v8795_v20 = vstv %s5999_s1  ;;  %s9110_s1 = sld [smem:[#allocation29_spill]] }
 0x499   : > { %v1585_v48 = vpop.permute.xlu0 %1584  ;;  %v1561_v56 = vpop.permute.xlu1 %1560 }
 0x49a   : > { %1594 = vst.msk [vmem:[#allocation3 + $0x48] sm:$0xfe] %vm1549_vm8, %v1585_v48 }
 0x49b   : > { %1569 = vst.msk [vmem:[#allocation3 + $0x20] sm:$0xff] %vm1551_vm9, %v1561_v56 }
 0x49d   : > { %v6580_v25 = vld [vmem:[#allocation3 + $0x18] sm:$0xff]  ;;  %v1574_v2 = vpop.permute.xlu0 %1573  ;;  %v1587_v31 = vpop.permute.xlu1 %1586  ;;  %v6590_v26 = vld [vmem:[#allocation3 + $0x30] sm:$0xff] }
 0x49e   : > { %1582 = vst.msk [vmem:[#allocation3 + $0x38] sm:$0xff] %vm1551_vm9, %v1574_v2  ;;  %1595 = vst.msk [vmem:[#allocation3 + $0x50] sm:$0xff] %vm1551_vm9, %v1587_v31  ;;  %v1910_v3 = vmul.f32 %v8797_v7, %v6580_v25  ;;  %v1845_v61 = vmul.f32 %v1844_v33, %v6580_v25  ;;  %v2088_v17 = vmul.f32 %v8794_v6, %v6590_v26  ;;  %v8796_v31 = vstv %s6675_s8 }
 0x49f   : > { %v2023_v21 = vmul.f32 %v2022_v34, %v6590_v26  ;;  %v2566_v58 = vmul.f32 %v8790_v62, %v6580_v25  ;;  %v2631_v10 = vmul.f32 %v2630_v51, %v6580_v25  ;;  %v2744_v54 = vmul.f32 %v8789_v32, %v6590_v26 }
 0x4a0   : > { %1914 = vrot.lane.b32.xlu1 %v1910_v3, %s9019_s28  ;;  %1849 = vrot.lane.b32.xlu0 %v1845_v61, %s9027_s19  ;;  %v2809_v13 = vmul.f32 %v2808_v35, %v6590_v26  ;;  %v3353_v8 = vmul.f32 %v8787_v9, %v6580_v25  ;;  %v3288_v39 = vmul.f32 %v8799_v43, %v6580_v25 }
 0x4a1   : > { %v1576_v19 = vpop.permute.xlu1 %1575  ;;  %v1563_v37 = vpop.permute.xlu0 %1562  ;;  %v6604_v63 = vld [vmem:[#allocation3 + $0x48] sm:$0xff]  ;;  %v3466_v49 = vmul.f32 %v8798_v42, %v6590_v26  ;;  %v6867_v42 = vstv %s9138_s26  ;;  %s9163_s26 = sld [smem:[#allocation82_spill]] }
 0x4a2   : > { %1583 = vst.msk [vmem:[#allocation3 + $0x40] sm:$0x1] %vm1553_vm10, %v1576_v19  ;;  %1570 = vst.msk [vmem:[#allocation3 + $0x28] sm:$0x1] %vm1553_vm10, %v1563_v37  ;;  %v2266_v18 = vmul.f32 %v8792_v5, %v6604_v63  ;;  %v2201_v30 = vmul.f32 %v2200_v23, %v6604_v63  ;;  %v2922_v36 = vmul.f32 %v8788_v14, %v6604_v63  ;;  %v6685_v22 = vld [vmem:[#allocation3 + $0x20] sm:$0xff]  ;;  %v8793_v37 = vstv %s6696_s0  ;;  %s9129_s0 = sld [smem:[#allocation41_spill]] }
 0x4a3   : > { %v2987_v55 = vmul.f32 %v2986_v57, %v6604_v63  ;;  %v1846_v47 = vmul.f32 %v1844_v33, %v6685_v22  ;;  %v3531_v33 = vmul.f32 %v8795_v20, %v6590_v26  ;;  %v4010_v19 = vmul.f32 %v8796_v31, %v6580_v25  ;;  %9154 = vst [vmem:[#allocation124_spill] sm:$0xff] %v6867_v42 }
 0x4a4   : > { %2092 = vrot.lane.b32.xlu1 %v2088_v17, %s9019_s28  ;;  %2027 = vrot.lane.b32.xlu0 %v2023_v21, %s9027_s19 }
 0x4a5   : > { %v6610_v50 = vpop.permute.xlu1 %1736  ;;  %v1589_v11 = vpop.permute.xlu0 %1588  ;;  %v6704_v28 = vld [vmem:[#allocation3 + $0x38] sm:$0xff]  ;;  %v6725_v2 = vld [vmem:[#allocation3 + $0x50] sm:$0xff] }
 0x4a6   : > { %9080 = vst [vmem:[#allocation96_spill] sm:$0xff] %v6610_v50  ;;  %1596 = vst.msk [vmem:[#allocation3 + $0x58] sm:$0x1] %vm1553_vm10, %v1589_v11  ;;  %v2024_v56 = vmul.f32 %v2022_v34, %v6704_v28  ;;  %v2202_v34 = vmul.f32 %v2200_v23, %v6725_v2  ;;  %v6757_v11 = vstv %s9091_s6  ;;  %s6777_s6 = spop %5001  ;;  %v6821_v23 = vstv %s9117_s5  ;;  %s9141_s5 = sld [smem:[#allocation56_spill]] }
 0x4a7   : > { %9087 = vst [vmem:[#allocation97_spill] sm:$0xff] %v6704_v28  ;;  %9106 = vst [vmem:[#allocation101_spill] sm:$0xff] %v6757_v11  ;;  %9113 = sst [smem:[#allocation65_spill]] %s6777_s6  ;;  %v6909_v50 = vstv %s9160_s30  ;;  %v6918_v42 = vstv %s9163_s26 }
 0x4a8   : > { %2270 = vrot.lane.b32.xlu1 %v2266_v18, %s9019_s28  ;;  %2205 = vrot.lane.b32.xlu0 %v2201_v30, %s9027_s19  ;;  %v2632_v18 = vmul.f32 %v2630_v51, %v6685_v22  ;;  %v4075_v30 = vmul.f32 %v8793_v37, %v6580_v25  ;;  %v6783_v51 = vstv %s9099_s9  ;;  %s9122_s6 = sld [smem:[#allocation37_spill]]  ;;  %9132 = vst [vmem:[#allocation113_spill] sm:$0xff] %v6821_v23  ;;  %v6844_v5 = vstv %s9129_s0 }
 0x4a9   : > { %v6623_v38 = vpop.permute.xlu1 %2392  ;;  %v6625_v16 = vpop.permute.xlu0 %1671  ;;  %9116 = vst [vmem:[#allocation107_spill] sm:$0xff] %v6783_v51  ;;  %s9125_s9 = sld [smem:[#allocation38_spill]]  ;;  %9146 = vst [vmem:[#allocation119_spill] sm:$0xff] %v6844_v5 }
 0x4aa   : > { %9084 = vst [vmem:[#allocation95_spill] sm:$0xff] %v6625_v16  ;;  %s9155_s0 = sld [smem:[#allocation74_spill]]  ;;  %v8807_v16 = vstv %s6013_s29  ;;  %9170 = vst [vmem:[#allocation132_spill] sm:$0xff] %v6909_v50 }
 0x4ab   : > { %9173 = vst [vmem:[#allocation135_spill] sm:$0xff] %v6918_v42  ;;  %v6950_v42 = vstv %s6683_s24  ;;  %s9203_s24 = sld [smem:[#allocation64_spill]] }
 0x4ac   : > { %2570 = vrot.lane.b32.xlu1 %v2566_v58, %s9027_s19  ;;  %2635 = vrot.lane.b32.xlu0 %v2631_v10, %s9019_s28  ;;  %v6766_v58 = vstv %s9093_s20  ;;  %v6769_v10 = vstv %s9094_s17  ;;  %s6785_s20 = spop %5003  ;;  %s9118_s17 = sld [smem:[#allocation34_spill]]  ;;  %9178 = vst [vmem:[#allocation139_spill] sm:$0xff] %v6950_v42 }
 0x4ad   : > { %v6637_v12 = vpop.permute.xlu1 %3179  ;;  %v6639_v52 = vpop.permute.xlu0 %2457  ;;  %9107 = vst [vmem:[#allocation102_spill] sm:$0xff] %v6766_v58  ;;  %9109 = vst [vmem:[#allocation103_spill] sm:$0xff] %v6769_v10  ;;  %v8800_v37 = vstv %s6785_s20  ;;  %v9186_v42 = vstv %s9070_s11  ;;  %s9193_s11 = sld [smem:[#allocation30_spill]] }
 0x4ae   : > { %v4253_v7 = vmul.f32 %v8800_v37, %v6590_v26  ;;  %v2398_v37 = vadd.f32 %v6623_v38, %v6340_v53  ;;  %s9366_s30 = sld [smem:[#allocation43_spill]] }
 0x4af   : > { %v6838_v62 = vstv %s9125_s9  ;;  %s9152_s9 = sld [smem:[#allocation72_spill]] }
 0x4b0   : > { %2748 = vrot.lane.b32.xlu1 %v2744_v54, %s9027_s19  ;;  %2813 = vrot.lane.b32.xlu0 %v2809_v13, %s9019_s28  ;;  %v6772_v54 = vstv %s9096_s27  ;;  %v6775_v13 = vstv %s9097_s14  ;;  %s9119_s27 = sld [smem:[#allocation35_spill]]  ;;  %9142 = vst [vmem:[#allocation117_spill] sm:$0xff] %v6838_v62 }
 0x4b1   : > { %v6653_v4 = vpop.permute.xlu1 %1673  ;;  %v6655_v60 = vpop.permute.xlu0 %3114  ;;  %9111 = vst [vmem:[#allocation104_spill] sm:$0xff] %v6772_v54  ;;  %9112 = vst [vmem:[#allocation105_spill] sm:$0xff] %v6775_v13  ;;  %s9121_s14 = sld [smem:[#allocation33_spill]] }
 0x4b2   : > { %v6824_v9 = vstv %s9118_s17  ;;  %s9143_s17 = sld [smem:[#allocation58_spill]] }
 0x4b3   : > { %9134 = vst [vmem:[#allocation114_spill] sm:$0xff] %v6824_v9  ;;  %s9371_s26 = sld [smem:[#allocation53_spill]] }
 0x4b4   : > { %2926 = vrot.lane.b32.xlu1 %v2922_v36, %s9027_s19  ;;  %2991 = vrot.lane.b32.xlu0 %v2987_v55, %s9019_s28  ;;  %v6780_v36 = vstv %s9098_s25  ;;  %v6790_v55 = vstv %s9102_s23  ;;  %s9127_s25 = sld [smem:[#allocation40_spill]]  ;;  %s6809_s23 = spop %5005 }
 0x4b5   : > { %v6671_v0 = vpop.permute.xlu1 %2459  ;;  %v6673_v40 = vpop.permute.xlu0 %3836  ;;  %9114 = vst [vmem:[#allocation106_spill] sm:$0xff] %v6780_v36  ;;  %9120 = vst [vmem:[#allocation108_spill] sm:$0xff] %v6790_v55  ;;  %9130 = sst [smem:[#allocation66_spill]] %s6809_s23 }
 0x4b6   : > { %v6827_v14 = vstv %s9119_s27  ;;  %s9145_s27 = sld [smem:[#allocation59_spill]] }
 0x4b7   : > { %9135 = vst [vmem:[#allocation115_spill] sm:$0xff] %v6827_v14  ;;  %s9150_s23 = sld [smem:[#allocation71_spill]] }
 0x4b8   : > { %3357 = vrot.lane.b32.xlu1 %v3353_v8, %s9019_s28  ;;  %3292 = vrot.lane.b32.xlu0 %v3288_v39, %s9027_s19  ;;  %v6793_v8 = vstv %s9104_s4  ;;  %v6796_v39 = vstv %s9105_s22  ;;  %s9131_s22 = sld [smem:[#allocation46_spill]] }
 0x4b9   : > { %v6692_v46 = vpop.permute.xlu1 %3116  ;;  %v6694_v44 = vpop.permute.xlu0 %3901  ;;  %9123 = vst [vmem:[#allocation109_spill] sm:$0xff] %v6796_v39  ;;  %s9133_s4 = sld [smem:[#allocation47_spill]] }
 0x4bc   : > { %1851 = vrot.lane.b32.xlu1 %v1846_v47, %s9027_s19  ;;  %3470 = vrot.lane.b32.xlu0 %v3466_v49, %s9027_s19  ;;  %v8791_v47 = vstv %s6744_s16 }
 0x4bd   : > { %v6713_v27 = vpop.permute.xlu1 %3838  ;;  %v6715_v48 = vpop.permute.xlu0 %1738 }
 0x4be   : > { %v6852_v31 = vstv %s9131_s22 }
 0x4bf   : > { %9149 = vst [vmem:[#allocation121_spill] sm:$0xff] %v6852_v31 }
 0x4c0   : > { %2029 = vrot.lane.b32.xlu1 %v2024_v56, %s9027_s19  ;;  %3535 = vrot.lane.b32.xlu0 %v3531_v33, %s9019_s28  ;;  %v6804_v33 = vstv %s9108_s2  ;;  %s9137_s2 = sld [smem:[#allocation49_spill]] }
 0x4c1   : > { %v6732_v3 = vpop.permute.xlu1 %3903  ;;  %v6734_v61 = vpop.permute.xlu0 %2394  ;;  %9128 = vst [vmem:[#allocation112_spill] sm:$0xff] %v6804_v33 }
 0x4c4   : > { %2207 = vrot.lane.b32.xlu1 %v2202_v34, %s9027_s19  ;;  %4014 = vrot.lane.b32.xlu0 %v4010_v19, %s9027_s19  ;;  %v6807_v34 = vstv %s9110_s1  ;;  %v2810_v19 = vmul.f32 %v2808_v35, %v6704_v28  ;;  %s6829_s1 = spop %5007  ;;  %v6833_v35 = vstv %s9122_s6  ;;  %s9148_s6 = sld [smem:[#allocation70_spill]] }
 0x4c5   : > { %v6751_v17 = vpop.permute.xlu1 %1695  ;;  %v6753_v21 = vpop.permute.xlu0 %3181  ;;  %9136 = sst [smem:[#allocation68_spill]] %s6829_s1  ;;  %9139 = vst [vmem:[#allocation116_spill] sm:$0xff] %v6833_v35  ;;  %s6847_s1 = spop %5009 }
 0x4c6   : > { %9101 = vst [vmem:[#allocation98_spill] sm:$0xff] %v6751_v17  ;;  %9103 = vst [vmem:[#allocation100_spill] sm:$0xff] %v6753_v21  ;;  %v6864_v32 = vstv %s9137_s2  ;;  %s9162_s2 = sld [smem:[#allocation78_spill]]  ;;  %v6894_v17 = vstv %s9152_s9 }
 0x4c7   : > { %9153 = vst [vmem:[#allocation123_spill] sm:$0xff] %v6864_v32  ;;  %9167 = vst [vmem:[#allocation130_spill] sm:$0xff] %v6894_v17  ;;  %v6953_v32 = vstv %s6690_s7  ;;  %s9211_s7 = sld [smem:[#allocation54_spill]] }
 0x4c8   : > { %2637 = vrot.lane.b32.xlu1 %v2632_v18, %s9019_s28  ;;  %4079 = vrot.lane.b32.xlu0 %v4075_v30, %s9019_s28  ;;  %v4188_v18 = vmul.f32 %v8791_v47, %v6590_v26  ;;  %v6818_v30 = vstv %s9115_s21  ;;  %s9140_s21 = sld [smem:[#allocation55_spill]]  ;;  %v6841_v47 = vstv %s9127_s25  ;;  %s6875_s25 = spop %5011  ;;  %9179 = vst [vmem:[#allocation140_spill] sm:$0xff] %v6953_v32 }
 0x4c9   : > { %v6799_v49 = vpop.permute.xlu1 %1784  ;;  %v6801_v56 = vpop.permute.xlu0 %1719  ;;  %9144 = vst [vmem:[#allocation118_spill] sm:$0xff] %v6841_v47  ;;  %s6883_s22 = spop %5013  ;;  %s9363_s9 = sld [smem:[#allocation25_spill]] }
 0x4ca   : > { %9124 = vst [vmem:[#allocation110_spill] sm:$0xff] %v6799_v49  ;;  %9126 = vst [vmem:[#allocation111_spill] sm:$0xff] %v6801_v56  ;;  %v6873_v49 = vstv %s9141_s5  ;;  %s9165_s5 = sld [smem:[#allocation85_spill]]  ;;  %v6891_v56 = vstv %s9150_s23  ;;  %v9187_v5 = vstv %s9148_s6 }
 0x4cb   : > { %9157 = vst [vmem:[#allocation126_spill] sm:$0xff] %v6873_v49  ;;  %9166 = vst [vmem:[#allocation129_spill] sm:$0xff] %v6891_v56  ;;  %s9333_s23 = sld [smem:[#allocation68_spill]] }
 0x4cc   : > { %2815 = vrot.lane.b32.xlu1 %v2810_v19, %s9019_s28  ;;  %4192 = vrot.lane.b32.xlu0 %v4188_v18, %s9027_s19  ;;  %v6855_v19 = vstv %s9133_s4  ;;  %v2988_v18 = vmul.f32 %v2986_v57, %v6725_v2  ;;  %v6881_v57 = vstv %s9145_s27  ;;  %s9161_s4 = sld [smem:[#allocation77_spill]] }
 0x4cd   : > { %v2441_v6 = vpop.permute.xlu1 %2440  ;;  %v6849_v20 = vpop.permute.xlu0 %1760  ;;  %9151 = vst [vmem:[#allocation122_spill] sm:$0xff] %v6855_v19  ;;  %9159 = vst [vmem:[#allocation128_spill] sm:$0xff] %v6881_v57  ;;  %v6915_v49 = vstv %s9162_s2  ;;  %v1911_v19 = vmul.f32 %v9186_v42, %v6685_v22  ;;  %s9360_s27 = sld [smem:[#allocation16_spill]] }
 0x4ce   : > { %9147 = vst [vmem:[#allocation120_spill] sm:$0xff] %v6849_v20  ;;  %v6870_v43 = vstv %s9140_s21  ;;  %v6878_v20 = vstv %s9143_s17  ;;  %s9164_s21 = sld [smem:[#allocation83_spill]]  ;;  %s6900_s17 = spop %5015  ;;  %9172 = vst [vmem:[#allocation134_spill] sm:$0xff] %v6915_v49 }
 0x4cf   : > { %9156 = vst [vmem:[#allocation125_spill] sm:$0xff] %v6870_v43  ;;  %9158 = vst [vmem:[#allocation127_spill] sm:$0xff] %v6878_v20  ;;  %v6898_v20 = vstv %s9155_s0  ;;  %s9365_s0 = sld [smem:[#allocation26_spill]] }
 0x4d0   : > { %2993 = vrot.lane.b32.xlu1 %v2988_v18, %s9019_s28  ;;  %4257 = vrot.lane.b32.xlu0 %v4253_v7, %s9019_s28  ;;  %9168 = vst [vmem:[#allocation131_spill] sm:$0xff] %v6898_v20  ;;  %v9169_v7 = vstv %s9085_s18  ;;  %v3644_v18 = vmul.f32 %v8807_v16, %v6604_v63  ;;  %v6930_v16 = vstv %s6663_s13  ;;  %s9180_s18 = sld [smem:[#allocation84_spill]] }
 0x4d1   : > { %v2482_v1 = vpop.permute.xlu1 %2481  ;;  %v2417_v57 = vpop.permute.xlu0 %2416  ;;  %v3289_v38 = vmul.f32 %v9169_v7, %v6685_v22  ;;  %v6947_v7 = vstv %s6665_s12  ;;  %s9182_s13 = sld [smem:[#allocation21_spill]] }
 0x4d2   : > { %v2422_v53 = vadd.f32 %v2417_v57, %v2398_v37  ;;  %v6912_v43 = vstv %s9161_s4  ;;  %v6924_v37 = vstv %s9165_s5  ;;  %s9185_s12 = sld [smem:[#allocation67_spill]]  ;;  %s8088_s5 = spop %5017 }
 0x4d3   : > { %9171 = vst [vmem:[#allocation133_spill] sm:$0xff] %v6912_v43  ;;  %9175 = vst [vmem:[#allocation137_spill] sm:$0xff] %v6924_v37  ;;  %v8816_v43 = vstv %s6900_s17  ;;  %v3120_v37 = vadd.f32 %v6655_v60, %v6402_v41  ;;  %v2526_v41 = vmul.f32 %v6824_v9, %v6580_v25  ;;  %v6958_v60 = vstv %s6706_s15  ;;  %s9215_s15 = sld [smem:[#allocation76_spill]] }
 0x4d4   : > { %v6921_v20 = vstv %s9164_s21  ;;  %v2446_v57 = vadd.f32 %v2441_v6, %v2422_v53  ;;  %3294 = vrot.lane.b32.xlu1 %v3289_v38, %s9027_s19  ;;  %3648 = vrot.lane.b32.xlu0 %v3644_v18, %s9027_s19  ;;  %v9177_v53 = vstv %s5993_s3  ;;  %v4366_v18 = vmul.f32 %v8816_v43, %v6604_v63  ;;  %9181 = vst [vmem:[#allocation141_spill] sm:$0xff] %v6958_v60  ;;  %s9183_s3 = sld [smem:[#allocation60_spill]] }
 0x4d5   : > { %9174 = vst [vmem:[#allocation136_spill] sm:$0xff] %v6921_v20  ;;  %v3139_v49 = vpop.permute.xlu1 %3138  ;;  %v2506_v50 = vpop.permute.xlu0 %2505  ;;  %v6935_v20 = vmul.f32 %v6824_v9, %v6685_v22  ;;  %v3467_v38 = vmul.f32 %v9177_v53, %v6704_v28  ;;  %v9184_v53 = vstv %s9121_s14  ;;  %v3238_v60 = vmul.f32 %v9187_v5, %v6580_v25  ;;  %s9369_s4 = sld [smem:[#allocation44_spill]] }
 0x4d6   : > { %v2463_v6 = vadd.f32 %v6639_v52, %v2446_v57  ;;  %v3144_v52 = vadd.f32 %v3139_v49, %v3120_v37  ;;  %v2516_v31 = vmul.f32 %v9184_v53, %v6580_v25  ;;  %v9188_v49 = vstv %s6675_s8  ;;  %s9200_s8 = sld [smem:[#allocation36_spill]] }
 0x4d7   : > { %9176 = vst [vmem:[#allocation138_spill] sm:$0xff] %v6935_v20  ;;  %v4011_v37 = vmul.f32 %v9188_v49, %v6685_v22  ;;  %v9190_v9 = vstv %s9182_s13  ;;  %v6988_v5 = vmul.f32 %v6757_v11, %v6685_v22  ;;  %v2532_v49 = vrot.slane %v2526_v41, 1  ;;  %s9370_s2 = sld [smem:[#allocation52_spill]] }
 0x4d8   : > { %v2487_v57 = vadd.f32 %v2482_v1, %v2463_v6  ;;  %3472 = vrot.lane.b32.xlu1 %v3467_v38, %s9027_s19  ;;  %4370 = vrot.lane.b32.xlu0 %v4366_v18, %s9027_s19  ;;  %v6975_v6 = vld [vmem:[#allocation3 + $0x28] sm:$0x3]  ;;  %v9189_v18 = vstv %s9180_s18  ;;  %v2089_v47 = vmul.f32 %v9190_v9, %v6704_v28  ;;  %v6992_v1 = vmul.f32 %v6891_v56, %v6685_v22  ;;  %s9427_s21 = sld [smem:[#allocation92_spill]] }
 0x4d9   : > { %v3228_v43 = vpop.permute.xlu1 %3227  ;;  %v3532_v21 = vmul.f32 %v9189_v18, %v6704_v28  ;;  %9192 = vst [vmem:[#allocation142_spill] sm:$0xff] %v6988_v5  ;;  %v9197_v41 = vrot.slane %v6935_v20, 1  ;;  %s9447_s13 = sld [smem:[#allocation15_spill]] }
 0x4da   : > { %v3163_v32 = vpop.permute.xlu0 %3162  ;;  %v2511_v53 = vadd.f32 %v2506_v50, %v2487_v57  ;;  %v9191_v42 = vstv %s9183_s3  ;;  %9194 = vst [vmem:[#allocation143_spill] sm:$0xff] %v6992_v1  ;;  %v6995_v50 = vstv %s9185_s12  ;;  %s9475_s3 = sld [smem:[#allocation24_spill]] }
 0x4db   : > { %v3168_v38 = vadd.f32 %v3163_v32, %v3144_v52  ;;  %v4076_v14 = vmul.f32 %v9191_v42, %v6685_v22  ;;  %9195 = vst [vmem:[#allocation144_spill] sm:$0xff] %v6995_v50  ;;  %v7002_v52 = vmul.f32 %v6766_v58, %v6685_v22  ;;  %v2534_v42 = vsel %vm1631_vm11, %v2532_v49, %v9197_v41  ;;  %s9484_s12 = sld [smem:[#allocation42_spill]] }
 0x4dc   : > { %v2518_v32 = vadd.f32 %v2516_v31, %v2511_v53  ;;  %3537 = vrot.lane.b32.xlu1 %v3532_v21, %s9019_s28  ;;  %1916 = vrot.lane.b32.xlu0 %v1911_v19, %s9019_s28  ;;  %v3248_v31 = vmul.f32 %v6891_v56, %v6580_v25  ;;  %v7013_v21 = vmul.f32 %v6894_v17, %v6685_v22  ;;  %v9199_v53 = vstv %s9193_s11  ;;  %s9485_s11 = sld [smem:[#allocation90_spill]] }
 0x4dd   : > { %v3185_v9 = vadd.f32 %v6637_v12, %v3168_v38  ;;  %9196 = vst [vmem:[#allocation145_spill] sm:$0xff] %v7002_v52  ;;  %v7004_v18 = vpop.permute.xlu1 %1721  ;;  %v1807_v12 = vmul.f32 %v6757_v11, %v6975_v6  ;;  %v2267_v38 = vmul.f32 %v9199_v53, %v6725_v2  ;;  %v1827_v49 = vmul.f32 %v6766_v58, %v6975_v6 }
 0x4de   : > { %v3204_v57 = vpop.permute.xlu0 %3203  ;;  %9198 = vst [vmem:[#allocation146_spill] sm:$0xff] %v7013_v21  ;;  %v7020_v50 = vadd.f32 %v2534_v42, %v2518_v32  ;;  %v3268_v56 = vmul.f32 %v6894_v17, %v6580_v25  ;;  %v9202_v32 = vstv %s6744_s16  ;;  %v9204_v20 = vstv %s9200_s8  ;;  %s9206_s16 = sld [smem:[#allocation45_spill]] }
 0x4df   : > { %v3209_v19 = vadd.f32 %v3204_v57, %v3185_v9  ;;  %v1814_v35 = vrot.slane %v1807_v12, 1  ;;  %v4189_v9 = vmul.f32 %v9202_v32, %v6704_v28  ;;  %v8830_v57 = vrot.slane %v7002_v52, 2  ;;  %s9503_s8 = sld [smem:[#allocation5_spill]] }
 0x4e0   : > { %9201 = vst [vmem:[#allocation147_spill] sm:$0xff] %v7020_v50  ;;  %4016 = vrot.lane.b32.xlu1 %v4011_v37, %s9027_s19  ;;  %2094 = vrot.lane.b32.xlu0 %v2089_v47, %s9019_s28  ;;  %v1834_v42 = vrot.slane %v1827_v49, 2  ;;  %v2567_v50 = vmul.f32 %v9204_v20, %v6685_v22  ;;  %v3254_v12 = vrot.slane %v3248_v31, 1  ;;  %v9205_v37 = vrot.slane %v6988_v5, 1 }
 0x4e1   : > { %v3233_v62 = vadd.f32 %v3228_v43, %v3209_v19  ;;  %v7034_v41 = vpop.permute.xlu1 %1762  ;;  %v3842_v19 = vadd.f32 %v6673_v40, %v6428_v24  ;;  %v7049_v49 = vmul.f32 %v6769_v10, %v6685_v22  ;;  %v9208_v31 = vstv %s6785_s20  ;;  %s9216_s20 = sld [smem:[#allocation6_spill]] }
 0x4e2   : > { %v3861_v53 = vpop.permute.xlu0 %3860  ;;  %v7043_v47 = vsel %vm1631_vm11, %v9205_v37, %v1814_v35  ;;  %v7054_v20 = vsel %vm1652_vm12, %v8830_v57, %v1834_v42  ;;  %v4254_v43 = vmul.f32 %v9208_v31, %v6704_v28  ;;  %v1862_v35 = vmul.f32 %v6769_v10, %v6580_v25 }
 0x4e3   : > { %v3240_v32 = vadd.f32 %v3238_v60, %v3233_v62  ;;  %9207 = vst [vmem:[#allocation148_spill] sm:$0xff] %v7049_v49  ;;  %v9209_v37 = vrot.slane %v6992_v1, 1  ;;  %v3274_v62 = vrot.slane %v3268_v56, 2  ;;  %v7065_v40 = vstv %s9203_s24  ;;  %s9504_s24 = sld [smem:[#allocation91_spill]] }
 0x4e4   : > { %9210 = vst [vmem:[#allocation149_spill] sm:$0xff] %v7065_v40  ;;  %v3866_v60 = vadd.f32 %v3861_v53, %v3842_v19  ;;  %4081 = vrot.lane.b32.xlu1 %v4076_v14, %s9019_s28  ;;  %2272 = vrot.lane.b32.xlu0 %v2267_v38, %s9019_s28  ;;  %v7071_v42 = vmul.f32 %v6772_v54, %v6685_v22  ;;  %v9213_v56 = vstv %s9206_s16  ;;  %v9214_v38 = vrot.slane %v7013_v21, 2  ;;  %s9508_s16 = sld [smem:[#allocation51_spill]] }
 0x4e5   : > { %v3256_v24 = vsel %vm1631_vm11, %v3254_v12, %v9209_v37  ;;  %v7073_v52 = vpop.permute.xlu1 %2418  ;;  %v2745_v12 = vmul.f32 %v9213_v56, %v6704_v28  ;;  %v1886_v53 = vmul.f32 %v6772_v54, %v6580_v25  ;;  %v1951_v14 = vmul.f32 %v6780_v36, %v6580_v25 }
 0x4e6   : > { %9212 = vst [vmem:[#allocation150_spill] sm:$0xff] %v7071_v42  ;;  %v3261_v31 = vadd.f32 %v3256_v24, %v3240_v32  ;;  %v3885_v57 = vpop.permute.xlu0 %3884  ;;  %v3276_v19 = vsel %vm1652_vm12, %v3274_v62, %v9214_v38  ;;  %v7088_v24 = vmul.f32 %v6780_v36, %v6685_v22  ;;  %v9219_v5 = vstv %s6651_s10 }
 0x4e7   : > { %v3890_v37 = vadd.f32 %v3885_v57, %v3866_v60  ;;  %v3960_v58 = vmul.f32 %v9219_v5, %v6580_v25  ;;  %v9220_v11 = vstv %s6013_s29  ;;  %v9221_v54 = vstv %s9211_s7  ;;  %s9239_s29 = sld [smem:[#allocation65_spill]] }
 0x4e8   : > { %9217 = vst [vmem:[#allocation151_spill] sm:$0xff] %v7088_v24  ;;  %v7090_v56 = vadd.f32 %v3276_v19, %v3261_v31  ;;  %v3645_v10 = vmul.f32 %v9220_v11, %v6725_v2  ;;  %v2923_v62 = vmul.f32 %v9221_v54, %v6725_v2  ;;  %v9222_v57 = vstv %s6900_s17  ;;  %4194 = vrot.lane.b32.xlu1 %v4189_v9, %s9027_s19  ;;  %s8101_s17 = spop %5019  ;;  %s9509_s7 = sld [smem:[#allocation80_spill]] }
 0x4e9   : > { %v4367_v60 = vmul.f32 %v9222_v57, %v6725_v2  ;;  %2572 = vrot.lane.b32.xlu0 %v2567_v50, %s9027_s19  ;;  %v3907_v31 = vadd.f32 %v6694_v44, %v3890_v37  ;;  %v1868_v38 = vrot.slane %v1862_v35, 1  ;;  %v1927_v5 = vmul.f32 %v6775_v13, %v6580_v25  ;;  %v7110_v32 = vpop.permute.xlu1 %2507  ;;  %s8103_s18 = spop %5021 }
 0x4ea   : > { %9218 = vst [vmem:[#allocation152_spill] sm:$0xff] %v7090_v56  ;;  %v3926_v11 = vpop.permute.xlu0 %3925  ;;  %v9223_v54 = vstv %s9215_s15  ;;  %v9224_v57 = vstv %s9216_s20  ;;  %v7122_v50 = vmul.f32 %v6775_v13, %v6685_v22  ;;  %v7126_v44 = vmul.f32 %v6930_v16, %v6685_v22  ;;  %s9510_s15 = sshll.u32 %s9503_s8, 6 }
 0x4eb   : > { %v3354_v56 = vmul.f32 %v9223_v54, %v6685_v22  ;;  %v7118_v9 = vmul.f32 %v9224_v57, %v6685_v22  ;;  %v9225_v35 = vrot.slane %v7049_v49, 1  ;;  %v1892_v19 = vrot.slane %v1886_v53, 2 }
 0x4ec   : > { %v1957_v36 = vrot.slane %v1951_v14, 2  ;;  %v9226_v57 = vstv %s9121_s14  ;;  %v7141_v13 = vmul.f32 %v6783_v51, %v6704_v28  ;;  %v3970_v21 = vmul.f32 %v6930_v16, %v6580_v25  ;;  %4259 = vrot.lane.b32.xlu1 %v4254_v43, %s9019_s28  ;;  %s9326_s14 = sld [smem:[#allocation86_spill]] }
 0x4ed   : > { %v7131_v37 = vsel %vm1631_vm11, %v1868_v38, %v9225_v35  ;;  %v7137_v40 = vmul.f32 %v9226_v57, %v6685_v22  ;;  %v7147_v49 = vmul.f32 %v6947_v7, %v6685_v22  ;;  %v3931_v53 = vadd.f32 %v3926_v11, %v3907_v31  ;;  %2750 = vrot.lane.b32.xlu0 %v2745_v12, %s9027_s19  ;;  %v7158_v1 = vpop.permute.xlu1 %3164 }
 0x4ee   : > { %9227 = vst [vmem:[#allocation153_spill] sm:$0xff] %v7141_v13  ;;  %v9228_v14 = vrot.slane %v7071_v42, 2  ;;  %v1933_v35 = vrot.slane %v1927_v5, 1  ;;  %v7156_v57 = vmul.f32 %v6790_v55, %v6704_v28  ;;  %v3950_v54 = vpop.permute.xlu0 %3949  ;;  %9229 = vst [vmem:[#allocation154_spill] sm:$0xff] %v7158_v1  ;;  %v2040_v31 = vmul.f32 %v6783_v51, %v6590_v26 }
 0x4ef   : > { %v3990_v12 = vmul.f32 %v6947_v7, %v6580_v25  ;;  %v3955_v11 = vadd.f32 %v3950_v54, %v3931_v53  ;;  %v9231_v42 = vstv %s6651_s10  ;;  %v7181_v43 = vmul.f32 %v6796_v39, %v6704_v28  ;;  %s9309_s10 = sld [smem:[#allocation66_spill]] }
 0x4f0   : > { %v1894_v38 = vsel %vm1652_vm12, %v1892_v19, %v9228_v14  ;;  %v9230_v19 = vrot.slane %v7088_v24, 2  ;;  %v2064_v14 = vmul.f32 %v6790_v55, %v6590_v26  ;;  %v7176_v17 = vmul.f32 %v9231_v42, %v6685_v22  ;;  %3650 = vrot.lane.b32.xlu1 %v3645_v10, %s9027_s19 }
 0x4f1   : > { %9232 = vst [vmem:[#allocation155_spill] sm:$0xff] %v7181_v43  ;;  %v3976_v1 = vrot.slane %v3970_v21, 1  ;;  %v3962_v53 = vadd.f32 %v3960_v58, %v3955_v11  ;;  %2928 = vrot.lane.b32.xlu0 %v2923_v62, %s9027_s19  ;;  %v7191_v51 = vpop.permute.xlu1 %3205  ;;  %v2046_v55 = vrot.slane %v2040_v31, 1  ;;  %v7195_v21 = vmul.f32 %v6793_v8, %v6704_v28 }
 0x4f2   : > { %v7169_v5 = vsel %vm1652_vm12, %v1957_v36, %v9230_v19  ;;  %v1678_v36 = vadd.f32 %v6653_v4, %v6381_v15  ;;  %v2129_v19 = vmul.f32 %v6796_v39, %v6590_v26  ;;  %9233 = vst [vmem:[#allocation156_spill] sm:$0xff] %v7191_v51  ;;  %v1698_v24 = vpop.permute.xlu0 %1697  ;;  %v9234_v15 = vrot.slane %v7126_v44, 1 }
 0x4f3   : > { %v3996_v58 = vrot.slane %v3990_v12, 2  ;;  %v9235_v62 = vrot.slane %v7122_v50, 1  ;;  %v2070_v42 = vrot.slane %v2064_v14, 2  ;;  %v9236_v39 = vrot.slane %v7141_v13, 1 }
 0x4f4   : > { %v3978_v4 = vsel %vm1631_vm11, %v3976_v1, %v9234_v15  ;;  %v1702_v10 = vadd.f32 %v1698_v24, %v1678_v36  ;;  %v8853_v28 = vrot.slane %v7181_v43, 2  ;;  %v2105_v51 = vmul.f32 %v6793_v8, %v6590_v26  ;;  %4372 = vrot.lane.b32.xlu1 %v4367_v60, %s9027_s19 }
 0x4f5   : > { %v1935_v11 = vsel %vm1631_vm11, %v1933_v35, %v9235_v62  ;;  %v3983_v54 = vadd.f32 %v3978_v4, %v3962_v53  ;;  %v7206_v31 = vsel %vm1631_vm11, %v2046_v55, %v9236_v39  ;;  %v9237_v1 = vrot.slane %v7147_v49, 2  ;;  %3359 = vrot.lane.b32.xlu0 %v3354_v56, %s9019_s28  ;;  %v3863_v36 = vpop.permute.xlu1 %3862 }
 0x4f6   : > { %v1726_v12 = vadd.f32 %v7004_v18, %v1702_v10  ;;  %v9238_v35 = vrot.slane %v7156_v57, 2  ;;  %v2135_v39 = vrot.slane %v2129_v19, 2  ;;  %v1787_v53 = vpop.permute.xlu0 %1786  ;;  %v8856_v15 = vrot.slane %v7195_v21, 1 }
 0x4f7   : > { %v3998_v24 = vsel %vm1652_vm12, %v3996_v58, %v9237_v1  ;;  %v9241_v4 = vstv %s9148_s6  ;;  %v2218_v18 = vmul.f32 %v6804_v33, %v6604_v63  ;;  %v7232_v56 = vmul.f32 %v6804_v33, %v6725_v2  ;;  %s9362_s6 = sld [smem:[#allocation17_spill]] }
 0x4f8   : > { %v2072_v55 = vsel %vm1652_vm12, %v2070_v42, %v9238_v35  ;;  %v7220_v14 = vadd.f32 %v3998_v24, %v3983_v54  ;;  %v7226_v58 = vmul.f32 %v9241_v4, %v6685_v22  ;;  %v3843_v60 = vadd.f32 %v6713_v27, %v6459_v45  ;;  %1873 = vrot.lane.b32.xlu1 %v7131_v37, %s9027_s19 }
 0x4f9   : > { %9242 = vst [vmem:[#allocation158_spill] sm:$0xff] %v7232_v56  ;;  %v2399_v54 = vadd.f32 %v6734_v61, %v6478_v59  ;;  %v1743_v42 = vadd.f32 %v6715_v48, %v1726_v12  ;;  %v7241_v19 = vmul.f32 %v6807_v34, %v6725_v2  ;;  %v7246_v10 = vsel %vm1652_vm12, %v2135_v39, %v8853_v28  ;;  %v3887_v24 = vpop.permute.xlu1 %3886 }
 0x4fa   : > { %9240 = vst [vmem:[#allocation157_spill] sm:$0xff] %v7220_v14  ;;  %v2111_v62 = vrot.slane %v2105_v51, 1  ;;  %v2242_v1 = vmul.f32 %v6807_v34, %v6604_v63  ;;  %v2307_v45 = vmul.f32 %v6821_v23, %v6604_v63  ;;  %v7253_v27 = vstv %s9239_s29  ;;  %1897 = vrot.lane.b32.xlu0 %v1894_v38, %s9027_s19  ;;  %v2443_v51 = vpop.permute.xlu0 %2442 }
 0x4fb   : > { %v2423_v59 = vadd.f32 %v7073_v52, %v2399_v54  ;;  %v3867_v48 = vadd.f32 %v3863_v36, %v3843_v60  ;;  %v1767_v61 = vadd.f32 %v7034_v41, %v1743_v42  ;;  %v2224_v35 = vrot.slane %v2218_v18, 1 }
 0x4fc   : > { %v2113_v12 = vsel %vm1631_vm11, %v2111_v62, %v8856_v15  ;;  %v8851_v39 = vrot.slane %v7232_v56, 1  ;;  %v7266_v52 = vmul.f32 %v6821_v23, %v6725_v2  ;;  %v8855_v37 = vrot.slane %v7241_v19, 2  ;;  %1962 = vrot.lane.b32.xlu1 %v7169_v5, %s9019_s28 }
 0x4fd   : > { %v1791_v36 = vadd.f32 %v1787_v53, %v1767_v61  ;;  %v3891_v41 = vadd.f32 %v3887_v24, %v3867_v48  ;;  %v2447_v4 = vadd.f32 %v2443_v51, %v2423_v59  ;;  %v3121_v38 = vadd.f32 %v6692_v46, %v6446_v29  ;;  %v3928_v46 = vpop.permute.xlu1 %3927  ;;  %v9244_v48 = vld [vmem:[#allocation117_spill] sm:$0xff]  ;;  %v9246_v51 = vld [vmem:[#allocation116_spill] sm:$0xff] }
 0x4fe   : > { %9243 = vst [vmem:[#allocation159_spill] sm:$0xff] %v7266_v52  ;;  %v2248_v60 = vrot.slane %v2242_v1, 2  ;;  %v2283_v54 = vmul.f32 %v6818_v30, %v6604_v63  ;;  %v7275_v18 = vmul.f32 %v6818_v30, %v6725_v2  ;;  %1938 = vrot.lane.b32.xlu0 %v1935_v11, %s9019_s28  ;;  %v2313_v29 = vrot.slane %v2307_v45, 2  ;;  %v2484_v1 = vpop.permute.xlu0 %2483 }
 0x4ff   : > { %v1798_v42 = vadd.f32 %v7118_v9, %v1791_v36  ;;  %v3908_v53 = vadd.f32 %v6732_v3, %v3891_v41  ;;  %v2464_v62 = vadd.f32 %v6671_v0, %v2447_v4  ;;  %v8852_v59 = vrot.slane %v7266_v52, 2 }
 0x500   : > { %v2607_v61 = vmul.f32 %v9244_v48, %v6580_v25  ;;  %v7288_v9 = vmul.f32 %v9244_v48, %v6685_v22  ;;  %v3972_v5 = vmul.f32 %v6930_v16, %v6975_v6  ;;  %v2226_v0 = vsel %vm1631_vm11, %v2224_v35, %v8851_v39  ;;  %2051 = vrot.lane.b32.xlu1 %v7206_v31, %s9027_s19 }
 0x501   : > { %v2488_v11 = vadd.f32 %v2484_v1, %v2464_v62  ;;  %v2250_v3 = vsel %vm1652_vm12, %v2248_v60, %v8855_v37  ;;  %v1819_v45 = vadd.f32 %v7043_v47, %v1798_v42  ;;  %v8854_v24 = vrot.slane %v7275_v18, 1  ;;  %v3952_v42 = vpop.permute.xlu1 %3951 }
 0x502   : > { %9245 = vst [vmem:[#allocation160_spill] sm:$0xff] %v7288_v9  ;;  %v2583_v36 = vmul.f32 %v9246_v51, %v6580_v25  ;;  %v7304_v41 = vmul.f32 %v9246_v51, %v6685_v22  ;;  %v3992_v16 = vmul.f32 %v6947_v7, %v6975_v6  ;;  %v3932_v4 = vadd.f32 %v3928_v46, %v3908_v53  ;;  %v3141_v62 = vpop.permute.xlu0 %3140 }
 0x503   : > { %v2512_v35 = vadd.f32 %v7110_v32, %v2488_v11  ;;  %2075 = vrot.lane.b32.xlu0 %v2072_v55, %s9027_s19  ;;  %v2289_v47 = vrot.slane %v2283_v54, 1  ;;  %v7313_v60 = vadd.f32 %v7054_v20, %v1819_v45  ;;  %v2315_v1 = vsel %vm1652_vm12, %v2313_v29, %v8852_v59  ;;  %v9248_v55 = vld [vmem:[#allocation115_spill] sm:$0xff]  ;;  %v9250_v11 = vld [vmem:[#allocation118_spill] sm:$0xff] }
 0x504   : > { %v2613_v39 = vrot.slane %v2607_v61, 2  ;;  %v8859_v7 = vrot.slane %v7288_v9, 2  ;;  %v3979_v53 = vrot.slane %v3972_v5, 1  ;;  %v3956_v46 = vadd.f32 %v3952_v42, %v3932_v4  ;;  %v9251_v61 = vld [vmem:[#allocation114_spill] sm:$0xff]  ;;  %2140 = vrot.lane.b32.xlu1 %v7246_v10, %s9019_s28  ;;  %v9256_v10 = vld [vmem:[#allocation100_spill] sm:$0xff] }
 0x505   : > { %9247 = vst [vmem:[#allocation116_spill] sm:$0xff] %v7313_v60  ;;  %v2519_v32 = vadd.f32 %v7137_v40, %v2512_v35  ;;  %v3145_v31 = vadd.f32 %v3141_v62, %v3121_v38  ;;  %v7322_v54 = vmul.f32 %v9248_v55, %v6685_v22  ;;  %v2291_v20 = vsel %vm1631_vm11, %v2289_v47, %v8854_v24  ;;  %v9252_v40 = vld [vmem:[#allocation154_spill] sm:$0xff]  ;;  %v9262_v38 = vld [vmem:[#allocation156_spill] sm:$0xff] }
 0x506   : > { %v2648_v45 = vmul.f32 %v9250_v11, %v6580_v25  ;;  %v3999_v29 = vrot.slane %v3992_v16, 2  ;;  %v2528_v59 = vmul.f32 %v9251_v61, %v6975_v6  ;;  %v3963_v5 = vadd.f32 %v7176_v17, %v3956_v46  ;;  %v9254_v16 = vld [vmem:[#allocation129_spill] sm:$0xff]  ;;  %v9258_v24 = vld [vmem:[#allocation130_spill] sm:$0xff] }
 0x507   : > { %9249 = vst [vmem:[#allocation161_spill] sm:$0xff] %v7322_v54  ;;  %v3169_v4 = vadd.f32 %v9252_v40, %v3145_v31  ;;  %2116 = vrot.lane.b32.xlu0 %v2113_v12, %s9019_s28  ;;  %v7339_v35 = vmul.f32 %v9250_v11, %v6685_v22  ;;  %v3250_v47 = vmul.f32 %v9254_v16, %v6975_v6  ;;  %v9255_v42 = vrot.slane %v7126_v44, 1  ;;  %v9257_v12 = vld [vmem:[#allocation119_spill] sm:$0xff] }
 0x508   : > { %v2535_v62 = vrot.slane %v2528_v59, 1  ;;  %v2548_v46 = vmul.f32 %v9248_v55, %v6975_v6  ;;  %v2672_v61 = vmul.f32 %v9257_v12, %v6580_v25  ;;  %v8857_v40 = vrot.slane %v7322_v54, 2  ;;  %2229 = vrot.lane.b32.xlu1 %v2226_v0, %s9027_s19 }
 0x509   : > { %9253 = vst [vmem:[#allocation114_spill] sm:$0xff] %v7339_v35  ;;  %v3980_v17 = vsel %vm1631_vm11, %v9255_v42, %v3979_v53  ;;  %v3186_v31 = vadd.f32 %v9256_v10, %v3169_v4  ;;  %v3270_v37 = vmul.f32 %v9258_v24, %v6975_v6  ;;  %v9259_v16 = vrot.slane %v7147_v49, 2  ;;  %v9260_v53 = vld [vmem:[#allocation138_spill] sm:$0xff]  ;;  %v3230_v24 = vpop.permute.xlu0 %3229 }
 0x50a   : > { %v3984_v28 = vadd.f32 %v3980_v17, %v3963_v5  ;;  %v9261_v59 = vrot.slane %v9260_v53, 1  ;;  %v2555_v15 = vrot.slane %v2548_v46, 2  ;;  %v2589_v25 = vrot.slane %v2583_v36, 1 }
 0x50b   : > { %v4000_v44 = vsel %vm1652_vm12, %v9259_v16, %v3999_v29  ;;  %v3210_v4 = vadd.f32 %v9262_v38, %v3186_v31  ;;  %2253 = vrot.lane.b32.xlu0 %v2250_v3, %s9027_s19  ;;  %v2615_v49 = vsel %vm1652_vm12, %v2613_v39, %v8859_v7  ;;  %v8858_v29 = vrot.slane %v7339_v35, 1  ;;  %v9265_v3 = vld [vmem:[#allocation122_spill] sm:$0xff]  ;;  %v9269_v31 = vld [vmem:[#allocation121_spill] sm:$0xff] }
 0x50c   : > { %v2536_v42 = vsel %vm1631_vm11, %v9261_v59, %v2535_v62  ;;  %v7363_v5 = vadd.f32 %v4000_v44, %v3984_v28  ;;  %v3257_v10 = vrot.slane %v3250_v47, 1  ;;  %v2556_v38 = vsel %vm1652_vm12, %v8857_v40, %v2555_v15  ;;  %v9264_v28 = vld [vmem:[#allocation97_spill] sm:$0xff]  ;;  %v7389_v44 = vld [vmem:[#allocation3 + $0x40] sm:$0x3]  ;;  %2318 = vrot.lane.b32.xlu1 %v2315_v1, %s9019_s28  ;;  %v9275_v40 = vld [vmem:[#allocation124_spill] sm:$0xff] }
 0x50d   : > { %v2540_v17 = vadd.f32 %v2536_v42, %v2519_v32  ;;  %v3234_v62 = vadd.f32 %v3230_v24, %v3210_v4  ;;  %v7374_v0 = vmul.f32 %v9257_v12, %v6685_v22  ;;  %v7378_v36 = vmul.f32 %v9265_v3, %v9264_v28  ;;  %v9276_v7 = vld [vmem:[#allocation146_spill] sm:$0xff] }
 0x50e   : > { %9263 = vst [vmem:[#allocation154_spill] sm:$0xff] %v7363_v5  ;;  %v9268_v39 = vrot.slane %v7304_v41, 1  ;;  %v2654_v47 = vrot.slane %v2648_v45, 1  ;;  %v7387_v16 = vmul.f32 %v9269_v31, %v9264_v28  ;;  %v3277_v15 = vrot.slane %v3270_v37, 2  ;;  %v9270_v37 = vld [vmem:[#allocation123_spill] sm:$0xff] }
 0x50f   : > { %9266 = vst [vmem:[#allocation129_spill] sm:$0xff] %v7378_v36  ;;  %v7380_v32 = vadd.f32 %v2556_v38, %v2540_v17  ;;  %v3241_v53 = vadd.f32 %v7226_v58, %v3234_v62  ;;  %2294 = vrot.lane.b32.xlu0 %v2291_v20, %s9019_s28  ;;  %v2678_v59 = vrot.slane %v2672_v61, 2  ;;  %v2785_v42 = vmul.f32 %v9265_v3, %v6590_v26  ;;  %v9272_v58 = vld [vmem:[#allocation135_spill] sm:$0xff] }
 0x510   : > { %v2591_v46 = vsel %vm1631_vm11, %v2589_v25, %v9268_v39  ;;  %v2761_v45 = vmul.f32 %v9269_v31, %v6590_v26  ;;  %v2656_v4 = vsel %vm1631_vm11, %v2654_v47, %v8858_v29  ;;  %v7403_v25 = vmul.f32 %v9270_v37, %v9264_v28  ;;  %v9273_v20 = vld [vmem:[#allocation143_spill] sm:$0xff]  ;;  %2618 = vrot.lane.b32.xlu1 %v2615_v49, %s9027_s19 }
 0x511   : > { %9267 = vst [vmem:[#allocation100_spill] sm:$0xff] %v7380_v32  ;;  %v7407_v1 = vmul.f32 %v9272_v58, %v9264_v28  ;;  %v9274_v61 = vrot.slane %v9273_v20, 1  ;;  %v2826_v62 = vmul.f32 %v9270_v37, %v6590_v26  ;;  %v7419_v29 = vmul.f32 %v9275_v40, %v9264_v28 }
 0x512   : > { %9271 = vst [vmem:[#allocation119_spill] sm:$0xff] %v7403_v25  ;;  %v9277_v5 = vrot.slane %v9276_v7, 2  ;;  %v2767_v38 = vrot.slane %v2761_v45, 1  ;;  %v2850_v7 = vmul.f32 %v9275_v40, %v6590_v26  ;;  %v7438_v32 = vpop.permute.xlu1 %1914  ;;  %v7440_v49 = vpop.permute.xlu0 %1849  ;;  %v9283_v45 = vrot.slane %v7378_v36, 2 }
 0x513   : > { %v3258_v17 = vsel %vm1631_vm11, %v9274_v61, %v3257_v10  ;;  %v3485_v10 = vmul.f32 %v9272_v58, %v7389_v44  ;;  %2594 = vrot.lane.b32.xlu0 %v2591_v46, %s9027_s19  ;;  %v2791_v61 = vrot.slane %v2785_v42, 2  ;;  %9280 = vst [vmem:[#allocation138_spill] sm:$0xff] %v7438_v32  ;;  %9281 = vst [vmem:[#allocation156_spill] sm:$0xff] %v7440_v49  ;;  %v9282_v46 = vrot.slane %v7374_v0, 2 }
 0x514   : > { %v3262_v39 = vadd.f32 %v3258_v17, %v3241_v53  ;;  %v3278_v20 = vsel %vm1652_vm12, %v9277_v5, %v3277_v15  ;;  %v9278_v53 = vld [vmem:[#allocation136_spill] sm:$0xff]  ;;  %v9284_v26 = vrot.slane %v7387_v16, 1  ;;  %2659 = vrot.lane.b32.xlu1 %v2656_v4, %s9019_s28  ;;  %v9290_v5 = vrot.slane %v7403_v25, 1 }
 0x515   : > { %v7430_v17 = vmul.f32 %v9278_v53, %v9264_v28  ;;  %v3492_v15 = vrot.slane %v3485_v10, 1  ;;  %v2680_v42 = vsel %vm1652_vm12, %v2678_v59, %v9282_v46  ;;  %v3509_v24 = vmul.f32 %v9278_v53, %v7389_v44 }
 0x516   : > { %v7432_v47 = vadd.f32 %v3278_v20, %v3262_v39  ;;  %v2793_v39 = vsel %vm1652_vm12, %v2791_v61, %v9283_v45  ;;  %v2832_v20 = vrot.slane %v2826_v62, 1  ;;  %v2769_v10 = vsel %vm1631_vm11, %v2767_v38, %v9284_v26  ;;  %v9288_v62 = vld [vmem:[#allocation126_spill] sm:$0xff]  ;;  %v7479_v36 = vpop.permute.xlu1 %2092  ;;  %v7481_v54 = vpop.permute.xlu0 %2027 }
 0x517   : > { %v9286_v59 = vrot.slane %v7407_v1, 1  ;;  %2683 = vrot.lane.b32.xlu0 %v2680_v42, %s9019_s28  ;;  %v2963_v61 = vmul.f32 %v9288_v62, %v6604_v63  ;;  %v7469_v38 = vmul.f32 %v9288_v62, %v6725_v2  ;;  %v3516_v26 = vrot.slane %v3509_v24, 2  ;;  %9292 = vst [vmem:[#allocation135_spill] sm:$0xff] %v7479_v36  ;;  %9293 = vst [vmem:[#allocation143_spill] sm:$0xff] %v7481_v54  ;;  %v9294_v24 = vld [vmem:[#allocation127_spill] sm:$0xff] }
 0x518   : > { %9279 = vst [vmem:[#allocation130_spill] sm:$0xff] %v7432_v47  ;;  %v9285_v47 = vld [vmem:[#allocation137_spill] sm:$0xff]  ;;  %v2834_v14 = vsel %vm1631_vm11, %v2832_v20, %v9290_v5  ;;  %v3004_v45 = vmul.f32 %v9294_v24, %v6604_v63  ;;  %v9295_v5 = vld [vmem:[#allocation139_spill] sm:$0xff]  ;;  %v9296_v20 = vrot.slane %v7430_v17, 2  ;;  %v9298_v36 = vrot.slane %v7419_v29, 2  ;;  %2796 = vrot.lane.b32.xlu1 %v2793_v39, %s9027_s19 }
 0x519   : > { %v7456_v60 = vmul.f32 %v9285_v47, %v9264_v28  ;;  %v7461_v46 = vsel %vm1631_vm11, %v9286_v59, %v3492_v15  ;;  %9289 = vst [vmem:[#allocation121_spill] sm:$0xff] %v7469_v38  ;;  %v2856_v15 = vrot.slane %v2850_v7, 2  ;;  %v9291_v59 = vld [vmem:[#allocation125_spill] sm:$0xff]  ;;  %v3550_v42 = vmul.f32 %v9285_v47, %v7389_v44 }
 0x51a   : > { %9287 = vst [vmem:[#allocation97_spill] sm:$0xff] %v7461_v46  ;;  %v2939_v4 = vmul.f32 %v9291_v59, %v6604_v63  ;;  %v7485_v62 = vmul.f32 %v9291_v59, %v6725_v2  ;;  %v7491_v7 = vmul.f32 %v9295_v5, %v6685_v22  ;;  %v7496_v25 = vsel %vm1652_vm12, %v9296_v20, %v3516_v26  ;;  %v9300_v26 = vld [vmem:[#allocation128_spill] sm:$0xff] }
 0x51b   : > { %9297 = vst [vmem:[#allocation124_spill] sm:$0xff] %v7496_v25  ;;  %v2858_v35 = vsel %vm1652_vm12, %v2856_v15, %v9298_v36  ;;  %v7503_v54 = vmul.f32 %v9294_v24, %v6725_v2  ;;  %v8874_v37 = vrot.slane %v7456_v60, 1  ;;  %v3557_v55 = vrot.slane %v3550_v42, 1  ;;  %2772 = vrot.lane.b32.xlu0 %v2769_v10, %s9027_s19  ;;  %v9302_v24 = vld [vmem:[#allocation140_spill] sm:$0xff]  ;;  %v9303_v42 = vld [vmem:[#allocation141_spill] sm:$0xff] }
 0x51c   : > { %v2969_v3 = vrot.slane %v2963_v61, 2  ;;  %v7511_v20 = vmul.f32 %v9300_v26, %v6725_v2  ;;  %v4029_v36 = vmul.f32 %v9295_v5, %v6975_v6  ;;  %v2945_v15 = vrot.slane %v2939_v4, 1  ;;  %v7528_v61 = vpop.permute.xlu1 %2270  ;;  %v7530_v2 = vpop.permute.xlu0 %2205  ;;  %2837 = vrot.lane.b32.xlu1 %v2834_v14, %s9019_s28  ;;  %v9318_v14 = vld [vmem:[#allocation149_spill] sm:$0xff] }
 0x51d   : > { %9299 = vst [vmem:[#allocation146_spill] sm:$0xff] %v7503_v54  ;;  %v7517_v25 = vmul.f32 %v9302_v24, %v6685_v22  ;;  %v7521_v39 = vmul.f32 %v9303_v42, %v6685_v22  ;;  %v7526_v10 = vsel %vm1631_vm11, %v8874_v37, %v3557_v55  ;;  %9305 = vst [vmem:[#allocation125_spill] sm:$0xff] %v7528_v61  ;;  %v3010_v4 = vrot.slane %v3004_v45, 1  ;;  %v7544_v37 = vld [vmem:[#allocation3 + $0x18] sm:$0xff] }
 0x51e   : > { %9301 = vst [vmem:[#allocation136_spill] sm:$0xff] %v7511_v20  ;;  %9304 = vst [vmem:[#allocation137_spill] sm:$0xff] %v7526_v10  ;;  %v8878_v11 = vrot.slane %v7491_v7, 1  ;;  %v4036_v52 = vrot.slane %v4029_v36, 1  ;;  %v3028_v48 = vmul.f32 %v9300_v26, %v6604_v63  ;;  %v4053_v56 = vmul.f32 %v9302_v24, %v6975_v6  ;;  %v9307_v36 = vld [vmem:[#allocation131_spill] sm:$0xff] }
 0x51f   : > { %9306 = vst [vmem:[#allocation139_spill] sm:$0xff] %v7530_v2  ;;  %v4094_v55 = vmul.f32 %v9303_v42, %v6975_v6  ;;  %2861 = vrot.lane.b32.xlu0 %v2858_v35, %s9019_s28  ;;  %v3305_v46 = vmul.f32 %v7544_v37, %v9307_v36  ;;  %v7550_v63 = vmul.f32 %v9307_v36, %v6685_v22  ;;  %v9313_v32 = vrot.slane %v7469_v38, 2  ;;  %v9317_v35 = vld [vmem:[#allocation144_spill] sm:$0xff] }
 0x520   : > { %v7555_v9 = vsel %vm1631_vm11, %v8878_v11, %v4036_v52  ;;  %v4060_v45 = vrot.slane %v4053_v56, 2  ;;  %v7559_v2 = vpop.permute.xlu1 %2570  ;;  %v7561_v10 = vpop.permute.xlu0 %2635  ;;  %v9314_v23 = vrot.slane %v7485_v62, 1  ;;  %v9315_v52 = vld [vmem:[#allocation132_spill] sm:$0xff]  ;;  %v7575_v56 = vmul.f32 %v9317_v35, %v6685_v22 }
 0x521   : > { %9308 = vst [vmem:[#allocation128_spill] sm:$0xff] %v7550_v63  ;;  %9310 = vst [vmem:[#allocation140_spill] sm:$0xff] %v7555_v9  ;;  %v4101_v61 = vrot.slane %v4094_v55, 1  ;;  %v2971_v36 = vsel %vm1652_vm12, %v2969_v3, %v9313_v32  ;;  %v7571_v11 = vmul.f32 %v9315_v52, %v6685_v22  ;;  %v3034_v55 = vrot.slane %v3028_v48, 2 }
 0x522   : > { %9311 = vst [vmem:[#allocation141_spill] sm:$0xff] %v7559_v2  ;;  %9312 = vst [vmem:[#allocation162_spill] sm:$0xff] %v7561_v10  ;;  %v2947_v43 = vsel %vm1631_vm11, %v2945_v15, %v9314_v23  ;;  %v7579_v10 = vmul.f32 %v9318_v14, %v9264_v28  ;;  %v9319_v38 = vrot.slane %v7517_v25, 2  ;;  %v9321_v23 = vrot.slane %v7521_v39, 1  ;;  %2974 = vrot.lane.b32.xlu1 %v2971_v36, %s9027_s19 }
 0x523   : > { %9316 = vst [vmem:[#allocation163_spill] sm:$0xff] %v7571_v11  ;;  %v7592_v15 = vstv %s9309_s10  ;;  %2950 = vrot.lane.b32.xlu0 %v2947_v43, %s9027_s19  ;;  %v9323_v48 = vrot.slane %v7503_v54, 1  ;;  %v3329_v9 = vmul.f32 %v7544_v37, %v9315_v52  ;;  %v4207_v43 = vmul.f32 %v9318_v14, %v7389_v44  ;;  %v9328_v54 = vld [vmem:[#allocation134_spill] sm:$0xff]  ;;  %s9511_s10 = sld [smem:[#allocation190_spill]] }
 0x524   : > { %v7584_v3 = vsel %vm1652_vm12, %v9319_v38, %v4060_v45  ;;  %v7589_v32 = vsel %vm1631_vm11, %v9321_v23, %v4101_v61  ;;  %v4118_v38 = vmul.f32 %v9317_v35, %v6975_v6  ;;  %v9324_v45 = vrot.slane %v7511_v20, 2  ;;  %v7609_v36 = vpop.permute.xlu1 %2748 }
 0x525   : > { %9320 = vst [vmem:[#allocation144_spill] sm:$0xff] %v7584_v3  ;;  %9322 = vst [vmem:[#allocation149_spill] sm:$0xff] %v7589_v32  ;;  %v3012_v2 = vsel %vm1631_vm11, %v3010_v4, %v9323_v48  ;;  %v3311_v23 = vrot.slane %v3305_v46, 1  ;;  %v7611_v4 = vpop.permute.xlu0 %2813  ;;  %v7616_v3 = vmul.f32 %v9328_v54, %v6685_v22  ;;  %v9330_v46 = vld [vmem:[#allocation133_spill] sm:$0xff]  ;;  %v3335_v48 = vrot.slane %v3329_v9, 2 }
 0x526   : > { %v3036_v61 = vsel %vm1652_vm12, %v3034_v55, %v9324_v45  ;;  %9325 = vst [vmem:[#allocation164_spill] sm:$0xff] %v7609_v36  ;;  %9327 = vst [vmem:[#allocation165_spill] sm:$0xff] %v7611_v4  ;;  %v4125_v55 = vrot.slane %v4118_v38, 2  ;;  %v7621_v45 = vmul.f32 %v9330_v46, %v6685_v22  ;;  %v7626_v36 = vmul.f32 %v7253_v27, %v9264_v28 }
 0x527   : > { %9329 = vst [vmem:[#allocation166_spill] sm:$0xff] %v7616_v3  ;;  %v4214_v4 = vrot.slane %v4207_v43, 1  ;;  %3015 = vrot.lane.b32.xlu1 %v3012_v2, %s9019_s28  ;;  %3039 = vrot.lane.b32.xlu0 %v3036_v61, %s9019_s28  ;;  %v3394_v49 = vmul.f32 %v7544_v37, %v9328_v54  ;;  %v3370_v38 = vmul.f32 %v7544_v37, %v9330_v46  ;;  %v9332_v22 = vrot.slane %v7575_v56, 2 }
 0x528   : > { %9331 = vst [vmem:[#allocation167_spill] sm:$0xff] %v7621_v45  ;;  %v7640_v33 = vstv %s9326_s14  ;;  %v7644_v2 = vmul.f32 %v7592_v15, %v9264_v28  ;;  %v9335_v9 = vrot.slane %v7579_v10, 1  ;;  %v4231_v43 = vmul.f32 %v7253_v27, %v7389_v44  ;;  %v7653_v54 = vpop.permute.xlu1 %2926 }
 0x529   : > { %v7637_v32 = vsel %vm1652_vm12, %v9332_v22, %v4125_v55  ;;  %9337 = vst [vmem:[#allocation170_spill] sm:$0xff] %v7653_v54  ;;  %v7655_v13 = vpop.permute.xlu0 %2991  ;;  %v9339_v55 = vrot.slane %v7550_v63, 1  ;;  %v8891_v46 = vrot.slane %v7616_v3, 2  ;;  %v8889_v20 = vrot.slane %v7626_v36, 2  ;;  %s8301_s14 = scalar_lea.vmem %s9511_s10, %s9510_s15 }
 0x52a   : > { %9334 = vst [vmem:[#allocation168_spill] sm:$0xff] %v7637_v32  ;;  %v7649_v61 = vsel %vm1631_vm11, %v9335_v9, %v4214_v4  ;;  %9338 = vst [vmem:[#allocation171_spill] sm:$0xff] %v7655_v13  ;;  %v9340_v32 = vrot.slane %v7571_v11, 2  ;;  %v9341_v4 = vld [vmem:[#allocation104_spill] sm:$0xff]  ;;  %v4238_v54 = vrot.slane %v4231_v43, 2  ;;  %v4272_v13 = vmul.f32 %v7592_v15, %v7389_v44 }
 0x52b   : > { %9336 = vst [vmem:[#allocation169_spill] sm:$0xff] %v7649_v61  ;;  %v3313_v22 = vsel %vm1631_vm11, %v3311_v23, %v9339_v55  ;;  %v1888_v9 = vmul.f32 %v9341_v4, %v6975_v6  ;;  %v7671_v63 = vstv %s9333_s23  ;;  %v3376_v23 = vrot.slane %v3370_v38, 1  ;;  %v7681_v4 = vld [vmem:[#allocation3 + $0x30] sm:$0xff]  ;;  %s9514_s23 = sld [smem:[#allocation81_spill]] }
 0x52c   : > { %v3337_v28 = vsel %vm1652_vm12, %v3335_v48, %v9340_v32  ;;  %3316 = vrot.lane.b32.xlu1 %v3313_v22, %s9027_s19  ;;  %v3400_v32 = vrot.slane %v3394_v49, 2  ;;  %v7675_v48 = vld [vmem:[#allocation3 + $0x38] sm:$0xff]  ;;  %v3483_v43 = vmul.f32 %v7681_v4, %v9272_v58  ;;  %v7689_v22 = vsel %vm1652_vm12, %v8889_v20, %v4238_v54  ;;  %v7691_v38 = vpop.permute.xlu1 %3357  ;;  %v9346_v20 = vld [vmem:[#allocation105_spill] sm:$0xff] }
 0x52d   : > { %3340 = vrot.lane.b32.xlu0 %v3337_v28, %s9027_s19  ;;  %v7679_v55 = vmul.f32 %v7675_v48, %v7640_v33  ;;  %9342 = vst [vmem:[#allocation104_spill] sm:$0xff] %v7689_v22  ;;  %v4279_v49 = vrot.slane %v4272_v13, 1  ;;  %9343 = vst [vmem:[#allocation172_spill] sm:$0xff] %v7691_v38  ;;  %v7693_v28 = vpop.permute.xlu0 %3292  ;;  %v7700_v52 = vmul.f32 %v7675_v48, %v7671_v63  ;;  %v9345_v61 = vrot.slane %v7621_v45, 1 }
 0x52e   : > { %9344 = vst [vmem:[#allocation173_spill] sm:$0xff] %v7693_v28  ;;  %v3402_v11 = vsel %vm1652_vm12, %v3400_v32, %v8891_v46  ;;  %v3574_v58 = vmul.f32 %v7640_v33, %v7389_v44  ;;  %v1895_v13 = vrot.slane %v1888_v9, 2  ;;  %v1929_v38 = vmul.f32 %v9346_v20, %v6975_v6 }
 0x52f   : > { %v3378_v54 = vsel %vm1631_vm11, %v3376_v23, %v9345_v61  ;;  %v9347_v28 = vrot.slane %v7644_v2, 1  ;;  %v8894_v32 = vrot.slane %v7679_v55, 2  ;;  %v4296_v22 = vmul.f32 %v7671_v63, %v7389_v44 }
 0x530   : > { %3405 = vrot.lane.b32.xlu1 %v3402_v11, %s9019_s28  ;;  %v3581_v46 = vrot.slane %v3574_v58, 2  ;;  %v3489_v61 = vrot.slane %v3483_v43, 1  ;;  %v3507_v9 = vmul.f32 %v7681_v4, %v9278_v53  ;;  %v7721_v20 = vpop.permute.xlu1 %1851  ;;  %v9351_v58 = vld [vmem:[#allocation150_spill] sm:$0xff]  ;;  %v9353_v43 = vrot.slane %v7407_v1, 1 }
 0x531   : > { %v7712_v3 = vsel %vm1631_vm11, %v9347_v28, %v4279_v49  ;;  %3381 = vrot.lane.b32.xlu0 %v3378_v54, %s9019_s28  ;;  %9349 = vst [vmem:[#allocation174_spill] sm:$0xff] %v7721_v20  ;;  %v7723_v23 = vpop.permute.xlu0 %3470  ;;  %v8893_v49 = vrot.slane %v7700_v52, 2  ;;  %v4303_v28 = vrot.slane %v4296_v22, 2  ;;  %v9352_v54 = vrot.slane %v9351_v58, 2  ;;  %v9354_v20 = vld [vmem:[#allocation108_spill] sm:$0xff] }
 0x532   : > { %9348 = vst [vmem:[#allocation105_spill] sm:$0xff] %v7712_v3  ;;  %9350 = vst [vmem:[#allocation175_spill] sm:$0xff] %v7723_v23  ;;  %v7729_v11 = vsel %vm1652_vm12, %v8894_v32, %v3581_v46  ;;  %v3491_v53 = vsel %vm1631_vm11, %v3489_v61, %v9353_v43  ;;  %v1936_v45 = vrot.slane %v1929_v38, 1  ;;  %v2066_v23 = vmul.f32 %v9354_v20, %v7389_v44 }
 0x533   : > { %v1896_v3 = vsel %vm1652_vm12, %v9352_v54, %v1895_v13  ;;  %v7744_v46 = vsel %vm1652_vm12, %v8893_v49, %v4303_v28  ;;  %v3513_v22 = vrot.slane %v3507_v9, 2  ;;  %v3548_v13 = vmul.f32 %v7681_v4, %v9285_v47  ;;  %v7760_v9 = vld [vmem:[#allocation3 + $0x58] sm:$0x3] }
 0x534   : > { %1899 = vrot.lane.b32.xlu1 %v1896_v3, %s9027_s19  ;;  %v7748_v1 = vpop.permute.xlu1 %2029  ;;  %v9356_v38 = vrot.slane %v7122_v50, 1  ;;  %v9357_v3 = vrot.slane %v7430_v17, 2  ;;  %v2073_v54 = vrot.slane %v2066_v23, 2  ;;  %v2107_v28 = vmul.f32 %v6793_v8, %v7389_v44 }
 0x535   : > { %3494 = vrot.lane.b32.xlu0 %v3491_v53, %s9027_s19  ;;  %9355 = vst [vmem:[#allocation150_spill] sm:$0xff] %v7748_v1  ;;  %v7750_v61 = vpop.permute.xlu0 %3535  ;;  %v3554_v47 = vrot.slane %v3548_v13, 1  ;;  %v4027_v50 = vmul.f32 %v7544_v37, %v9295_v5  ;;  %v9359_v17 = vrot.slane %v7156_v57, 2  ;;  %v9361_v8 = vrot.slane %v7456_v60, 1 }
 0x536   : > { %v1937_v20 = vsel %vm1631_vm11, %v9356_v38, %v1936_v45  ;;  %v3515_v58 = vsel %vm1652_vm12, %v3513_v22, %v9357_v3  ;;  %v2114_v22 = vrot.slane %v2107_v28, 1  ;;  %v2244_v13 = vmul.f32 %v6807_v34, %v7760_v9 }
 0x537   : > { %v2074_v23 = vsel %vm1652_vm12, %v9359_v17, %v2073_v54  ;;  %v3556_v53 = vsel %vm1631_vm11, %v3554_v47, %v9361_v8  ;;  %v4033_v5 = vrot.slane %v4027_v50, 1  ;;  %v4051_v57 = vmul.f32 %v7544_v37, %v9302_v24 }
 0x538   : > { %1940 = vrot.lane.b32.xlu1 %v1937_v20, %s9019_s28  ;;  %v7766_v43 = vpop.permute.xlu1 %2207  ;;  %v2285_v20 = vmul.f32 %v6818_v30, %v7760_v9  ;;  %v9367_v34 = vrot.slane %v7195_v21, 1  ;;  %v2251_v28 = vrot.slane %v2244_v13, 2  ;;  %v2585_v24 = vmul.f32 %v9246_v51, %v6975_v6 }
 0x539   : > { %3518 = vrot.lane.b32.xlu0 %v3515_v58, %s9027_s19  ;;  %9358 = vst [vmem:[#allocation108_spill] sm:$0xff] %v7766_v43  ;;  %v7768_v45 = vpop.permute.xlu0 %4014  ;;  %v9368_v58 = vrot.slane %v7491_v7, 1  ;;  %v7797_v47 = vstv %s9360_s27  ;;  %v7800_v50 = vstv %s9362_s6  ;;  %v4092_v30 = vmul.f32 %v7544_v37, %v9303_v42  ;;  %s9519_s27 = sld [smem:[#allocation79_spill]] }
 0x53a   : > { %v2115_v3 = vsel %vm1631_vm11, %v9367_v34, %v2114_v22  ;;  %v7807_v21 = vstv %s9363_s9  ;;  %v4057_v7 = vrot.slane %v4051_v57, 2  ;;  %v4116_v17 = vmul.f32 %v7544_v37, %v9317_v35  ;;  %v9373_v22 = vld [vmem:[#allocation95_spill] sm:$0xff]  ;;  %s9522_s6 = sld [smem:[#allocation93_spill]]  ;;  %s5024_s9 = spop %5023 }
 0x53b   : > { %v4035_v54 = vsel %vm1631_vm11, %v4033_v5, %v9368_v58  ;;  %v2674_v51 = vmul.f32 %v9257_v12, %v6975_v6  ;;  %v7817_v8 = vstv %s9366_s30  ;;  %v2292_v34 = vrot.slane %v2285_v20, 1  ;;  %s5026_s30 = spop %5025 }
 0x53c   : > { %2077 = vrot.lane.b32.xlu1 %v2074_v23, %s9027_s19  ;;  %v7782_v38 = vpop.permute.xlu1 %2637  ;;  %v7814_v23 = vstv %s9365_s0  ;;  %v9375_v57 = vrot.slane %v7241_v19, 2  ;;  %v2592_v12 = vrot.slane %v2585_v24, 1  ;;  %v4205_v58 = vmul.f32 %v7681_v4, %v9318_v14  ;;  %s9525_s0 = sld [smem:[#allocation94_spill]] }
 0x53d   : > { %3559 = vrot.lane.b32.xlu0 %v3556_v53, %s9019_s28  ;;  %9364 = vst [vmem:[#allocation176_spill] sm:$0xff] %v7782_v38  ;;  %v7784_v60 = vpop.permute.xlu0 %4079  ;;  %v9372_v53 = vld [vmem:[#allocation99_spill] sm:$0xff]  ;;  %v4098_v20 = vrot.slane %v4092_v30, 1  ;;  %v7843_v19 = vmul.f32 %v9269_v31, %v7389_v44  ;;  %v9380_v30 = vrot.slane %v7521_v39, 1  ;;  %v7861_v31 = vmul.f32 %v7675_v48, %v7797_v47 }
 0x53e   : > { %v1677_v13 = vadd.f32 %v9373_v22, %v9372_v53  ;;  %v2252_v35 = vsel %vm1652_vm12, %v9375_v57, %v2251_v28  ;;  %v7837_v53 = vstv %s9370_s2  ;;  %v9377_v28 = vld [vmem:[#allocation98_spill] sm:$0xff]  ;;  %v2681_v22 = vrot.slane %v2674_v51, 2  ;;  %s9532_s2 = sld [smem:[#allocation61_spill]] }
 0x53f   : > { %v9381_v51 = vrot.slane %v7304_v41, 1  ;;  %v4229_v39 = vmul.f32 %v7681_v4, %v7253_v27  ;;  %v9383_v27 = vrot.slane %v7374_v0, 2  ;;  %v2163_v49 = vmul.f32 %v7807_v21, %v7760_v9 }
 0x540   : > { %2118 = vrot.lane.b32.xlu1 %v2115_v3, %s9019_s28  ;;  %v7821_v5 = vpop.permute.xlu1 %2815  ;;  %v9376_v3 = vrot.slane %v7517_v25, 2  ;;  %v7846_v25 = vstv %s9371_s26  ;;  %v1701_v24 = vadd.f32 %v9377_v28, %v1677_v13  ;;  %v4211_v28 = vrot.slane %v4205_v58, 1  ;;  %s9533_s26 = sld [smem:[#allocation88_spill]] }
 0x541   : > { %4038 = vrot.lane.b32.xlu0 %v4035_v54, %s9027_s19  ;;  %9374 = vst [vmem:[#allocation99_spill] sm:$0xff] %v7821_v5  ;;  %v7823_v42 = vpop.permute.xlu0 %4192  ;;  %v7834_v54 = vstv %s9369_s4  ;;  %v2593_v13 = vsel %vm1631_vm11, %v9381_v51, %v2592_v12  ;;  %v7890_v12 = vmul.f32 %v7675_v48, %v7817_v8  ;;  %v2682_v58 = vsel %vm1652_vm12, %v9383_v27, %v2681_v22  ;;  %s9531_s4 = sld [smem:[#allocation63_spill]] }
 0x542   : > { %v4059_v6 = vsel %vm1652_vm12, %v4057_v7, %v9376_v3  ;;  %v4122_v7 = vrot.slane %v4116_v17, 2  ;;  %v9379_v3 = vrot.slane %v7275_v18, 1  ;;  %v7865_v17 = vmul.f32 %v7675_v48, %v7800_v50 }
 0x543   : > { %v9382_v18 = vrot.slane %v7575_v56, 2  ;;  %v2183_v0 = vmul.f32 %v7814_v23, %v7760_v9 }
 0x544   : > { %2255 = vrot.lane.b32.xlu1 %v2252_v35, %s9027_s19  ;;  %v7849_v14 = vpop.permute.xlu1 %2993  ;;  %v2293_v35 = vsel %vm1631_vm11, %v9379_v3, %v2292_v34  ;;  %v7878_v3 = vld [vmem:[#allocation3 + $0x50] sm:$0xff] }
 0x545   : > { %4062 = vrot.lane.b32.xlu0 %v4059_v6, %s9027_s19  ;;  %9378 = vst [vmem:[#allocation95_spill] sm:$0xff] %v7849_v14  ;;  %v7851_v57 = vpop.permute.xlu0 %4257  ;;  %v4100_v6 = vsel %vm1631_vm11, %v4098_v20, %v9380_v30  ;;  %v4124_v34 = vsel %vm1652_vm12, %v4122_v7, %v9382_v18  ;;  %v2770_v20 = vrot.slane %v7843_v19, 1  ;;  %v7882_v41 = vmul.f32 %v7878_v3, %v7807_v21 }
 0x546   : > { %v7886_v56 = vmul.f32 %v7878_v3, %v7814_v23  ;;  %v9384_v19 = vrot.slane %v7579_v10, 1  ;;  %v2005_v30 = vmul.f32 %v7800_v50, %v7389_v44  ;;  %v2852_v18 = vmul.f32 %v9275_v40, %v7389_v44 }
 0x547   : > { %v7912_v10 = vmul.f32 %v7675_v48, %v7834_v54  ;;  %v2706_v40 = vmul.f32 %v7817_v8, %v7389_v44  ;;  %v7945_v14 = vmul.f32 %v7878_v3, %v7846_v25 }
 0x548   : > { %2296 = vrot.lane.b32.xlu1 %v2293_v35, %s9019_s28  ;;  %v4213_v7 = vsel %vm1631_vm11, %v4211_v28, %v9384_v19  ;;  %v1985_v35 = vmul.f32 %v7797_v47, %v7389_v44  ;;  %v7916_v28 = vmul.f32 %v7878_v3, %v7837_v53  ;;  %v2012_v19 = vrot.slane %v2005_v30, 2 }
 0x549   : > { %4103 = vrot.lane.b32.xlu0 %v4100_v6, %s9019_s28  ;;  %v7902_v6 = vpop.permute.xlu1 %3294  ;;  %v7904_v51 = vpop.permute.xlu0 %3648  ;;  %v9388_v30 = vrot.slane %v7865_v17, 2 }
 0x54a   : > { %9385 = vst [vmem:[#allocation98_spill] sm:$0xff] %v7902_v6  ;;  %9386 = vst [vmem:[#allocation177_spill] sm:$0xff] %v7904_v51  ;;  %v1992_v27 = vrot.slane %v1985_v35, 1  ;;  %v9387_v51 = vrot.slane %v7861_v31, 1  ;;  %v2190_v6 = vrot.slane %v2183_v0, 2  ;;  %v9393_v0 = vrot.slane %v7886_v56, 2 }
 0x54c   : > { %2596 = vrot.lane.b32.xlu1 %v2593_v13, %s9027_s19  ;;  %v7930_v35 = vsel %vm1631_vm11, %v9387_v51, %v1992_v27  ;;  %v7935_v13 = vsel %vm1652_vm12, %v9388_v30, %v2012_v19  ;;  %v2726_v51 = vmul.f32 %v7834_v54, %v7389_v44  ;;  %v2884_v27 = vmul.f32 %v7837_v53, %v7760_v9 }
 0x54d   : > { %4127 = vrot.lane.b32.xlu0 %v4124_v34, %s9019_s28  ;;  %9389 = vst [vmem:[#allocation178_spill] sm:$0xff] %v7935_v13  ;;  %v2170_v34 = vrot.slane %v2163_v49, 1  ;;  %v7939_v32 = vpop.permute.xlu1 %3472  ;;  %v7941_v22 = vpop.permute.xlu0 %4370  ;;  %v9392_v30 = vrot.slane %v7882_v41, 1  ;;  %v7963_v5 = vsel %vm1652_vm12, %v9393_v0, %v2190_v6  ;;  %v2904_v19 = vmul.f32 %v7846_v25, %v7760_v9  ;;  %v9394_v49 = vld [vmem:[#allocation111_spill] sm:$0xff] }
 0x54e   : > { %9390 = vst [vmem:[#allocation179_spill] sm:$0xff] %v7939_v32  ;;  %9391 = vst [vmem:[#allocation180_spill] sm:$0xff] %v7941_v22  ;;  %v2713_v22 = vrot.slane %v2706_v40, 1  ;;  %v2733_v43 = vrot.slane %v2726_v51, 2  ;;  %v2891_v38 = vrot.slane %v2884_v27, 1  ;;  %v1725_v1 = vadd.f32 %v9394_v49, %v1701_v24 }
 0x54f   : > { %v7956_v32 = vsel %vm1631_vm11, %v9392_v30, %v2170_v34  ;;  %v4235_v13 = vrot.slane %v4229_v39, 2  ;;  %v4270_v40 = vmul.f32 %v7681_v4, %v7592_v15  ;;  %v9397_v27 = vrot.slane %v7912_v10, 2 }
 0x550   : > { %2685 = vrot.lane.b32.xlu1 %v2682_v58, %s9019_s28  ;;  %v9395_v58 = vrot.slane %v7890_v12, 1  ;;  %v9398_v24 = vrot.slane %v7916_v28, 1  ;;  %v2911_v39 = vrot.slane %v2904_v19, 2  ;;  %v9401_v0 = vrot.slane %v7626_v36, 2  ;;  %v9404_v36 = vld [vmem:[#allocation96_spill] sm:$0xff] }
 0x551   : > { %4216 = vrot.lane.b32.xlu0 %v4213_v7, %s9027_s19  ;;  %v7975_v34 = vpop.permute.xlu1 %3537  ;;  %v7977_v6 = vpop.permute.xlu0 %1916  ;;  %v7983_v30 = vsel %vm1652_vm12, %v9397_v27, %v2733_v43  ;;  %v2859_v51 = vrot.slane %v2852_v18, 2  ;;  %v9402_v43 = vrot.slane %v7945_v14, 2  ;;  %v1742_v19 = vadd.f32 %v9404_v36, %v1725_v1  ;;  %v9410_v36 = vld [vmem:[#allocation132_spill] sm:$0xff] }
 0x552   : > { %v7973_v7 = vsel %vm1631_vm11, %v9395_v58, %v2713_v22  ;;  %9396 = vst [vmem:[#allocation111_spill] sm:$0xff] %v7975_v34  ;;  %v7988_v15 = vsel %vm1631_vm11, %v9398_v24, %v2891_v38  ;;  %v9400_v22 = vrot.slane %v7387_v16, 1  ;;  %v4237_v58 = vsel %vm1652_vm12, %v4235_v13, %v9401_v0 }
 0x553   : > { %9399 = vst [vmem:[#allocation181_spill] sm:$0xff] %v7988_v15  ;;  %v2941_v34 = vmul.f32 %v9291_v59, %v7760_v9  ;;  %v8003_v38 = vsel %vm1652_vm12, %v9402_v43, %v2911_v39  ;;  %v4276_v16 = vrot.slane %v4270_v40, 1  ;;  %v3030_v59 = vmul.f32 %v9300_v26, %v7760_v9 }
 0x554   : > { %v2771_v49 = vsel %vm1631_vm11, %v9400_v22, %v2770_v20  ;;  %9403 = vst [vmem:[#allocation182_spill] sm:$0xff] %v8003_v38  ;;  %v3572_v20 = vmul.f32 %v7681_v4, %v7640_v33  ;;  %v9405_v27 = vrot.slane %v7419_v29, 2  ;;  %v9406_v39 = vrot.slane %v7644_v2, 1 }
 0x555   : > { %2774 = vrot.lane.b32.xlu1 %v2771_v49, %s9027_s19  ;;  %4240 = vrot.lane.b32.xlu0 %v4237_v58, %s9027_s19  ;;  %v8008_v13 = vpop.permute.xlu1 %4016  ;;  %v8010_v18 = vpop.permute.xlu0 %2094  ;;  %v2948_v22 = vrot.slane %v2941_v34, 1  ;;  %v4294_v33 = vmul.f32 %v7681_v4, %v7671_v63  ;;  %v9407_v49 = vld [vmem:[#allocation120_spill] sm:$0xff]  ;;  %v9408_v2 = vrot.slane %v7485_v62, 1  ;;  %v9409_v34 = vrot.slane %v7679_v55, 2 }
 0x556   : > { %v2860_v24 = vsel %vm1652_vm12, %v9405_v27, %v2859_v51  ;;  %v4278_v40 = vsel %vm1631_vm11, %v4276_v16, %v9406_v39  ;;  %v3578_v1 = vrot.slane %v3572_v20, 2  ;;  %v1766_v0 = vadd.f32 %v9407_v49, %v1742_v19  ;;  %v8035_v16 = vld [vmem:[#allocation3 + $0x28] sm:$0x3]  ;;  %v9411_v20 = vld [vmem:[#allocation103_spill] sm:$0xff] }
 0x557   : > { %v3037_v51 = vrot.slane %v3030_v59, 2  ;;  %v2949_v58 = vsel %vm1631_vm11, %v9408_v2, %v2948_v22  ;;  %v3331_v63 = vmul.f32 %v8035_v16, %v9410_v36  ;;  %v1864_v19 = vmul.f32 %v8035_v16, %v9411_v20  ;;  %v9412_v59 = vld [vmem:[#allocation110_spill] sm:$0xff]  ;;  %v9414_v22 = vld [vmem:[#allocation136_spill] sm:$0xff] }
 0x558   : > { %v3580_v43 = vsel %vm1652_vm12, %v3578_v1, %v9409_v34  ;;  %v4300_v62 = vrot.slane %v4294_v33, 2  ;;  %v1790_v27 = vadd.f32 %v9412_v59, %v1766_v0  ;;  %v9415_v1 = vrot.slane %v9414_v22, 2  ;;  %v9417_v33 = vld [vmem:[#allocation133_spill] sm:$0xff]  ;;  %v9418_v36 = vld [vmem:[#allocation106_spill] sm:$0xff] }
 0x559   : > { %2863 = vrot.lane.b32.xlu1 %v2860_v24, %s9019_s28  ;;  %4281 = vrot.lane.b32.xlu0 %v4278_v40, %s9019_s28  ;;  %v8025_v26 = vpop.permute.xlu1 %4081  ;;  %v8027_v29 = vpop.permute.xlu0 %2272  ;;  %v9413_v24 = vld [vmem:[#allocation101_spill] sm:$0xff]  ;;  %v9416_v2 = vrot.slane %v7700_v52, 2  ;;  %v3338_v34 = vrot.slane %v3331_v63, 2  ;;  %v3372_v0 = vmul.f32 %v8035_v16, %v9417_v33  ;;  %v1953_v20 = vmul.f32 %v8035_v16, %v9418_v36  ;;  %v9421_v63 = vld [vmem:[#allocation107_spill] sm:$0xff]  ;;  %v9424_v36 = vld [vmem:[#allocation148_spill] sm:$0xff] }
 0x55a   : > { %v1805_v55 = vmul.f32 %v7544_v37, %v9413_v24  ;;  %v3038_v49 = vsel %vm1652_vm12, %v9415_v1, %v3037_v51  ;;  %v9419_v59 = vstv %s9216_s20  ;;  %v9422_v1 = vld [vmem:[#allocation163_spill] sm:$0xff]  ;;  %v9425_v38 = vrot.slane %v9424_v36, 1 }
 0x55b   : > { %v1795_v24 = vmul.f32 %v7544_v37, %v9419_v59  ;;  %v1960_v15 = vrot.slane %v1953_v20, 2  ;;  %v9434_v20 = vld [vmem:[#allocation151_spill] sm:$0xff] }
 0x55c   : > { %v1811_v22 = vrot.slane %v1805_v55, 1  ;;  %v9428_v55 = vld [vmem:[#allocation142_spill] sm:$0xff] }
 0x55d   : > { %2952 = vrot.lane.b32.xlu1 %v2949_v58, %s9027_s19  ;;  %3583 = vrot.lane.b32.xlu0 %v3580_v43, %s9019_s28  ;;  %v8046_v39 = vpop.permute.xlu1 %4194  ;;  %v8048_v40 = vpop.permute.xlu0 %2572  ;;  %v4302_v58 = vsel %vm1652_vm12, %v4300_v62, %v9416_v2  ;;  %v1871_v43 = vrot.slane %v1864_v19, 1  ;;  %v1797_v51 = vadd.f32 %v1795_v24, %v1790_v27  ;;  %v2042_v19 = vmul.f32 %v9421_v63, %v7389_v44 }
 0x55e   : > { %v9423_v2 = vrot.slane %v9422_v1, 2  ;;  %v9429_v24 = vrot.slane %v9428_v55, 1  ;;  %v8895_v55 = vstv %s9427_s21 }
 0x55f   : > { %v1872_v59 = vsel %vm1631_vm11, %v9425_v38, %v1871_v43  ;;  %v9432_v38 = vld [vmem:[#allocation167_spill] sm:$0xff] }
 0x560   : > { %v3339_v33 = vsel %vm1652_vm12, %v9423_v2, %v3338_v34  ;;  %v1813_v63 = vsel %vm1631_vm11, %v1811_v22, %v9429_v24  ;;  %v9433_v43 = vrot.slane %v9432_v38, 1  ;;  %v9437_v24 = vld [vmem:[#allocation145_spill] sm:$0xff] }
 0x561   : > { %3041 = vrot.lane.b32.xlu1 %v3038_v49, %s9019_s28  ;;  %4305 = vrot.lane.b32.xlu0 %v4302_v58, %s9019_s28  ;;  %v8065_v52 = vpop.permute.xlu1 %4259  ;;  %v8067_v62 = vpop.permute.xlu0 %2750  ;;  %v3379_v49 = vrot.slane %v3372_v0, 1  ;;  %v9426_v58 = vld [vmem:[#allocation102_spill] sm:$0xff]  ;;  %v1818_v1 = vadd.f32 %v1813_v63, %v1797_v51 }
 0x562   : > { %9420 = vst [vmem:[#allocation96_spill] sm:$0xff] %v8065_v52  ;;  %v1825_v27 = vmul.f32 %v7544_v37, %v9426_v58  ;;  %v9436_v58 = vld [vmem:[#allocation109_spill] sm:$0xff] }
 0x563   : > { %v3380_v0 = vsel %vm1631_vm11, %v9433_v43, %v3379_v49  ;;  %v2131_v22 = vmul.f32 %v9436_v58, %v7389_v44  ;;  %v9438_v49 = vrot.slane %v9437_v24, 2  ;;  %v9441_v43 = vld [vmem:[#allocation153_spill] sm:$0xff]  ;;  %v9444_v24 = vld [vmem:[#allocation156_spill] sm:$0xff] }
 0x564   : > { %v1831_v51 = vrot.slane %v1825_v27, 2  ;;  %v3710_v27 = vmul.f32 %v7878_v3, %v8895_v55 }
 0x565   : > { %3342 = vrot.lane.b32.xlu1 %v3339_v33, %s9027_s19  ;;  %1875 = vrot.lane.b32.xlu0 %v1872_v59, %s9027_s19  ;;  %v8084_v34 = vpop.permute.xlu1 %3650  ;;  %v8086_v2 = vpop.permute.xlu0 %2928  ;;  %v9435_v33 = vrot.slane %v9434_v20, 2  ;;  %v2049_v59 = vrot.slane %v2042_v19, 1 }
 0x566   : > { %9430 = vst [vmem:[#allocation120_spill] sm:$0xff] %v8084_v34  ;;  %9431 = vst [vmem:[#allocation132_spill] sm:$0xff] %v8086_v2 }
 0x567   : > { %v1961_v36 = vsel %vm1652_vm12, %v9435_v33, %v1960_v15  ;;  %v1833_v15 = vsel %vm1652_vm12, %v1831_v51, %v9438_v49  ;;  %v2138_v33 = vrot.slane %v2131_v22, 2  ;;  %v8896_v51 = vstv %s8103_s18 }
 0x568   : > { %v1838_v38 = vadd.f32 %v1833_v15, %v1818_v1  ;;  %v4432_v1 = vmul.f32 %v7878_v3, %v8896_v51 }
 0x569   : > { %3383 = vrot.lane.b32.xlu1 %v3380_v0, %s9019_s28  ;;  %1964 = vrot.lane.b32.xlu0 %v1961_v36, %s9019_s28  ;;  %v8108_v19 = vpop.permute.xlu1 %4372  ;;  %v8110_v63 = vpop.permute.xlu0 %3359  ;;  %v9442_v0 = vrot.slane %v9441_v43, 1  ;;  %v9443_v36 = vld [vmem:[#allocation112_spill] sm:$0xff]  ;;  %v9445_v43 = vld [vmem:[#allocation155_spill] sm:$0xff] }
 0x56a   : > { %9439 = vst [vmem:[#allocation103_spill] sm:$0xff] %v8108_v19  ;;  %9440 = vst [vmem:[#allocation110_spill] sm:$0xff] %v8110_v63  ;;  %v2220_v58 = vmul.f32 %v9443_v36, %v7760_v9  ;;  %v1855_v49 = vadd.f32 %v9444_v24, %v1838_v38  ;;  %v9446_v55 = vrot.slane %v9445_v43, 2  ;;  %v9449_v24 = vld [vmem:[#allocation138_spill] sm:$0xff] }
 0x56b   : > { %v2050_v20 = vsel %vm1631_vm11, %v9442_v0, %v2049_v59  ;;  %v9448_v0 = vld [vmem:[#allocation113_spill] sm:$0xff] }
 0x56c   : > { %v2139_v59 = vsel %vm1652_vm12, %v9446_v55, %v2138_v33  ;;  %v2227_v22 = vrot.slane %v2220_v58, 1  ;;  %v9452_v55 = vld [vmem:[#allocation117_spill] sm:$0xff] }
 0x56d   : > { %3715 = vrot.lane.b32.xlu1 %v3710_v27, %s9019_s28  ;;  %2053 = vrot.lane.b32.xlu0 %v2050_v20, %s9027_s19  ;;  %v1874_v34 = vpop.permute.xlu1 %1873  ;;  %v1898_v19 = vpop.permute.xlu0 %1897  ;;  %v2309_v27 = vmul.f32 %v9448_v0, %v7760_v9  ;;  %v2609_v33 = vmul.f32 %v8035_v16, %v9452_v55  ;;  %v9453_v58 = vld [vmem:[#allocation97_spill] sm:$0xff] }
 0x56e   : > { %v1879_v15 = vadd.f32 %v1874_v34, %v1855_v49  ;;  %v9450_v34 = vld [vmem:[#allocation158_spill] sm:$0xff] }
 0x56f   : > { %v9451_v49 = vrot.slane %v9450_v34, 1  ;;  %v2316_v2 = vrot.slane %v2309_v27, 2  ;;  %v2616_v55 = vrot.slane %v2609_v33, 2 }
 0x570   : > { %v1903_v38 = vadd.f32 %v1898_v19, %v1879_v15  ;;  %v1983_v19 = vmul.f32 %v7681_v4, %v7797_v47 }
 0x571   : > { %4437 = vrot.lane.b32.xlu1 %v4432_v1, %s9019_s28  ;;  %2142 = vrot.lane.b32.xlu0 %v2139_v59, %s9019_s28  ;;  %v1963_v20 = vpop.permute.xlu1 %1962  ;;  %v1939_v36 = vpop.permute.xlu0 %1938  ;;  %v2228_v43 = vsel %vm1631_vm11, %v9451_v49, %v2227_v22  ;;  %v8897_v1 = vstv %s9447_s13  ;;  %v2003_v22 = vmul.f32 %v7681_v4, %v7800_v50  ;;  %v9458_v50 = vrot.slane %v7861_v31, 1 }
 0x572   : > { %v1920_v51 = vadd.f32 %v9449_v24, %v1903_v38  ;;  %v1973_v59 = vmul.f32 %v7681_v4, %v8897_v1  ;;  %v9454_v24 = vld [vmem:[#allocation159_spill] sm:$0xff]  ;;  %v1989_v47 = vrot.slane %v1983_v19, 1  ;;  %v9461_v19 = vld [vmem:[#allocation122_spill] sm:$0xff] }
 0x573   : > { %v9455_v34 = vrot.slane %v9454_v24, 2  ;;  %v2787_v63 = vmul.f32 %v9461_v19, %v7389_v44  ;;  %v9469_v19 = vld [vmem:[#allocation140_spill] sm:$0xff] }
 0x574   : > { %v1944_v15 = vadd.f32 %v1939_v36, %v1920_v51  ;;  %v9457_v51 = vld [vmem:[#allocation124_spill] sm:$0xff]  ;;  %v1991_v1 = vsel %vm1631_vm11, %v1989_v47, %v9458_v50 }
 0x575   : > { %3496 = vrot.lane.b32.xlu1 %v9453_v58, %s9027_s19  ;;  %2231 = vrot.lane.b32.xlu0 %v2228_v43, %s9027_s19  ;;  %v2052_v0 = vpop.permute.xlu1 %2051  ;;  %v2076_v27 = vpop.permute.xlu0 %2075  ;;  %v2317_v49 = vsel %vm1652_vm12, %v9455_v34, %v2316_v2  ;;  %v9456_v43 = vld [vmem:[#allocation118_spill] sm:$0xff]  ;;  %v9459_v2 = vld [vmem:[#allocation160_spill] sm:$0xff] }
 0x576   : > { %v1968_v38 = vadd.f32 %v1963_v20, %v1944_v15  ;;  %v2650_v58 = vmul.f32 %v8035_v16, %v9456_v43  ;;  %v2009_v20 = vrot.slane %v2003_v22, 2  ;;  %v9460_v33 = vrot.slane %v9459_v2, 2  ;;  %v9464_v22 = vld [vmem:[#allocation137_spill] sm:$0xff] }
 0x578   : > { %v1975_v36 = vadd.f32 %v1973_v59, %v1968_v38  ;;  %v2617_v34 = vsel %vm1652_vm12, %v9460_v33, %v2616_v55  ;;  %v2657_v43 = vrot.slane %v2650_v58, 1  ;;  %v9463_v59 = vrot.slane %v7865_v17, 2  ;;  %v9465_v58 = vld [vmem:[#allocation123_spill] sm:$0xff] }
 0x579   : > { %3520 = vrot.lane.b32.xlu1 %v9457_v51, %s9027_s19  ;;  %2320 = vrot.lane.b32.xlu0 %v2317_v49, %s9019_s28  ;;  %v2141_v15 = vpop.permute.xlu1 %2140  ;;  %v2117_v24 = vpop.permute.xlu0 %2116  ;;  %v9462_v51 = vld [vmem:[#allocation115_spill] sm:$0xff]  ;;  %v2828_v47 = vmul.f32 %v9465_v58, %v7389_v44 }
 0x57a   : > { %v1996_v52 = vadd.f32 %v1991_v1, %v1975_v36  ;;  %v2546_v49 = vmul.f32 %v7544_v37, %v9462_v51  ;;  %v2011_v31 = vsel %vm1652_vm12, %v2009_v20, %v9463_v59  ;;  %v9466_v36 = vld [vmem:[#allocation143_spill] sm:$0xff]  ;;  %v9467_v37 = vld [vmem:[#allocation114_spill] sm:$0xff]  ;;  %v2794_v20 = vrot.slane %v2787_v63, 2  ;;  %v9473_v63 = vld [vmem:[#allocation129_spill] sm:$0xff] }
 0x57b   : > { %v9468_v2 = vrot.slane %v9467_v37, 1  ;;  %v9476_v37 = vld [vmem:[#allocation126_spill] sm:$0xff] }
 0x57c   : > { %v2016_v1 = vadd.f32 %v2011_v31, %v1996_v52  ;;  %v2552_v33 = vrot.slane %v2546_v49, 2  ;;  %v9474_v49 = vrot.slane %v9473_v63, 2 }
 0x57d   : > { %3561 = vrot.lane.b32.xlu1 %v9464_v22, %s9019_s28  ;;  %2620 = vrot.lane.b32.xlu0 %v2617_v34, %s9027_s19  ;;  %v8175_v38 = vpop.permute.xlu1 %2229  ;;  %v8177_v55 = vpop.permute.xlu0 %2253  ;;  %v2658_v17 = vsel %vm1631_vm11, %v9468_v2, %v2657_v43  ;;  %v9470_v34 = vld [vmem:[#allocation161_spill] sm:$0xff]  ;;  %v2835_v22 = vrot.slane %v2828_v47, 1  ;;  %v9479_v47 = vld [vmem:[#allocation135_spill] sm:$0xff] }
 0x57e   : > { %v2033_v50 = vadd.f32 %v9466_v36, %v2016_v1  ;;  %v9471_v51 = vrot.slane %v9470_v34, 2  ;;  %v9472_v1 = vld [vmem:[#allocation147_spill] sm:$0xff]  ;;  %v2795_v36 = vsel %vm1652_vm12, %v9474_v49, %v2794_v20  ;;  %v9478_v2 = vld [vmem:[#allocation141_spill] sm:$0xff] }
 0x57f   : > { %v9480_v34 = vld [vmem:[#allocation119_spill] sm:$0xff] }
 0x580   : > { %v2057_v52 = vadd.f32 %v2052_v0, %v2033_v50  ;;  %v2554_v59 = vsel %vm1652_vm12, %v2552_v33, %v9471_v51  ;;  %v2965_v0 = vmul.f32 %v9476_v37, %v7760_v9  ;;  %v9477_v50 = vld [vmem:[#allocation144_spill] sm:$0xff]  ;;  %v9481_v51 = vrot.slane %v9480_v34, 1 }
 0x581   : > { %4040 = vrot.lane.b32.xlu1 %v9469_v19, %s9027_s19  ;;  %2661 = vrot.lane.b32.xlu0 %v2658_v17, %s9019_s28  ;;  %v8191_v31 = vpop.permute.xlu1 %2318  ;;  %v8193_v44 = vpop.permute.xlu0 %2294  ;;  %v2559_v58 = vadd.f32 %v2554_v59, %v9472_v1  ;;  %v8206_v19 = vld [vmem:[#allocation3 + $0x48] sm:$0xff] }
 0x582   : > { %v2081_v43 = vadd.f32 %v2076_v27, %v2057_v52  ;;  %v2161_v27 = vmul.f32 %v8206_v19, %v7807_v21  ;;  %v2836_v59 = vsel %vm1631_vm11, %v9481_v51, %v2835_v22  ;;  %v2972_v49 = vrot.slane %v2965_v0, 2  ;;  %v9488_v51 = vld [vmem:[#allocation121_spill] sm:$0xff] }
 0x583   : > { %v2576_v17 = vadd.f32 %v9478_v2, %v2559_v58  ;;  %v8898_v58 = vstv %s9475_s3 }
 0x584   : > { %v2098_v33 = vadd.f32 %v9479_v47, %v2081_v43  ;;  %v2181_v43 = vmul.f32 %v8206_v19, %v7814_v23  ;;  %v2151_v21 = vmul.f32 %v8206_v19, %v8898_v58  ;;  %v2167_v0 = vrot.slane %v2161_v27, 1  ;;  %v9486_v47 = vld [vmem:[#allocation131_spill] sm:$0xff] }
 0x585   : > { %4064 = vrot.lane.b32.xlu1 %v9477_v50, %s9027_s19  ;;  %2798 = vrot.lane.b32.xlu0 %v2795_v36, %s9027_s19  ;;  %v2619_v52 = vpop.permute.xlu1 %2618  ;;  %v2595_v20 = vpop.permute.xlu0 %2594  ;;  %v9482_v36 = vld [vmem:[#allocation127_spill] sm:$0xff]  ;;  %v9483_v50 = vld [vmem:[#allocation149_spill] sm:$0xff]  ;;  %v9490_v58 = vrot.slane %v7882_v41, 1  ;;  %v2704_v27 = vmul.f32 %v7681_v4, %v7817_v8  ;;  %v2724_v8 = vmul.f32 %v7681_v4, %v7834_v54 }
 0x586   : > { %v2122_v1 = vadd.f32 %v2117_v24, %v2098_v33  ;;  %v2600_v63 = vadd.f32 %v2595_v20, %v2576_v17  ;;  %v3006_v37 = vmul.f32 %v9482_v36, %v7760_v9  ;;  %v3307_v33 = vmul.f32 %v8035_v16, %v9486_v47  ;;  %v9487_v20 = vld [vmem:[#allocation162_spill] sm:$0xff] }
 0x587   : > { %v9489_v36 = vrot.slane %v9488_v51, 2  ;;  %v9493_v51 = vld [vmem:[#allocation146_spill] sm:$0xff] }
 0x588   : > { %v2146_v22 = vadd.f32 %v2141_v15, %v2122_v1  ;;  %v2624_v24 = vadd.f32 %v2619_v52, %v2600_v63  ;;  %v2169_v15 = vsel %vm1631_vm11, %v2167_v0, %v9490_v58  ;;  %v2187_v52 = vrot.slane %v2181_v43, 2  ;;  %v9491_v1 = vld [vmem:[#allocation168_spill] sm:$0xff] }
 0x589   : > { %4105 = vrot.lane.b32.xlu1 %v9483_v50, %s9019_s28  ;;  %2839 = vrot.lane.b32.xlu0 %v2836_v59, %s9019_s28  ;;  %v2660_v2 = vpop.permute.xlu1 %2659  ;;  %v2684_v17 = vpop.permute.xlu0 %2683  ;;  %v2973_v59 = vsel %vm1652_vm12, %v9489_v36, %v2972_v49  ;;  %v3013_v50 = vrot.slane %v3006_v37, 1  ;;  %v8908_v63 = vstv %s9484_s12  ;;  %v9492_v49 = vrot.slane %v7886_v56, 2 }
 0x58a   : > { %v2153_v23 = vadd.f32 %v2151_v21, %v2146_v22  ;;  %v2641_v34 = vadd.f32 %v9487_v20, %v2624_v24  ;;  %v3660_v21 = vstv %s9485_s11  ;;  %v2694_v41 = vmul.f32 %v7681_v4, %v8908_v63 }
 0x58b   : > { %v2189_v37 = vsel %vm1652_vm12, %v2187_v52, %v9492_v49  ;;  %v3314_v0 = vrot.slane %v3307_v33, 1  ;;  %v9494_v36 = vrot.slane %v9493_v51, 1  ;;  %v2710_v56 = vrot.slane %v2704_v27, 1  ;;  %v9498_v27 = vld [vmem:[#allocation128_spill] sm:$0xff] }
 0x58c   : > { %v2174_v22 = vadd.f32 %v2169_v15, %v2153_v23  ;;  %v2665_v24 = vadd.f32 %v2660_v2, %v2641_v34  ;;  %v8252_v2 = vmul.f32 %v7878_v3, %v3660_v21  ;;  %v9495_v34 = vld [vmem:[#allocation169_spill] sm:$0xff]  ;;  %v3661_v33 = vmul.f32 %v8206_v19, %v3660_v21 }
 0x58d   : > { %4129 = vrot.lane.b32.xlu1 %v9491_v1, %s9019_s28  ;;  %2976 = vrot.lane.b32.xlu0 %v2973_v59, %s9027_s19  ;;  %v2797_v58 = vpop.permute.xlu1 %2796  ;;  %v2773_v43 = vpop.permute.xlu0 %2772  ;;  %v3014_v23 = vsel %vm1631_vm11, %v9494_v36, %v3013_v50  ;;  %v9496_v59 = vld [vmem:[#allocation139_spill] sm:$0xff]  ;;  %v2730_v50 = vrot.slane %v2724_v8, 2  ;;  %v9502_v8 = vld [vmem:[#allocation104_spill] sm:$0xff] }
 0x58e   : > { %v2194_v47 = vadd.f32 %v2189_v37, %v2174_v22  ;;  %v2689_v20 = vadd.f32 %v2684_v17, %v2665_v24  ;;  %v9497_v17 = vrot.slane %v7890_v12, 1  ;;  %v9499_v24 = vrot.slane %v9498_v27, 1 }
 0x58f   : > { %v9501_v12 = vrot.slane %v7912_v10, 2 }
 0x590   : > { %v2211_v54 = vadd.f32 %v9496_v59, %v2194_v47  ;;  %v2696_v15 = vadd.f32 %v2694_v41, %v2689_v20  ;;  %v2712_v52 = vsel %vm1631_vm11, %v2710_v56, %v9497_v17  ;;  %v3315_v49 = vsel %vm1631_vm11, %v9499_v24, %v3314_v0  ;;  %v9500_v41 = vld [vmem:[#allocation134_spill] sm:$0xff] }
 0x591   : > { %4218 = vrot.lane.b32.xlu1 %v9495_v34, %s9027_s19  ;;  %3017 = vrot.lane.b32.xlu0 %v3014_v23, %s9019_s28  ;;  %v2838_v1 = vpop.permute.xlu1 %2837  ;;  %v8262_v22 = vpop.permute.xlu0 %2861  ;;  %v3668_v47 = vrot.slane %v8252_v2, 1  ;;  %v3396_v20 = vmul.f32 %v8035_v16, %v9500_v41  ;;  %v2732_v36 = vsel %vm1652_vm12, %v2730_v50, %v9501_v12  ;;  %v4382_v23 = vstv %s8088_s5  ;;  %v9505_v16 = vld [vmem:[#allocation125_spill] sm:$0xff]  ;;  %s9535_s5 = sld [smem:[#allocation87_spill]] }
 0x592   : > { %v2235_v37 = vadd.f32 %v8175_v38, %v2211_v54  ;;  %v2717_v51 = vadd.f32 %v2712_v52, %v2696_v15  ;;  %v3667_v56 = vrot.slane %v3661_v33, 1  ;;  %v8284_v10 = vmul.f32 %v7878_v3, %v4382_v23  ;;  %v9506_v15 = vld [vmem:[#allocation164_spill] sm:$0xff] }
 0x593   : > { %v3403_v50 = vrot.slane %v3396_v20, 2  ;;  %v4383_v33 = vmul.f32 %v8206_v19, %v4382_v23  ;;  %v9521_v2 = vrot.slane %v7945_v14, 2 }
 0x594   : > { %v2259_v0 = vadd.f32 %v8177_v55, %v2235_v37  ;;  %v2737_v38 = vadd.f32 %v2732_v36, %v2717_v51  ;;  %v3669_v52 = vsel %vm1631_vm11, %v3667_v56, %v3668_v47  ;;  %v9507_v55 = vld [vmem:[#allocation105_spill] sm:$0xff]  ;;  %v2882_v37 = vmul.f32 %v8206_v19, %v7837_v53  ;;  %v9512_v36 = vld [vmem:[#allocation166_spill] sm:$0xff] }
 0x595   : > { %4242 = vrot.lane.b32.xlu1 %v9502_v8, %s9027_s19  ;;  %3318 = vrot.lane.b32.xlu0 %v3315_v49, %s9027_s19  ;;  %v8279_v34 = vpop.permute.xlu1 %2974  ;;  %v8281_v59 = vpop.permute.xlu0 %2950  ;;  %v3684_v49 = vstv %s9504_s24  ;;  %v4390_v20 = vrot.slane %v8284_v10, 1  ;;  %v9513_v8 = vrot.slane %v9512_v36, 2  ;;  %v8903_v53 = vstv %s9508_s16  ;;  %v9516_v10 = vld [vmem:[#allocation173_spill] sm:$0xff] }
 0x596   : > { %v2276_v54 = vadd.f32 %v9505_v16, %v2259_v0  ;;  %v2754_v17 = vadd.f32 %v9506_v15, %v2737_v38  ;;  %v8317_v38 = vmul.f32 %v7878_v3, %v3684_v49  ;;  %v8321_v56 = vstv %s9509_s7  ;;  %v9517_v15 = vld [vmem:[#allocation165_spill] sm:$0xff] }
 0x597   : > { %v3404_v0 = vsel %vm1652_vm12, %v9513_v8, %v3403_v50  ;;  %v2902_v16 = vmul.f32 %v8206_v19, %v7846_v25  ;;  %v2888_v50 = vrot.slane %v2882_v37, 1  ;;  %v9518_v37 = vrot.slane %v7916_v28, 1 }
 0x598   : > { %v2300_v27 = vadd.f32 %v8193_v44, %v2276_v54  ;;  %v2778_v24 = vadd.f32 %v2773_v43, %v2754_v17  ;;  %v3663_v44 = vmul.f32 %v3660_v21, %v7760_v9  ;;  %v4406_v21 = vstv %s8101_s17 }
 0x599   : > { %4283 = vrot.lane.b32.xlu1 %v9507_v55, %s9019_s28  ;;  %3672 = vrot.lane.b32.xlu0 %v3669_v52, %s9027_s19  ;;  %v8306_v51 = vpop.permute.xlu1 %3015  ;;  %v8308_v41 = vpop.permute.xlu0 %3039  ;;  %v3685_v52 = vmul.f32 %v8206_v19, %v3684_v49  ;;  %v3692_v8 = vrot.slane %v8317_v38, 2  ;;  %v4407_v38 = vmul.f32 %v8206_v19, %v4406_v21 }
 0x59a   : > { %v2324_v43 = vadd.f32 %v8191_v31, %v2300_v27  ;;  %v2802_v12 = vadd.f32 %v2797_v58, %v2778_v24  ;;  %v4389_v31 = vrot.slane %v4383_v33, 1  ;;  %v9515_v58 = vld [vmem:[#allocation152_spill] sm:$0xff]  ;;  %v3670_v27 = vrot.slane %v3663_v44, 1 }
 0x59b   : > { %v3298_v54 = vadd.f32 %v9516_v10, %v9515_v58  ;;  %v4385_v33 = vmul.f32 %v4382_v23, %v7760_v9  ;;  %v2890_v58 = vsel %vm1631_vm11, %v2888_v50, %v9518_v37  ;;  %v3691_v44 = vrot.slane %v3685_v52, 2 }
 0x59c   : > { %2326 = vst.msk [vmem:[%s8301_s14] sm:$0xff] %vm521_vm5, %v2324_v43  ;;  %v2819_v17 = vadd.f32 %v9517_v15, %v2802_v12  ;;  %v8342_v43 = vstv %s9514_s23  ;;  %v2872_v12 = vmul.f32 %v8206_v19, %v8903_v53  ;;  %v3671_v28 = vsel %vm1631_vm11, %v3668_v47, %v3670_v27 }
 0x59d   : > { %3585 = vrot.lane.b32.xlu1 %v7729_v11, %s9019_s28  ;;  %3407 = vrot.lane.b32.xlu0 %v3404_v0, %s9019_s28  ;;  %v4391_v11 = vsel %vm1631_vm11, %v4389_v31, %v4390_v20  ;;  %v8339_v0 = vmul.f32 %v7878_v3, %v4406_v21  ;;  %v2908_v31 = vrot.slane %v2902_v16, 2  ;;  %v8360_v16 = vmul.f32 %v7675_v48, %v8321_v56 }
 0x59e   : > { %v3317_v25 = vpop.permute.xlu1 %3316  ;;  %v2843_v24 = vadd.f32 %v2838_v1, %v2819_v17  ;;  %v3687_v15 = vmul.f32 %v3684_v49, %v7760_v9  ;;  %v3693_v52 = vsel %vm1652_vm12, %v3691_v44, %v3692_v8  ;;  %v8376_v49 = vmul.f32 %v7675_v48, %v8342_v43 }
 0x59f   : > { %v3341_v55 = vpop.permute.xlu0 %3340  ;;  %v3322_v36 = vadd.f32 %v3317_v25, %v3298_v54  ;;  %v4414_v25 = vrot.slane %v8339_v0, 2  ;;  %v2910_v47 = vsel %vm1652_vm12, %v2908_v31, %v9521_v2  ;;  %v4413_v14 = vrot.slane %v4407_v38, 2 }
 0x5a0   : > { %v2867_v1 = vadd.f32 %v8262_v22, %v2843_v24  ;;  %v9520_v22 = vld [vmem:[#allocation172_spill] sm:$0xff]  ;;  %v3446_v24 = vmul.f32 %v7681_v4, %v8342_v43  ;;  %v4409_v44 = vmul.f32 %v4406_v21, %v7760_v9  ;;  %v8899_v38 = vrot.slane %v8376_v49, 2 }
 0x5a1   : > { %4307 = vrot.lane.b32.xlu1 %v7744_v46, %s9019_s28  ;;  %4394 = vrot.lane.b32.xlu0 %v4391_v11, %s9027_s19  ;;  %v3346_v23 = vadd.f32 %v3341_v55, %v3322_v36  ;;  %v4392_v46 = vrot.slane %v4385_v33, 1  ;;  %v8901_v55 = vstv %s9519_s27  ;;  %v3426_v11 = vmul.f32 %v7681_v4, %v8321_v56 }
 0x5a2   : > { %v3406_v10 = vpop.permute.xlu1 %3405  ;;  %v2874_v17 = vadd.f32 %v2872_v12, %v2867_v1  ;;  %v3416_v36 = vmul.f32 %v7681_v4, %v8901_v55  ;;  %v8900_v12 = vrot.slane %v8360_v16, 1  ;;  %v3694_v1 = vrot.slane %v3687_v15, 2 }
 0x5a3   : > { %v3382_v54 = vpop.permute.xlu0 %3381  ;;  %v3363_v50 = vadd.f32 %v9520_v22, %v3346_v23  ;;  %v4393_v31 = vsel %vm1631_vm11, %v4390_v20, %v4392_v46  ;;  %v4415_v23 = vsel %vm1652_vm12, %v4413_v14, %v4414_v25  ;;  %v3725_v4 = vstv %s9522_s6 }
 0x5a4   : > { %v2895_v27 = vadd.f32 %v2890_v58, %v2874_v17  ;;  %v3452_v20 = vrot.slane %v3446_v24, 2  ;;  %v9524_v15 = vstv %s9427_s21  ;;  %v3728_v2 = vmul.f32 %v3725_v4, %v7760_v9  ;;  %s9534_s21 = sld [smem:[#allocation89_spill]] }
 0x5a5   : > { %3674 = vrot.lane.b32.xlu1 %v3671_v28, %s9027_s19  ;;  %3696 = vrot.lane.b32.xlu0 %v3693_v52, %s9027_s19  ;;  %v3387_v33 = vadd.f32 %v3382_v54, %v3363_v50  ;;  %v3432_v54 = vrot.slane %v3426_v11, 1  ;;  %v9523_v28 = vld [vmem:[#allocation170_spill] sm:$0xff]  ;;  %v3709_v50 = vmul.f32 %v8206_v19, %v9524_v15  ;;  %v3727_v52 = vmul.f32 %v7878_v3, %v3725_v4 }
 0x5a6   : > { %v8383_v0 = vpop.permute.xlu1 %1899  ;;  %v2915_v48 = vadd.f32 %v2910_v47, %v2895_v27  ;;  %v3695_v27 = vsel %vm1652_vm12, %v3692_v8, %v3694_v1  ;;  %v3454_v24 = vsel %vm1652_vm12, %v3452_v20, %v8899_v38  ;;  %v4447_v14 = vstv %s5024_s9 }
 0x5a7   : > { %v3495_v37 = vpop.permute.xlu0 %3494  ;;  %v3411_v58 = vadd.f32 %v3406_v10, %v3387_v33  ;;  %v3434_v10 = vsel %vm1631_vm11, %v3432_v54, %v8900_v12  ;;  %v4416_v33 = vrot.slane %v4409_v44, 2  ;;  %v9526_v8 = vstv %s8103_s18 }
 0x5a8   : > { %v2932_v17 = vadd.f32 %v9523_v28, %v2915_v48  ;;  %v3726_v48 = vmul.f32 %v8206_v19, %v3725_v4  ;;  %v4431_v1 = vmul.f32 %v8206_v19, %v9526_v8  ;;  %v4449_v44 = vmul.f32 %v7878_v3, %v4447_v14  ;;  %v9527_v28 = vld [vmem:[#allocation171_spill] sm:$0xff]  ;;  %v9529_v4 = vld [vmem:[#allocation157_spill] sm:$0xff] }
 0x5a9   : > { %4396 = vrot.lane.b32.xlu1 %v4393_v31, %s9027_s19  ;;  %4418 = vrot.lane.b32.xlu0 %v4415_v23, %s9027_s19  ;;  %v3418_v22 = vadd.f32 %v3416_v36, %v3411_v58  ;;  %v3735_v23 = vrot.slane %v3728_v2, 1  ;;  %v4450_v54 = vmul.f32 %v4447_v14, %v7760_v9  ;;  %v3749_v15 = vstv %s9525_s0 }
 0x5aa   : > { %v8397_v46 = vpop.permute.xlu1 %1940  ;;  %v2956_v47 = vadd.f32 %v8281_v59, %v2932_v17  ;;  %v4448_v2 = vmul.f32 %v8206_v19, %v4447_v14 }
 0x5ab   : > { %v3519_v21 = vpop.permute.xlu0 %3518  ;;  %v3439_v11 = vadd.f32 %v3434_v10, %v3418_v22  ;;  %v9528_v22 = vld [vmem:[#allocation175_spill] sm:$0xff]  ;;  %v3733_v10 = vrot.slane %v3727_v52, 1 }
 0x5ac   : > { %v2980_v36 = vadd.f32 %v8279_v34, %v2956_v47  ;;  %v4417_v34 = vsel %vm1652_vm12, %v4414_v25, %v4416_v33 }
 0x5ad   : > { %3698 = vrot.lane.b32.xlu1 %v3695_v27, %s9027_s19  ;;  %3713 = vrot.lane.b32.xlu0 %v3709_v50, %s9019_s28  ;;  %v3459_v31 = vadd.f32 %v3454_v24, %v3439_v11  ;;  %v4020_v50 = vadd.f32 %v7768_v45, %v9529_v4  ;;  %v3732_v27 = vrot.slane %v3726_v48, 1  ;;  %v3751_v24 = vmul.f32 %v7878_v3, %v3749_v15 }
 0x5ae   : > { %v8413_v59 = vpop.permute.xlu1 %2077  ;;  %v2997_v17 = vadd.f32 %v9527_v28, %v2980_v36  ;;  %v3736_v33 = vsel %vm1631_vm11, %v3733_v10, %v3735_v23  ;;  %v4455_v45 = vrot.slane %v4449_v44, 1  ;;  %v4457_v36 = vrot.slane %v4450_v54, 1 }
 0x5af   : > { %v3560_v58 = vpop.permute.xlu0 %3559  ;;  %v3476_v20 = vadd.f32 %v9528_v22, %v3459_v31  ;;  %v3752_v31 = vmul.f32 %v3749_v15, %v7760_v9  ;;  %v4471_v48 = vstv %s5026_s30  ;;  %v3750_v44 = vmul.f32 %v8206_v19, %v3749_v15 }
 0x5b0   : > { %v3021_v47 = vadd.f32 %v8306_v51, %v2997_v17  ;;  %v3734_v51 = vsel %vm1631_vm11, %v3732_v27, %v3733_v10  ;;  %v3757_v17 = vrot.slane %v3751_v24, 2  ;;  %v4473_v10 = vmul.f32 %v7878_v3, %v4471_v48 }
 0x5b1   : > { %4420 = vrot.lane.b32.xlu1 %v4417_v34, %s9027_s19  ;;  %4435 = vrot.lane.b32.xlu0 %v4431_v1, %s9019_s28  ;;  %v3500_v11 = vadd.f32 %v3495_v37, %v3476_v20  ;;  %v4454_v37 = vrot.slane %v4448_v2, 1  ;;  %s9530_s19 = sld [smem:[#allocation62_spill]]  ;;  %v3759_v22 = vrot.slane %v3752_v31, 2  ;;  %v4474_v4 = vmul.f32 %v4471_v48, %v7760_v9  ;;  %v8464_v9 = vld [vmem:[#allocation3 + $0x38] sm:$0xff]  ;;  %v5067_v31 = vld [vmem:[#allocation3 + $0x30] sm:$0xff] }
 0x5b2   : > { %v8431_v25 = vpop.permute.xlu1 %2118  ;;  %v3045_v8 = vadd.f32 %v8308_v41, %v3021_v47  ;;  %v4472_v2 = vmul.f32 %v8206_v19, %v4471_v48  ;;  %v8459_v47 = vstv %s9531_s4 }
 0x5b3   : > { %v4039_v52 = vpop.permute.xlu0 %4038  ;;  %v3524_v14 = vadd.f32 %v3519_v21, %v3500_v11  ;;  %v4458_v21 = vsel %vm1631_vm11, %v4455_v45, %v4457_v36  ;;  %v4456_v28 = vsel %vm1631_vm11, %v4454_v37, %v4455_v45  ;;  %v3760_v27 = vsel %vm1652_vm12, %v3757_v17, %v3759_v22 }
 0x5b4   : > { %v4044_v1 = vadd.f32 %v4039_v52, %v4020_v50  ;;  %4586 = vst.msk [vmem:[%s8301_s14 + $0x10] sm:$0xff] %vm521_vm5, %v3045_v8  ;;  %v3756_v50 = vrot.slane %v3750_v44, 2  ;;  %v4481_v45 = vrot.slane %v4474_v4, 2  ;;  %v8907_v36 = vstv %s9532_s2 }
 0x5b5   : > { %3739 = vrot.lane.b32.xlu1 %v3736_v33, %s9019_s28  ;;  %3737 = vrot.lane.b32.xlu0 %v3734_v51, %s9019_s28  ;;  %v3541_v23 = vadd.f32 %v7750_v61, %v3524_v14  ;;  %v4479_v33 = vrot.slane %v4473_v10, 2  ;;  %v8477_v14 = vmul.f32 %v8464_v9, %v8459_v47  ;;  %v4138_v44 = vmul.f32 %v5067_v31, %v8907_v36 }
 0x5b6   : > { %v8443_v54 = vpop.permute.xlu1 %2255 }
 0x5b7   : > { %v4063_v41 = vpop.permute.xlu0 %4062  ;;  %v8447_v20 = vadd.f32 %v3560_v58, %v3541_v23  ;;  %v8454_v61 = vstv %s9530_s19  ;;  %v4168_v23 = vmul.f32 %v5067_v31, %v8459_v47  ;;  %v8904_v22 = vrot.slane %v8477_v14, 2 }
 0x5b8   : > { %v4068_v34 = vadd.f32 %v4063_v41, %v4044_v1  ;;  %v8468_v24 = vmul.f32 %v8464_v9, %v8454_v61  ;;  %v4148_v8 = vmul.f32 %v5067_v31, %v8454_v61  ;;  %v4478_v1 = vrot.slane %v4472_v2, 2 }
 0x5b9   : > { %4461 = vrot.lane.b32.xlu1 %v4458_v21, %s9019_s28  ;;  %4459 = vrot.lane.b32.xlu0 %v4456_v28, %s9019_s28  ;;  %v4482_v21 = vsel %vm1652_vm12, %v4479_v33, %v4481_v45  ;;  %v8502_v45 = vstv %s9533_s26 }
 0x5ba   : > { %v4085_v15 = vadd.f32 %v7784_v60, %v4068_v34  ;;  %v8461_v58 = vpop.permute.xlu1 %2296  ;;  %v3758_v60 = vsel %vm1652_vm12, %v3756_v50, %v3757_v17  ;;  %v8905_v37 = vrot.slane %v8468_v24, 1  ;;  %v4480_v28 = vsel %vm1652_vm12, %v4478_v1, %v4479_v33 }
 0x5bb   : > { %v4104_v11 = vpop.permute.xlu0 %4103  ;;  %v4154_v17 = vrot.slane %v4148_v8, 1 }
 0x5bc   : > { %v4109_v52 = vadd.f32 %v4104_v11, %v4085_v15  ;;  %v4174_v15 = vrot.slane %v4168_v23, 2  ;;  %v8511_v23 = vstv %s9534_s21 }
 0x5bd   : > { %3763 = vrot.lane.b32.xlu1 %v3760_v27, %s9019_s28  ;;  %3761 = vrot.lane.b32.xlu0 %v3758_v60, %s9019_s28  ;;  %v4156_v10 = vsel %vm1631_vm11, %v4154_v17, %v8905_v37 }
 0x5be   : > { %v8479_v51 = vpop.permute.xlu1 %2596  ;;  %v4176_v11 = vsel %vm1652_vm12, %v4174_v15, %v8904_v22 }
 0x5bf   : > { %v4128_v48 = vpop.permute.xlu0 %4127 }
 0x5c0   : > { %v4133_v41 = vadd.f32 %v4128_v48, %v4109_v52  ;;  %v8508_v48 = vmul.f32 %v7878_v3, %v8502_v45 }
 0x5c1   : > { %4485 = vrot.lane.b32.xlu1 %v4482_v21, %s9019_s28  ;;  %4483 = vrot.lane.b32.xlu0 %v4480_v28, %s9019_s28  ;;  %v8902_v21 = vstv %s9535_s5  ;;  %v8521_v28 = vstv %s6875_s25 }
 0x5c2   : > { %v4140_v34 = vadd.f32 %v4138_v44, %v4133_v41  ;;  %v8493_v4 = vpop.permute.xlu1 %2685  ;;  %v3604_v41 = vmul.f32 %v8206_v19, %v8502_v45  ;;  %v8906_v15 = vrot.slane %v8508_v48, 1 }
 0x5c3   : > { %v4217_v50 = vpop.permute.xlu0 %4216 }
 0x5c4   : > { %v4161_v2 = vadd.f32 %v4156_v10, %v4140_v34  ;;  %v8912_v34 = vstv %s6847_s1 }
 0x5c5   : > { %v4316_v22 = vmul.f32 %v8206_v19, %v8912_v34 }
 0x5c6   : > { %v4181_v27 = vadd.f32 %v4176_v11, %v4161_v2  ;;  %v8530_v2 = vmul.f32 %v7878_v3, %v8521_v28  ;;  %v3624_v11 = vmul.f32 %v8206_v19, %v8511_v23 }
 0x5c7   : > { %v8498_v52 = vpop.permute.xlu1 %2774  ;;  %v4241_v60 = vpop.permute.xlu0 %4240 }
 0x5c8   : > { %v4198_v33 = vadd.f32 %v7823_v42, %v4181_v27  ;;  %v8517_v42 = vmul.f32 %v7878_v3, %v8511_v23  ;;  %v8535_v27 = vstv %s6883_s22 }
 0x5c9   : > { %v8546_v12 = vmul.f32 %v7878_v3, %v8535_v27 }
 0x5ca   : > { %v4222_v31 = vadd.f32 %v4217_v50, %v4198_v33  ;;  %v8909_v38 = vrot.slane %v8517_v42, 2 }
 0x5cb   : > { %v8504_v8 = vpop.permute.xlu1 %2863  ;;  %v4282_v1 = vpop.permute.xlu0 %4281 }
 0x5cc   : > { %v4246_v44 = vadd.f32 %v4241_v60, %v4222_v31  ;;  %v3610_v31 = vrot.slane %v3604_v41, 1  ;;  %v3630_v41 = vrot.slane %v3624_v11, 2 }
 0x5ce   : > { %v4263_v17 = vadd.f32 %v7851_v57, %v4246_v44  ;;  %v3594_v57 = vmul.f32 %v8206_v19, %v8902_v21  ;;  %v4326_v44 = vmul.f32 %v8206_v19, %v8521_v28  ;;  %v8911_v21 = vrot.slane %v8530_v2, 1 }
 0x5cf   : > { %v8525_v10 = vpop.permute.xlu1 %2952  ;;  %v3584_v50 = vpop.permute.xlu0 %3583 }
 0x5d0   : > { %v4287_v60 = vadd.f32 %v4282_v1, %v4263_v17  ;;  %v3589_v33 = vadd.f32 %v3584_v50, %v8447_v20  ;;  %v3612_v1 = vsel %vm1631_vm11, %v3610_v31, %v8906_v15  ;;  %v4346_v50 = vmul.f32 %v8206_v19, %v8535_v27  ;;  %v9536_v31 = vld [vmem:[#allocation116_spill] sm:$0xff]  ;;  %v9537_v15 = vld [vmem:[#allocation174_spill] sm:$0xff] }
 0x5d1   : > { %v4332_v37 = vrot.slane %v4326_v44, 1  ;;  %v1856_v36 = vadd.f32 %v9537_v15, %v9536_v31 }
 0x5d2   : > { %v3596_v55 = vadd.f32 %v3594_v57, %v3589_v33  ;;  %v3632_v57 = vsel %vm1652_vm12, %v3630_v41, %v8909_v38  ;;  %v8910_v33 = vrot.slane %v8546_v12, 2  ;;  %v4352_v44 = vrot.slane %v4346_v50, 2 }
 0x5d3   : > { %v8551_v17 = vpop.permute.xlu1 %3041  ;;  %v4306_v20 = vpop.permute.xlu0 %4305 }
 0x5d4   : > { %v3617_v53 = vadd.f32 %v3612_v1, %v3596_v55  ;;  %v4311_v3 = vadd.f32 %v4306_v20, %v4287_v60  ;;  %v4334_v55 = vsel %vm1631_vm11, %v4332_v37, %v8911_v21  ;;  %v4354_v41 = vsel %vm1652_vm12, %v4352_v44, %v8910_v33 }
 0x5d6   : > { %v4318_v63 = vadd.f32 %v4316_v22, %v4311_v3  ;;  %v8565_v11 = vadd.f32 %v3632_v57, %v3617_v53 }
 0x5d7   : > { %v8570_v19 = vpop.permute.xlu1 %3342  ;;  %v1876_v60 = vpop.permute.xlu0 %1875 }
 0x5d8   : > { %v4339_v1 = vadd.f32 %v4334_v55, %v4318_v63  ;;  %v1880_v20 = vadd.f32 %v1876_v60, %v1856_v36  ;;  %v9540_v63 = vstv %s9447_s13 }
 0x5d9   : > { %v1974_v36 = vmul.f32 %v8464_v9, %v9540_v63  ;;  %v9543_v63 = vld [vmem:[#allocation100_spill] sm:$0xff] }
 0x5da   : > { %v1904_v15 = vadd.f32 %v8383_v0, %v1880_v20  ;;  %v8576_v22 = vadd.f32 %v4354_v41, %v4339_v1  ;;  %v9541_v20 = vld [vmem:[#allocation178_spill] sm:$0xff] }
 0x5db   : > { %v8578_v53 = vpop.permute.xlu1 %3383  ;;  %v1965_v3 = vpop.permute.xlu0 %1964 }
 0x5dc   : > { %9538 = vst [vmem:[#allocation101_spill] sm:$0xff] %v8576_v22  ;;  %v1921_v57 = vadd.f32 %v7977_v6, %v1904_v15 }
 0x5de   : > { %v1945_v37 = vadd.f32 %v8397_v46, %v1921_v57  ;;  %v9542_v46 = vld [vmem:[#allocation150_spill] sm:$0xff] }
 0x5df   : > { %v8582_v31 = vpop.permute.xlu1 %3715  ;;  %v2054_v50 = vpop.permute.xlu0 %2053 }
 0x5e0   : > { %9539 = vst [vmem:[#allocation136_spill] sm:$0xff] %v8582_v31  ;;  %v1969_v55 = vadd.f32 %v1965_v3, %v1945_v37  ;;  %v2577_v3 = vadd.f32 %v8048_v40, %v9543_v63  ;;  %v9545_v40 = vld [vmem:[#allocation176_spill] sm:$0xff] }
 0x5e2   : > { %v1976_v60 = vadd.f32 %v1974_v36, %v1969_v55  ;;  %v2601_v36 = vadd.f32 %v8479_v51, %v2577_v3  ;;  %v9546_v51 = vld [vmem:[#allocation154_spill] sm:$0xff] }
 0x5e3   : > { %v8587_v44 = vpop.permute.xlu1 %4437  ;;  %v2143_v0 = vpop.permute.xlu0 %2142 }
 0x5e4   : > { %v1997_v1 = vadd.f32 %v7930_v35, %v1976_v60 }
 0x5e6   : > { %v2017_v41 = vadd.f32 %v9541_v20, %v1997_v1 }
 0x5e7   : > { %v8591_v38 = vpop.permute.xlu1 %3496  ;;  %v2232_v6 = vpop.permute.xlu0 %2231 }
 0x5e8   : > { %v2034_v15 = vadd.f32 %v9542_v46, %v2017_v41  ;;  %v9544_v41 = vstv %s9475_s3 }
 0x5ea   : > { %v2058_v57 = vadd.f32 %v2054_v50, %v2034_v15  ;;  %v8604_v50 = vld [vmem:[#allocation3 + $0x50] sm:$0xff] }
 0x5eb   : > { %v8594_v33 = vpop.permute.xlu1 %3520  ;;  %v2321_v21 = vpop.permute.xlu0 %2320  ;;  %v2152_v46 = vmul.f32 %v8604_v50, %v9544_v41 }
 0x5ec   : > { %v2082_v37 = vadd.f32 %v8413_v59, %v2058_v57 }
 0x5ee   : > { %v2099_v35 = vadd.f32 %v8010_v18, %v2082_v37  ;;  %v4021_v18 = vadd.f32 %v8008_v13, %v9546_v51 }
 0x5ef   : > { %v8601_v55 = vpop.permute.xlu1 %3561  ;;  %v2621_v60 = vpop.permute.xlu0 %2620 }
 0x5f0   : > { %v2123_v1 = vadd.f32 %v8431_v25, %v2099_v35  ;;  %v2625_v20 = vadd.f32 %v2621_v60, %v2601_v36  ;;  %v9547_v25 = vstv %s9484_s12 }
 0x5f1   : > { %v2695_v36 = vmul.f32 %v8464_v9, %v9547_v25  ;;  %v9549_v25 = vstv %s9532_s2 }
 0x5f2   : > { %v2147_v15 = vadd.f32 %v2143_v0, %v2123_v1  ;;  %v2642_v63 = vadd.f32 %v9545_v40, %v2625_v20  ;;  %v9548_v40 = vld [vmem:[#allocation108_spill] sm:$0xff] }
 0x5f3   : > { %v4041_v59 = vpop.permute.xlu1 %4040  ;;  %v2662_v57 = vpop.permute.xlu0 %2661 }
 0x5f4   : > { %v2154_v3 = vadd.f32 %v2152_v46, %v2147_v15  ;;  %v2666_v37 = vadd.f32 %v2662_v57, %v2642_v63  ;;  %v4045_v31 = vadd.f32 %v4041_v59, %v4021_v18  ;;  %v5069_v63 = vld [vmem:[#allocation3 + $0x40] sm:$0x3] }
 0x5f5   : > { %v4150_v59 = vmul.f32 %v5069_v63, %v8454_v61  ;;  %v4170_v51 = vmul.f32 %v5069_v63, %v8459_v47  ;;  %v4139_v61 = vmul.f32 %v8464_v9, %v9549_v25 }
 0x5f6   : > { %v2175_v34 = vadd.f32 %v7956_v32, %v2154_v3  ;;  %v2690_v35 = vadd.f32 %v8493_v4, %v2666_v37 }
 0x5f7   : > { %v4065_v60 = vpop.permute.xlu1 %4064  ;;  %v2799_v41 = vpop.permute.xlu0 %2798  ;;  %v4157_v18 = vrot.slane %v4150_v59, 1 }
 0x5f8   : > { %v2195_v0 = vadd.f32 %v7963_v5, %v2175_v34  ;;  %v2697_v1 = vadd.f32 %v2695_v36, %v2690_v35  ;;  %v4069_v20 = vadd.f32 %v4065_v60, %v4045_v31 }
 0x5fa   : > { %v2212_v22 = vadd.f32 %v9548_v40, %v2195_v0  ;;  %v2718_v13 = vadd.f32 %v7973_v7, %v2697_v1  ;;  %v4086_v46 = vadd.f32 %v8025_v26, %v4069_v20  ;;  %v9551_v0 = vld [vmem:[#allocation99_spill] sm:$0xff]  ;;  %v9552_v20 = vrot.slane %v8477_v14, 2 }
 0x5fb   : > { %v4106_v32 = vpop.permute.xlu1 %4105  ;;  %v2840_v15 = vpop.permute.xlu0 %2839 }
 0x5fc   : > { %v2236_v57 = vadd.f32 %v2232_v6, %v2212_v22  ;;  %v2738_v4 = vadd.f32 %v7983_v30, %v2718_v13  ;;  %v4110_v31 = vadd.f32 %v4106_v32, %v4086_v46  ;;  %v4177_v30 = vrot.slane %v4170_v51, 2  ;;  %v9553_v13 = vld [vmem:[#allocation130_spill] sm:$0xff] }
 0x5fd   : > { %v9554_v46 = vld [vmem:[#allocation98_spill] sm:$0xff] }
 0x5fe   : > { %v2260_v5 = vadd.f32 %v8443_v54, %v2236_v57  ;;  %v2755_v34 = vadd.f32 %v8067_v62, %v2738_v4  ;;  %v9550_v62 = vrot.slane %v8468_v24, 1  ;;  %v4178_v40 = vsel %vm1652_vm12, %v9552_v20, %v4177_v30  ;;  %v9558_v30 = vld [vmem:[#allocation182_spill] sm:$0xff] }
 0x5ff   : > { %v4130_v7 = vpop.permute.xlu1 %4129  ;;  %v2977_v3 = vpop.permute.xlu0 %2976  ;;  %v9555_v57 = vstv %s9508_s16 }
 0x600   : > { %v2277_v26 = vadd.f32 %v8027_v29, %v2260_v5  ;;  %v2779_v37 = vadd.f32 %v8498_v52, %v2755_v34  ;;  %v4134_v22 = vadd.f32 %v4130_v7, %v4110_v31  ;;  %v4158_v36 = vsel %vm1631_vm11, %v9550_v62, %v4157_v18 }
 0x601   : > { %v2873_v4 = vmul.f32 %v8604_v50, %v9555_v57  ;;  %v9563_v57 = vstv %s6847_s1 }
 0x602   : > { %v2301_v47 = vadd.f32 %v8461_v58, %v2277_v26  ;;  %v2803_v54 = vadd.f32 %v2799_v41, %v2779_v37  ;;  %v4141_v6 = vadd.f32 %v4139_v61, %v4134_v22  ;;  %v3299_v58 = vadd.f32 %v9554_v46, %v9553_v13  ;;  %v9556_v26 = vld [vmem:[#allocation181_spill] sm:$0xff]  ;;  %v9557_v61 = vld [vmem:[#allocation110_spill] sm:$0xff] }
 0x603   : > { %v4219_v35 = vpop.permute.xlu1 %4218  ;;  %v3018_v60 = vpop.permute.xlu0 %3017  ;;  %v9562_v46 = vrot.slane %v8360_v16, 1 }
 0x604   : > { %v2325_v29 = vadd.f32 %v2321_v21, %v2301_v47  ;;  %v2820_v1 = vadd.f32 %v9551_v0, %v2803_v54  ;;  %v4162_v52 = vadd.f32 %v4158_v36, %v4141_v6  ;;  %v9559_v47 = vld [vmem:[#allocation96_spill] sm:$0xff] }
 0x606   : > { %2327 = vst.msk [vmem:[%s8301_s14 + $0x8] sm:$0xff] %vm521_vm5, %v2325_v29  ;;  %v2844_v41 = vadd.f32 %v2840_v15, %v2820_v1  ;;  %v4182_v32 = vadd.f32 %v4178_v40, %v4162_v52  ;;  %v3428_v15 = vmul.f32 %v5069_v63, %v8321_v56  ;;  %v9560_v29 = vld [vmem:[#allocation132_spill] sm:$0xff]  ;;  %v9561_v1 = vstv %s9519_s27 }
 0x607   : > { %v4243_v24 = vpop.permute.xlu1 %4242  ;;  %v3319_v59 = vpop.permute.xlu0 %3318  ;;  %v3417_v52 = vmul.f32 %v8464_v9, %v9561_v1  ;;  %v4317_v9 = vmul.f32 %v8604_v50, %v9563_v57  ;;  %v9576_v57 = vld [vmem:[#allocation180_spill] sm:$0xff] }
 0x608   : > { %v2868_v21 = vadd.f32 %v8504_v8, %v2844_v41  ;;  %v4199_v51 = vadd.f32 %v8046_v39, %v4182_v32  ;;  %v3323_v5 = vadd.f32 %v3319_v59, %v3299_v58  ;;  %v3448_v8 = vmul.f32 %v5069_v63, %v8342_v43 }
 0x609   : > { %v3435_v62 = vrot.slane %v3428_v15, 1 }
 0x60a   : > { %v2875_v14 = vadd.f32 %v2873_v4, %v2868_v21  ;;  %v4223_v34 = vadd.f32 %v4219_v35, %v4199_v51  ;;  %v3347_v31 = vadd.f32 %v8570_v19, %v3323_v5  ;;  %v5070_v35 = vld [vmem:[#allocation3 + $0x58] sm:$0x3]  ;;  %v3455_v43 = vrot.slane %v3448_v8, 2  ;;  %v9565_v51 = vld [vmem:[#allocation95_spill] sm:$0xff] }
 0x60b   : > { %v4284_v18 = vpop.permute.xlu1 %4283  ;;  %v8649_v7 = vpop.permute.xlu0 %3672  ;;  %v4328_v56 = vmul.f32 %v5070_v35, %v8521_v28  ;;  %v4348_v63 = vmul.f32 %v5070_v35, %v8535_v27  ;;  %v3436_v58 = vsel %vm1631_vm11, %v9562_v46, %v3435_v62  ;;  %v9564_v21 = vrot.slane %v8376_v49, 2  ;;  %v9570_v62 = vld [vmem:[#allocation103_spill] sm:$0xff] }
 0x60c   : > { %v2896_v37 = vadd.f32 %v9556_v26, %v2875_v14  ;;  %v4247_v25 = vadd.f32 %v4243_v24, %v4223_v34  ;;  %v3364_v22 = vadd.f32 %v9557_v61, %v3347_v31  ;;  %v9566_v34 = vrot.slane %v8530_v2, 1  ;;  %v9567_v26 = vld [vmem:[#allocation179_spill] sm:$0xff] }
 0x60d   : > { %v4335_v41 = vrot.slane %v4328_v56, 1  ;;  %v3456_v27 = vsel %vm1652_vm12, %v9564_v21, %v3455_v43  ;;  %v9568_v49 = vrot.slane %v8546_v12, 2 }
 0x60e   : > { %v2916_v39 = vadd.f32 %v9558_v30, %v2896_v37  ;;  %v4264_v54 = vadd.f32 %v9559_v47, %v4247_v25  ;;  %v3388_v6 = vadd.f32 %v8578_v53, %v3364_v22 }
 0x60f   : > { %v3586_v19 = vpop.permute.xlu1 %3585  ;;  %v3408_v36 = vpop.permute.xlu0 %3407  ;;  %v4336_v31 = vsel %vm1631_vm11, %v9566_v34, %v4335_v41 }
 0x610   : > { %v2933_v0 = vadd.f32 %v9560_v29, %v2916_v39  ;;  %v3412_v20 = vadd.f32 %v3408_v36, %v3388_v6  ;;  %v4288_v13 = vadd.f32 %v4284_v18, %v4264_v54  ;;  %v9569_v54 = vld [vmem:[#allocation111_spill] sm:$0xff]  ;;  %v3626_v36 = vmul.f32 %v5070_v35, %v8511_v23  ;;  %v9573_v23 = vld [vmem:[#allocation177_spill] sm:$0xff] }
 0x612   : > { %v2957_v40 = vadd.f32 %v8525_v10, %v2933_v0  ;;  %v3419_v53 = vadd.f32 %v3417_v52, %v3412_v20  ;;  %v4355_v10 = vrot.slane %v4348_v63, 2  ;;  %v9571_v0 = vstv %s9535_s5 }
 0x613   : > { %v4308_v32 = vpop.permute.xlu1 %4307  ;;  %v4395_v28 = vpop.permute.xlu0 %4394  ;;  %v3595_v1 = vmul.f32 %v8604_v50, %v9571_v0  ;;  %v3633_v43 = vrot.slane %v3626_v36, 2 }
 0x614   : > { %v2981_v24 = vadd.f32 %v2977_v3, %v2957_v40  ;;  %v3440_v59 = vadd.f32 %v3436_v58, %v3419_v53  ;;  %v4312_v4 = vadd.f32 %v4308_v32, %v4288_v13  ;;  %v4356_v61 = vsel %vm1652_vm12, %v9568_v49, %v4355_v10 }
 0x615   : > { %v9572_v13 = vrot.slane %v8508_v48, 1  ;;  %v9574_v58 = vrot.slane %v8517_v42, 2 }
 0x616   : > { %v2998_v5 = vadd.f32 %v9565_v51, %v2981_v24  ;;  %v3460_v16 = vadd.f32 %v3456_v27, %v3440_v59  ;;  %v4319_v14 = vadd.f32 %v4317_v9, %v4312_v4  ;;  %v9575_v59 = vld [vmem:[#allocation101_spill] sm:$0xff]  ;;  %v9577_v9 = vld [vmem:[#allocation120_spill] sm:$0xff] }
 0x617   : > { %v3675_v3 = vpop.permute.xlu1 %3674  ;;  %v3697_v18 = vpop.permute.xlu0 %3696  ;;  %v3634_v50 = vsel %vm1652_vm12, %v9574_v58, %v3633_v43  ;;  %v4376_v48 = vadd.f32 %v9576_v57, %v9575_v59 }
 0x618   : > { %v3022_v15 = vadd.f32 %v3018_v60, %v2998_v5  ;;  %v3477_v37 = vadd.f32 %v9567_v26, %v3460_v16  ;;  %v4340_v25 = vadd.f32 %v4336_v31, %v4319_v14  ;;  %v3606_v60 = vmul.f32 %v5070_v35, %v8502_v45  ;;  %v9578_v31 = vld [vmem:[#allocation136_spill] sm:$0xff] }
 0x619   : > { %v3654_v35 = vadd.f32 %v9573_v23, %v8565_v11  ;;  %v4400_v10 = vadd.f32 %v4395_v28, %v4376_v48 }
 0x61a   : > { %v3046_v22 = vadd.f32 %v8551_v17, %v3022_v15  ;;  %v3501_v8 = vadd.f32 %v8591_v38, %v3477_v37  ;;  %v4360_v30 = vadd.f32 %v4356_v61, %v4340_v25  ;;  %v3613_v38 = vrot.slane %v3606_v60, 1 }
 0x61b   : > { %v4397_v39 = vpop.permute.xlu1 %4396  ;;  %v4419_v2 = vpop.permute.xlu0 %4418  ;;  %v3678_v32 = vadd.f32 %v8649_v7, %v3654_v35 }
 0x61c   : > { %4587 = vst.msk [vmem:[%s8301_s14 + $0x18] sm:$0xff] %vm521_vm5, %v3046_v22  ;;  %v3525_v47 = vadd.f32 %v8594_v33, %v3501_v8  ;;  %v4377_v12 = vadd.f32 %v9570_v62, %v4360_v30  ;;  %v3614_v53 = vsel %vm1631_vm11, %v9572_v13, %v3613_v38  ;;  %v4424_v42 = vadd.f32 %v4419_v2, %v4400_v10 }
 0x61d   : > { %v3702_v21 = vadd.f32 %v3697_v18, %v3678_v32 }
 0x61e   : > { %v3542_v6 = vadd.f32 %v9569_v54, %v3525_v47  ;;  %v4401_v20 = vadd.f32 %v4397_v39, %v4377_v12 }
 0x61f   : > { %v3699_v56 = vpop.permute.xlu1 %3698  ;;  %v3714_v29 = vpop.permute.xlu0 %3713 }
 0x620   : > { %v3566_v17 = vadd.f32 %v8601_v55, %v3542_v6  ;;  %v3719_v51 = vadd.f32 %v3714_v29, %v3702_v21 }
 0x622   : > { %v3590_v52 = vadd.f32 %v3586_v19, %v3566_v17 }
 0x623   : > { %v4421_v33 = vpop.permute.xlu1 %4420  ;;  %v4436_v63 = vpop.permute.xlu0 %4435 }
 0x624   : > { %v3597_v45 = vadd.f32 %v3595_v1, %v3590_v52  ;;  %v4425_v40 = vadd.f32 %v4421_v33, %v4401_v20  ;;  %v4441_v34 = vadd.f32 %v4436_v63, %v4424_v42 }
 0x626   : > { %v3618_v46 = vadd.f32 %v3614_v53, %v3597_v45  ;;  %v4442_v55 = vadd.f32 %v8587_v44, %v4425_v40 }
 0x627   : > { %v3740_v19 = vpop.permute.xlu1 %3739  ;;  %v3738_v41 = vpop.permute.xlu0 %3737 }
 0x628   : > { %v3638_v24 = vadd.f32 %v3634_v50, %v3618_v46  ;;  %v3743_v16 = vadd.f32 %v3738_v41, %v3719_v51 }
 0x62a   : > { %v3655_v4 = vadd.f32 %v9577_v9, %v3638_v24 }
 0x62b   : > { %v4462_v27 = vpop.permute.xlu1 %4461  ;;  %v4460_v11 = vpop.permute.xlu0 %4459 }
 0x62c   : > { %v3679_v44 = vadd.f32 %v3675_v3, %v3655_v4  ;;  %v4466_v18 = vadd.f32 %v4462_v27, %v4442_v55  ;;  %v4465_v25 = vadd.f32 %v4460_v11, %v4441_v34 }
 0x62e   : > { %v3703_v5 = vadd.f32 %v3699_v56, %v3679_v44 }
 0x62f   : > { %v3764_v14 = vpop.permute.xlu1 %3763  ;;  %v3762_v7 = vpop.permute.xlu0 %3761 }
 0x630   : > { %v3720_v15 = vadd.f32 %v9578_v31, %v3703_v5  ;;  %v3767_v26 = vadd.f32 %v3762_v7, %v3743_v16 }
 0x632   : > { %v3744_v37 = vadd.f32 %v3740_v19, %v3720_v15  ;;  %4588 = vst.msk [vmem:[%s8301_s14 + $0x20] sm:$0xff] %vm521_vm5, %v3767_v26 }
 0x633   : > { %v4486_v28 = vpop.permute.xlu1 %4485  ;;  %v4484_v3 = vpop.permute.xlu0 %4483 }
 0x634   : > { %v3768_v49 = vadd.f32 %v3764_v14, %v3744_v37  ;;  %v4490_v61 = vadd.f32 %v4486_v28, %v4466_v18  ;;  %v4489_v22 = vadd.f32 %v4484_v3, %v4465_v25 }
 0x636   : > { %4589 = vst.msk [vmem:[%s8301_s14 + $0x28] sm:$0xff] %vm521_vm5, %v3768_v49  ;;  %4591 = vst.msk [vmem:[%s8301_s14 + $0x38] sm:$0xff] %vm521_vm5, %v4490_v61 }
 0x637   : > { %4590 = vst.msk [vmem:[%s8301_s14 + $0x30] sm:$0xff] %vm521_vm5, %v4489_v22 }
 0x638 PF: > { %s9579_s28 = sld [smem:[#allocation4_spill]] }
 0x63e   : > { %s17_s24 = sadd.s32 1, %s9579_s28  }
 0x63f   : > { %p14_p4 = scmp.ge.s32.totalorder %s17_s24, 4  }
 0x641   :  { %16 = sbr.rel (!%p14_p4) target bundleno = 9 (0x9), region = 84 }

</bundles_post_ra>
